<compile_context>
chip_gen: v6e
topology: v6e:2x2x1
jax: 0.10.0
libtpu: 0.0.40
codegen_flags: <defaults>
</compile_context>

<pallas_src>
import functools

import jax
import jax.numpy as jnp
from jax.experimental import pallas as pl
from jax.experimental.pallas import tpu as pltpu


# ---------------------------------------------------------------------------
# Kernel 1/2: fused 3x3 conv (pad=1) + bias + ReLU + 2x2/2 max-pool
# ---------------------------------------------------------------------------
def _conv3x3_relu_pool_kernel(xs_ref, w_ref, b_ref, o_ref, *, wh, r_out, c_in):
    """One image per grid step.

    xs_ref : [1, 2, 2, r_in, c_in]  parity-split (H,W), row-flattened, padded image
    w_ref  : [9, c_in, c_out]       tap-major conv weights
    b_ref  : [1, c_out]
    o_ref  : [1, r_out, c_out]      pooled rows r = ph*wh + pw (pw < wh-1 are valid)
    """
    pooled = None
    for a in (0, 1):                      # pool-window row offset
        for bb in (0, 1):                 # pool-window col offset
            acc = None
            for di in (0, 1, 2):          # conv tap row
                for dj in (0, 1, 2):      # conv tap col
                    up, uq = (a + di) % 2, (a + di) // 2
                    vp, vq = (bb + dj) % 2, (bb + dj) // 2
                    off = uq * wh + vq
                    slab = xs_ref[0, up, vp, off:off + r_out, :]   # [r_out, c_in]
                    t = di * 3 + dj
                    if c_in == 1:
                        # K=1: keep it on the VPU (broadcast FMA); MXU would idle.
                        term = slab * w_ref[t]                     # [r_out, c_out]
                    else:
                        term = jnp.dot(slab, w_ref[t],
                                       preferred_element_type=jnp.float32)
                    acc = term if acc is None else acc + term
            pooled = acc if pooled is None else jnp.maximum(pooled, acc)
    # bias + ReLU commute with the window max (bias is common to the window)
    o_ref[0] = jnp.maximum(pooled + b_ref[...], 0.0)


def conv3x3_relu_pool(x, w, b):
    """x: [B,H,W,Cin] NHWC (H,W even) -> [B,H/2,W/2,Cout]."""
    B, H, W, cin = x.shape
    cout = w.shape[-1]
    hp, wp = H // 2, W // 2
    hh, wh = hp + 1, wp + 1
    r_out = hp * wh                       # pooled rows incl. 1 garbage col per row

    # Host-side prep (small tensors, one pad + one reshape/transpose; no im2col):
    xp = jnp.pad(x, ((0, 0), (1, 1), (1, 1), (0, 0)))                   # [B,2hh,2wh,C]
    xs = xp.reshape(B, hh, 2, wh, 2, cin).transpose(0, 2, 4, 1, 3, 5)   # [B,2,2,hh,wh,C]
    xs = xs.reshape(B, 2, 2, hh * wh, cin)
    r_in = hh * wh + wh + 2               # room for max slab offset (wh + 1)
    r_in += (-r_in) % 8
    xs = jnp.pad(xs, ((0, 0), (0, 0), (0, 0), (0, r_in - hh * wh), (0, 0)))

    out = pl.pallas_call(
        functools.partial(_conv3x3_relu_pool_kernel, wh=wh, r_out=r_out, c_in=cin),
        out_shape=jax.ShapeDtypeStruct((B, r_out, cout), jnp.float32),
        grid=(B,),
        in_specs=[
            pl.BlockSpec((1, 2, 2, r_in, cin), lambda i: (i, 0, 0, 0, 0)),
            pl.BlockSpec((9, cin, cout), lambda i: (0, 0, 0)),
            pl.BlockSpec((1, cout), lambda i: (0, 0)),
        ],
        out_specs=pl.BlockSpec((1, r_out, cout), lambda i: (i, 0, 0)),
        compiler_params=pltpu.CompilerParams(dimension_semantics=("parallel",)),
    )(xs, w, b.reshape(1, cout))

    # drop the per-row garbage column produced by the row-flattened halo
    return out.reshape(B, hp, wh, cout)[:, :, :wp, :]


# ---------------------------------------------------------------------------
# Kernel 3: fused classifier fc + both adversary heads (+ log_softmax)
# ---------------------------------------------------------------------------
def _cfair_head_kernel(f_ref, wfc_ref, bfc_ref, w1_ref, b1_ref, w2_ref, b2_ref,
                       cls_ref, adv_ref):
    f = f_ref[...]                                                     # [tb, K]
    # class logits on raw features
    cls_ref[...] = (jnp.dot(f, wfc_ref[...], preferred_element_type=jnp.float32)
                    + bfc_ref[...])
    # adversary branch: relu(features) computed ONCE; grad_reverse is identity fwd.
    # TODO(synk): grad_reverse only matters for backward (gradient negation);
    # a custom_vjp would be required if this forward is ever differentiated.
    h = jnp.maximum(f, 0.0)
    a = jnp.dot(h, w1_ref[...], preferred_element_type=jnp.float32) + b1_ref[...]
    a = jnp.maximum(a, 0.0)                                            # [tb, 2*A]
    asz = w2_ref.shape[1]
    for j in range(2):
        aj = a[:, j * asz:(j + 1) * asz]                               # 128-aligned slice
        logits = (jnp.dot(aj, w2_ref[j], preferred_element_type=jnp.float32)
                  + b2_ref[j])
        m = jnp.max(logits, axis=-1, keepdims=True)
        s = logits - m
        lse = jnp.log(jnp.sum(jnp.exp(s), axis=-1, keepdims=True))
        adv_ref[j] = s - lse


def cfair_head(features, wfc, bfc, w1, b1, w2, b2, *, block_rows=256):
    B, K = features.shape
    nc = wfc.shape[1]
    asz = w2.shape[1]
    bp = B + (-B) % 8
    tb = min(block_rows, bp)
    bp += (-bp) % tb
    f = jnp.pad(features, ((0, bp - B), (0, 0)))

    cls, adv = pl.pallas_call(
        _cfair_head_kernel,
        out_shape=(jax.ShapeDtypeStruct((bp, nc), jnp.float32),
                   jax.ShapeDtypeStruct((2, bp, 2), jnp.float32)),
        grid=(bp // tb,),
        in_specs=[
            pl.BlockSpec((tb, K), lambda i: (i, 0)),
            pl.BlockSpec((K, nc), lambda i: (0, 0)),
            pl.BlockSpec((1, nc), lambda i: (0, 0)),
            pl.BlockSpec((K, 2 * asz), lambda i: (0, 0)),
            pl.BlockSpec((1, 2 * asz), lambda i: (0, 0)),
            pl.BlockSpec((2, asz, 2), lambda i: (0, 0, 0)),
            pl.BlockSpec((2, 1, 2), lambda i: (0, 0, 0)),
        ],
        out_specs=(pl.BlockSpec((tb, nc), lambda i: (i, 0)),
                   pl.BlockSpec((2, tb, 2), lambda i: (0, i, 0))),
        compiler_params=pltpu.CompilerParams(dimension_semantics=("parallel",)),
    )(f, wfc, bfc.reshape(1, nc), w1, b1.reshape(1, 2 * asz), w2,
      b2.reshape(2, 1, 2))
    return cls[:B], adv[:, :B, :]


# ---------------------------------------------------------------------------
# CFairNet forward (SimpleCNN backbone, hidden_size = 32*7*7 = 1568)
# ---------------------------------------------------------------------------
def cfairnet_forward(x_nchw, labels, params):
    B = x_nchw.shape[0]
    x = jnp.transpose(x_nchw, (0, 2, 3, 1))                       # NCHW -> NHWC once
    y = conv3x3_relu_pool(x, params["w_conv1"], params["b_conv1"])   # [B,14,14,16]
    y = conv3x3_relu_pool(y, params["w_conv2"], params["b_conv2"])   # [B, 7, 7,32]
    features = y.reshape(B, 7 * 7 * 32)                              # [B,1568]

    outputs, adv_logp = cfair_head(
        features, params["w_fc"], params["b_fc"],
        params["w_adv1"], params["b_adv1"], params["w_adv2"], params["b_adv2"])

    if labels is None:
        return outputs, features

    c_losses = []
    for j in range(2):  # used_classes = 2
        mask = labels[:, 0] == j
        # Eager boolean row-selection (data-dependent shape, like h_relu[idx] in
        # the reference); per-row head math is identical whether rows are
        # selected before or after the kernel.  Not jit-compatible by design.
        c_losses.append(adv_logp[j][mask])
    return outputs, c_losses


# ---------------------------------------------------------------------------
# Deterministic parameter init (PyTorch-style U(-1/sqrt(fan_in), 1/sqrt(fan_in)))
# ---------------------------------------------------------------------------
def init_params(key, num_classes=3, adversary_size=128, hidden_size=1568):
    ks = jax.random.split(key, 7)

    def uni(k, shape, fan_in):
        bound = float(fan_in) ** -0.5
        return jax.random.uniform(k, shape, jnp.float32, -bound, bound)

    def linear(k, fan_in, fan_out):
        kw, kb = jax.random.split(k)
        return uni(kw, (fan_out, fan_in), fan_in), uni(kb, (fan_out,), fan_in)

    def conv(k, cin, cout):
        kw, kb = jax.random.split(k)
        w = uni(kw, (cout, cin, 3, 3), cin * 9)
        b = uni(kb, (cout,), cin * 9)
        # tap-major matmul layout: [9, cin, cout], tap index t = di*3 + dj
        return w.reshape(cout, cin, 9).transpose(2, 1, 0), b

    p = {}
    p["w_conv1"], p["b_conv1"] = conv(ks[0], 1, 16)
    p["w_conv2"], p["b_conv2"] = conv(ks[1], 16, 32)

    wfc, bfc = linear(ks[2], hidden_size, num_classes)
    p["w_fc"], p["b_fc"] = wfc.T, bfc

    w1s, b1s, w2s, b2s = [], [], [], []
    for j in range(2):
        w1, b1 = linear(ks[3 + j], hidden_size, adversary_size)
        w2, b2 = linear(ks[5 + j], adversary_size, 2)
        w1s.append(w1.T), b1s.append(b1)
        w2s.append(w2.T), b2s.append(b2)
    p["w_adv1"] = jnp.concatenate(w1s, axis=1)      # [1568, 256]  (both heads, N-concat)
    p["b_adv1"] = jnp.concatenate(b1s, axis=0)      # [256]
    p["w_adv2"] = jnp.stack(w2s, axis=0)            # [2, 128, 2]
    p["b_adv2"] = jnp.stack(b2s, axis=0)            # [2, 2]
    return p


if __name__ == "__main__":
    key = jax.random.PRNGKey(0)
    pkey, xkey = jax.random.split(key)
    params = init_params(pkey, num_classes=3, adversary_size=128)

    # batch=4, 1x28x28 images (SimpleCNN => hidden_size 32*7*7 = 1568)
    x = jax.random.normal(xkey, (4, 1, 28, 28), jnp.float32)
    labels = jnp.array([[0], [1], [0], [1]], dtype=jnp.int32)

    outputs, c_losses = cfairnet_forward(x, labels, params)
    jax.block_until_ready(outputs)
    for c in c_losses:
        jax.block_until_ready(c)
    print("KERNEL_OK")
</pallas_src>

<mosaic_0001>
module attributes {stable_mosaic.version = 11 : i64} {
  func.func @_conv3x3_relu_pool_kernel(%arg0: i32, %arg1: memref<1x2x2x248x1xf32, #tpu.memory_space<vmem>>, %arg2: memref<9x1x16xf32, #tpu.memory_space<vmem>>, %arg3: memref<1x16xf32, #tpu.memory_space<vmem>>, %arg4: memref<1x210x16xf32, #tpu.memory_space<vmem>>) attributes {dimension_semantics = [#tpu.dimension_semantics<parallel>], iteration_bounds = array<i64: 4>, scalar_prefetch = 0 : i64, scratch_operands = 0 : i64, tpu.core_type = #tpu.core_type<tc>, window_params = [{transform_indices = @transform_0, window_bounds = array<i64: 1, 2, 2, 248, 1>}, {pipeline_mode = #tpu.pipeline_mode<synchronous>, transform_indices = @transform_1, window_bounds = array<i64: 9, 1, 16>}, {pipeline_mode = #tpu.pipeline_mode<synchronous>, transform_indices = @transform_2, window_bounds = array<i64: 1, 16>}, {transform_indices = @transform_3, window_bounds = array<i64: 1, 210, 16>}]} {
    %c0 = arith.constant 0 : index
    %c0_0 = arith.constant 0 : index
    %c0_1 = arith.constant 0 : index
    %c0_2 = arith.constant 0 : index
    %c0_3 = arith.constant 0 : index
    %0 = vector.load %arg1[%c0, %c0_0, %c0_1, %c0_2, %c0_3] : memref<1x2x2x248x1xf32, #tpu.memory_space<vmem>>, vector<1x1x1x210x1xf32>
    %1 = vector.shape_cast %0 : vector<1x1x1x210x1xf32> to vector<210x1xf32>
    %c0_4 = arith.constant 0 : index
    %c0_5 = arith.constant 0 : index
    %c0_6 = arith.constant 0 : index
    %2 = vector.load %arg2[%c0_4, %c0_5, %c0_6] : memref<9x1x16xf32, #tpu.memory_space<vmem>>, vector<1x1x16xf32>
    %3 = vector.shape_cast %2 : vector<1x1x16xf32> to vector<1x16xf32>
    %4 = vector.broadcast %1 : vector<210x1xf32> to vector<210x16xf32>
    %5 = vector.broadcast %3 : vector<1x16xf32> to vector<210x16xf32>
    %6 = arith.mulf %4, %5 : vector<210x16xf32>
    %c0_7 = arith.constant 0 : index
    %c0_8 = arith.constant 0 : index
    %c1 = arith.constant 1 : index
    %c0_9 = arith.constant 0 : index
    %c0_10 = arith.constant 0 : index
    %7 = vector.load %arg1[%c0_7, %c0_8, %c1, %c0_9, %c0_10] : memref<1x2x2x248x1xf32, #tpu.memory_space<vmem>>, vector<1x1x1x210x1xf32>
    %8 = vector.shape_cast %7 : vector<1x1x1x210x1xf32> to vector<210x1xf32>
    %c1_11 = arith.constant 1 : index
    %c0_12 = arith.constant 0 : index
    %c0_13 = arith.constant 0 : index
    %9 = vector.load %arg2[%c1_11, %c0_12, %c0_13] : memref<9x1x16xf32, #tpu.memory_space<vmem>>, vector<1x1x16xf32>
    %10 = vector.shape_cast %9 : vector<1x1x16xf32> to vector<1x16xf32>
    %11 = vector.broadcast %8 : vector<210x1xf32> to vector<210x16xf32>
    %12 = vector.broadcast %10 : vector<1x16xf32> to vector<210x16xf32>
    %13 = arith.mulf %11, %12 : vector<210x16xf32>
    %14 = arith.addf %6, %13 : vector<210x16xf32>
    %c0_14 = arith.constant 0 : index
    %c0_15 = arith.constant 0 : index
    %c0_16 = arith.constant 0 : index
    %c1_17 = arith.constant 1 : index
    %c0_18 = arith.constant 0 : index
    %15 = vector.load %arg1[%c0_14, %c0_15, %c0_16, %c1_17, %c0_18] : memref<1x2x2x248x1xf32, #tpu.memory_space<vmem>>, vector<1x1x1x210x1xf32>
    %16 = vector.shape_cast %15 : vector<1x1x1x210x1xf32> to vector<210x1xf32>
    %c2 = arith.constant 2 : index
    %c0_19 = arith.constant 0 : index
    %c0_20 = arith.constant 0 : index
    %17 = vector.load %arg2[%c2, %c0_19, %c0_20] : memref<9x1x16xf32, #tpu.memory_space<vmem>>, vector<1x1x16xf32>
    %18 = vector.shape_cast %17 : vector<1x1x16xf32> to vector<1x16xf32>
    %19 = vector.broadcast %16 : vector<210x1xf32> to vector<210x16xf32>
    %20 = vector.broadcast %18 : vector<1x16xf32> to vector<210x16xf32>
    %21 = arith.mulf %19, %20 : vector<210x16xf32>
    %22 = arith.addf %14, %21 : vector<210x16xf32>
    %c0_21 = arith.constant 0 : index
    %c1_22 = arith.constant 1 : index
    %c0_23 = arith.constant 0 : index
    %c0_24 = arith.constant 0 : index
    %c0_25 = arith.constant 0 : index
    %23 = vector.load %arg1[%c0_21, %c1_22, %c0_23, %c0_24, %c0_25] : memref<1x2x2x248x1xf32, #tpu.memory_space<vmem>>, vector<1x1x1x210x1xf32>
    %24 = vector.shape_cast %23 : vector<1x1x1x210x1xf32> to vector<210x1xf32>
    %c3 = arith.constant 3 : index
    %c0_26 = arith.constant 0 : index
    %c0_27 = arith.constant 0 : index
    %25 = vector.load %arg2[%c3, %c0_26, %c0_27] : memref<9x1x16xf32, #tpu.memory_space<vmem>>, vector<1x1x16xf32>
    %26 = vector.shape_cast %25 : vector<1x1x16xf32> to vector<1x16xf32>
    %27 = vector.broadcast %24 : vector<210x1xf32> to vector<210x16xf32>
    %28 = vector.broadcast %26 : vector<1x16xf32> to vector<210x16xf32>
    %29 = arith.mulf %27, %28 : vector<210x16xf32>
    %30 = arith.addf %22, %29 : vector<210x16xf32>
    %c0_28 = arith.constant 0 : index
    %c1_29 = arith.constant 1 : index
    %c1_30 = arith.constant 1 : index
    %c0_31 = arith.constant 0 : index
    %c0_32 = arith.constant 0 : index
    %31 = vector.load %arg1[%c0_28, %c1_29, %c1_30, %c0_31, %c0_32] : memref<1x2x2x248x1xf32, #tpu.memory_space<vmem>>, vector<1x1x1x210x1xf32>
    %32 = vector.shape_cast %31 : vector<1x1x1x210x1xf32> to vector<210x1xf32>
    %c4 = arith.constant 4 : index
    %c0_33 = arith.constant 0 : index
    %c0_34 = arith.constant 0 : index
    %33 = vector.load %arg2[%c4, %c0_33, %c0_34] : memref<9x1x16xf32, #tpu.memory_space<vmem>>, vector<1x1x16xf32>
    %34 = vector.shape_cast %33 : vector<1x1x16xf32> to vector<1x16xf32>
    %35 = vector.broadcast %32 : vector<210x1xf32> to vector<210x16xf32>
    %36 = vector.broadcast %34 : vector<1x16xf32> to vector<210x16xf32>
    %37 = arith.mulf %35, %36 : vector<210x16xf32>
    %38 = arith.addf %30, %37 : vector<210x16xf32>
    %c0_35 = arith.constant 0 : index
    %c1_36 = arith.constant 1 : index
    %c0_37 = arith.constant 0 : index
    %c1_38 = arith.constant 1 : index
    %c0_39 = arith.constant 0 : index
    %39 = vector.load %arg1[%c0_35, %c1_36, %c0_37, %c1_38, %c0_39] : memref<1x2x2x248x1xf32, #tpu.memory_space<vmem>>, vector<1x1x1x210x1xf32>
    %40 = vector.shape_cast %39 : vector<1x1x1x210x1xf32> to vector<210x1xf32>
    %c5 = arith.constant 5 : index
    %c0_40 = arith.constant 0 : index
    %c0_41 = arith.constant 0 : index
    %41 = vector.load %arg2[%c5, %c0_40, %c0_41] : memref<9x1x16xf32, #tpu.memory_space<vmem>>, vector<1x1x16xf32>
    %42 = vector.shape_cast %41 : vector<1x1x16xf32> to vector<1x16xf32>
    %43 = vector.broadcast %40 : vector<210x1xf32> to vector<210x16xf32>
    %44 = vector.broadcast %42 : vector<1x16xf32> to vector<210x16xf32>
    %45 = arith.mulf %43, %44 : vector<210x16xf32>
    %46 = arith.addf %38, %45 : vector<210x16xf32>
    %c0_42 = arith.constant 0 : index
    %c0_43 = arith.constant 0 : index
    %c0_44 = arith.constant 0 : index
    %c15 = arith.constant 15 : index
    %c0_45 = arith.constant 0 : index
    %47 = vector.load %arg1[%c0_42, %c0_43, %c0_44, %c15, %c0_45] : memref<1x2x2x248x1xf32, #tpu.memory_space<vmem>>, vector<1x1x1x210x1xf32>
    %48 = vector.shape_cast %47 : vector<1x1x1x210x1xf32> to vector<210x1xf32>
    %c6 = arith.constant 6 : index
    %c0_46 = arith.constant 0 : index
    %c0_47 = arith.constant 0 : index
    %49 = vector.load %arg2[%c6, %c0_46, %c0_47] : memref<9x1x16xf32, #tpu.memory_space<vmem>>, vector<1x1x16xf32>
    %50 = vector.shape_cast %49 : vector<1x1x16xf32> to vector<1x16xf32>
    %51 = vector.broadcast %48 : vector<210x1xf32> to vector<210x16xf32>
    %52 = vector.broadcast %50 : vector<1x16xf32> to vector<210x16xf32>
    %53 = arith.mulf %51, %52 : vector<210x16xf32>
    %54 = arith.addf %46, %53 : vector<210x16xf32>
    %c0_48 = arith.constant 0 : index
    %c0_49 = arith.constant 0 : index
    %c1_50 = arith.constant 1 : index
    %c15_51 = arith.constant 15 : index
    %c0_52 = arith.constant 0 : index
    %55 = vector.load %arg1[%c0_48, %c0_49, %c1_50, %c15_51, %c0_52] : memref<1x2x2x248x1xf32, #tpu.memory_space<vmem>>, vector<1x1x1x210x1xf32>
    %56 = vector.shape_cast %55 : vector<1x1x1x210x1xf32> to vector<210x1xf32>
    %c7 = arith.constant 7 : index
    %c0_53 = arith.constant 0 : index
    %c0_54 = arith.constant 0 : index
    %57 = vector.load %arg2[%c7, %c0_53, %c0_54] : memref<9x1x16xf32, #tpu.memory_space<vmem>>, vector<1x1x16xf32>
    %58 = vector.shape_cast %57 : vector<1x1x16xf32> to vector<1x16xf32>
    %59 = vector.broadcast %56 : vector<210x1xf32> to vector<210x16xf32>
    %60 = vector.broadcast %58 : vector<1x16xf32> to vector<210x16xf32>
    %61 = arith.mulf %59, %60 : vector<210x16xf32>
    %62 = arith.addf %54, %61 : vector<210x16xf32>
    %c0_55 = arith.constant 0 : index
    %c0_56 = arith.constant 0 : index
    %c0_57 = arith.constant 0 : index
    %c16 = arith.constant 16 : index
    %c0_58 = arith.constant 0 : index
    %63 = vector.load %arg1[%c0_55, %c0_56, %c0_57, %c16, %c0_58] : memref<1x2x2x248x1xf32, #tpu.memory_space<vmem>>, vector<1x1x1x210x1xf32>
    %64 = vector.shape_cast %63 : vector<1x1x1x210x1xf32> to vector<210x1xf32>
    %c8 = arith.constant 8 : index
    %c0_59 = arith.constant 0 : index
    %c0_60 = arith.constant 0 : index
    %65 = vector.load %arg2[%c8, %c0_59, %c0_60] : memref<9x1x16xf32, #tpu.memory_space<vmem>>, vector<1x1x16xf32>
    %66 = vector.shape_cast %65 : vector<1x1x16xf32> to vector<1x16xf32>
    %67 = vector.broadcast %64 : vector<210x1xf32> to vector<210x16xf32>
    %68 = vector.broadcast %66 : vector<1x16xf32> to vector<210x16xf32>
    %69 = arith.mulf %67, %68 : vector<210x16xf32>
    %70 = arith.addf %62, %69 : vector<210x16xf32>
    %c0_61 = arith.constant 0 : index
    %c0_62 = arith.constant 0 : index
    %c1_63 = arith.constant 1 : index
    %c0_64 = arith.constant 0 : index
    %c0_65 = arith.constant 0 : index
    %71 = vector.load %arg1[%c0_61, %c0_62, %c1_63, %c0_64, %c0_65] : memref<1x2x2x248x1xf32, #tpu.memory_space<vmem>>, vector<1x1x1x210x1xf32>
    %72 = vector.shape_cast %71 : vector<1x1x1x210x1xf32> to vector<210x1xf32>
    %c0_66 = arith.constant 0 : index
    %c0_67 = arith.constant 0 : index
    %c0_68 = arith.constant 0 : index
    %73 = vector.load %arg2[%c0_66, %c0_67, %c0_68] : memref<9x1x16xf32, #tpu.memory_space<vmem>>, vector<1x1x16xf32>
    %74 = vector.shape_cast %73 : vector<1x1x16xf32> to vector<1x16xf32>
    %75 = vector.broadcast %72 : vector<210x1xf32> to vector<210x16xf32>
    %76 = vector.broadcast %74 : vector<1x16xf32> to vector<210x16xf32>
    %77 = arith.mulf %75, %76 : vector<210x16xf32>
    %c0_69 = arith.constant 0 : index
    %c0_70 = arith.constant 0 : index
    %c0_71 = arith.constant 0 : index
    %c1_72 = arith.constant 1 : index
    %c0_73 = arith.constant 0 : index
    %78 = vector.load %arg1[%c0_69, %c0_70, %c0_71, %c1_72, %c0_73] : memref<1x2x2x248x1xf32, #tpu.memory_space<vmem>>, vector<1x1x1x210x1xf32>
    %79 = vector.shape_cast %78 : vector<1x1x1x210x1xf32> to vector<210x1xf32>
    %c1_74 = arith.constant 1 : index
    %c0_75 = arith.constant 0 : index
    %c0_76 = arith.constant 0 : index
    %80 = vector.load %arg2[%c1_74, %c0_75, %c0_76] : memref<9x1x16xf32, #tpu.memory_space<vmem>>, vector<1x1x16xf32>
    %81 = vector.shape_cast %80 : vector<1x1x16xf32> to vector<1x16xf32>
    %82 = vector.broadcast %79 : vector<210x1xf32> to vector<210x16xf32>
    %83 = vector.broadcast %81 : vector<1x16xf32> to vector<210x16xf32>
    %84 = arith.mulf %82, %83 : vector<210x16xf32>
    %85 = arith.addf %77, %84 : vector<210x16xf32>
    %c0_77 = arith.constant 0 : index
    %c0_78 = arith.constant 0 : index
    %c1_79 = arith.constant 1 : index
    %c1_80 = arith.constant 1 : index
    %c0_81 = arith.constant 0 : index
    %86 = vector.load %arg1[%c0_77, %c0_78, %c1_79, %c1_80, %c0_81] : memref<1x2x2x248x1xf32, #tpu.memory_space<vmem>>, vector<1x1x1x210x1xf32>
    %87 = vector.shape_cast %86 : vector<1x1x1x210x1xf32> to vector<210x1xf32>
    %c2_82 = arith.constant 2 : index
    %c0_83 = arith.constant 0 : index
    %c0_84 = arith.constant 0 : index
    %88 = vector.load %arg2[%c2_82, %c0_83, %c0_84] : memref<9x1x16xf32, #tpu.memory_space<vmem>>, vector<1x1x16xf32>
    %89 = vector.shape_cast %88 : vector<1x1x16xf32> to vector<1x16xf32>
    %90 = vector.broadcast %87 : vector<210x1xf32> to vector<210x16xf32>
    %91 = vector.broadcast %89 : vector<1x16xf32> to vector<210x16xf32>
    %92 = arith.mulf %90, %91 : vector<210x16xf32>
    %93 = arith.addf %85, %92 : vector<210x16xf32>
    %c0_85 = arith.constant 0 : index
    %c1_86 = arith.constant 1 : index
    %c1_87 = arith.constant 1 : index
    %c0_88 = arith.constant 0 : index
    %c0_89 = arith.constant 0 : index
    %94 = vector.load %arg1[%c0_85, %c1_86, %c1_87, %c0_88, %c0_89] : memref<1x2x2x248x1xf32, #tpu.memory_space<vmem>>, vector<1x1x1x210x1xf32>
    %95 = vector.shape_cast %94 : vector<1x1x1x210x1xf32> to vector<210x1xf32>
    %c3_90 = arith.constant 3 : index
    %c0_91 = arith.constant 0 : index
    %c0_92 = arith.constant 0 : index
    %96 = vector.load %arg2[%c3_90, %c0_91, %c0_92] : memref<9x1x16xf32, #tpu.memory_space<vmem>>, vector<1x1x16xf32>
    %97 = vector.shape_cast %96 : vector<1x1x16xf32> to vector<1x16xf32>
    %98 = vector.broadcast %95 : vector<210x1xf32> to vector<210x16xf32>
    %99 = vector.broadcast %97 : vector<1x16xf32> to vector<210x16xf32>
    %100 = arith.mulf %98, %99 : vector<210x16xf32>
    %101 = arith.addf %93, %100 : vector<210x16xf32>
    %c0_93 = arith.constant 0 : index
    %c1_94 = arith.constant 1 : index
    %c0_95 = arith.constant 0 : index
    %c1_96 = arith.constant 1 : index
    %c0_97 = arith.constant 0 : index
    %102 = vector.load %arg1[%c0_93, %c1_94, %c0_95, %c1_96, %c0_97] : memref<1x2x2x248x1xf32, #tpu.memory_space<vmem>>, vector<1x1x1x210x1xf32>
    %103 = vector.shape_cast %102 : vector<1x1x1x210x1xf32> to vector<210x1xf32>
    %c4_98 = arith.constant 4 : index
    %c0_99 = arith.constant 0 : index
    %c0_100 = arith.constant 0 : index
    %104 = vector.load %arg2[%c4_98, %c0_99, %c0_100] : memref<9x1x16xf32, #tpu.memory_space<vmem>>, vector<1x1x16xf32>
    %105 = vector.shape_cast %104 : vector<1x1x16xf32> to vector<1x16xf32>
    %106 = vector.broadcast %103 : vector<210x1xf32> to vector<210x16xf32>
    %107 = vector.broadcast %105 : vector<1x16xf32> to vector<210x16xf32>
    %108 = arith.mulf %106, %107 : vector<210x16xf32>
    %109 = arith.addf %101, %108 : vector<210x16xf32>
    %c0_101 = arith.constant 0 : index
    %c1_102 = arith.constant 1 : index
    %c1_103 = arith.constant 1 : index
    %c1_104 = arith.constant 1 : index
    %c0_105 = arith.constant 0 : index
    %110 = vector.load %arg1[%c0_101, %c1_102, %c1_103, %c1_104, %c0_105] : memref<1x2x2x248x1xf32, #tpu.memory_space<vmem>>, vector<1x1x1x210x1xf32>
    %111 = vector.shape_cast %110 : vector<1x1x1x210x1xf32> to vector<210x1xf32>
    %c5_106 = arith.constant 5 : index
    %c0_107 = arith.constant 0 : index
    %c0_108 = arith.constant 0 : index
    %112 = vector.load %arg2[%c5_106, %c0_107, %c0_108] : memref<9x1x16xf32, #tpu.memory_space<vmem>>, vector<1x1x16xf32>
    %113 = vector.shape_cast %112 : vector<1x1x16xf32> to vector<1x16xf32>
    %114 = vector.broadcast %111 : vector<210x1xf32> to vector<210x16xf32>
    %115 = vector.broadcast %113 : vector<1x16xf32> to vector<210x16xf32>
    %116 = arith.mulf %114, %115 : vector<210x16xf32>
    %117 = arith.addf %109, %116 : vector<210x16xf32>
    %c0_109 = arith.constant 0 : index
    %c0_110 = arith.constant 0 : index
    %c1_111 = arith.constant 1 : index
    %c15_112 = arith.constant 15 : index
    %c0_113 = arith.constant 0 : index
    %118 = vector.load %arg1[%c0_109, %c0_110, %c1_111, %c15_112, %c0_113] : memref<1x2x2x248x1xf32, #tpu.memory_space<vmem>>, vector<1x1x1x210x1xf32>
    %119 = vector.shape_cast %118 : vector<1x1x1x210x1xf32> to vector<210x1xf32>
    %c6_114 = arith.constant 6 : index
    %c0_115 = arith.constant 0 : index
    %c0_116 = arith.constant 0 : index
    %120 = vector.load %arg2[%c6_114, %c0_115, %c0_116] : memref<9x1x16xf32, #tpu.memory_space<vmem>>, vector<1x1x16xf32>
    %121 = vector.shape_cast %120 : vector<1x1x16xf32> to vector<1x16xf32>
    %122 = vector.broadcast %119 : vector<210x1xf32> to vector<210x16xf32>
    %123 = vector.broadcast %121 : vector<1x16xf32> to vector<210x16xf32>
    %124 = arith.mulf %122, %123 : vector<210x16xf32>
    %125 = arith.addf %117, %124 : vector<210x16xf32>
    %c0_117 = arith.constant 0 : index
    %c0_118 = arith.constant 0 : index
    %c0_119 = arith.constant 0 : index
    %c16_120 = arith.constant 16 : index
    %c0_121 = arith.constant 0 : index
    %126 = vector.load %arg1[%c0_117, %c0_118, %c0_119, %c16_120, %c0_121] : memref<1x2x2x248x1xf32, #tpu.memory_space<vmem>>, vector<1x1x1x210x1xf32>
    %127 = vector.shape_cast %126 : vector<1x1x1x210x1xf32> to vector<210x1xf32>
    %c7_122 = arith.constant 7 : index
    %c0_123 = arith.constant 0 : index
    %c0_124 = arith.constant 0 : index
    %128 = vector.load %arg2[%c7_122, %c0_123, %c0_124] : memref<9x1x16xf32, #tpu.memory_space<vmem>>, vector<1x1x16xf32>
    %129 = vector.shape_cast %128 : vector<1x1x16xf32> to vector<1x16xf32>
    %130 = vector.broadcast %127 : vector<210x1xf32> to vector<210x16xf32>
    %131 = vector.broadcast %129 : vector<1x16xf32> to vector<210x16xf32>
    %132 = arith.mulf %130, %131 : vector<210x16xf32>
    %133 = arith.addf %125, %132 : vector<210x16xf32>
    %c0_125 = arith.constant 0 : index
    %c0_126 = arith.constant 0 : index
    %c1_127 = arith.constant 1 : index
    %c16_128 = arith.constant 16 : index
    %c0_129 = arith.constant 0 : index
    %134 = vector.load %arg1[%c0_125, %c0_126, %c1_127, %c16_128, %c0_129] : memref<1x2x2x248x1xf32, #tpu.memory_space<vmem>>, vector<1x1x1x210x1xf32>
    %135 = vector.shape_cast %134 : vector<1x1x1x210x1xf32> to vector<210x1xf32>
    %c8_130 = arith.constant 8 : index
    %c0_131 = arith.constant 0 : index
    %c0_132 = arith.constant 0 : index
    %136 = vector.load %arg2[%c8_130, %c0_131, %c0_132] : memref<9x1x16xf32, #tpu.memory_space<vmem>>, vector<1x1x16xf32>
    %137 = vector.shape_cast %136 : vector<1x1x16xf32> to vector<1x16xf32>
    %138 = vector.broadcast %135 : vector<210x1xf32> to vector<210x16xf32>
    %139 = vector.broadcast %137 : vector<1x16xf32> to vector<210x16xf32>
    %140 = arith.mulf %138, %139 : vector<210x16xf32>
    %141 = arith.addf %133, %140 : vector<210x16xf32>
    %142 = arith.maximumf %70, %141 : vector<210x16xf32>
    %c0_133 = arith.constant 0 : index
    %c1_134 = arith.constant 1 : index
    %c0_135 = arith.constant 0 : index
    %c0_136 = arith.constant 0 : index
    %c0_137 = arith.constant 0 : index
    %143 = vector.load %arg1[%c0_133, %c1_134, %c0_135, %c0_136, %c0_137] : memref<1x2x2x248x1xf32, #tpu.memory_space<vmem>>, vector<1x1x1x210x1xf32>
    %144 = vector.shape_cast %143 : vector<1x1x1x210x1xf32> to vector<210x1xf32>
    %c0_138 = arith.constant 0 : index
    %c0_139 = arith.constant 0 : index
    %c0_140 = arith.constant 0 : index
    %145 = vector.load %arg2[%c0_138, %c0_139, %c0_140] : memref<9x1x16xf32, #tpu.memory_space<vmem>>, vector<1x1x16xf32>
    %146 = vector.shape_cast %145 : vector<1x1x16xf32> to vector<1x16xf32>
    %147 = vector.broadcast %144 : vector<210x1xf32> to vector<210x16xf32>
    %148 = vector.broadcast %146 : vector<1x16xf32> to vector<210x16xf32>
    %149 = arith.mulf %147, %148 : vector<210x16xf32>
    %c0_141 = arith.constant 0 : index
    %c1_142 = arith.constant 1 : index
    %c1_143 = arith.constant 1 : index
    %c0_144 = arith.constant 0 : index
    %c0_145 = arith.constant 0 : index
    %150 = vector.load %arg1[%c0_141, %c1_142, %c1_143, %c0_144, %c0_145] : memref<1x2x2x248x1xf32, #tpu.memory_space<vmem>>, vector<1x1x1x210x1xf32>
    %151 = vector.shape_cast %150 : vector<1x1x1x210x1xf32> to vector<210x1xf32>
    %c1_146 = arith.constant 1 : index
    %c0_147 = arith.constant 0 : index
    %c0_148 = arith.constant 0 : index
    %152 = vector.load %arg2[%c1_146, %c0_147, %c0_148] : memref<9x1x16xf32, #tpu.memory_space<vmem>>, vector<1x1x16xf32>
    %153 = vector.shape_cast %152 : vector<1x1x16xf32> to vector<1x16xf32>
    %154 = vector.broadcast %151 : vector<210x1xf32> to vector<210x16xf32>
    %155 = vector.broadcast %153 : vector<1x16xf32> to vector<210x16xf32>
    %156 = arith.mulf %154, %155 : vector<210x16xf32>
    %157 = arith.addf %149, %156 : vector<210x16xf32>
    %c0_149 = arith.constant 0 : index
    %c1_150 = arith.constant 1 : index
    %c0_151 = arith.constant 0 : index
    %c1_152 = arith.constant 1 : index
    %c0_153 = arith.constant 0 : index
    %158 = vector.load %arg1[%c0_149, %c1_150, %c0_151, %c1_152, %c0_153] : memref<1x2x2x248x1xf32, #tpu.memory_space<vmem>>, vector<1x1x1x210x1xf32>
    %159 = vector.shape_cast %158 : vector<1x1x1x210x1xf32> to vector<210x1xf32>
    %c2_154 = arith.constant 2 : index
    %c0_155 = arith.constant 0 : index
    %c0_156 = arith.constant 0 : index
    %160 = vector.load %arg2[%c2_154, %c0_155, %c0_156] : memref<9x1x16xf32, #tpu.memory_space<vmem>>, vector<1x1x16xf32>
    %161 = vector.shape_cast %160 : vector<1x1x16xf32> to vector<1x16xf32>
    %162 = vector.broadcast %159 : vector<210x1xf32> to vector<210x16xf32>
    %163 = vector.broadcast %161 : vector<1x16xf32> to vector<210x16xf32>
    %164 = arith.mulf %162, %163 : vector<210x16xf32>
    %165 = arith.addf %157, %164 : vector<210x16xf32>
    %c0_157 = arith.constant 0 : index
    %c0_158 = arith.constant 0 : index
    %c0_159 = arith.constant 0 : index
    %c15_160 = arith.constant 15 : index
    %c0_161 = arith.constant 0 : index
    %166 = vector.load %arg1[%c0_157, %c0_158, %c0_159, %c15_160, %c0_161] : memref<1x2x2x248x1xf32, #tpu.memory_space<vmem>>, vector<1x1x1x210x1xf32>
    %167 = vector.shape_cast %166 : vector<1x1x1x210x1xf32> to vector<210x1xf32>
    %c3_162 = arith.constant 3 : index
    %c0_163 = arith.constant 0 : index
    %c0_164 = arith.constant 0 : index
    %168 = vector.load %arg2[%c3_162, %c0_163, %c0_164] : memref<9x1x16xf32, #tpu.memory_space<vmem>>, vector<1x1x16xf32>
    %169 = vector.shape_cast %168 : vector<1x1x16xf32> to vector<1x16xf32>
    %170 = vector.broadcast %167 : vector<210x1xf32> to vector<210x16xf32>
    %171 = vector.broadcast %169 : vector<1x16xf32> to vector<210x16xf32>
    %172 = arith.mulf %170, %171 : vector<210x16xf32>
    %173 = arith.addf %165, %172 : vector<210x16xf32>
    %c0_165 = arith.constant 0 : index
    %c0_166 = arith.constant 0 : index
    %c1_167 = arith.constant 1 : index
    %c15_168 = arith.constant 15 : index
    %c0_169 = arith.constant 0 : index
    %174 = vector.load %arg1[%c0_165, %c0_166, %c1_167, %c15_168, %c0_169] : memref<1x2x2x248x1xf32, #tpu.memory_space<vmem>>, vector<1x1x1x210x1xf32>
    %175 = vector.shape_cast %174 : vector<1x1x1x210x1xf32> to vector<210x1xf32>
    %c4_170 = arith.constant 4 : index
    %c0_171 = arith.constant 0 : index
    %c0_172 = arith.constant 0 : index
    %176 = vector.load %arg2[%c4_170, %c0_171, %c0_172] : memref<9x1x16xf32, #tpu.memory_space<vmem>>, vector<1x1x16xf32>
    %177 = vector.shape_cast %176 : vector<1x1x16xf32> to vector<1x16xf32>
    %178 = vector.broadcast %175 : vector<210x1xf32> to vector<210x16xf32>
    %179 = vector.broadcast %177 : vector<1x16xf32> to vector<210x16xf32>
    %180 = arith.mulf %178, %179 : vector<210x16xf32>
    %181 = arith.addf %173, %180 : vector<210x16xf32>
    %c0_173 = arith.constant 0 : index
    %c0_174 = arith.constant 0 : index
    %c0_175 = arith.constant 0 : index
    %c16_176 = arith.constant 16 : index
    %c0_177 = arith.constant 0 : index
    %182 = vector.load %arg1[%c0_173, %c0_174, %c0_175, %c16_176, %c0_177] : memref<1x2x2x248x1xf32, #tpu.memory_space<vmem>>, vector<1x1x1x210x1xf32>
    %183 = vector.shape_cast %182 : vector<1x1x1x210x1xf32> to vector<210x1xf32>
    %c5_178 = arith.constant 5 : index
    %c0_179 = arith.constant 0 : index
    %c0_180 = arith.constant 0 : index
    %184 = vector.load %arg2[%c5_178, %c0_179, %c0_180] : memref<9x1x16xf32, #tpu.memory_space<vmem>>, vector<1x1x16xf32>
    %185 = vector.shape_cast %184 : vector<1x1x16xf32> to vector<1x16xf32>
    %186 = vector.broadcast %183 : vector<210x1xf32> to vector<210x16xf32>
    %187 = vector.broadcast %185 : vector<1x16xf32> to vector<210x16xf32>
    %188 = arith.mulf %186, %187 : vector<210x16xf32>
    %189 = arith.addf %181, %188 : vector<210x16xf32>
    %c0_181 = arith.constant 0 : index
    %c1_182 = arith.constant 1 : index
    %c0_183 = arith.constant 0 : index
    %c15_184 = arith.constant 15 : index
    %c0_185 = arith.constant 0 : index
    %190 = vector.load %arg1[%c0_181, %c1_182, %c0_183, %c15_184, %c0_185] : memref<1x2x2x248x1xf32, #tpu.memory_space<vmem>>, vector<1x1x1x210x1xf32>
    %191 = vector.shape_cast %190 : vector<1x1x1x210x1xf32> to vector<210x1xf32>
    %c6_186 = arith.constant 6 : index
    %c0_187 = arith.constant 0 : index
    %c0_188 = arith.constant 0 : index
    %192 = vector.load %arg2[%c6_186, %c0_187, %c0_188] : memref<9x1x16xf32, #tpu.memory_space<vmem>>, vector<1x1x16xf32>
    %193 = vector.shape_cast %192 : vector<1x1x16xf32> to vector<1x16xf32>
    %194 = vector.broadcast %191 : vector<210x1xf32> to vector<210x16xf32>
    %195 = vector.broadcast %193 : vector<1x16xf32> to vector<210x16xf32>
    %196 = arith.mulf %194, %195 : vector<210x16xf32>
    %197 = arith.addf %189, %196 : vector<210x16xf32>
    %c0_189 = arith.constant 0 : index
    %c1_190 = arith.constant 1 : index
    %c1_191 = arith.constant 1 : index
    %c15_192 = arith.constant 15 : index
    %c0_193 = arith.constant 0 : index
    %198 = vector.load %arg1[%c0_189, %c1_190, %c1_191, %c15_192, %c0_193] : memref<1x2x2x248x1xf32, #tpu.memory_space<vmem>>, vector<1x1x1x210x1xf32>
    %199 = vector.shape_cast %198 : vector<1x1x1x210x1xf32> to vector<210x1xf32>
    %c7_194 = arith.constant 7 : index
    %c0_195 = arith.constant 0 : index
    %c0_196 = arith.constant 0 : index
    %200 = vector.load %arg2[%c7_194, %c0_195, %c0_196] : memref<9x1x16xf32, #tpu.memory_space<vmem>>, vector<1x1x16xf32>
    %201 = vector.shape_cast %200 : vector<1x1x16xf32> to vector<1x16xf32>
    %202 = vector.broadcast %199 : vector<210x1xf32> to vector<210x16xf32>
    %203 = vector.broadcast %201 : vector<1x16xf32> to vector<210x16xf32>
    %204 = arith.mulf %202, %203 : vector<210x16xf32>
    %205 = arith.addf %197, %204 : vector<210x16xf32>
    %c0_197 = arith.constant 0 : index
    %c1_198 = arith.constant 1 : index
    %c0_199 = arith.constant 0 : index
    %c16_200 = arith.constant 16 : index
    %c0_201 = arith.constant 0 : index
    %206 = vector.load %arg1[%c0_197, %c1_198, %c0_199, %c16_200, %c0_201] : memref<1x2x2x248x1xf32, #tpu.memory_space<vmem>>, vector<1x1x1x210x1xf32>
    %207 = vector.shape_cast %206 : vector<1x1x1x210x1xf32> to vector<210x1xf32>
    %c8_202 = arith.constant 8 : index
    %c0_203 = arith.constant 0 : index
    %c0_204 = arith.constant 0 : index
    %208 = vector.load %arg2[%c8_202, %c0_203, %c0_204] : memref<9x1x16xf32, #tpu.memory_space<vmem>>, vector<1x1x16xf32>
    %209 = vector.shape_cast %208 : vector<1x1x16xf32> to vector<1x16xf32>
    %210 = vector.broadcast %207 : vector<210x1xf32> to vector<210x16xf32>
    %211 = vector.broadcast %209 : vector<1x16xf32> to vector<210x16xf32>
    %212 = arith.mulf %210, %211 : vector<210x16xf32>
    %213 = arith.addf %205, %212 : vector<210x16xf32>
    %214 = arith.maximumf %142, %213 : vector<210x16xf32>
    %c0_205 = arith.constant 0 : index
    %c1_206 = arith.constant 1 : index
    %c1_207 = arith.constant 1 : index
    %c0_208 = arith.constant 0 : index
    %c0_209 = arith.constant 0 : index
    %215 = vector.load %arg1[%c0_205, %c1_206, %c1_207, %c0_208, %c0_209] : memref<1x2x2x248x1xf32, #tpu.memory_space<vmem>>, vector<1x1x1x210x1xf32>
    %216 = vector.shape_cast %215 : vector<1x1x1x210x1xf32> to vector<210x1xf32>
    %c0_210 = arith.constant 0 : index
    %c0_211 = arith.constant 0 : index
    %c0_212 = arith.constant 0 : index
    %217 = vector.load %arg2[%c0_210, %c0_211, %c0_212] : memref<9x1x16xf32, #tpu.memory_space<vmem>>, vector<1x1x16xf32>
    %218 = vector.shape_cast %217 : vector<1x1x16xf32> to vector<1x16xf32>
    %219 = vector.broadcast %216 : vector<210x1xf32> to vector<210x16xf32>
    %220 = vector.broadcast %218 : vector<1x16xf32> to vector<210x16xf32>
    %221 = arith.mulf %219, %220 : vector<210x16xf32>
    %c0_213 = arith.constant 0 : index
    %c1_214 = arith.constant 1 : index
    %c0_215 = arith.constant 0 : index
    %c1_216 = arith.constant 1 : index
    %c0_217 = arith.constant 0 : index
    %222 = vector.load %arg1[%c0_213, %c1_214, %c0_215, %c1_216, %c0_217] : memref<1x2x2x248x1xf32, #tpu.memory_space<vmem>>, vector<1x1x1x210x1xf32>
    %223 = vector.shape_cast %222 : vector<1x1x1x210x1xf32> to vector<210x1xf32>
    %c1_218 = arith.constant 1 : index
    %c0_219 = arith.constant 0 : index
    %c0_220 = arith.constant 0 : index
    %224 = vector.load %arg2[%c1_218, %c0_219, %c0_220] : memref<9x1x16xf32, #tpu.memory_space<vmem>>, vector<1x1x16xf32>
    %225 = vector.shape_cast %224 : vector<1x1x16xf32> to vector<1x16xf32>
    %226 = vector.broadcast %223 : vector<210x1xf32> to vector<210x16xf32>
    %227 = vector.broadcast %225 : vector<1x16xf32> to vector<210x16xf32>
    %228 = arith.mulf %226, %227 : vector<210x16xf32>
    %229 = arith.addf %221, %228 : vector<210x16xf32>
    %c0_221 = arith.constant 0 : index
    %c1_222 = arith.constant 1 : index
    %c1_223 = arith.constant 1 : index
    %c1_224 = arith.constant 1 : index
    %c0_225 = arith.constant 0 : index
    %230 = vector.load %arg1[%c0_221, %c1_222, %c1_223, %c1_224, %c0_225] : memref<1x2x2x248x1xf32, #tpu.memory_space<vmem>>, vector<1x1x1x210x1xf32>
    %231 = vector.shape_cast %230 : vector<1x1x1x210x1xf32> to vector<210x1xf32>
    %c2_226 = arith.constant 2 : index
    %c0_227 = arith.constant 0 : index
    %c0_228 = arith.constant 0 : index
    %232 = vector.load %arg2[%c2_226, %c0_227, %c0_228] : memref<9x1x16xf32, #tpu.memory_space<vmem>>, vector<1x1x16xf32>
    %233 = vector.shape_cast %232 : vector<1x1x16xf32> to vector<1x16xf32>
    %234 = vector.broadcast %231 : vector<210x1xf32> to vector<210x16xf32>
    %235 = vector.broadcast %233 : vector<1x16xf32> to vector<210x16xf32>
    %236 = arith.mulf %234, %235 : vector<210x16xf32>
    %237 = arith.addf %229, %236 : vector<210x16xf32>
    %c0_229 = arith.constant 0 : index
    %c0_230 = arith.constant 0 : index
    %c1_231 = arith.constant 1 : index
    %c15_232 = arith.constant 15 : index
    %c0_233 = arith.constant 0 : index
    %238 = vector.load %arg1[%c0_229, %c0_230, %c1_231, %c15_232, %c0_233] : memref<1x2x2x248x1xf32, #tpu.memory_space<vmem>>, vector<1x1x1x210x1xf32>
    %239 = vector.shape_cast %238 : vector<1x1x1x210x1xf32> to vector<210x1xf32>
    %c3_234 = arith.constant 3 : index
    %c0_235 = arith.constant 0 : index
    %c0_236 = arith.constant 0 : index
    %240 = vector.load %arg2[%c3_234, %c0_235, %c0_236] : memref<9x1x16xf32, #tpu.memory_space<vmem>>, vector<1x1x16xf32>
    %241 = vector.shape_cast %240 : vector<1x1x16xf32> to vector<1x16xf32>
    %242 = vector.broadcast %239 : vector<210x1xf32> to vector<210x16xf32>
    %243 = vector.broadcast %241 : vector<1x16xf32> to vector<210x16xf32>
    %244 = arith.mulf %242, %243 : vector<210x16xf32>
    %245 = arith.addf %237, %244 : vector<210x16xf32>
    %c0_237 = arith.constant 0 : index
    %c0_238 = arith.constant 0 : index
    %c0_239 = arith.constant 0 : index
    %c16_240 = arith.constant 16 : index
    %c0_241 = arith.constant 0 : index
    %246 = vector.load %arg1[%c0_237, %c0_238, %c0_239, %c16_240, %c0_241] : memref<1x2x2x248x1xf32, #tpu.memory_space<vmem>>, vector<1x1x1x210x1xf32>
    %247 = vector.shape_cast %246 : vector<1x1x1x210x1xf32> to vector<210x1xf32>
    %c4_242 = arith.constant 4 : index
    %c0_243 = arith.constant 0 : index
    %c0_244 = arith.constant 0 : index
    %248 = vector.load %arg2[%c4_242, %c0_243, %c0_244] : memref<9x1x16xf32, #tpu.memory_space<vmem>>, vector<1x1x16xf32>
    %249 = vector.shape_cast %248 : vector<1x1x16xf32> to vector<1x16xf32>
    %250 = vector.broadcast %247 : vector<210x1xf32> to vector<210x16xf32>
    %251 = vector.broadcast %249 : vector<1x16xf32> to vector<210x16xf32>
    %252 = arith.mulf %250, %251 : vector<210x16xf32>
    %253 = arith.addf %245, %252 : vector<210x16xf32>
    %c0_245 = arith.constant 0 : index
    %c0_246 = arith.constant 0 : index
    %c1_247 = arith.constant 1 : index
    %c16_248 = arith.constant 16 : index
    %c0_249 = arith.constant 0 : index
    %254 = vector.load %arg1[%c0_245, %c0_246, %c1_247, %c16_248, %c0_249] : memref<1x2x2x248x1xf32, #tpu.memory_space<vmem>>, vector<1x1x1x210x1xf32>
    %255 = vector.shape_cast %254 : vector<1x1x1x210x1xf32> to vector<210x1xf32>
    %c5_250 = arith.constant 5 : index
    %c0_251 = arith.constant 0 : index
    %c0_252 = arith.constant 0 : index
    %256 = vector.load %arg2[%c5_250, %c0_251, %c0_252] : memref<9x1x16xf32, #tpu.memory_space<vmem>>, vector<1x1x16xf32>
    %257 = vector.shape_cast %256 : vector<1x1x16xf32> to vector<1x16xf32>
    %258 = vector.broadcast %255 : vector<210x1xf32> to vector<210x16xf32>
    %259 = vector.broadcast %257 : vector<1x16xf32> to vector<210x16xf32>
    %260 = arith.mulf %258, %259 : vector<210x16xf32>
    %261 = arith.addf %253, %260 : vector<210x16xf32>
    %c0_253 = arith.constant 0 : index
    %c1_254 = arith.constant 1 : index
    %c1_255 = arith.constant 1 : index
    %c15_256 = arith.constant 15 : index
    %c0_257 = arith.constant 0 : index
    %262 = vector.load %arg1[%c0_253, %c1_254, %c1_255, %c15_256, %c0_257] : memref<1x2x2x248x1xf32, #tpu.memory_space<vmem>>, vector<1x1x1x210x1xf32>
    %263 = vector.shape_cast %262 : vector<1x1x1x210x1xf32> to vector<210x1xf32>
    %c6_258 = arith.constant 6 : index
    %c0_259 = arith.constant 0 : index
    %c0_260 = arith.constant 0 : index
    %264 = vector.load %arg2[%c6_258, %c0_259, %c0_260] : memref<9x1x16xf32, #tpu.memory_space<vmem>>, vector<1x1x16xf32>
    %265 = vector.shape_cast %264 : vector<1x1x16xf32> to vector<1x16xf32>
    %266 = vector.broadcast %263 : vector<210x1xf32> to vector<210x16xf32>
    %267 = vector.broadcast %265 : vector<1x16xf32> to vector<210x16xf32>
    %268 = arith.mulf %266, %267 : vector<210x16xf32>
    %269 = arith.addf %261, %268 : vector<210x16xf32>
    %c0_261 = arith.constant 0 : index
    %c1_262 = arith.constant 1 : index
    %c0_263 = arith.constant 0 : index
    %c16_264 = arith.constant 16 : index
    %c0_265 = arith.constant 0 : index
    %270 = vector.load %arg1[%c0_261, %c1_262, %c0_263, %c16_264, %c0_265] : memref<1x2x2x248x1xf32, #tpu.memory_space<vmem>>, vector<1x1x1x210x1xf32>
    %271 = vector.shape_cast %270 : vector<1x1x1x210x1xf32> to vector<210x1xf32>
    %c7_266 = arith.constant 7 : index
    %c0_267 = arith.constant 0 : index
    %c0_268 = arith.constant 0 : index
    %272 = vector.load %arg2[%c7_266, %c0_267, %c0_268] : memref<9x1x16xf32, #tpu.memory_space<vmem>>, vector<1x1x16xf32>
    %273 = vector.shape_cast %272 : vector<1x1x16xf32> to vector<1x16xf32>
    %274 = vector.broadcast %271 : vector<210x1xf32> to vector<210x16xf32>
    %275 = vector.broadcast %273 : vector<1x16xf32> to vector<210x16xf32>
    %276 = arith.mulf %274, %275 : vector<210x16xf32>
    %277 = arith.addf %269, %276 : vector<210x16xf32>
    %c0_269 = arith.constant 0 : index
    %c1_270 = arith.constant 1 : index
    %c1_271 = arith.constant 1 : index
    %c16_272 = arith.constant 16 : index
    %c0_273 = arith.constant 0 : index
    %278 = vector.load %arg1[%c0_269, %c1_270, %c1_271, %c16_272, %c0_273] : memref<1x2x2x248x1xf32, #tpu.memory_space<vmem>>, vector<1x1x1x210x1xf32>
    %279 = vector.shape_cast %278 : vector<1x1x1x210x1xf32> to vector<210x1xf32>
    %c8_274 = arith.constant 8 : index
    %c0_275 = arith.constant 0 : index
    %c0_276 = arith.constant 0 : index
    %280 = vector.load %arg2[%c8_274, %c0_275, %c0_276] : memref<9x1x16xf32, #tpu.memory_space<vmem>>, vector<1x1x16xf32>
    %281 = vector.shape_cast %280 : vector<1x1x16xf32> to vector<1x16xf32>
    %282 = vector.broadcast %279 : vector<210x1xf32> to vector<210x16xf32>
    %283 = vector.broadcast %281 : vector<1x16xf32> to vector<210x16xf32>
    %284 = arith.mulf %282, %283 : vector<210x16xf32>
    %285 = arith.addf %277, %284 : vector<210x16xf32>
    %286 = arith.maximumf %214, %285 : vector<210x16xf32>
    %c0_277 = arith.constant 0 : index
    %c0_278 = arith.constant 0 : index
    %287 = vector.load %arg3[%c0_277, %c0_278] : memref<1x16xf32, #tpu.memory_space<vmem>>, vector<1x16xf32>
    %288 = vector.broadcast %287 : vector<1x16xf32> to vector<210x16xf32>
    %289 = arith.addf %286, %288 : vector<210x16xf32>
    %cst = arith.constant 0.000000e+00 : f32
    %290 = vector.broadcast %cst : f32 to vector<210x16xf32>
    %291 = arith.maximumf %289, %290 : vector<210x16xf32>
    %c0_279 = arith.constant 0 : index
    %c0_280 = arith.constant 0 : index
    %c0_281 = arith.constant 0 : index
    %292 = vector.load %arg4[%c0_279, %c0_280, %c0_281] : memref<1x210x16xf32, #tpu.memory_space<vmem>>, vector<1x210x16xf32>
    %293 = vector.shape_cast %292 : vector<1x210x16xf32> to vector<210x16xf32>
    %294 = vector.shape_cast %291 : vector<210x16xf32> to vector<1x210x16xf32>
    tpu.vector_store %arg4[%c0_279, %c0_280, %c0_281], %294 {strides = array<i32>} : memref<1x210x16xf32, #tpu.memory_space<vmem>>, vector<1x210x16xf32>,
    return
  }
  func.func @transform_0(%arg0: i32) -> (i32, i32, i32, i32, i32) {
    %c0_i32 = arith.constant 0 : i32
    %c0_i32_0 = arith.constant 0 : i32
    %c0_i32_1 = arith.constant 0 : i32
    %c0_i32_2 = arith.constant 0 : i32
    %c0_i32_3 = arith.constant 0 : i32
    return %arg0, %c0_i32, %c0_i32_0, %c0_i32_1, %c0_i32_2 : i32, i32, i32, i32, i32
  }
  func.func @transform_1(%arg0: i32) -> (i32, i32, i32) {
    %c0_i32 = arith.constant 0 : i32
    %c0_i32_0 = arith.constant 0 : i32
    %c0_i32_1 = arith.constant 0 : i32
    %c0_i32_2 = arith.constant 0 : i32
    return %c0_i32, %c0_i32_0, %c0_i32_1 : i32, i32, i32
  }
  func.func @transform_2(%arg0: i32) -> (i32, i32) {
    %c0_i32 = arith.constant 0 : i32
    %c0_i32_0 = arith.constant 0 : i32
    %c0_i32_1 = arith.constant 0 : i32
    return %c0_i32, %c0_i32_0 : i32, i32
  }
  func.func @transform_3(%arg0: i32) -> (i32, i32, i32) {
    %c0_i32 = arith.constant 0 : i32
    %c0_i32_0 = arith.constant 0 : i32
    %c0_i32_1 = arith.constant 0 : i32
    return %arg0, %c0_i32, %c0_i32_0 : i32, i32, i32
  }
}

</mosaic_0001>

<bundles_post_ra>
// kernel: tpu_custom_call.1
= control target key start
LH: loop header
LB: loop body
LE: loop exit
PB: predicated region body
PF: predicated region fallthrough
CT: control target
= control target key end

     0   :  { %s5305_s12 = smov 0   ;;  %s11435_s0 = inlined_call_operand.vmem [shape: f32[4,2,2,248,1], index: 0, kind: input, shape index: {}]   ;;  %s11436_s1 = inlined_call_operand.vmem [shape: f32[9,1,16], index: 1, kind: input, shape index: {}]   ;;  %s11437_s2 = inlined_call_operand.vmem [shape: f32[1,16], index: 2, kind: input, shape index: {}]   ;;  %s11438_s3 = inlined_call_operand.vmem [shape: f32[4,210,16], index: 3, kind: output, shape index: {}]  }
   0x1 LB: > { %s4899_s13 = sadd.s32 4294967295, %s5282_s12   ;;  %p4903_p0 = scmp.ge.s32.totalorder %s5282_s12, 1  ;;  %s5282_s12 = sphi %s5305_s12, %s13_s12  }
   0x2   : > { %p137_p1 = scmp.lt.s32.totalorder %s5282_s12, 5 }
   0x4   : > { %p138_p2 = pnand %p4903_p0, %p137_p1 }
   0x6   : > { %141 = sbr.rel (%p138_p2) target bundleno = 1099 (0x44b), region = 32 }
   0xb   : > { %p161_p3 = scmp.lt.s32.totalorder %s4899_s13, 3  ;;  %v5284_v0 = vmov 0   ;;  %vm4815_vm0 = vcmask 130048   ;;  %vm4842_vm1 = vcmask 123904  }
   0xc   : > { %5262 = vset.pattern.permute.xlu1 %v5284_v0  ;;  %5261 = vset.pattern.permute.xlu0 %v5284_v0 }
   0xd   : > { %s13395_s13 = smov (!%p161_p3, %s4899_s13), 3 }
   0xe   : > { %s5250_s14 = smul.u32 992, %s13395_s13 }
  0x10   : > { %s5319_s17 = scalar_lea.vmem %s11435_s0, %s5250_s14 }
  0x11   : > { %v173_v1 = vld [vmem:[%s5319_s17 + $0x10] sm:$0xff]  ;;  %v171_v2 = vld [vmem:[%s5319_s17] sm:$0xff]  ;;  %v174_v3 = vld [vmem:[%s5319_s17 + $0x18] sm:$0xff] }
  0x12   : > { %211 = vperm.xlu1 %5262, %v173_v1   ;;  %201 = vperm.xlu0 %5261, %v171_v2   ;;  %v172_v4 = vld [vmem:[%s5319_s17 + $0x8] sm:$0xff]  ;;  %v175_v6 = vld [vmem:[%s5319_s17 + $0x20] sm:$0xff]  ;;  %v178_v7 = vld [vmem:[%s5319_s17 + $0x38] sm:$0xff] }
  0x13   : > { %v176_v5 = vld [vmem:[%s5319_s17 + $0x28] sm:$0xff]  ;;  %v177_v8 = vld [vmem:[%s5319_s17 + $0x30] sm:$0xff]  ;;  %v179_v10 = vld [vmem:[%s5319_s17 + $0x40] sm:$0xff] }
  0x14   : > { %v180_v9 = vld [vmem:[%s5319_s17 + $0x48] sm:$0xff]  ;;  %v182_v11 = vld [vmem:[%s5319_s17 + $0x58] sm:$0xff]  ;;  %v181_v12 = vld [vmem:[%s5319_s17 + $0x50] sm:$0xff] }
  0x15   : > { %v184_v13 = vld [vmem:[%s5319_s17 + $0x68] sm:$0xff]  ;;  %v183_v14 = vld [vmem:[%s5319_s17 + $0x60] sm:$0xff]  ;;  %v186_v15 = vld [vmem:[%s5319_s17 + $0x78] sm:$0xff] }
  0x16   : > { %216 = vperm.xlu1 %5262, %v174_v3   ;;  %206 = vperm.xlu0 %5261, %v172_v4   ;;  %v185_v16 = vld [vmem:[%s5319_s17 + $0x70] sm:$0xff]  ;;  %v188_v17 = vld [vmem:[%s5319_s17 + $0x88] sm:$0xff]  ;;  %v187_v18 = vld [vmem:[%s5319_s17 + $0x80] sm:$0xff] }
  0x17   : > { %v190_v19 = vld [vmem:[%s5319_s17 + $0x98] sm:$0xff]  ;;  %v189_v20 = vld [vmem:[%s5319_s17 + $0x90] sm:$0xff]  ;;  %v192_v21 = vld [vmem:[%s5319_s17 + $0xa8] sm:$0xff] }
  0x18   : > { %v191_v22 = vld [vmem:[%s5319_s17 + $0xa0] sm:$0xff]  ;;  %v194_v23 = vld [vmem:[%s5319_s17 + $0xb8] sm:$0xff]  ;;  %v193_v24 = vld [vmem:[%s5319_s17 + $0xb0] sm:$0xff] }
  0x19   : > { %v196_v25 = vld [vmem:[%s5319_s17 + $0xc8] sm:$0xff]  ;;  %v195_v26 = vld [vmem:[%s5319_s17 + $0xc0] sm:$0xff]  ;;  %v4907_v27 = vld [vmem:[%s5319_s17 + $0xf8] sm:$0xff] }
  0x1a   : > { %226 = vperm.xlu1 %5262, %v176_v5   ;;  %221 = vperm.xlu0 %5261, %v175_v6   ;;  %v197_v28 = vld [vmem:[%s5319_s17 + $0xd0] sm:$0x3]  ;;  %v4909_v29 = vld [vmem:[%s5319_s17 + $0x108] sm:$0xff]  ;;  %v4908_v30 = vld [vmem:[%s5319_s17 + $0x100] sm:$0xff] }
  0x1b   : > { %v4911_v31 = vld [vmem:[%s5319_s17 + $0x118] sm:$0xff]  ;;  %v4910_v32 = vld [vmem:[%s5319_s17 + $0x110] sm:$0xff]  ;;  %v4913_v33 = vld [vmem:[%s5319_s17 + $0x128] sm:$0xff] }
  0x1c   : > { %v4912_v34 = vld [vmem:[%s5319_s17 + $0x120] sm:$0xff]  ;;  %v4915_v35 = vld [vmem:[%s5319_s17 + $0x138] sm:$0xff]  ;;  %v4914_v36 = vld [vmem:[%s5319_s17 + $0x130] sm:$0xff] }
  0x1d   : > { %v4917_v37 = vld [vmem:[%s5319_s17 + $0x148] sm:$0xff]  ;;  %v4916_v38 = vld [vmem:[%s5319_s17 + $0x140] sm:$0xff]  ;;  %v4919_v39 = vld [vmem:[%s5319_s17 + $0x158] sm:$0xff] }
  0x1e   : > { %236 = vperm.xlu1 %5262, %v178_v7   ;;  %231 = vperm.xlu0 %5261, %v177_v8   ;;  %v4918_v40 = vld [vmem:[%s5319_s17 + $0x150] sm:$0xff]  ;;  %v4921_v41 = vld [vmem:[%s5319_s17 + $0x168] sm:$0xff]  ;;  %v4920_v42 = vld [vmem:[%s5319_s17 + $0x160] sm:$0xff] }
  0x1f   : > { %v4923_v43 = vld [vmem:[%s5319_s17 + $0x178] sm:$0xff]  ;;  %v4922_v44 = vld [vmem:[%s5319_s17 + $0x170] sm:$0xff]  ;;  %v4925_v45 = vld [vmem:[%s5319_s17 + $0x188] sm:$0xff] }
  0x20   : > { %v4924_v46 = vld [vmem:[%s5319_s17 + $0x180] sm:$0xff]  ;;  %v4927_v47 = vld [vmem:[%s5319_s17 + $0x198] sm:$0xff]  ;;  %v4926_v48 = vld [vmem:[%s5319_s17 + $0x190] sm:$0xff] }
  0x21   : > { %v4929_v49 = vld [vmem:[%s5319_s17 + $0x1a8] sm:$0xff]  ;;  %v4928_v50 = vld [vmem:[%s5319_s17 + $0x1a0] sm:$0xff]  ;;  %v4931_v51 = vld [vmem:[%s5319_s17 + $0x1b8] sm:$0xff] }
  0x22   : > { %246 = vperm.xlu1 %5262, %v180_v9   ;;  %241 = vperm.xlu0 %5261, %v179_v10   ;;  %v4930_v52 = vld [vmem:[%s5319_s17 + $0x1b0] sm:$0xff]  ;;  %v4933_v53 = vld [vmem:[%s5319_s17 + $0x1c8] sm:$0x3]  ;;  %v4932_v54 = vld [vmem:[%s5319_s17 + $0x1c0] sm:$0xff] }
  0x23   : > { %v593_v55 = vld [vmem:[%s5319_s17 + $0x9] sm:$0xff]  ;;  %v592_v56 = vld [vmem:[%s5319_s17 + $0x1] sm:$0xff]  ;;  %v595_v57 = vld [vmem:[%s5319_s17 + $0x19] sm:$0xff] }
  0x24   : > { %v594_v58 = vld [vmem:[%s5319_s17 + $0x11] sm:$0xff]  ;;  %v597_v59 = vld [vmem:[%s5319_s17 + $0x29] sm:$0xff]  ;;  %v596_v60 = vld [vmem:[%s5319_s17 + $0x21] sm:$0xff] }
  0x25   : > { %v599_v61 = vld [vmem:[%s5319_s17 + $0x39] sm:$0xff]  ;;  %v598_v62 = vld [vmem:[%s5319_s17 + $0x31] sm:$0xff]  ;;  %v601_v63 = vld [vmem:[%s5319_s17 + $0x49] sm:$0xff] }
  0x26   : > { %256 = vperm.xlu1 %5262, %v182_v11   ;;  %251 = vperm.xlu0 %5261, %v181_v12   ;;  %v600_v0 = vld [vmem:[%s5319_s17 + $0x41] sm:$0xff]  ;;  %v603_v3 = vld [vmem:[%s5319_s17 + $0x59] sm:$0xff]  ;;  %v602_v4 = vld [vmem:[%s5319_s17 + $0x51] sm:$0xff] }
  0x27   : > { %v605_v7 = vld [vmem:[%s5319_s17 + $0x69] sm:$0xff]  ;;  %v604_v8 = vld [vmem:[%s5319_s17 + $0x61] sm:$0xff]  ;;  %v607_v11 = vld [vmem:[%s5319_s17 + $0x79] sm:$0xff] }
  0x28   : > { %v606_v12 = vld [vmem:[%s5319_s17 + $0x71] sm:$0xff] }
  0x2a   : > { %266 = vperm.xlu1 %5262, %v184_v13   ;;  %261 = vperm.xlu0 %5261, %v183_v14  }
  0x2e   : > { %276 = vperm.xlu1 %5262, %v186_v15   ;;  %271 = vperm.xlu0 %5261, %v185_v16   ;;  %v609_v15 = vld [vmem:[%s5319_s17 + $0x89] sm:$0xff]  ;;  %v608_v16 = vld [vmem:[%s5319_s17 + $0x81] sm:$0xff] }
  0x32   : > { %286 = vperm.xlu1 %5262, %v188_v17   ;;  %281 = vperm.xlu0 %5261, %v187_v18  }
  0x36   : > { %296 = vperm.xlu1 %5262, %v190_v19   ;;  %291 = vperm.xlu0 %5261, %v189_v20   ;;  %v611_v19 = vld [vmem:[%s5319_s17 + $0x99] sm:$0xff]  ;;  %v610_v20 = vld [vmem:[%s5319_s17 + $0x91] sm:$0xff] }
  0x3a   : > { %306 = vperm.xlu1 %5262, %v192_v21   ;;  %301 = vperm.xlu0 %5261, %v191_v22  }
  0x3e   : > { %316 = vperm.xlu1 %5262, %v194_v23   ;;  %311 = vperm.xlu0 %5261, %v193_v24   ;;  %v613_v23 = vld [vmem:[%s5319_s17 + $0xa9] sm:$0xff]  ;;  %v612_v24 = vld [vmem:[%s5319_s17 + $0xa1] sm:$0xff] }
  0x42   : > { %326 = vperm.xlu1 %5262, %v196_v25   ;;  %321 = vperm.xlu0 %5261, %v195_v26  }
  0x46   : > { %399 = vperm.xlu1 %5262, %v4907_v27   ;;  %331 = vperm.xlu0 %5261, %v197_v28   ;;  %v615_v27 = vld [vmem:[%s5319_s17 + $0xb9] sm:$0xff]  ;;  %v614_v28 = vld [vmem:[%s5319_s17 + $0xb1] sm:$0xff] }
  0x4a   : > { %409 = vperm.xlu1 %5262, %v4909_v29   ;;  %404 = vperm.xlu0 %5261, %v4908_v30  }
  0x4e   : > { %419 = vperm.xlu1 %5262, %v4911_v31   ;;  %414 = vperm.xlu0 %5261, %v4910_v32   ;;  %v617_v31 = vld [vmem:[%s5319_s17 + $0xc9] sm:$0xff]  ;;  %v616_v32 = vld [vmem:[%s5319_s17 + $0xc1] sm:$0xff] }
  0x52   : > { %429 = vperm.xlu1 %5262, %v4913_v33   ;;  %424 = vperm.xlu0 %5261, %v4912_v34  }
  0x56   : > { %439 = vperm.xlu1 %5262, %v4915_v35   ;;  %434 = vperm.xlu0 %5261, %v4914_v36   ;;  %v4938_v35 = vld [vmem:[%s5319_s17 + $0x1f0] sm:$0xff] }
  0x57   : > { %v618_v36 = vld [vmem:[%s5319_s17 + $0xd1] sm:$0x3] }
  0x5a   : > { %449 = vperm.xlu1 %5262, %v4917_v37   ;;  %444 = vperm.xlu0 %5261, %v4916_v38  }
  0x5e   : > { %459 = vperm.xlu1 %5262, %v4919_v39   ;;  %454 = vperm.xlu0 %5261, %v4918_v40   ;;  %v4940_v39 = vld [vmem:[%s5319_s17 + $0x200] sm:$0xff]  ;;  %v4939_v40 = vld [vmem:[%s5319_s17 + $0x1f8] sm:$0xff] }
  0x62   : > { %469 = vperm.xlu1 %5262, %v4921_v41   ;;  %464 = vperm.xlu0 %5261, %v4920_v42  }
  0x66   : > { %479 = vperm.xlu1 %5262, %v4923_v43   ;;  %474 = vperm.xlu0 %5261, %v4922_v44   ;;  %v4942_v43 = vld [vmem:[%s5319_s17 + $0x210] sm:$0xff]  ;;  %v4941_v44 = vld [vmem:[%s5319_s17 + $0x208] sm:$0xff] }
  0x6a   : > { %489 = vperm.xlu1 %5262, %v4925_v45   ;;  %484 = vperm.xlu0 %5261, %v4924_v46  }
  0x6e   : > { %499 = vperm.xlu1 %5262, %v4927_v47   ;;  %494 = vperm.xlu0 %5261, %v4926_v48   ;;  %v4944_v47 = vld [vmem:[%s5319_s17 + $0x220] sm:$0xff]  ;;  %v4943_v48 = vld [vmem:[%s5319_s17 + $0x218] sm:$0xff] }
  0x72   : > { %509 = vperm.xlu1 %5262, %v4929_v49   ;;  %504 = vperm.xlu0 %5261, %v4928_v50  }
  0x76   : > { %519 = vperm.xlu1 %5262, %v4931_v51   ;;  %514 = vperm.xlu0 %5261, %v4930_v52   ;;  %v4946_v51 = vld [vmem:[%s5319_s17 + $0x230] sm:$0xff]  ;;  %v4945_v52 = vld [vmem:[%s5319_s17 + $0x228] sm:$0xff] }
  0x7a   : > { %529 = vperm.xlu1 %5262, %v4933_v53   ;;  %524 = vperm.xlu0 %5261, %v4932_v54  }
  0x7e   : > { %628 = vperm.xlu1 %5262, %v593_v55   ;;  %623 = vperm.xlu0 %5261, %v592_v56   ;;  %v4948_v55 = vld [vmem:[%s5319_s17 + $0x240] sm:$0xff]  ;;  %v4947_v56 = vld [vmem:[%s5319_s17 + $0x238] sm:$0xff] }
  0x82   : > { %638 = vperm.xlu1 %5262, %v595_v57   ;;  %633 = vperm.xlu0 %5261, %v594_v58  }
  0x86   : > { %648 = vperm.xlu1 %5262, %v597_v59   ;;  %643 = vperm.xlu0 %5261, %v596_v60   ;;  %v4950_v59 = vld [vmem:[%s5319_s17 + $0x250] sm:$0xff]  ;;  %v4949_v60 = vld [vmem:[%s5319_s17 + $0x248] sm:$0xff] }
  0x8a   : > { %658 = vperm.xlu1 %5262, %v599_v61   ;;  %653 = vperm.xlu0 %5261, %v598_v62  }
  0x8d   : > { %v5385_v1 = vpop.permute.xlu1 %211  ;;  %v5387_v2 = vpop.permute.xlu0 %201 }
  0x8e   : > { %668 = vperm.xlu1 %5262, %v601_v63   ;;  %663 = vperm.xlu0 %5261, %v600_v0   ;;  %v4952_v63 = vld [vmem:[%s5319_s17 + $0x260] sm:$0xff]  ;;  %v4951_v0 = vld [vmem:[%s5319_s17 + $0x258] sm:$0xff] }
  0x91   : > { %v5391_v5 = vpop.permute.xlu1 %216  ;;  %v5393_v6 = vpop.permute.xlu0 %206 }
  0x92   : > { %678 = vperm.xlu1 %5262, %v603_v3   ;;  %673 = vperm.xlu0 %5261, %v602_v4  }
  0x95   : > { %v5397_v9 = vpop.permute.xlu1 %226  ;;  %v5399_v10 = vpop.permute.xlu0 %221 }
  0x96   : > { %688 = vperm.xlu1 %5262, %v605_v7   ;;  %683 = vperm.xlu0 %5261, %v604_v8   ;;  %v4954_v7 = vld [vmem:[%s5319_s17 + $0x270] sm:$0xff]  ;;  %v4953_v8 = vld [vmem:[%s5319_s17 + $0x268] sm:$0xff] }
  0x99   : > { %v5403_v13 = vpop.permute.xlu1 %236  ;;  %v5405_v14 = vpop.permute.xlu0 %231 }
  0x9a   : > { %698 = vperm.xlu1 %5262, %v607_v11   ;;  %693 = vperm.xlu0 %5261, %v606_v12  }
  0x9d   : > { %v5409_v17 = vpop.permute.xlu1 %246  ;;  %v5411_v18 = vpop.permute.xlu0 %241 }
  0x9e   : > { %708 = vperm.xlu1 %5262, %v609_v15   ;;  %703 = vperm.xlu0 %5261, %v608_v16   ;;  %v4956_v15 = vld [vmem:[%s5319_s17 + $0x280] sm:$0xff]  ;;  %v4955_v16 = vld [vmem:[%s5319_s17 + $0x278] sm:$0xff] }
  0xa1   : > { %v5415_v21 = vpop.permute.xlu1 %256  ;;  %v5417_v22 = vpop.permute.xlu0 %251 }
  0xa2   : > { %718 = vperm.xlu1 %5262, %v611_v19   ;;  %713 = vperm.xlu0 %5261, %v610_v20  }
  0xa5   : > { %v5421_v25 = vpop.permute.xlu1 %266  ;;  %v5423_v26 = vpop.permute.xlu0 %261 }
  0xa6   : > { %728 = vperm.xlu1 %5262, %v613_v23   ;;  %723 = vperm.xlu0 %5261, %v612_v24   ;;  %v4958_v23 = vld [vmem:[%s5319_s17 + $0x290] sm:$0xff]  ;;  %v4957_v24 = vld [vmem:[%s5319_s17 + $0x288] sm:$0xff] }
  0xa9   : > { %v5427_v29 = vpop.permute.xlu1 %276  ;;  %v5429_v30 = vpop.permute.xlu0 %271 }
  0xaa   : > { %738 = vperm.xlu1 %5262, %v615_v27   ;;  %733 = vperm.xlu0 %5261, %v614_v28  }
  0xad   : > { %v5433_v33 = vpop.permute.xlu1 %286  ;;  %v5435_v34 = vpop.permute.xlu0 %281 }
  0xae   : > { %748 = vperm.xlu1 %5262, %v617_v31   ;;  %743 = vperm.xlu0 %5261, %v616_v32   ;;  %v4960_v31 = vld [vmem:[%s5319_s17 + $0x2a0] sm:$0xff]  ;;  %v4959_v32 = vld [vmem:[%s5319_s17 + $0x298] sm:$0xff] }
  0xb1   : > { %v5439_v37 = vpop.permute.xlu1 %296  ;;  %v5441_v38 = vpop.permute.xlu0 %291 }
  0xb2   : > { %848 = vperm.xlu1 %5262, %v4938_v35   ;;  %753 = vperm.xlu0 %5261, %v618_v36  }
  0xb5   : > { %v5445_v41 = vpop.permute.xlu1 %306  ;;  %v5447_v42 = vpop.permute.xlu0 %301 }
  0xb6   : > { %858 = vperm.xlu1 %5262, %v4940_v39   ;;  %853 = vperm.xlu0 %5261, %v4939_v40   ;;  %v4962_v39 = vld [vmem:[%s5319_s17 + $0x2b0] sm:$0xff]  ;;  %v4961_v40 = vld [vmem:[%s5319_s17 + $0x2a8] sm:$0xff] }
  0xb9   : > { %v5451_v45 = vpop.permute.xlu1 %316  ;;  %v5453_v46 = vpop.permute.xlu0 %311 }
  0xba   : > { %868 = vperm.xlu1 %5262, %v4942_v43   ;;  %863 = vperm.xlu0 %5261, %v4941_v44  }
  0xbd   : > { %v5457_v49 = vpop.permute.xlu1 %326  ;;  %v5459_v50 = vpop.permute.xlu0 %321 }
  0xbe   : > { %878 = vperm.xlu1 %5262, %v4944_v47   ;;  %873 = vperm.xlu0 %5261, %v4943_v48   ;;  %v4964_v47 = vld [vmem:[%s5319_s17 + $0x2c0] sm:$0x3]  ;;  %v4963_v48 = vld [vmem:[%s5319_s17 + $0x2b8] sm:$0xff] }
  0xc1   : > { %v5463_v53 = vpop.permute.xlu1 %399  ;;  %v5465_v54 = vpop.permute.xlu0 %331 }
  0xc2   : > { %888 = vperm.xlu1 %5262, %v4946_v51   ;;  %883 = vperm.xlu0 %5261, %v4945_v52  }
  0xc5   : > { %v5469_v57 = vpop.permute.xlu1 %409  ;;  %v5471_v58 = vpop.permute.xlu0 %404 }
  0xc6   : > { %898 = vperm.xlu1 %5262, %v4948_v55   ;;  %893 = vperm.xlu0 %5261, %v4947_v56   ;;  %v4968_v55 = vld [vmem:[%s5319_s17 + $0x2f0] sm:$0xff]  ;;  %v4967_v56 = vld [vmem:[%s5319_s17 + $0x2e8] sm:$0xff] }
  0xc9   : > { %v5475_v61 = vpop.permute.xlu1 %419  ;;  %v5477_v62 = vpop.permute.xlu0 %414 }
  0xca   : > { %908 = vperm.xlu1 %5262, %v4950_v59   ;;  %903 = vperm.xlu0 %5261, %v4949_v60  }
  0xcd   : > { %v5481_v3 = vpop.permute.xlu1 %429  ;;  %v5483_v4 = vpop.permute.xlu0 %424 }
  0xce   : > { %918 = vperm.xlu1 %5262, %v4952_v63   ;;  %913 = vperm.xlu0 %5261, %v4951_v0   ;;  %v4970_v63 = vld [vmem:[%s5319_s17 + $0x300] sm:$0xff]  ;;  %v4969_v0 = vld [vmem:[%s5319_s17 + $0x2f8] sm:$0xff] }
  0xd1   : > { %v5487_v11 = vpop.permute.xlu1 %439  ;;  %v5489_v12 = vpop.permute.xlu0 %434 }
  0xd2   : > { %928 = vperm.xlu1 %5262, %v4954_v7   ;;  %923 = vperm.xlu0 %5261, %v4953_v8  }
  0xd5   : > { %v5493_v19 = vpop.permute.xlu1 %449  ;;  %v5495_v20 = vpop.permute.xlu0 %444 }
  0xd6   : > { %938 = vperm.xlu1 %5262, %v4956_v15   ;;  %933 = vperm.xlu0 %5261, %v4955_v16   ;;  %v4972_v15 = vld [vmem:[%s5319_s17 + $0x310] sm:$0xff]  ;;  %v4971_v16 = vld [vmem:[%s5319_s17 + $0x308] sm:$0xff] }
  0xd9   : > { %v5499_v27 = vpop.permute.xlu1 %459  ;;  %v5501_v28 = vpop.permute.xlu0 %454 }
  0xda   : > { %948 = vperm.xlu1 %5262, %v4958_v23   ;;  %943 = vperm.xlu0 %5261, %v4957_v24  }
  0xdd   : > { %v5505_v35 = vpop.permute.xlu1 %469  ;;  %v5507_v36 = vpop.permute.xlu0 %464 }
  0xde   : > { %958 = vperm.xlu1 %5262, %v4960_v31   ;;  %953 = vperm.xlu0 %5261, %v4959_v32   ;;  %v4974_v31 = vld [vmem:[%s5319_s17 + $0x320] sm:$0xff]  ;;  %v4973_v32 = vld [vmem:[%s5319_s17 + $0x318] sm:$0xff] }
  0xe1   : > { %v5511_v43 = vpop.permute.xlu1 %479  ;;  %v5513_v44 = vpop.permute.xlu0 %474 }
  0xe2   : > { %968 = vperm.xlu1 %5262, %v4962_v39   ;;  %963 = vperm.xlu0 %5261, %v4961_v40  }
  0xe5   : > { %v5517_v51 = vpop.permute.xlu1 %489  ;;  %v5519_v52 = vpop.permute.xlu0 %484 }
  0xe6   : > { %978 = vperm.xlu1 %5262, %v4964_v47   ;;  %973 = vperm.xlu0 %5261, %v4963_v48   ;;  %v4976_v47 = vld [vmem:[%s5319_s17 + $0x330] sm:$0xff]  ;;  %v4975_v48 = vld [vmem:[%s5319_s17 + $0x328] sm:$0xff] }
  0xe9   : > { %v5523_v59 = vpop.permute.xlu1 %499  ;;  %v5525_v60 = vpop.permute.xlu0 %494 }
  0xea   : > { %1078 = vperm.xlu1 %5262, %v4968_v55   ;;  %1073 = vperm.xlu0 %5261, %v4967_v56  }
  0xed   : > { %v5529_v7 = vpop.permute.xlu1 %509  ;;  %v5531_v8 = vpop.permute.xlu0 %504 }
  0xee   : > { %1088 = vperm.xlu1 %5262, %v4970_v63   ;;  %1083 = vperm.xlu0 %5261, %v4969_v0   ;;  %v4978_v63 = vld [vmem:[%s5319_s17 + $0x340] sm:$0xff]  ;;  %v4977_v0 = vld [vmem:[%s5319_s17 + $0x338] sm:$0xff] }
  0xf1   : > { %v5535_v23 = vpop.permute.xlu1 %519  ;;  %v5537_v24 = vpop.permute.xlu0 %514 }
  0xf2   : > { %1098 = vperm.xlu1 %5262, %v4972_v15   ;;  %1093 = vperm.xlu0 %5261, %v4971_v16  }
  0xf5   : > { %v5541_v39 = vpop.permute.xlu1 %529  ;;  %v5543_v40 = vpop.permute.xlu0 %524 }
  0xf6   : > { %11782 = vst [vmem:[#allocation2_spill] sm:$0xff] %v5541_v39  ;;  %11783 = vst [vmem:[#allocation3_spill] sm:$0xff] %v5543_v40  ;;  %1108 = vperm.xlu1 %5262, %v4974_v31   ;;  %1103 = vperm.xlu0 %5261, %v4973_v32   ;;  %v4980_v31 = vld [vmem:[%s5319_s17 + $0x350] sm:$0xff]  ;;  %v4979_v32 = vld [vmem:[%s5319_s17 + $0x348] sm:$0xff] }
  0xf9   : > { %v5547_v55 = vpop.permute.xlu1 %628  ;;  %v5549_v56 = vpop.permute.xlu0 %623 }
  0xfa   : > { %11784 = vst [vmem:[#allocation4_spill] sm:$0xff] %v5547_v55  ;;  %11785 = vst [vmem:[#allocation5_spill] sm:$0xff] %v5549_v56  ;;  %1118 = vperm.xlu1 %5262, %v4976_v47   ;;  %1113 = vperm.xlu0 %5261, %v4975_v48   ;;  %v4982_v47 = vld [vmem:[%s5319_s17 + $0x360] sm:$0xff]  ;;  %v4981_v48 = vld [vmem:[%s5319_s17 + $0x358] sm:$0xff] }
  0xfd   : > { %v5553_v15 = vpop.permute.xlu1 %638  ;;  %v5555_v16 = vpop.permute.xlu0 %633 }
  0xfe   : > { %11786 = vst [vmem:[#allocation6_spill] sm:$0xff] %v5553_v15  ;;  %11787 = vst [vmem:[#allocation7_spill] sm:$0xff] %v5555_v16  ;;  %1128 = vperm.xlu1 %5262, %v4978_v63   ;;  %1123 = vperm.xlu0 %5261, %v4977_v0   ;;  %v4984_v63 = vld [vmem:[%s5319_s17 + $0x370] sm:$0xff]  ;;  %v4983_v0 = vld [vmem:[%s5319_s17 + $0x368] sm:$0xff] }
 0x101   : > { %v5559_v40 = vpop.permute.xlu1 %648  ;;  %v5561_v55 = vpop.permute.xlu0 %643 }
 0x102   : > { %11788 = vst [vmem:[#allocation8_spill] sm:$0xff] %v5559_v40  ;;  %11789 = vst [vmem:[#allocation9_spill] sm:$0xff] %v5561_v55  ;;  %1138 = vperm.xlu1 %5262, %v4980_v31   ;;  %1133 = vperm.xlu0 %5261, %v4979_v32   ;;  %v4986_v31 = vld [vmem:[%s5319_s17 + $0x380] sm:$0xff]  ;;  %v4985_v32 = vld [vmem:[%s5319_s17 + $0x378] sm:$0xff] }
 0x105   : > { %v5565_v56 = vpop.permute.xlu1 %658  ;;  %v5567_v15 = vpop.permute.xlu0 %653 }
 0x106   : > { %11790 = vst [vmem:[#allocation10_spill] sm:$0xff] %v5565_v56  ;;  %11791 = vst [vmem:[#allocation11_spill] sm:$0xff] %v5567_v15  ;;  %1148 = vperm.xlu1 %5262, %v4982_v47   ;;  %1143 = vperm.xlu0 %5261, %v4981_v48   ;;  %v4988_v47 = vld [vmem:[%s5319_s17 + $0x390] sm:$0xff]  ;;  %v4987_v48 = vld [vmem:[%s5319_s17 + $0x388] sm:$0xff] }
 0x109   : > { %v5571_v16 = vpop.permute.xlu1 %668  ;;  %v5573_v40 = vpop.permute.xlu0 %663 }
 0x10a   : > { %11792 = vst [vmem:[#allocation12_spill] sm:$0xff] %v5571_v16  ;;  %11793 = vst [vmem:[#allocation13_spill] sm:$0xff] %v5573_v40  ;;  %1158 = vperm.xlu1 %5262, %v4984_v63   ;;  %1153 = vperm.xlu0 %5261, %v4983_v0   ;;  %v4990_v63 = vld [vmem:[%s5319_s17 + $0x3a0] sm:$0xff]  ;;  %v4989_v0 = vld [vmem:[%s5319_s17 + $0x398] sm:$0xff] }
 0x10d   : > { %v5577_v55 = vpop.permute.xlu1 %678  ;;  %v5579_v56 = vpop.permute.xlu0 %673 }
 0x10e   : > { %11794 = vst [vmem:[#allocation14_spill] sm:$0xff] %v5577_v55  ;;  %11795 = vst [vmem:[#allocation15_spill] sm:$0xff] %v5579_v56  ;;  %1168 = vperm.xlu1 %5262, %v4986_v31   ;;  %1163 = vperm.xlu0 %5261, %v4985_v32   ;;  %v4992_v31 = vld [vmem:[%s5319_s17 + $0x3b0] sm:$0xff]  ;;  %v4991_v32 = vld [vmem:[%s5319_s17 + $0x3a8] sm:$0xff] }
 0x111   : > { %v5583_v15 = vpop.permute.xlu1 %688  ;;  %v5585_v16 = vpop.permute.xlu0 %683 }
 0x112   : > { %11796 = vst [vmem:[#allocation16_spill] sm:$0xff] %v5583_v15  ;;  %11797 = vst [vmem:[#allocation17_spill] sm:$0xff] %v5585_v16  ;;  %1178 = vperm.xlu1 %5262, %v4988_v47   ;;  %1173 = vperm.xlu0 %5261, %v4987_v48   ;;  %v4996_v47 = vld [vmem:[%s5319_s17 + $0x1f1] sm:$0xff] }
 0x113   : > { %v4993_v48 = vld [vmem:[%s5319_s17 + $0x3b8] sm:$0x3] }
 0x115   : > { %v5589_v40 = vpop.permute.xlu1 %698  ;;  %v5591_v55 = vpop.permute.xlu0 %693 }
 0x116   : > { %11798 = vst [vmem:[#allocation18_spill] sm:$0xff] %v5589_v40  ;;  %11799 = vst [vmem:[#allocation19_spill] sm:$0xff] %v5591_v55  ;;  %1188 = vperm.xlu1 %5262, %v4990_v63   ;;  %1183 = vperm.xlu0 %5261, %v4989_v0   ;;  %v4998_v63 = vld [vmem:[%s5319_s17 + $0x201] sm:$0xff]  ;;  %v4997_v0 = vld [vmem:[%s5319_s17 + $0x1f9] sm:$0xff] }
 0x119   : > { %v5595_v56 = vpop.permute.xlu1 %708  ;;  %v5597_v15 = vpop.permute.xlu0 %703 }
 0x11a   : > { %11800 = vst [vmem:[#allocation20_spill] sm:$0xff] %v5595_v56  ;;  %11801 = vst [vmem:[#allocation21_spill] sm:$0xff] %v5597_v15  ;;  %1198 = vperm.xlu1 %5262, %v4992_v31   ;;  %1193 = vperm.xlu0 %5261, %v4991_v32   ;;  %v5000_v31 = vld [vmem:[%s5319_s17 + $0x211] sm:$0xff]  ;;  %v4999_v32 = vld [vmem:[%s5319_s17 + $0x209] sm:$0xff] }
 0x11d   : > { %v5601_v16 = vpop.permute.xlu1 %718  ;;  %v5603_v40 = vpop.permute.xlu0 %713 }
 0x11e   : > { %11802 = vst [vmem:[#allocation22_spill] sm:$0xff] %v5601_v16  ;;  %11803 = vst [vmem:[#allocation23_spill] sm:$0xff] %v5603_v40  ;;  %1297 = vperm.xlu1 %5262, %v4996_v47   ;;  %1203 = vperm.xlu0 %5261, %v4993_v48   ;;  %v5002_v47 = vld [vmem:[%s5319_s17 + $0x221] sm:$0xff]  ;;  %v5001_v48 = vld [vmem:[%s5319_s17 + $0x219] sm:$0xff] }
 0x121   : > { %v5607_v55 = vpop.permute.xlu1 %728  ;;  %v5609_v56 = vpop.permute.xlu0 %723 }
 0x122   : > { %11804 = vst [vmem:[#allocation24_spill] sm:$0xff] %v5607_v55  ;;  %11805 = vst [vmem:[#allocation25_spill] sm:$0xff] %v5609_v56  ;;  %1307 = vperm.xlu1 %5262, %v4998_v63   ;;  %1302 = vperm.xlu0 %5261, %v4997_v0   ;;  %v5004_v63 = vld [vmem:[%s5319_s17 + $0x231] sm:$0xff]  ;;  %v5003_v0 = vld [vmem:[%s5319_s17 + $0x229] sm:$0xff] }
 0x125   : > { %v5613_v15 = vpop.permute.xlu1 %738  ;;  %v5615_v16 = vpop.permute.xlu0 %733 }
 0x126   : > { %11806 = vst [vmem:[#allocation26_spill] sm:$0xff] %v5613_v15  ;;  %11807 = vst [vmem:[#allocation27_spill] sm:$0xff] %v5615_v16  ;;  %1317 = vperm.xlu1 %5262, %v5000_v31   ;;  %1312 = vperm.xlu0 %5261, %v4999_v32   ;;  %v5006_v31 = vld [vmem:[%s5319_s17 + $0x241] sm:$0xff]  ;;  %v5005_v32 = vld [vmem:[%s5319_s17 + $0x239] sm:$0xff] }
 0x129   : > { %v5619_v40 = vpop.permute.xlu1 %748  ;;  %v5621_v55 = vpop.permute.xlu0 %743 }
 0x12a   : > { %11808 = vst [vmem:[#allocation28_spill] sm:$0xff] %v5619_v40  ;;  %11809 = vst [vmem:[#allocation29_spill] sm:$0xff] %v5621_v55  ;;  %1327 = vperm.xlu1 %5262, %v5002_v47   ;;  %1322 = vperm.xlu0 %5261, %v5001_v48   ;;  %v5008_v47 = vld [vmem:[%s5319_s17 + $0x251] sm:$0xff]  ;;  %v5007_v48 = vld [vmem:[%s5319_s17 + $0x249] sm:$0xff] }
 0x12d   : > { %v5625_v56 = vpop.permute.xlu1 %848  ;;  %v5627_v15 = vpop.permute.xlu0 %753 }
 0x12e   : > { %11810 = vst [vmem:[#allocation30_spill] sm:$0xff] %v5625_v56  ;;  %11811 = vst [vmem:[#allocation31_spill] sm:$0xff] %v5627_v15  ;;  %1337 = vperm.xlu1 %5262, %v5004_v63   ;;  %1332 = vperm.xlu0 %5261, %v5003_v0   ;;  %v5010_v63 = vld [vmem:[%s5319_s17 + $0x261] sm:$0xff]  ;;  %v5009_v0 = vld [vmem:[%s5319_s17 + $0x259] sm:$0xff] }
 0x131   : > { %v5631_v16 = vpop.permute.xlu1 %858  ;;  %v5633_v40 = vpop.permute.xlu0 %853 }
 0x132   : > { %11812 = vst [vmem:[#allocation32_spill] sm:$0xff] %v5631_v16  ;;  %11813 = vst [vmem:[#allocation33_spill] sm:$0xff] %v5633_v40  ;;  %1347 = vperm.xlu1 %5262, %v5006_v31   ;;  %1342 = vperm.xlu0 %5261, %v5005_v32   ;;  %v5012_v31 = vld [vmem:[%s5319_s17 + $0x271] sm:$0xff]  ;;  %v5011_v32 = vld [vmem:[%s5319_s17 + $0x269] sm:$0xff] }
 0x135   : > { %v5637_v55 = vpop.permute.xlu1 %868  ;;  %v5639_v56 = vpop.permute.xlu0 %863 }
 0x136   : > { %11814 = vst [vmem:[#allocation34_spill] sm:$0xff] %v5637_v55  ;;  %11815 = vst [vmem:[#allocation35_spill] sm:$0xff] %v5639_v56  ;;  %1357 = vperm.xlu1 %5262, %v5008_v47   ;;  %1352 = vperm.xlu0 %5261, %v5007_v48   ;;  %v5014_v47 = vld [vmem:[%s5319_s17 + $0x281] sm:$0xff]  ;;  %v5013_v48 = vld [vmem:[%s5319_s17 + $0x279] sm:$0xff] }
 0x139   : > { %v5643_v15 = vpop.permute.xlu1 %878  ;;  %v5645_v16 = vpop.permute.xlu0 %873 }
 0x13a   : > { %11816 = vst [vmem:[#allocation36_spill] sm:$0xff] %v5643_v15  ;;  %11817 = vst [vmem:[#allocation37_spill] sm:$0xff] %v5645_v16  ;;  %1367 = vperm.xlu1 %5262, %v5010_v63   ;;  %1362 = vperm.xlu0 %5261, %v5009_v0   ;;  %v5016_v63 = vld [vmem:[%s5319_s17 + $0x291] sm:$0xff]  ;;  %v5015_v0 = vld [vmem:[%s5319_s17 + $0x289] sm:$0xff] }
 0x13d   : > { %v5649_v40 = vpop.permute.xlu1 %888  ;;  %v5651_v55 = vpop.permute.xlu0 %883 }
 0x13e   : > { %11818 = vst [vmem:[#allocation38_spill] sm:$0xff] %v5649_v40  ;;  %11819 = vst [vmem:[#allocation39_spill] sm:$0xff] %v5651_v55  ;;  %1377 = vperm.xlu1 %5262, %v5012_v31   ;;  %1372 = vperm.xlu0 %5261, %v5011_v32   ;;  %v5018_v31 = vld [vmem:[%s5319_s17 + $0x2a1] sm:$0xff]  ;;  %v5017_v32 = vld [vmem:[%s5319_s17 + $0x299] sm:$0xff] }
 0x141   : > { %v5655_v56 = vpop.permute.xlu1 %898  ;;  %v5657_v15 = vpop.permute.xlu0 %893 }
 0x142   : > { %11820 = vst [vmem:[#allocation40_spill] sm:$0xff] %v5655_v56  ;;  %11821 = vst [vmem:[#allocation41_spill] sm:$0xff] %v5657_v15  ;;  %1387 = vperm.xlu1 %5262, %v5014_v47   ;;  %1382 = vperm.xlu0 %5261, %v5013_v48   ;;  %v5020_v47 = vld [vmem:[%s5319_s17 + $0x2b1] sm:$0xff]  ;;  %v5019_v48 = vld [vmem:[%s5319_s17 + $0x2a9] sm:$0xff] }
 0x145   : > { %v5661_v16 = vpop.permute.xlu1 %908  ;;  %v5663_v40 = vpop.permute.xlu0 %903 }
 0x146   : > { %11822 = vst [vmem:[#allocation42_spill] sm:$0xff] %v5661_v16  ;;  %11823 = vst [vmem:[#allocation43_spill] sm:$0xff] %v5663_v40  ;;  %1397 = vperm.xlu1 %5262, %v5016_v63   ;;  %1392 = vperm.xlu0 %5261, %v5015_v0   ;;  %v5022_v63 = vld [vmem:[%s5319_s17 + $0x2c1] sm:$0x3]  ;;  %v5021_v0 = vld [vmem:[%s5319_s17 + $0x2b9] sm:$0xff] }
 0x149   : > { %v5667_v55 = vpop.permute.xlu1 %918  ;;  %v5669_v56 = vpop.permute.xlu0 %913 }
 0x14a   : > { %11824 = vst [vmem:[#allocation44_spill] sm:$0xff] %v5667_v55  ;;  %11825 = vst [vmem:[#allocation45_spill] sm:$0xff] %v5669_v56  ;;  %1407 = vperm.xlu1 %5262, %v5018_v31   ;;  %1402 = vperm.xlu0 %5261, %v5017_v32   ;;  %v1491_v31 = vld [vmem:[%s5319_s17 + $0x17] sm:$0xff]  ;;  %v1490_v32 = vld [vmem:[%s5319_s17 + $0xf] sm:$0xff] }
 0x14d   : > { %v5673_v15 = vpop.permute.xlu1 %928  ;;  %v5675_v16 = vpop.permute.xlu0 %923 }
 0x14e   : > { %11826 = vst [vmem:[#allocation46_spill] sm:$0xff] %v5673_v15  ;;  %11827 = vst [vmem:[#allocation47_spill] sm:$0xff] %v5675_v16  ;;  %1417 = vperm.xlu1 %5262, %v5020_v47   ;;  %1412 = vperm.xlu0 %5261, %v5019_v48   ;;  %v1493_v47 = vld [vmem:[%s5319_s17 + $0x27] sm:$0xff]  ;;  %v1492_v48 = vld [vmem:[%s5319_s17 + $0x1f] sm:$0xff] }
 0x151   : > { %v5679_v40 = vpop.permute.xlu1 %938  ;;  %v5681_v55 = vpop.permute.xlu0 %933 }
 0x152   : > { %11828 = vst [vmem:[#allocation48_spill] sm:$0xff] %v5679_v40  ;;  %11829 = vst [vmem:[#allocation49_spill] sm:$0xff] %v5681_v55  ;;  %1427 = vperm.xlu1 %5262, %v5022_v63   ;;  %1422 = vperm.xlu0 %5261, %v5021_v0   ;;  %v1495_v63 = vld [vmem:[%s5319_s17 + $0x37] sm:$0xff]  ;;  %v1494_v0 = vld [vmem:[%s5319_s17 + $0x2f] sm:$0xff] }
 0x155   : > { %v5685_v56 = vpop.permute.xlu1 %948  ;;  %v5687_v15 = vpop.permute.xlu0 %943 }
 0x156   : > { %11830 = vst [vmem:[#allocation50_spill] sm:$0xff] %v5685_v56  ;;  %11831 = vst [vmem:[#allocation51_spill] sm:$0xff] %v5687_v15  ;;  %1526 = vperm.xlu1 %5262, %v1491_v31   ;;  %1521 = vperm.xlu0 %5261, %v1490_v32   ;;  %v1497_v31 = vld [vmem:[%s5319_s17 + $0x47] sm:$0xff]  ;;  %v1496_v32 = vld [vmem:[%s5319_s17 + $0x3f] sm:$0xff] }
 0x159   : > { %v5691_v16 = vpop.permute.xlu1 %958  ;;  %v5693_v40 = vpop.permute.xlu0 %953 }
 0x15a   : > { %11832 = vst [vmem:[#allocation52_spill] sm:$0xff] %v5691_v16  ;;  %11833 = vst [vmem:[#allocation53_spill] sm:$0xff] %v5693_v40  ;;  %1536 = vperm.xlu1 %5262, %v1493_v47   ;;  %1531 = vperm.xlu0 %5261, %v1492_v48   ;;  %v1499_v47 = vld [vmem:[%s5319_s17 + $0x57] sm:$0xff]  ;;  %v1498_v48 = vld [vmem:[%s5319_s17 + $0x4f] sm:$0xff] }
 0x15d   : > { %v5697_v55 = vpop.permute.xlu1 %968  ;;  %v5699_v56 = vpop.permute.xlu0 %963 }
 0x15e   : > { %11834 = vst [vmem:[#allocation54_spill] sm:$0xff] %v5697_v55  ;;  %11835 = vst [vmem:[#allocation55_spill] sm:$0xff] %v5699_v56  ;;  %1546 = vperm.xlu1 %5262, %v1495_v63   ;;  %1541 = vperm.xlu0 %5261, %v1494_v0   ;;  %v1501_v63 = vld [vmem:[%s5319_s17 + $0x67] sm:$0xff]  ;;  %v1500_v0 = vld [vmem:[%s5319_s17 + $0x5f] sm:$0xff] }
 0x161   : > { %v5703_v15 = vpop.permute.xlu1 %978  ;;  %v5705_v16 = vpop.permute.xlu0 %973 }
 0x162   : > { %11836 = vst [vmem:[#allocation56_spill] sm:$0xff] %v5703_v15  ;;  %11837 = vst [vmem:[#allocation57_spill] sm:$0xff] %v5705_v16  ;;  %1556 = vperm.xlu1 %5262, %v1497_v31   ;;  %1551 = vperm.xlu0 %5261, %v1496_v32   ;;  %v1503_v31 = vld [vmem:[%s5319_s17 + $0x77] sm:$0xff]  ;;  %v1502_v32 = vld [vmem:[%s5319_s17 + $0x6f] sm:$0xff] }
 0x165   : > { %v5709_v40 = vpop.permute.xlu1 %1078  ;;  %v5711_v55 = vpop.permute.xlu0 %1073 }
 0x166   : > { %11838 = vst [vmem:[#allocation58_spill] sm:$0xff] %v5709_v40  ;;  %11839 = vst [vmem:[#allocation59_spill] sm:$0xff] %v5711_v55  ;;  %1566 = vperm.xlu1 %5262, %v1499_v47   ;;  %1561 = vperm.xlu0 %5261, %v1498_v48   ;;  %v1505_v47 = vld [vmem:[%s5319_s17 + $0x87] sm:$0xff]  ;;  %v1504_v48 = vld [vmem:[%s5319_s17 + $0x7f] sm:$0xff] }
 0x169   : > { %v5715_v56 = vpop.permute.xlu1 %1088  ;;  %v5717_v15 = vpop.permute.xlu0 %1083 }
 0x16a   : > { %11840 = vst [vmem:[#allocation60_spill] sm:$0xff] %v5715_v56  ;;  %11841 = vst [vmem:[#allocation61_spill] sm:$0xff] %v5717_v15  ;;  %1576 = vperm.xlu1 %5262, %v1501_v63   ;;  %1571 = vperm.xlu0 %5261, %v1500_v0   ;;  %v1507_v63 = vld [vmem:[%s5319_s17 + $0x97] sm:$0xff]  ;;  %v1506_v0 = vld [vmem:[%s5319_s17 + $0x8f] sm:$0xff] }
 0x16d   : > { %v5721_v16 = vpop.permute.xlu1 %1098  ;;  %v5723_v40 = vpop.permute.xlu0 %1093 }
 0x16e   : > { %11842 = vst [vmem:[#allocation62_spill] sm:$0xff] %v5721_v16  ;;  %11843 = vst [vmem:[#allocation63_spill] sm:$0xff] %v5723_v40  ;;  %1586 = vperm.xlu1 %5262, %v1503_v31   ;;  %1581 = vperm.xlu0 %5261, %v1502_v32   ;;  %v1509_v31 = vld [vmem:[%s5319_s17 + $0xa7] sm:$0xff]  ;;  %v1508_v32 = vld [vmem:[%s5319_s17 + $0x9f] sm:$0xff] }
 0x171   : > { %v5727_v55 = vpop.permute.xlu1 %1108  ;;  %v5729_v56 = vpop.permute.xlu0 %1103 }
 0x172   : > { %11844 = vst [vmem:[#allocation64_spill] sm:$0xff] %v5727_v55  ;;  %11845 = vst [vmem:[#allocation65_spill] sm:$0xff] %v5729_v56  ;;  %1596 = vperm.xlu1 %5262, %v1505_v47   ;;  %1591 = vperm.xlu0 %5261, %v1504_v48   ;;  %v1511_v47 = vld [vmem:[%s5319_s17 + $0xb7] sm:$0xff]  ;;  %v1510_v48 = vld [vmem:[%s5319_s17 + $0xaf] sm:$0xff] }
 0x175   : > { %v5733_v15 = vpop.permute.xlu1 %1118  ;;  %v5735_v16 = vpop.permute.xlu0 %1113 }
 0x176   : > { %11846 = vst [vmem:[#allocation66_spill] sm:$0xff] %v5733_v15  ;;  %11847 = vst [vmem:[#allocation67_spill] sm:$0xff] %v5735_v16  ;;  %1606 = vperm.xlu1 %5262, %v1507_v63   ;;  %1601 = vperm.xlu0 %5261, %v1506_v0   ;;  %v1513_v63 = vld [vmem:[%s5319_s17 + $0xc7] sm:$0xff]  ;;  %v1512_v0 = vld [vmem:[%s5319_s17 + $0xbf] sm:$0xff] }
 0x179   : > { %v5739_v40 = vpop.permute.xlu1 %1128  ;;  %v5741_v55 = vpop.permute.xlu0 %1123 }
 0x17a   : > { %11848 = vst [vmem:[#allocation68_spill] sm:$0xff] %v5739_v40  ;;  %11849 = vst [vmem:[#allocation69_spill] sm:$0xff] %v5741_v55  ;;  %1616 = vperm.xlu1 %5262, %v1509_v31   ;;  %1611 = vperm.xlu0 %5261, %v1508_v32   ;;  %v1515_v31 = vld [vmem:[%s5319_s17 + $0xd7] sm:$0xff]  ;;  %v1514_v32 = vld [vmem:[%s5319_s17 + $0xcf] sm:$0xff] }
 0x17d   : > { %v5745_v56 = vpop.permute.xlu1 %1138  ;;  %v5747_v15 = vpop.permute.xlu0 %1133 }
 0x17e   : > { %11850 = vst [vmem:[#allocation70_spill] sm:$0xff] %v5745_v56  ;;  %11851 = vst [vmem:[#allocation71_spill] sm:$0xff] %v5747_v15  ;;  %1626 = vperm.xlu1 %5262, %v1511_v47   ;;  %1621 = vperm.xlu0 %5261, %v1510_v48   ;;  %v5027_v47 = vld [vmem:[%s5319_s17 + $0x107] sm:$0xff]  ;;  %v1516_v48 = vld [vmem:[%s5319_s17 + $0xdf] sm:$0x3] }
 0x181   : > { %v5751_v16 = vpop.permute.xlu1 %1148  ;;  %v5753_v40 = vpop.permute.xlu0 %1143 }
 0x182   : > { %11852 = vst [vmem:[#allocation72_spill] sm:$0xff] %v5751_v16  ;;  %11853 = vst [vmem:[#allocation73_spill] sm:$0xff] %v5753_v40  ;;  %1636 = vperm.xlu1 %5262, %v1513_v63   ;;  %1631 = vperm.xlu0 %5261, %v1512_v0   ;;  %v5029_v63 = vld [vmem:[%s5319_s17 + $0x117] sm:$0xff]  ;;  %v5028_v0 = vld [vmem:[%s5319_s17 + $0x10f] sm:$0xff] }
 0x185   : > { %v5757_v55 = vpop.permute.xlu1 %1158  ;;  %v5759_v56 = vpop.permute.xlu0 %1153 }
 0x186   : > { %11854 = vst [vmem:[#allocation74_spill] sm:$0xff] %v5757_v55  ;;  %11855 = vst [vmem:[#allocation75_spill] sm:$0xff] %v5759_v56  ;;  %1646 = vperm.xlu1 %5262, %v1515_v31   ;;  %1641 = vperm.xlu0 %5261, %v1514_v32   ;;  %v5031_v31 = vld [vmem:[%s5319_s17 + $0x127] sm:$0xff]  ;;  %v5030_v32 = vld [vmem:[%s5319_s17 + $0x11f] sm:$0xff] }
 0x189   : > { %v5763_v15 = vpop.permute.xlu1 %1168  ;;  %v5765_v16 = vpop.permute.xlu0 %1163 }
 0x18a   : > { %11856 = vst [vmem:[#allocation76_spill] sm:$0xff] %v5763_v15  ;;  %11857 = vst [vmem:[#allocation77_spill] sm:$0xff] %v5765_v16  ;;  %1745 = vperm.xlu1 %5262, %v5027_v47   ;;  %1651 = vperm.xlu0 %5261, %v1516_v48   ;;  %v5033_v47 = vld [vmem:[%s5319_s17 + $0x137] sm:$0xff]  ;;  %v5032_v48 = vld [vmem:[%s5319_s17 + $0x12f] sm:$0xff] }
 0x18d   : > { %v5769_v40 = vpop.permute.xlu1 %1178  ;;  %v5771_v55 = vpop.permute.xlu0 %1173 }
 0x18e   : > { %11858 = vst [vmem:[#allocation78_spill] sm:$0xff] %v5769_v40  ;;  %11859 = vst [vmem:[#allocation79_spill] sm:$0xff] %v5771_v55  ;;  %1755 = vperm.xlu1 %5262, %v5029_v63   ;;  %1750 = vperm.xlu0 %5261, %v5028_v0   ;;  %v5035_v63 = vld [vmem:[%s5319_s17 + $0x147] sm:$0xff]  ;;  %v5034_v0 = vld [vmem:[%s5319_s17 + $0x13f] sm:$0xff] }
 0x191   : > { %v5775_v56 = vpop.permute.xlu1 %1188  ;;  %v5777_v15 = vpop.permute.xlu0 %1183 }
 0x192   : > { %11860 = vst [vmem:[#allocation80_spill] sm:$0xff] %v5775_v56  ;;  %11861 = vst [vmem:[#allocation81_spill] sm:$0xff] %v5777_v15  ;;  %1765 = vperm.xlu1 %5262, %v5031_v31   ;;  %1760 = vperm.xlu0 %5261, %v5030_v32   ;;  %v5037_v31 = vld [vmem:[%s5319_s17 + $0x157] sm:$0xff]  ;;  %v5036_v32 = vld [vmem:[%s5319_s17 + $0x14f] sm:$0xff] }
 0x195   : > { %v5781_v16 = vpop.permute.xlu1 %1198  ;;  %v5783_v40 = vpop.permute.xlu0 %1193 }
 0x196   : > { %11862 = vst [vmem:[#allocation82_spill] sm:$0xff] %v5781_v16  ;;  %11863 = vst [vmem:[#allocation83_spill] sm:$0xff] %v5783_v40  ;;  %1775 = vperm.xlu1 %5262, %v5033_v47   ;;  %1770 = vperm.xlu0 %5261, %v5032_v48   ;;  %v5039_v47 = vld [vmem:[%s5319_s17 + $0x167] sm:$0xff]  ;;  %v5038_v48 = vld [vmem:[%s5319_s17 + $0x15f] sm:$0xff] }
 0x199   : > { %v5787_v55 = vpop.permute.xlu1 %1297  ;;  %v5789_v56 = vpop.permute.xlu0 %1203 }
 0x19a   : > { %11864 = vst [vmem:[#allocation84_spill] sm:$0xff] %v5787_v55  ;;  %11865 = vst [vmem:[#allocation85_spill] sm:$0xff] %v5789_v56  ;;  %1785 = vperm.xlu1 %5262, %v5035_v63   ;;  %1780 = vperm.xlu0 %5261, %v5034_v0   ;;  %v5041_v63 = vld [vmem:[%s5319_s17 + $0x177] sm:$0xff]  ;;  %v5040_v0 = vld [vmem:[%s5319_s17 + $0x16f] sm:$0xff] }
 0x19d   : > { %v5793_v15 = vpop.permute.xlu1 %1307  ;;  %v5795_v16 = vpop.permute.xlu0 %1302 }
 0x19e   : > { %11866 = vst [vmem:[#allocation86_spill] sm:$0xff] %v5793_v15  ;;  %11867 = vst [vmem:[#allocation87_spill] sm:$0xff] %v5795_v16  ;;  %1795 = vperm.xlu1 %5262, %v5037_v31   ;;  %1790 = vperm.xlu0 %5261, %v5036_v32   ;;  %v5043_v31 = vld [vmem:[%s5319_s17 + $0x187] sm:$0xff]  ;;  %v5042_v32 = vld [vmem:[%s5319_s17 + $0x17f] sm:$0xff] }
 0x1a1   : > { %v5799_v40 = vpop.permute.xlu1 %1317  ;;  %v5801_v55 = vpop.permute.xlu0 %1312 }
 0x1a2   : > { %11868 = vst [vmem:[#allocation88_spill] sm:$0xff] %v5799_v40  ;;  %11869 = vst [vmem:[#allocation89_spill] sm:$0xff] %v5801_v55  ;;  %1805 = vperm.xlu1 %5262, %v5039_v47   ;;  %1800 = vperm.xlu0 %5261, %v5038_v48   ;;  %v5045_v47 = vld [vmem:[%s5319_s17 + $0x197] sm:$0xff]  ;;  %v5044_v48 = vld [vmem:[%s5319_s17 + $0x18f] sm:$0xff] }
 0x1a5   : > { %v5805_v56 = vpop.permute.xlu1 %1327  ;;  %v5807_v15 = vpop.permute.xlu0 %1322 }
 0x1a6   : > { %11870 = vst [vmem:[#allocation90_spill] sm:$0xff] %v5805_v56  ;;  %11871 = vst [vmem:[#allocation91_spill] sm:$0xff] %v5807_v15  ;;  %1815 = vperm.xlu1 %5262, %v5041_v63   ;;  %1810 = vperm.xlu0 %5261, %v5040_v0   ;;  %v5047_v63 = vld [vmem:[%s5319_s17 + $0x1a7] sm:$0xff]  ;;  %v5046_v0 = vld [vmem:[%s5319_s17 + $0x19f] sm:$0xff] }
 0x1a9   : > { %v5811_v16 = vpop.permute.xlu1 %1337  ;;  %v5813_v40 = vpop.permute.xlu0 %1332 }
 0x1aa   : > { %11872 = vst [vmem:[#allocation92_spill] sm:$0xff] %v5811_v16  ;;  %11873 = vst [vmem:[#allocation93_spill] sm:$0xff] %v5813_v40  ;;  %1825 = vperm.xlu1 %5262, %v5043_v31   ;;  %1820 = vperm.xlu0 %5261, %v5042_v32   ;;  %v5049_v31 = vld [vmem:[%s5319_s17 + $0x1b7] sm:$0xff]  ;;  %v5048_v32 = vld [vmem:[%s5319_s17 + $0x1af] sm:$0xff] }
 0x1ad   : > { %v5817_v55 = vpop.permute.xlu1 %1347  ;;  %v5819_v56 = vpop.permute.xlu0 %1342 }
 0x1ae   : > { %11874 = vst [vmem:[#allocation94_spill] sm:$0xff] %v5817_v55  ;;  %11875 = vst [vmem:[#allocation95_spill] sm:$0xff] %v5819_v56  ;;  %1835 = vperm.xlu1 %5262, %v5045_v47   ;;  %1830 = vperm.xlu0 %5261, %v5044_v48   ;;  %v5051_v47 = vld [vmem:[%s5319_s17 + $0x1c7] sm:$0xff]  ;;  %v5050_v48 = vld [vmem:[%s5319_s17 + $0x1bf] sm:$0xff] }
 0x1b1   : > { %v5823_v15 = vpop.permute.xlu1 %1357  ;;  %v5825_v16 = vpop.permute.xlu0 %1352 }
 0x1b2   : > { %11876 = vst [vmem:[#allocation96_spill] sm:$0xff] %v5823_v15  ;;  %11877 = vst [vmem:[#allocation97_spill] sm:$0xff] %v5825_v16  ;;  %1845 = vperm.xlu1 %5262, %v5047_v63   ;;  %1840 = vperm.xlu0 %5261, %v5046_v0   ;;  %v5053_v63 = vld [vmem:[%s5319_s17 + $0x1d7] sm:$0x3]  ;;  %v5052_v0 = vld [vmem:[%s5319_s17 + $0x1cf] sm:$0xff] }
 0x1b5   : > { %v5829_v40 = vpop.permute.xlu1 %1367  ;;  %v5831_v55 = vpop.permute.xlu0 %1362 }
 0x1b6   : > { %11878 = vst [vmem:[#allocation98_spill] sm:$0xff] %v5829_v40  ;;  %11879 = vst [vmem:[#allocation99_spill] sm:$0xff] %v5831_v55  ;;  %1855 = vperm.xlu1 %5262, %v5049_v31   ;;  %1850 = vperm.xlu0 %5261, %v5048_v32   ;;  %v1939_v31 = vld [vmem:[%s5319_s17 + $0x18] sm:$0xff]  ;;  %v1938_v32 = vld [vmem:[%s5319_s17 + $0x10] sm:$0xff] }
 0x1b9   : > { %v5835_v56 = vpop.permute.xlu1 %1377  ;;  %v5837_v15 = vpop.permute.xlu0 %1372 }
 0x1ba   : > { %11880 = vst [vmem:[#allocation100_spill] sm:$0xff] %v5835_v56  ;;  %11881 = vst [vmem:[#allocation101_spill] sm:$0xff] %v5837_v15  ;;  %1865 = vperm.xlu1 %5262, %v5051_v47   ;;  %1860 = vperm.xlu0 %5261, %v5050_v48   ;;  %v1941_v47 = vld [vmem:[%s5319_s17 + $0x28] sm:$0xff]  ;;  %v1940_v48 = vld [vmem:[%s5319_s17 + $0x20] sm:$0xff] }
 0x1bd   : > { %v5841_v16 = vpop.permute.xlu1 %1387  ;;  %v5843_v40 = vpop.permute.xlu0 %1382 }
 0x1be   : > { %11882 = vst [vmem:[#allocation102_spill] sm:$0xff] %v5841_v16  ;;  %11883 = vst [vmem:[#allocation103_spill] sm:$0xff] %v5843_v40  ;;  %1875 = vperm.xlu1 %5262, %v5053_v63   ;;  %1870 = vperm.xlu0 %5261, %v5052_v0   ;;  %v1943_v63 = vld [vmem:[%s5319_s17 + $0x38] sm:$0xff]  ;;  %v1942_v0 = vld [vmem:[%s5319_s17 + $0x30] sm:$0xff] }
 0x1c1   : > { %v5847_v55 = vpop.permute.xlu1 %1397  ;;  %v5849_v56 = vpop.permute.xlu0 %1392 }
 0x1c2   : > { %11884 = vst [vmem:[#allocation104_spill] sm:$0xff] %v5847_v55  ;;  %11885 = vst [vmem:[#allocation105_spill] sm:$0xff] %v5849_v56  ;;  %1974 = vperm.xlu1 %5262, %v1939_v31   ;;  %1969 = vperm.xlu0 %5261, %v1938_v32   ;;  %v1945_v31 = vld [vmem:[%s5319_s17 + $0x48] sm:$0xff]  ;;  %v1944_v32 = vld [vmem:[%s5319_s17 + $0x40] sm:$0xff] }
 0x1c5   : > { %v5853_v15 = vpop.permute.xlu1 %1407  ;;  %v5855_v16 = vpop.permute.xlu0 %1402 }
 0x1c6   : > { %11886 = vst [vmem:[#allocation106_spill] sm:$0xff] %v5853_v15  ;;  %11887 = vst [vmem:[#allocation107_spill] sm:$0xff] %v5855_v16  ;;  %1984 = vperm.xlu1 %5262, %v1941_v47   ;;  %1979 = vperm.xlu0 %5261, %v1940_v48   ;;  %v1947_v47 = vld [vmem:[%s5319_s17 + $0x58] sm:$0xff]  ;;  %v1946_v48 = vld [vmem:[%s5319_s17 + $0x50] sm:$0xff] }
 0x1c9   : > { %v5859_v40 = vpop.permute.xlu1 %1417  ;;  %v5861_v55 = vpop.permute.xlu0 %1412 }
 0x1ca   : > { %11888 = vst [vmem:[#allocation108_spill] sm:$0xff] %v5859_v40  ;;  %11889 = vst [vmem:[#allocation109_spill] sm:$0xff] %v5861_v55  ;;  %1994 = vperm.xlu1 %5262, %v1943_v63   ;;  %1989 = vperm.xlu0 %5261, %v1942_v0   ;;  %v1949_v63 = vld [vmem:[%s5319_s17 + $0x68] sm:$0xff]  ;;  %v1948_v0 = vld [vmem:[%s5319_s17 + $0x60] sm:$0xff] }
 0x1cd   : > { %v5865_v56 = vpop.permute.xlu1 %1427  ;;  %v5867_v15 = vpop.permute.xlu0 %1422 }
 0x1ce   : > { %11890 = vst [vmem:[#allocation110_spill] sm:$0xff] %v5865_v56  ;;  %11891 = vst [vmem:[#allocation111_spill] sm:$0xff] %v5867_v15  ;;  %2004 = vperm.xlu1 %5262, %v1945_v31   ;;  %1999 = vperm.xlu0 %5261, %v1944_v32   ;;  %v1951_v31 = vld [vmem:[%s5319_s17 + $0x78] sm:$0xff]  ;;  %v1950_v32 = vld [vmem:[%s5319_s17 + $0x70] sm:$0xff] }
 0x1d1   : > { %v5871_v16 = vpop.permute.xlu1 %1526  ;;  %v5873_v40 = vpop.permute.xlu0 %1521 }
 0x1d2   : > { %11892 = vst [vmem:[#allocation112_spill] sm:$0xff] %v5871_v16  ;;  %11893 = vst [vmem:[#allocation113_spill] sm:$0xff] %v5873_v40  ;;  %2014 = vperm.xlu1 %5262, %v1947_v47   ;;  %2009 = vperm.xlu0 %5261, %v1946_v48   ;;  %v1953_v47 = vld [vmem:[%s5319_s17 + $0x88] sm:$0xff]  ;;  %v1952_v48 = vld [vmem:[%s5319_s17 + $0x80] sm:$0xff] }
 0x1d5   : > { %v5877_v55 = vpop.permute.xlu1 %1536  ;;  %v5879_v56 = vpop.permute.xlu0 %1531 }
 0x1d6   : > { %11894 = vst [vmem:[#allocation114_spill] sm:$0xff] %v5877_v55  ;;  %11895 = vst [vmem:[#allocation115_spill] sm:$0xff] %v5879_v56  ;;  %2024 = vperm.xlu1 %5262, %v1949_v63   ;;  %2019 = vperm.xlu0 %5261, %v1948_v0   ;;  %v1955_v63 = vld [vmem:[%s5319_s17 + $0x98] sm:$0xff]  ;;  %v1954_v0 = vld [vmem:[%s5319_s17 + $0x90] sm:$0xff] }
 0x1d9   : > { %v5883_v15 = vpop.permute.xlu1 %1546  ;;  %v5885_v16 = vpop.permute.xlu0 %1541 }
 0x1da   : > { %11896 = vst [vmem:[#allocation116_spill] sm:$0xff] %v5883_v15  ;;  %11897 = vst [vmem:[#allocation117_spill] sm:$0xff] %v5885_v16  ;;  %2034 = vperm.xlu1 %5262, %v1951_v31   ;;  %2029 = vperm.xlu0 %5261, %v1950_v32   ;;  %v1957_v31 = vld [vmem:[%s5319_s17 + $0xa8] sm:$0xff]  ;;  %v1956_v32 = vld [vmem:[%s5319_s17 + $0xa0] sm:$0xff] }
 0x1dd   : > { %v5889_v40 = vpop.permute.xlu1 %1556  ;;  %v5891_v55 = vpop.permute.xlu0 %1551 }
 0x1de   : > { %11898 = vst [vmem:[#allocation118_spill] sm:$0xff] %v5889_v40  ;;  %11899 = vst [vmem:[#allocation119_spill] sm:$0xff] %v5891_v55  ;;  %2044 = vperm.xlu1 %5262, %v1953_v47   ;;  %2039 = vperm.xlu0 %5261, %v1952_v48   ;;  %v1959_v47 = vld [vmem:[%s5319_s17 + $0xb8] sm:$0xff]  ;;  %v1958_v48 = vld [vmem:[%s5319_s17 + $0xb0] sm:$0xff] }
 0x1e1   : > { %v5895_v56 = vpop.permute.xlu1 %1566  ;;  %v5897_v15 = vpop.permute.xlu0 %1561 }
 0x1e2   : > { %11900 = vst [vmem:[#allocation120_spill] sm:$0xff] %v5895_v56  ;;  %11901 = vst [vmem:[#allocation121_spill] sm:$0xff] %v5897_v15  ;;  %2054 = vperm.xlu1 %5262, %v1955_v63   ;;  %2049 = vperm.xlu0 %5261, %v1954_v0   ;;  %v1961_v63 = vld [vmem:[%s5319_s17 + $0xc8] sm:$0xff]  ;;  %v1960_v0 = vld [vmem:[%s5319_s17 + $0xc0] sm:$0xff] }
 0x1e5   : > { %v5901_v16 = vpop.permute.xlu1 %1576  ;;  %v5903_v40 = vpop.permute.xlu0 %1571 }
 0x1e6   : > { %11902 = vst [vmem:[#allocation122_spill] sm:$0xff] %v5901_v16  ;;  %11903 = vst [vmem:[#allocation123_spill] sm:$0xff] %v5903_v40  ;;  %2064 = vperm.xlu1 %5262, %v1957_v31   ;;  %2059 = vperm.xlu0 %5261, %v1956_v32   ;;  %v1963_v31 = vld [vmem:[%s5319_s17 + $0xd8] sm:$0xff]  ;;  %v1962_v32 = vld [vmem:[%s5319_s17 + $0xd0] sm:$0xff] }
 0x1e9   : > { %v5907_v55 = vpop.permute.xlu1 %1586  ;;  %v5909_v56 = vpop.permute.xlu0 %1581 }
 0x1ea   : > { %11904 = vst [vmem:[#allocation124_spill] sm:$0xff] %v5907_v55  ;;  %11905 = vst [vmem:[#allocation125_spill] sm:$0xff] %v5909_v56  ;;  %2074 = vperm.xlu1 %5262, %v1959_v47   ;;  %2069 = vperm.xlu0 %5261, %v1958_v48   ;;  %v5058_v47 = vld [vmem:[%s5319_s17 + $0xf9] sm:$0xff] }
 0x1eb   : > { %v1964_v48 = vld [vmem:[%s5319_s17 + $0xe0] sm:$0x3] }
 0x1ed   : > { %v5913_v15 = vpop.permute.xlu1 %1596  ;;  %v5915_v16 = vpop.permute.xlu0 %1591 }
 0x1ee   : > { %11906 = vst [vmem:[#allocation126_spill] sm:$0xff] %v5913_v15  ;;  %11907 = vst [vmem:[#allocation127_spill] sm:$0xff] %v5915_v16  ;;  %2084 = vperm.xlu1 %5262, %v1961_v63   ;;  %2079 = vperm.xlu0 %5261, %v1960_v0   ;;  %v5060_v63 = vld [vmem:[%s5319_s17 + $0x109] sm:$0xff]  ;;  %v5059_v0 = vld [vmem:[%s5319_s17 + $0x101] sm:$0xff] }
 0x1f1   : > { %v5919_v40 = vpop.permute.xlu1 %1606  ;;  %v5921_v55 = vpop.permute.xlu0 %1601 }
 0x1f2   : > { %11908 = vst [vmem:[#allocation128_spill] sm:$0xff] %v5919_v40  ;;  %11909 = vst [vmem:[#allocation129_spill] sm:$0xff] %v5921_v55  ;;  %2094 = vperm.xlu1 %5262, %v1963_v31   ;;  %2089 = vperm.xlu0 %5261, %v1962_v32   ;;  %v5062_v31 = vld [vmem:[%s5319_s17 + $0x119] sm:$0xff]  ;;  %v5061_v32 = vld [vmem:[%s5319_s17 + $0x111] sm:$0xff] }
 0x1f5   : > { %v5925_v56 = vpop.permute.xlu1 %1616  ;;  %v5927_v15 = vpop.permute.xlu0 %1611 }
 0x1f6   : > { %11910 = vst [vmem:[#allocation130_spill] sm:$0xff] %v5925_v56  ;;  %11911 = vst [vmem:[#allocation131_spill] sm:$0xff] %v5927_v15  ;;  %2272 = vperm.xlu1 %5262, %v5058_v47   ;;  %2099 = vperm.xlu0 %5261, %v1964_v48   ;;  %v5944_v47 = vld [vmem:[%s11436_s1] ss:$0 sm:$0xff]  ;;  %v5064_v48 = vld [vmem:[%s5319_s17 + $0x129] sm:$0xff] }
 0x1f7   : > { %11916 = vst [vmem:[#allocation136_spill] sm:$0xff] %v5944_v47  ;;  %v6047_v15 = vmul.f32 %v5944_v47, %v5451_v45  ;;  %v6067_v45 = vmul.f32 %v5944_v47, %v5463_v53 }
 0x1f9   : > { %v5931_v16 = vpop.permute.xlu1 %1626  ;;  %v5933_v40 = vpop.permute.xlu0 %1621  ;;  %11922 = vst [vmem:[#allocation142_spill] sm:$0xff] %v6047_v15  ;;  %11925 = vst [vmem:[#allocation145_spill] sm:$0xff] %v6067_v45 }
 0x1fa   : > { %11912 = vst [vmem:[#allocation132_spill] sm:$0xff] %v5931_v16  ;;  %11913 = vst [vmem:[#allocation133_spill] sm:$0xff] %v5933_v40  ;;  %2282 = vperm.xlu1 %5262, %v5060_v63   ;;  %2277 = vperm.xlu0 %5261, %v5059_v0   ;;  %v5063_v16 = vld [vmem:[%s5319_s17 + $0x121] sm:$0xff]  ;;  %v342_v63 = vmul.f32 %v5944_v47, %v5385_v1  ;;  %v344_v1 = vmul.f32 %v5944_v47, %v5399_v10 }
 0x1fb   : > { %v348_v10 = vmul.f32 %v5944_v47, %v5411_v18  ;;  %v6005_v18 = vmul.f32 %v5944_v47, %v5427_v29  ;;  %v6027_v29 = vmul.f32 %v5944_v47, %v5441_v38 }
 0x1fd   : > { %v5937_v55 = vpop.permute.xlu1 %1636  ;;  %v5939_v56 = vpop.permute.xlu0 %1631 }
 0x1fe   : > { %11914 = vst [vmem:[#allocation134_spill] sm:$0xff] %v5937_v55  ;;  %11915 = vst [vmem:[#allocation135_spill] sm:$0xff] %v5939_v56  ;;  %2292 = vperm.xlu1 %5262, %v5062_v31   ;;  %2287 = vperm.xlu0 %5261, %v5061_v32   ;;  %v340_v31 = vmul.f32 %v5944_v47, %v5387_v2  ;;  %v343_v56 = vmul.f32 %v5944_v47, %v5391_v5 }
 0x1ff   : > { %v341_v32 = vmul.f32 %v5944_v47, %v5393_v6  ;;  %v5962_v55 = vmul.f32 %v5944_v47, %v5397_v9  ;;  %v346_v2 = vmul.f32 %v5944_v47, %v5405_v14  ;;  %v5975_v5 = vmul.f32 %v5944_v47, %v5409_v17  ;;  %v5980_v6 = vld [vmem:[%s11436_s1 + $0x1] ss:$0 sm:$0xff]  ;;  %v5065_v9 = vld [vmem:[%s5319_s17 + $0x131] sm:$0xff] }
 0x200   : > { %v5991_v14 = vmul.f32 %v5944_v47, %v5417_v22  ;;  %v5995_v17 = vmul.f32 %v5944_v47, %v5421_v25  ;;  %v6013_v22 = vmul.f32 %v5944_v47, %v5433_v33  ;;  %v5068_v33 = vld [vmem:[%s5319_s17 + $0x149] sm:$0xff]  ;;  %v539_v38 = vmul.f32 %v5980_v6, %v5471_v58 }
 0x201   : > { %v5948_v40 = vpop.permute.xlu1 %1646  ;;  %v5952_v0 = vpop.permute.xlu0 %1641  ;;  %v543_v45 = vmul.f32 %v5980_v6, %v5483_v4 }
 0x202   : > { %11917 = vst [vmem:[#allocation137_spill] sm:$0xff] %v5948_v40  ;;  %11918 = vst [vmem:[#allocation138_spill] sm:$0xff] %v5952_v0  ;;  %2302 = vperm.xlu1 %5262, %v5064_v48   ;;  %2297 = vperm.xlu0 %5261, %v5063_v16   ;;  %v5066_v40 = vld [vmem:[%s5319_s17 + $0x139] sm:$0xff]  ;;  %v5969_v48 = vmul.f32 %v5944_v47, %v5403_v13  ;;  %v5987_v13 = vmul.f32 %v5944_v47, %v5415_v21 }
 0x203   : > { %v6001_v0 = vmul.f32 %v5944_v47, %v5423_v26  ;;  %v6009_v21 = vmul.f32 %v5944_v47, %v5429_v30  ;;  %v6019_v26 = vmul.f32 %v5944_v47, %v5435_v34  ;;  %v538_v30 = vmul.f32 %v5980_v6, %v5463_v53 }
 0x204   : > { %v6038_v34 = vmul.f32 %v5944_v47, %v5447_v42  ;;  %v6055_v42 = vmul.f32 %v5944_v47, %v5457_v49  ;;  %v541_v49 = vmul.f32 %v5980_v6, %v5477_v62  ;;  %v544_v53 = vmul.f32 %v5980_v6, %v5481_v3 }
 0x205   : > { %v5997_v16 = vpop.permute.xlu1 %1745  ;;  %v6015_v25 = vpop.permute.xlu0 %1651  ;;  %v6090_v15 = vadd.f32 %v539_v38, %v341_v32  ;;  %v545_v32 = vmul.f32 %v5980_v6, %v5489_v12 }
 0x206   : > { %11919 = vst [vmem:[#allocation139_spill] sm:$0xff] %v5997_v16  ;;  %11920 = vst [vmem:[#allocation140_spill] sm:$0xff] %v6015_v25  ;;  %2312 = vperm.xlu1 %5262, %v5066_v40   ;;  %v6023_v16 = vmul.f32 %v5944_v47, %v5439_v37  ;;  %2307 = vperm.xlu0 %5261, %v5065_v9   ;;  %v6034_v40 = vmul.f32 %v5944_v47, %v5445_v41  ;;  %v5067_v25 = vld [vmem:[%s5319_s17 + $0x141] sm:$0xff] }
 0x207   : > { %v540_v37 = vmul.f32 %v5980_v6, %v5469_v57  ;;  %v6051_v41 = vmul.f32 %v5944_v47, %v5453_v46  ;;  %11923 = vst [vmem:[#allocation143_spill] sm:$0xff] %v6055_v42  ;;  %v542_v9 = vmul.f32 %v5980_v6, %v5475_v61  ;;  %v6071_v46 = vmul.f32 %v5944_v47, %v5465_v54  ;;  %v5070_v54 = vld [vmem:[%s5319_s17 + $0x159] sm:$0xff] }
 0x208   : > { %11921 = vst [vmem:[#allocation141_spill] sm:$0xff] %v6034_v40  ;;  %v6063_v40 = vmul.f32 %v5944_v47, %v5459_v50  ;;  %v6081_v50 = vmul.f32 %v5944_v47, %v5469_v57  ;;  %v546_v57 = vmul.f32 %v5980_v6, %v5487_v11  ;;  %v6125_v38 = vadd.f32 %v544_v53, %v346_v2 }
 0x209   : > { %v6059_v39 = vpop.permute.xlu1 %1755  ;;  %11926 = vst [vmem:[#allocation146_spill] sm:$0xff] %v6071_v46  ;;  %v6075_v42 = vpop.permute.xlu0 %1750  ;;  %v6088_v46 = vadd.f32 %v540_v37, %v342_v63  ;;  %v6107_v63 = vmul.f32 %v5944_v47, %v5477_v62  ;;  %v547_v37 = vmul.f32 %v5980_v6, %v5495_v20  ;;  %v6145_v2 = vmul.f32 %v5944_v47, %v5489_v12 }
 0x20a   : > { %11924 = vst [vmem:[#allocation144_spill] sm:$0xff] %v6059_v39  ;;  %11927 = vst [vmem:[#allocation147_spill] sm:$0xff] %v6075_v42  ;;  %2322 = vperm.xlu1 %5262, %v5068_v33   ;;  %v6077_v39 = vadd.f32 %v538_v30, %v340_v31  ;;  %2317 = vperm.xlu0 %5261, %v5067_v25   ;;  %v6094_v31 = vmul.f32 %v5944_v47, %v5471_v58  ;;  %v5069_v30 = vld [vmem:[%s5319_s17 + $0x151] sm:$0xff] }
 0x20b   : > { %v6099_v33 = vadd.f32 %v542_v9, %v344_v1  ;;  %v6103_v42 = vmul.f32 %v5944_v47, %v5475_v61  ;;  %v6113_v25 = vadd.f32 %v541_v49, %v343_v56  ;;  %v6117_v1 = vmul.f32 %v5944_v47, %v5481_v3  ;;  %v5072_v49 = vld [vmem:[%s5319_s17 + $0x169] sm:$0xff] }
 0x20c   : > { %v548_v61 = vmul.f32 %v5980_v6, %v5493_v19  ;;  %v6128_v9 = vadd.f32 %v543_v45, %v5962_v55  ;;  %v6132_v56 = vmul.f32 %v5944_v47, %v5483_v4  ;;  %v550_v3 = vmul.f32 %v5980_v6, %v5499_v27  ;;  %v5071_v4 = vld [vmem:[%s5319_s17 + $0x161] sm:$0xff] }
 0x20d   : > { %v6111_v58 = vpop.permute.xlu1 %1765  ;;  %v6123_v62 = vpop.permute.xlu0 %1760  ;;  %v549_v55 = vmul.f32 %v5980_v6, %v5501_v28  ;;  %v6151_v45 = vadd.f32 %v545_v32, %v5969_v48  ;;  %v551_v53 = vmul.f32 %v5980_v6, %v5507_v36  ;;  %v6167_v48 = vadd.f32 %v547_v37, %v5975_v5 }
 0x20e   : > { %11928 = vst [vmem:[#allocation148_spill] sm:$0xff] %v6111_v58  ;;  %11929 = vst [vmem:[#allocation149_spill] sm:$0xff] %v6123_v62  ;;  %2332 = vperm.xlu1 %5262, %v5070_v54   ;;  %2327 = vperm.xlu0 %5261, %v5069_v30   ;;  %v6137_v58 = vadd.f32 %v546_v57, %v348_v10  ;;  %v6141_v62 = vmul.f32 %v5944_v47, %v5487_v11 }
 0x20f   : > { %v6155_v10 = vmul.f32 %v5944_v47, %v5493_v19  ;;  %v552_v11 = vmul.f32 %v5980_v6, %v5505_v35  ;;  %v6164_v54 = vadd.f32 %v548_v61, %v5991_v14  ;;  %v6171_v57 = vmul.f32 %v5944_v47, %v5495_v20  ;;  %v5074_v61 = vld [vmem:[%s5319_s17 + $0x179] sm:$0xff] }
 0x210   : > { %v6175_v19 = vmul.f32 %v5944_v47, %v5499_v27  ;;  %v6180_v32 = vadd.f32 %v550_v3, %v6001_v0  ;;  %v6184_v14 = vmul.f32 %v5944_v47, %v5501_v28  ;;  %v554_v5 = vmul.f32 %v5980_v6, %v5511_v43  ;;  %v5073_v3 = vld [vmem:[%s5319_s17 + $0x171] sm:$0xff] }
 0x211   : > { %v6161_v12 = vpop.permute.xlu1 %1775  ;;  %v6177_v30 = vpop.permute.xlu0 %1770  ;;  %v553_v20 = vmul.f32 %v5980_v6, %v5513_v44  ;;  %v6192_v27 = vadd.f32 %v549_v55, %v5987_v13  ;;  %v6196_v37 = vmul.f32 %v5944_v47, %v5505_v35  ;;  %v556_v0 = vmul.f32 %v5980_v6, %v5517_v51 }
 0x212   : > { %11930 = vst [vmem:[#allocation150_spill] sm:$0xff] %v6161_v12  ;;  %11931 = vst [vmem:[#allocation151_spill] sm:$0xff] %v6177_v30  ;;  %2342 = vperm.xlu1 %5262, %v5072_v49   ;;  %2337 = vperm.xlu0 %5261, %v5071_v4   ;;  %v555_v28 = vmul.f32 %v5980_v6, %v5519_v52  ;;  %v6204_v49 = vadd.f32 %v552_v11, %v6009_v21  ;;  %v5076_v12 = vld [vmem:[%s5319_s17 + $0x189] sm:$0xff] }
 0x213   : > { %v6207_v4 = vadd.f32 %v551_v53, %v5995_v17  ;;  %v6211_v13 = vmul.f32 %v5944_v47, %v5507_v36  ;;  %v558_v35 = vmul.f32 %v5980_v6, %v5523_v59  ;;  %v6219_v30 = vmul.f32 %v5944_v47, %v5511_v43 }
 0x214   : > { %v6223_v21 = vmul.f32 %v5944_v47, %v5513_v44  ;;  %v557_v17 = vmul.f32 %v5980_v6, %v5525_v60  ;;  %v560_v36 = vmul.f32 %v5980_v6, %v5529_v7  ;;  %v6232_v53 = vadd.f32 %v554_v5, %v6019_v26 }
 0x215   : > { %v6215_v55 = vpop.permute.xlu1 %1785  ;;  %11933 = vst [vmem:[#allocation153_spill] sm:$0xff] %v6219_v30  ;;  %v6229_v11 = vpop.permute.xlu0 %1780  ;;  %v6235_v43 = vadd.f32 %v553_v20, %v6005_v18  ;;  %v559_v44 = vmul.f32 %v5980_v6, %v5531_v8  ;;  %v6245_v30 = vadd.f32 %v556_v0, %v6027_v29  ;;  %v6252_v26 = vmul.f32 %v5944_v47, %v5519_v52 }
 0x216   : > { %11932 = vst [vmem:[#allocation152_spill] sm:$0xff] %v6215_v55  ;;  %11934 = vst [vmem:[#allocation154_spill] sm:$0xff] %v6229_v11  ;;  %2352 = vperm.xlu1 %5262, %v5074_v61   ;;  %v6239_v55 = vmul.f32 %v5944_v47, %v5517_v51  ;;  %2347 = vperm.xlu0 %5261, %v5073_v3   ;;  %v6248_v61 = vadd.f32 %v555_v28, %v6013_v22  ;;  %v5075_v51 = vld [vmem:[%s5319_s17 + $0x181] sm:$0xff]  ;;  %v5078_v11 = vld [vmem:[%s5319_s17 + $0x199] sm:$0xff] }
 0x217   : > { %v6256_v18 = vmul.f32 %v5944_v47, %v5523_v59  ;;  %v6260_v5 = vadd.f32 %v558_v35, %v6038_v34  ;;  %v6264_v20 = vmul.f32 %v5944_v47, %v5525_v60  ;;  %v562_v22 = vmul.f32 %v5980_v6, %v5535_v23  ;;  %v6273_v59 = vld [vmem:[%s11436_s1 + $0x2] ss:$0 sm:$0xff]  ;;  %v11943_v35 = vld [vmem:[#allocation141_spill] sm:$0xff] }
 0x218   : > { %v561_v52 = vmul.f32 %v5980_v6, %v5537_v24  ;;  %11937 = vst [vmem:[#allocation157_spill] sm:$0xff] %v6273_v59  ;;  %v6278_v34 = vadd.f32 %v557_v17, %v6023_v16  ;;  %v6281_v60 = vadd.f32 %v560_v36, %v6051_v41  ;;  %v6285_v0 = vmul.f32 %v5944_v47, %v5529_v7  ;;  %v11945_v41 = vld [vmem:[#allocation2_spill] sm:$0xff]  ;;  %v11946_v36 = vld [vmem:[#allocation3_spill] sm:$0xff] }
 0x219   : > { %11935 = vst [vmem:[#allocation155_spill] sm:$0xff] %v6256_v18  ;;  %11936 = vst [vmem:[#allocation156_spill] sm:$0xff] %v6260_v5  ;;  %v6275_v29 = vpop.permute.xlu1 %1795  ;;  %v6289_v28 = vmul.f32 %v5944_v47, %v5531_v8  ;;  %v6291_v3 = vpop.permute.xlu0 %1790  ;;  %v6298_v16 = vmul.f32 %v5944_v47, %v5535_v23  ;;  %v564_v17 = vmul.f32 %v5980_v6, %v11945_v41  ;;  %v11947_v8 = vld [vmem:[#allocation4_spill] sm:$0xff]  ;;  %v11952_v5 = vld [vmem:[#allocation6_spill] sm:$0xff] }
 0x21a   : > { %11938 = vst [vmem:[#allocation158_spill] sm:$0xff] %v6275_v29  ;;  %11939 = vst [vmem:[#allocation159_spill] sm:$0xff] %v6281_v60  ;;  %2362 = vperm.xlu1 %5262, %v5076_v12   ;;  %v6294_v29 = vadd.f32 %v559_v44, %v11943_v35  ;;  %v563_v7 = vmul.f32 %v5980_v6, %v11946_v36  ;;  %2357 = vperm.xlu0 %5261, %v5075_v51   ;;  %v11948_v44 = vld [vmem:[#allocation5_spill] sm:$0xff]  ;;  %v11950_v60 = vld [vmem:[#allocation142_spill] sm:$0xff] }
 0x21b   : > { %11940 = vst [vmem:[#allocation160_spill] sm:$0xff] %v6285_v0  ;;  %11941 = vst [vmem:[#allocation161_spill] sm:$0xff] %v6289_v28  ;;  %v763_v0 = vmul.f32 %v6273_v59, %v11947_v8  ;;  %v2190_v12 = vmul.f32 %v5980_v6, %v11947_v8  ;;  %v762_v35 = vmul.f32 %v6273_v59, %v11948_v44 }
 0x21c   : > { %11942 = vst [vmem:[#allocation162_spill] sm:$0xff] %v6291_v3  ;;  %11944 = vst [vmem:[#allocation141_spill] sm:$0xff] %v6298_v16  ;;  %v2189_v23 = vmul.f32 %v5980_v6, %v11948_v44  ;;  %v5077_v3 = vld [vmem:[%s5319_s17 + $0x191] sm:$0xff]  ;;  %v6315_v16 = vadd.f32 %v562_v22, %v6063_v40  ;;  %v6318_v51 = vadd.f32 %v561_v52, %v11950_v60  ;;  %v11956_v52 = vld [vmem:[#allocation7_spill] sm:$0xff] }
 0x21d   : > { %v6322_v18 = vmul.f32 %v5944_v47, %v5537_v24  ;;  %v765_v8 = vmul.f32 %v6273_v59, %v11952_v5  ;;  %v6326_v28 = vpop.permute.xlu1 %1805  ;;  %v6330_v44 = vmul.f32 %v5944_v47, %v11945_v41  ;;  %v6334_v40 = vmul.f32 %v5944_v47, %v11946_v36  ;;  %v6340_v60 = vpop.permute.xlu0 %1800  ;;  %v11960_v36 = vld [vmem:[#allocation8_spill] sm:$0xff] }
 0x21e   : > { %11949 = vst [vmem:[#allocation2_spill] sm:$0xff] %v6315_v16  ;;  %11953 = vst [vmem:[#allocation4_spill] sm:$0xff] %v6326_v28  ;;  %v2192_v22 = vmul.f32 %v5980_v6, %v11952_v5  ;;  %v764_v24 = vmul.f32 %v6273_v59, %v11956_v52  ;;  %2372 = vperm.xlu1 %5262, %v5078_v11   ;;  %v11958_v16 = vld [vmem:[#allocation146_spill] sm:$0xff]  ;;  %v767_v47 = vmul.f32 %v6273_v59, %v11960_v36  ;;  %v5080_v5 = vld [vmem:[%s5319_s17 + $0x1a9] sm:$0xff] }
 0x21f   : > { %11951 = vst [vmem:[#allocation3_spill] sm:$0xff] %v6322_v18  ;;  %11954 = vst [vmem:[#allocation5_spill] sm:$0xff] %v6330_v44  ;;  %v6343_v28 = vadd.f32 %v564_v17, %v11958_v16  ;;  %v11959_v18 = vld [vmem:[#allocation143_spill] sm:$0xff]  ;;  %v2191_v44 = vmul.f32 %v5980_v6, %v11956_v52  ;;  %2367 = vperm.xlu0 %5261, %v5077_v3   ;;  %v6360_v11 = vadd.f32 %v762_v35, %v6077_v39  ;;  %v11962_v16 = vld [vmem:[#allocation145_spill] sm:$0xff] }
 0x220   : > { %11955 = vst [vmem:[#allocation142_spill] sm:$0xff] %v6334_v40  ;;  %11957 = vst [vmem:[#allocation6_spill] sm:$0xff] %v6340_v60  ;;  %v6346_v41 = vadd.f32 %v563_v7, %v11959_v18  ;;  %v6354_v40 = vadd.f32 %v763_v0, %v6090_v15  ;;  %v6357_v60 = vadd.f32 %v2190_v12, %v6094_v31  ;;  %v5079_v17 = vld [vmem:[%s5319_s17 + $0x1a1] sm:$0xff]  ;;  %v11964_v52 = vld [vmem:[#allocation9_spill] sm:$0xff] }
 0x221   : > { %v6363_v18 = vadd.f32 %v2189_v23, %v11962_v16  ;;  %v6367_v7 = vadd.f32 %v765_v8, %v6113_v25  ;;  %v2194_v3 = vmul.f32 %v5980_v6, %v11960_v36  ;;  %v766_v15 = vmul.f32 %v6273_v59, %v11964_v52  ;;  %v6375_v0 = vpop.permute.xlu1 %1815  ;;  %v11967_v25 = vld [vmem:[#allocation10_spill] sm:$0xff]  ;;  %v6387_v8 = vpop.permute.xlu0 %1810 }
 0x222   : > { %11961 = vst [vmem:[#allocation7_spill] sm:$0xff] %v6357_v60  ;;  %v2193_v31 = vmul.f32 %v5980_v6, %v11964_v52  ;;  %11965 = vst [vmem:[#allocation143_spill] sm:$0xff] %v6375_v0  ;;  %v6378_v39 = vadd.f32 %v2192_v22, %v6107_v63  ;;  %v6381_v12 = vadd.f32 %v764_v24, %v6088_v46  ;;  %2382 = vperm.xlu1 %5262, %v5080_v5   ;;  %v11970_v63 = vld [vmem:[#allocation11_spill] sm:$0xff]  ;;  %v5082_v24 = vld [vmem:[%s5319_s17 + $0x1b9] sm:$0xff] }
 0x223   : > { %11963 = vst [vmem:[#allocation146_spill] sm:$0xff] %v6363_v18  ;;  %v769_v35 = vmul.f32 %v6273_v59, %v11967_v25  ;;  %v2196_v23 = vmul.f32 %v5980_v6, %v11967_v25  ;;  %11968 = vst [vmem:[#allocation145_spill] sm:$0xff] %v6387_v8  ;;  %v6390_v36 = vadd.f32 %v2191_v44, %v6081_v50  ;;  %2377 = vperm.xlu0 %5261, %v5079_v17   ;;  %v11971_v52 = vld [vmem:[#allocation12_spill] sm:$0xff]  ;;  %v11975_v60 = vld [vmem:[#allocation14_spill] sm:$0xff] }
 0x224   : > { %11966 = vst [vmem:[#allocation8_spill] sm:$0xff] %v6378_v39  ;;  %v6393_v16 = vadd.f32 %v767_v47, %v6128_v9  ;;  %v768_v22 = vmul.f32 %v6273_v59, %v11970_v63  ;;  %v2195_v46 = vmul.f32 %v5980_v6, %v11970_v63  ;;  %v771_v25 = vmul.f32 %v6273_v59, %v11971_v52  ;;  %v11972_v39 = vld [vmem:[#allocation13_spill] sm:$0xff] }
 0x225   : > { %11969 = vst [vmem:[#allocation9_spill] sm:$0xff] %v6390_v36  ;;  %v2198_v5 = vmul.f32 %v5980_v6, %v11971_v52  ;;  %v770_v50 = vmul.f32 %v6273_v59, %v11972_v39  ;;  %v2197_v47 = vmul.f32 %v5980_v6, %v11972_v39  ;;  %v5081_v9 = vld [vmem:[%s5319_s17 + $0x1b1] sm:$0xff]  ;;  %v6410_v44 = vadd.f32 %v2194_v3, %v6132_v56  ;;  %v6420_v36 = vpop.permute.xlu1 %1825 }
 0x226   : > { %v6413_v17 = vadd.f32 %v766_v15, %v6099_v33  ;;  %v6416_v63 = vadd.f32 %v2193_v31, %v6103_v42  ;;  %v773_v52 = vmul.f32 %v6273_v59, %v11975_v60  ;;  %11976 = vst [vmem:[#allocation12_spill] sm:$0xff] %v6420_v36  ;;  %v6423_v18 = vadd.f32 %v769_v35, %v6151_v45  ;;  %v11978_v33 = vld [vmem:[#allocation15_spill] sm:$0xff]  ;;  %v6432_v42 = vpop.permute.xlu0 %1820  ;;  %v5098_v36 = vld [vmem:[%s5319_s17 + $0x351] sm:$0xff] }
 0x227   : > { %11973 = vst [vmem:[#allocation10_spill] sm:$0xff] %v6410_v44  ;;  %v6426_v39 = vadd.f32 %v2196_v23, %v6145_v2  ;;  %v2200_v56 = vmul.f32 %v5980_v6, %v11975_v60  ;;  %v772_v3 = vmul.f32 %v6273_v59, %v11978_v33  ;;  %11979 = vst [vmem:[#allocation14_spill] sm:$0xff] %v6432_v42  ;;  %2392 = vperm.xlu1 %5262, %v5082_v24   ;;  %v11981_v2 = vld [vmem:[#allocation16_spill] sm:$0xff]  ;;  %v5084_v60 = vld [vmem:[%s5319_s17 + $0x1c9] sm:$0x3] }
 0x228   : > { %11974 = vst [vmem:[#allocation11_spill] sm:$0xff] %v6416_v63  ;;  %v6435_v15 = vadd.f32 %v768_v22, %v6125_v38  ;;  %v6438_v31 = vadd.f32 %v2195_v46, %v6117_v1  ;;  %v2199_v45 = vmul.f32 %v5980_v6, %v11978_v33  ;;  %v775_v35 = vmul.f32 %v6273_v59, %v11981_v2  ;;  %v5083_v22 = vld [vmem:[%s5319_s17 + $0x1c1] sm:$0xff] }
 0x229   : > { %11977 = vst [vmem:[#allocation13_spill] sm:$0xff] %v6426_v39  ;;  %2387 = vperm.xlu0 %5261, %v5081_v9   ;;  %v6446_v23 = vadd.f32 %v771_v25, %v6167_v48  ;;  %v6449_v39 = vadd.f32 %v2198_v5, %v6171_v57  ;;  %v6452_v38 = vadd.f32 %v770_v50, %v6137_v58  ;;  %v11984_v9 = vld [vmem:[#allocation17_spill] sm:$0xff]  ;;  %v6467_v25 = vpop.permute.xlu1 %1835 }
 0x22a   : > { %11980 = vst [vmem:[#allocation15_spill] sm:$0xff] %v6438_v31  ;;  %v6455_v1 = vadd.f32 %v2197_v47, %v6141_v62  ;;  %v6459_v46 = vadd.f32 %v773_v52, %v6192_v27  ;;  %v2202_v24 = vmul.f32 %v5980_v6, %v11981_v2  ;;  %v774_v48 = vmul.f32 %v6273_v59, %v11984_v9  ;;  %v11987_v27 = vld [vmem:[#allocation18_spill] sm:$0xff]  ;;  %v6479_v47 = vpop.permute.xlu0 %1830  ;;  %v11991_v2 = vld [vmem:[#allocation20_spill] sm:$0xff] }
 0x22b   : > { %11982 = vst [vmem:[#allocation16_spill] sm:$0xff] %v6449_v39  ;;  %v2201_v57 = vmul.f32 %v5980_v6, %v11984_v9  ;;  %11985 = vst [vmem:[#allocation17_spill] sm:$0xff] %v6467_v25  ;;  %v6470_v58 = vadd.f32 %v2200_v56, %v6184_v14  ;;  %v6473_v62 = vadd.f32 %v772_v3, %v6164_v54  ;;  %2402 = vperm.xlu1 %5262, %v5084_v60   ;;  %v11990_v14 = vld [vmem:[#allocation19_spill] sm:$0xff]  ;;  %v5086_v3 = vld [vmem:[%s5319_s17 + $0x2f1] sm:$0xff] }
 0x22c   : > { %11983 = vst [vmem:[#allocation163_spill] sm:$0xff] %v6455_v1  ;;  %v777_v5 = vmul.f32 %v6273_v59, %v11987_v27  ;;  %v2204_v50 = vmul.f32 %v5980_v6, %v11987_v27  ;;  %11988 = vst [vmem:[#allocation18_spill] sm:$0xff] %v6479_v47  ;;  %v6482_v52 = vadd.f32 %v2199_v45, %v6155_v10  ;;  %v11992_v27 = vld [vmem:[#allocation21_spill] sm:$0xff]  ;;  %v5085_v45 = vld [vmem:[%s5319_s17 + $0x2e9] sm:$0xff] }
 0x22d   : > { %11986 = vst [vmem:[#allocation164_spill] sm:$0xff] %v6470_v58  ;;  %v6485_v33 = vadd.f32 %v775_v35, %v6207_v4  ;;  %v776_v56 = vmul.f32 %v6273_v59, %v11990_v14  ;;  %v2203_v54 = vmul.f32 %v5980_v6, %v11990_v14  ;;  %2397 = vperm.xlu0 %5261, %v5083_v22   ;;  %v11995_v58 = vld [vmem:[#allocation22_spill] sm:$0xff]  ;;  %v6512_v39 = vpop.permute.xlu1 %1845 }
 0x22e   : > { %11989 = vst [vmem:[#allocation165_spill] sm:$0xff] %v6482_v52  ;;  %v779_v9 = vmul.f32 %v6273_v59, %v11991_v2  ;;  %v2206_v60 = vmul.f32 %v5980_v6, %v11991_v2  ;;  %v778_v10 = vmul.f32 %v6273_v59, %v11992_v27  ;;  %v2205_v4 = vmul.f32 %v5980_v6, %v11992_v27  ;;  %v5095_v47 = vld [vmem:[%s5319_s17 + $0x339] sm:$0xff] }
 0x22f   : > { %v6502_v35 = vadd.f32 %v2202_v24, %v6211_v13  ;;  %v6505_v22 = vadd.f32 %v774_v48, %v6180_v32  ;;  %v6508_v14 = vadd.f32 %v2201_v57, %v6175_v19  ;;  %v781_v2 = vmul.f32 %v6273_v59, %v11995_v58  ;;  %11996 = vst [vmem:[#allocation21_spill] sm:$0xff] %v6512_v39  ;;  %v11998_v32 = vld [vmem:[#allocation23_spill] sm:$0xff]  ;;  %v6524_v19 = vpop.permute.xlu0 %1840  ;;  %v12053_v39 = vld [vmem:[#allocation45_spill] sm:$0xff] }
 0x230   : > { %v6515_v52 = vadd.f32 %v777_v5, %v6235_v43  ;;  %v6518_v27 = vadd.f32 %v2204_v50, %v6223_v21  ;;  %v2208_v13 = vmul.f32 %v5980_v6, %v11995_v58  ;;  %v780_v24 = vmul.f32 %v6273_v59, %v11998_v32  ;;  %11999 = vst [vmem:[#allocation23_spill] sm:$0xff] %v6524_v19  ;;  %v12001_v21 = vld [vmem:[#allocation24_spill] sm:$0xff]  ;;  %v5088_v58 = vld [vmem:[%s5319_s17 + $0x301] sm:$0xff] }
 0x231   : > { %11993 = vst [vmem:[#allocation19_spill] sm:$0xff] %v6502_v35  ;;  %11994 = vst [vmem:[#allocation20_spill] sm:$0xff] %v6508_v14  ;;  %2601 = vperm.xlu1 %5262, %v5086_v3   ;;  %v6527_v48 = vadd.f32 %v776_v56, %v6204_v49  ;;  %v6530_v57 = vadd.f32 %v2203_v54, %v6196_v37  ;;  %v2207_v43 = vmul.f32 %v5980_v6, %v11998_v32  ;;  %v12003_v56 = vld [vmem:[#allocation153_spill] sm:$0xff] }
 0x232   : > { %11997 = vst [vmem:[#allocation22_spill] sm:$0xff] %v6518_v27  ;;  %v783_v5 = vmul.f32 %v6273_v59, %v12001_v21  ;;  %2596 = vperm.xlu0 %5261, %v5085_v45   ;;  %v6538_v50 = vadd.f32 %v779_v9, %v6248_v61  ;;  %v6541_v27 = vadd.f32 %v2206_v60, %v6252_v26  ;;  %v5087_v54 = vld [vmem:[%s5319_s17 + $0x2f9] sm:$0xff]  ;;  %v6559_v9 = vpop.permute.xlu1 %1855 }
 0x233   : > { %12000 = vst [vmem:[#allocation166_spill] sm:$0xff] %v6530_v57  ;;  %v6544_v49 = vadd.f32 %v778_v10, %v6232_v53  ;;  %v6547_v37 = vadd.f32 %v2205_v4, %v12003_v56  ;;  %v6551_v3 = vadd.f32 %v781_v2, %v6278_v34  ;;  %v2210_v45 = vmul.f32 %v5980_v6, %v12001_v21  ;;  %v12005_v32 = vld [vmem:[#allocation25_spill] sm:$0xff]  ;;  %v12008_v34 = vld [vmem:[#allocation26_spill] sm:$0xff]  ;;  %v6576_v21 = vpop.permute.xlu0 %1850 }
 0x234   : > { %12002 = vst [vmem:[#allocation24_spill] sm:$0xff] %v6541_v27  ;;  %v782_v61 = vmul.f32 %v6273_v59, %v12005_v32  ;;  %v2209_v26 = vmul.f32 %v5980_v6, %v12005_v32  ;;  %12006 = vst [vmem:[#allocation25_spill] sm:$0xff] %v6559_v9  ;;  %v6562_v53 = vadd.f32 %v2208_v13, %v6264_v20  ;;  %v6574_v2 = vld [vmem:[%s11436_s1 + $0x3] ss:$0 sm:$0xff]  ;;  %v12011_v13 = vld [vmem:[#allocation27_spill] sm:$0xff] }
 0x235   : > { %12004 = vst [vmem:[#allocation153_spill] sm:$0xff] %v6547_v37  ;;  %v6565_v60 = vadd.f32 %v780_v24, %v6245_v30  ;;  %v785_v10 = vmul.f32 %v6273_v59, %v12008_v34  ;;  %v2212_v4 = vmul.f32 %v5980_v6, %v12008_v34  ;;  %12009 = vst [vmem:[#allocation26_spill] sm:$0xff] %v6576_v21  ;;  %2611 = vperm.xlu1 %5262, %v5088_v58   ;;  %v5090_v32 = vld [vmem:[%s5319_s17 + $0x311] sm:$0xff]  ;;  %v12019_v57 = vld [vmem:[#allocation30_spill] sm:$0xff] }
 0x236   : > { %12007 = vst [vmem:[#allocation167_spill] sm:$0xff] %v6562_v53  ;;  %v6579_v20 = vadd.f32 %v2207_v43, %v6239_v55  ;;  %v6582_v30 = vadd.f32 %v783_v5, %v6294_v29  ;;  %v784_v24 = vmul.f32 %v6273_v59, %v12011_v13  ;;  %v2211_v56 = vmul.f32 %v5980_v6, %v12011_v13  ;;  %v12012_v34 = vld [vmem:[#allocation28_spill] sm:$0xff]  ;;  %v12013_v27 = vld [vmem:[#allocation29_spill] sm:$0xff]  ;;  %v12017_v13 = vld [vmem:[#allocation155_spill] sm:$0xff]  ;;  %v6609_v14 = vpop.permute.xlu1 %1865 }
 0x237   : > { %2606 = vperm.xlu0 %5261, %v5087_v54   ;;  %v787_v53 = vmul.f32 %v6273_v59, %v12012_v34  ;;  %v2214_v58 = vmul.f32 %v5980_v6, %v12012_v34  ;;  %v786_v55 = vmul.f32 %v6273_v59, %v12013_v27  ;;  %v2213_v29 = vmul.f32 %v5980_v6, %v12013_v27  ;;  %v5089_v43 = vld [vmem:[%s5319_s17 + $0x309] sm:$0xff]  ;;  %v12014_v5 = vld [vmem:[#allocation161_spill] sm:$0xff] }
 0x238   : > { %12010 = vst [vmem:[#allocation168_spill] sm:$0xff] %v6579_v20  ;;  %v6599_v20 = vadd.f32 %v2210_v45, %v12014_v5  ;;  %v12016_v37 = vld [vmem:[#allocation156_spill] sm:$0xff]  ;;  %v6605_v35 = vadd.f32 %v2209_v26, %v12017_v13  ;;  %v987_v34 = vmul.f32 %v6574_v2, %v12019_v57  ;;  %12020 = vst [vmem:[#allocation29_spill] sm:$0xff] %v6609_v14  ;;  %v12021_v27 = vld [vmem:[#allocation3_spill] sm:$0xff] }
 0x239   : > { %v6602_v54 = vadd.f32 %v782_v61, %v12016_v37  ;;  %v6612_v1 = vadd.f32 %v785_v10, %v6318_v51  ;;  %v6615_v44 = vadd.f32 %v2212_v4, %v12021_v27  ;;  %v12023_v45 = vld [vmem:[#allocation31_spill] sm:$0xff]  ;;  %v6621_v61 = vpop.permute.xlu0 %1860  ;;  %2621 = vperm.xlu1 %5262, %v5090_v32   ;;  %v12028_v51 = vld [vmem:[#allocation32_spill] sm:$0xff]  ;;  %v12029_v4 = vld [vmem:[#allocation33_spill] sm:$0xff]  ;;  %v6635_v31 = vadd.f32 %v787_v53, %v6346_v41 }
 0x23a   : > { %12015 = vst [vmem:[#allocation27_spill] sm:$0xff] %v6599_v20  ;;  %12018 = vst [vmem:[#allocation28_spill] sm:$0xff] %v6605_v35  ;;  %v788_v5 = vmul.f32 %v6273_v59, %v12023_v45  ;;  %v2215_v37 = vmul.f32 %v5980_v6, %v12023_v45  ;;  %v12025_v26 = vld [vmem:[#allocation159_spill] sm:$0xff]  ;;  %v12026_v20 = vld [vmem:[#allocation160_spill] sm:$0xff]  ;;  %v989_v10 = vmul.f32 %v6574_v2, %v12028_v51 }
 0x23b   : > { %12022 = vst [vmem:[#allocation161_spill] sm:$0xff] %v6615_v44  ;;  %12024 = vst [vmem:[#allocation156_spill] sm:$0xff] %v6621_v61  ;;  %v6624_v13 = vadd.f32 %v784_v24, %v12025_v26  ;;  %v6627_v35 = vadd.f32 %v2211_v56, %v12026_v20  ;;  %v988_v27 = vmul.f32 %v6574_v2, %v12029_v4  ;;  %2616 = vperm.xlu0 %5261, %v5089_v43   ;;  %v5092_v44 = vld [vmem:[%s5319_s17 + $0x321] sm:$0xff]  ;;  %v12033_v26 = vld [vmem:[#allocation141_spill] sm:$0xff] }
 0x23c   : > { %v12030_v45 = vld [vmem:[#allocation142_spill] sm:$0xff]  ;;  %v6644_v20 = vadd.f32 %v2213_v29, %v12033_v26  ;;  %v12035_v61 = vld [vmem:[#allocation136_spill] sm:$0xff]  ;;  %v6661_v29 = vadd.f32 %v788_v5, %v6343_v28  ;;  %v6673_v14 = vadd.f32 %v989_v10, %v6381_v12  ;;  %v12045_v10 = vld [vmem:[#allocation39_spill] sm:$0xff] }
 0x23d   : > { %12027 = vst [vmem:[#allocation155_spill] sm:$0xff] %v6627_v35  ;;  %v6638_v63 = vadd.f32 %v2214_v58, %v12030_v45  ;;  %v12032_v32 = vld [vmem:[#allocation2_spill] sm:$0xff]  ;;  %v6648_v35 = vadd.f32 %v987_v34, %v6360_v11  ;;  %v6652_v43 = vmul.f32 %v12035_v61, %v12019_v57  ;;  %v12037_v58 = vld [vmem:[#allocation35_spill] sm:$0xff]  ;;  %v12041_v34 = vld [vmem:[#allocation36_spill] sm:$0xff]  ;;  %2631 = vperm.xlu1 %5262, %v5092_v44  }
 0x23e   : > { %v6641_v24 = vadd.f32 %v786_v55, %v12032_v32  ;;  %12034 = vst [vmem:[#allocation3_spill] sm:$0xff] %v6644_v20  ;;  %v5091_v56 = vld [vmem:[%s5319_s17 + $0x319] sm:$0xff]  ;;  %v990_v45 = vmul.f32 %v6574_v2, %v12037_v58  ;;  %v6658_v55 = vpop.permute.xlu1 %1875  ;;  %v993_v26 = vmul.f32 %v6574_v2, %v12041_v34  ;;  %v6670_v20 = vpop.permute.xlu0 %1870  ;;  %v6677_v28 = vmul.f32 %v12035_v61, %v12028_v51  ;;  %v12069_v59 = vld [vmem:[#allocation52_spill] sm:$0xff] }
 0x23f   : > { %12031 = vst [vmem:[#allocation30_spill] sm:$0xff] %v6638_v63  ;;  %v12036_v41 = vld [vmem:[#allocation34_spill] sm:$0xff]  ;;  %12038 = vst [vmem:[#allocation31_spill] sm:$0xff] %v6658_v55  ;;  %v12039_v32 = vld [vmem:[#allocation5_spill] sm:$0xff]  ;;  %v6680_v5 = vadd.f32 %v988_v27, %v6354_v40  ;;  %2626 = vperm.xlu0 %5261, %v5091_v56   ;;  %v6693_v12 = vmul.f32 %v12035_v61, %v12037_v58  ;;  %v994_v40 = vmul.f32 %v6574_v2, %v12045_v10 }
 0x240   : > { %v991_v53 = vmul.f32 %v6574_v2, %v12036_v41  ;;  %v6664_v11 = vadd.f32 %v2215_v37, %v12039_v32  ;;  %v12042_v57 = vld [vmem:[#allocation37_spill] sm:$0xff]  ;;  %12043 = vst [vmem:[#allocation160_spill] sm:$0xff] %v6670_v20  ;;  %v6684_v37 = vmul.f32 %v12035_v61, %v12029_v4  ;;  %v12044_v44 = vld [vmem:[#allocation38_spill] sm:$0xff]  ;;  %v5093_v27 = vld [vmem:[%s5319_s17 + $0x329] sm:$0xff]  ;;  %v6704_v56 = vadd.f32 %v990_v45, %v6367_v7 }
 0x241   : > { %v992_v63 = vmul.f32 %v6574_v2, %v12042_v57  ;;  %v5094_v32 = vld [vmem:[%s5319_s17 + $0x331] sm:$0xff]  ;;  %v995_v51 = vmul.f32 %v6574_v2, %v12044_v44  ;;  %v6713_v9 = vadd.f32 %v993_v26, %v6435_v15  ;;  %v6724_v7 = vmul.f32 %v12035_v61, %v12042_v57  ;;  %v5096_v57 = vld [vmem:[%s5319_s17 + $0x341] sm:$0xff] }
 0x242   : > { %12040 = vst [vmem:[#allocation159_spill] sm:$0xff] %v6664_v11  ;;  %v6689_v11 = vmul.f32 %v12035_v61, %v12036_v41  ;;  %v6701_v4 = vadd.f32 %v991_v53, %v6413_v17  ;;  %v12046_v41 = vld [vmem:[#allocation40_spill] sm:$0xff]  ;;  %v12047_v55 = vld [vmem:[#allocation41_spill] sm:$0xff]  ;;  %v6710_v21 = vpop.permute.xlu1 %1974  ;;  %v6717_v17 = vmul.f32 %v12035_v61, %v12041_v34  ;;  %v6726_v45 = vpop.permute.xlu0 %1969  ;;  %2641 = vperm.xlu1 %5262, %v5094_v32   ;;  %v12050_v34 = vld [vmem:[#allocation42_spill] sm:$0xff] }
 0x243   : > { %v997_v20 = vmul.f32 %v6574_v2, %v12046_v41  ;;  %v996_v58 = vmul.f32 %v6574_v2, %v12047_v55  ;;  %12048 = vst [vmem:[#allocation32_spill] sm:$0xff] %v6710_v21  ;;  %v6720_v53 = vadd.f32 %v992_v63, %v6393_v16  ;;  %12049 = vst [vmem:[#allocation33_spill] sm:$0xff] %v6726_v45  ;;  %v12051_v16 = vld [vmem:[#allocation43_spill] sm:$0xff]  ;;  %2636 = vperm.xlu0 %5261, %v5093_v27  }
 0x244   : > { %v6730_v21 = vmul.f32 %v12035_v61, %v12044_v44  ;;  %v6734_v15 = vmul.f32 %v12035_v61, %v12045_v10  ;;  %v999_v26 = vmul.f32 %v6574_v2, %v12050_v34  ;;  %v998_v63 = vmul.f32 %v6574_v2, %v12051_v16  ;;  %v12052_v44 = vld [vmem:[#allocation44_spill] sm:$0xff] }
 0x245   : > { %v6742_v19 = vadd.f32 %v995_v51, %v6452_v38  ;;  %v6745_v32 = vadd.f32 %v994_v40, %v6423_v18  ;;  %v1001_v45 = vmul.f32 %v6574_v2, %v12052_v44  ;;  %v1000_v10 = vmul.f32 %v6574_v2, %v12053_v39 }
 0x246   : > { %v6753_v25 = vadd.f32 %v997_v20, %v6473_v62  ;;  %v6757_v27 = vmul.f32 %v12035_v61, %v12046_v41  ;;  %v6760_v38 = vadd.f32 %v996_v58, %v6446_v23  ;;  %v6764_v18 = vmul.f32 %v12035_v61, %v12047_v55  ;;  %v6766_v51 = vpop.permute.xlu1 %1984  ;;  %v12055_v20 = vld [vmem:[#allocation46_spill] sm:$0xff]  ;;  %v12056_v23 = vld [vmem:[#allocation47_spill] sm:$0xff]  ;;  %v6780_v42 = vpop.permute.xlu0 %1979  ;;  %2651 = vperm.xlu1 %5262, %v5096_v57  }
 0x247   : > { %12054 = vst [vmem:[#allocation142_spill] sm:$0xff] %v6766_v51  ;;  %v6770_v40 = vmul.f32 %v12035_v61, %v12050_v34  ;;  %v6774_v62 = vmul.f32 %v12035_v61, %v12051_v16  ;;  %v1003_v41 = vmul.f32 %v6574_v2, %v12055_v20  ;;  %v1002_v58 = vmul.f32 %v6574_v2, %v12056_v23 }
 0x248   : > { %12057 = vst [vmem:[#allocation2_spill] sm:$0xff] %v6780_v42  ;;  %v6783_v55 = vadd.f32 %v999_v26, %v6505_v22  ;;  %v6786_v34 = vadd.f32 %v998_v63, %v6459_v46  ;;  %v6790_v51 = vmul.f32 %v12035_v61, %v12052_v44  ;;  %v6794_v16 = vmul.f32 %v12035_v61, %v12053_v39  ;;  %v12060_v22 = vld [vmem:[#allocation48_spill] sm:$0xff]  ;;  %v12061_v26 = vld [vmem:[#allocation49_spill] sm:$0xff] }
 0x249   : > { %2646 = vperm.xlu0 %5261, %v5095_v47   ;;  %v6798_v8 = vadd.f32 %v1001_v45, %v6527_v48  ;;  %v6801_v57 = vadd.f32 %v1000_v10, %v6485_v33  ;;  %v1005_v46 = vmul.f32 %v6574_v2, %v12060_v22  ;;  %v1004_v63 = vmul.f32 %v6574_v2, %v12061_v26  ;;  %v5097_v44 = vld [vmem:[%s5319_s17 + $0x349] sm:$0xff]  ;;  %v12064_v47 = vld [vmem:[#allocation50_spill] sm:$0xff] }
 0x24a   : > { %12058 = vst [vmem:[#allocation141_spill] sm:$0xff] %v6790_v51  ;;  %v6810_v42 = vmul.f32 %v12035_v61, %v12055_v20  ;;  %v6814_v39 = vmul.f32 %v12035_v61, %v12056_v23  ;;  %v1007_v33 = vmul.f32 %v6574_v2, %v12064_v47  ;;  %v12065_v48 = vld [vmem:[#allocation51_spill] sm:$0xff]  ;;  %v6820_v10 = vpop.permute.xlu1 %1994  ;;  %v6823_v0 = vadd.f32 %v1003_v41, %v6544_v49  ;;  %v12070_v23 = vld [vmem:[#allocation53_spill] sm:$0xff]  ;;  %v12073_v41 = vld [vmem:[#allocation54_spill] sm:$0xff] }
 0x24b   : > { %12059 = vst [vmem:[#allocation136_spill] sm:$0xff] %v6798_v8  ;;  %v1006_v45 = vmul.f32 %v6574_v2, %v12065_v48  ;;  %12066 = vst [vmem:[#allocation5_spill] sm:$0xff] %v6820_v10  ;;  %v6826_v20 = vadd.f32 %v1002_v58, %v6515_v52  ;;  %v1008_v51 = vmul.f32 %v6574_v2, %v12070_v23  ;;  %v6832_v8 = vpop.permute.xlu0 %1989  ;;  %2661 = vperm.xlu1 %5262, %v5098_v36   ;;  %v12074_v58 = vld [vmem:[#allocation55_spill] sm:$0xff] }
 0x24c   : > { %12062 = vst [vmem:[#allocation34_spill] sm:$0xff] %v6810_v42  ;;  %12063 = vst [vmem:[#allocation35_spill] sm:$0xff] %v6814_v39  ;;  %v1009_v42 = vmul.f32 %v6574_v2, %v12069_v59  ;;  %v6836_v39 = vmul.f32 %v12035_v61, %v12060_v22  ;;  %v6840_v49 = vmul.f32 %v12035_v61, %v12061_v26 }
 0x24d   : > { %12067 = vst [vmem:[#allocation36_spill] sm:$0xff] %v6823_v0  ;;  %12068 = vst [vmem:[#allocation37_spill] sm:$0xff] %v6826_v20  ;;  %v1011_v52 = vmul.f32 %v6574_v2, %v12073_v41  ;;  %v1010_v10 = vmul.f32 %v6574_v2, %v12074_v58  ;;  %2656 = vperm.xlu0 %5261, %v5097_v44   ;;  %v5100_v0 = vld [vmem:[%s5319_s17 + $0x361] sm:$0xff]  ;;  %v6848_v20 = vadd.f32 %v1005_v46, %v6565_v60  ;;  %v12076_v60 = vld [vmem:[#allocation56_spill] sm:$0xff] }
 0x24e   : > { %12071 = vst [vmem:[#allocation38_spill] sm:$0xff] %v6832_v8  ;;  %12072 = vst [vmem:[#allocation39_spill] sm:$0xff] %v6836_v39  ;;  %v6851_v36 = vadd.f32 %v1004_v63, %v6538_v50  ;;  %v6855_v22 = vmul.f32 %v12035_v61, %v12064_v47  ;;  %v6859_v26 = vmul.f32 %v12035_v61, %v12065_v48  ;;  %v5099_v8 = vld [vmem:[%s5319_s17 + $0x359] sm:$0xff]  ;;  %v6875_v47 = vld [vmem:[%s11436_s1 + $0x4] ss:$0 sm:$0xff]  ;;  %v6877_v48 = vpop.permute.xlu1 %2004 }
 0x24f   : > { %v6863_v39 = vadd.f32 %v1007_v33, %v6602_v54  ;;  %v6866_v44 = vadd.f32 %v1006_v45, %v6551_v3  ;;  %v1013_v50 = vmul.f32 %v6574_v2, %v12076_v60  ;;  %v12077_v46 = vld [vmem:[#allocation57_spill] sm:$0xff]  ;;  %12078 = vst [vmem:[#allocation41_spill] sm:$0xff] %v6877_v48  ;;  %v6880_v54 = vadd.f32 %v1009_v42, %v6624_v13 }
 0x250   : > { %12075 = vst [vmem:[#allocation40_spill] sm:$0xff] %v6855_v22  ;;  %v1012_v63 = vmul.f32 %v6574_v2, %v12077_v46  ;;  %v6884_v3 = vmul.f32 %v12035_v61, %v12069_v59  ;;  %v6887_v33 = vadd.f32 %v1008_v51, %v6582_v30  ;;  %v6891_v45 = vmul.f32 %v12035_v61, %v12070_v23  ;;  %v6893_v22 = vpop.permute.xlu0 %1999  ;;  %v5102_v13 = vld [vmem:[%s5319_s17 + $0x371] sm:$0xff]  ;;  %v12082_v51 = vld [vmem:[#allocation58_spill] sm:$0xff] }
 0x251   : > { %12079 = vst [vmem:[#allocation42_spill] sm:$0xff] %v6893_v22  ;;  %2671 = vperm.xlu1 %5262, %v5100_v0   ;;  %v6896_v48 = vadd.f32 %v1011_v52, %v6641_v24  ;;  %v6900_v42 = vmul.f32 %v12035_v61, %v12073_v41  ;;  %v6903_v59 = vadd.f32 %v1010_v10, %v6612_v1  ;;  %v12083_v24 = vld [vmem:[#allocation59_spill] sm:$0xff] }
 0x252   : > { %v6907_v30 = vmul.f32 %v12035_v61, %v12074_v58  ;;  %2666 = vperm.xlu0 %5261, %v5099_v8   ;;  %v1213_v23 = vmul.f32 %v6875_v47, %v12082_v51  ;;  %v3162_v0 = vmul.f32 %v5980_v6, %v12082_v51  ;;  %v1212_v52 = vmul.f32 %v6875_v47, %v12083_v24  ;;  %v5101_v1 = vld [vmem:[%s5319_s17 + $0x369] sm:$0xff] }
 0x253   : > { %12080 = vst [vmem:[#allocation43_spill] sm:$0xff] %v6896_v48  ;;  %12081 = vst [vmem:[#allocation44_spill] sm:$0xff] %v6900_v42  ;;  %v3161_v41 = vmul.f32 %v5980_v6, %v12083_v24  ;;  %v6920_v10 = vadd.f32 %v1013_v50, %v6661_v29  ;;  %v6924_v8 = vmul.f32 %v12035_v61, %v12076_v60  ;;  %v6933_v42 = vpop.permute.xlu1 %2014 }
 0x254   : > { %v6927_v58 = vadd.f32 %v1012_v63, %v6635_v31  ;;  %v6931_v22 = vmul.f32 %v12035_v61, %v12077_v46  ;;  %12086 = vst [vmem:[#allocation47_spill] sm:$0xff] %v6933_v42  ;;  %v6937_v48 = vmul.f32 %v12035_v61, %v12082_v51  ;;  %v6941_v29 = vmul.f32 %v12035_v61, %v12083_v24  ;;  %v6943_v60 = vpop.permute.xlu0 %2009  ;;  %v12092_v46 = vld [vmem:[#allocation60_spill] sm:$0xff] }
 0x255   : > { %12084 = vst [vmem:[#allocation45_spill] sm:$0xff] %v6920_v10  ;;  %12085 = vst [vmem:[#allocation46_spill] sm:$0xff] %v6924_v8  ;;  %2681 = vperm.xlu1 %5262, %v5102_v13   ;;  %v6947_v31 = vmul.f32 %v6574_v2, %v12083_v24  ;;  %v6951_v50 = vmul.f32 %v6574_v2, %v12082_v51  ;;  %v1215_v63 = vmul.f32 %v6875_v47, %v12092_v46  ;;  %v5103_v10 = vld [vmem:[%s5319_s17 + $0x379] sm:$0xff] }
 0x256   : > { %12087 = vst [vmem:[#allocation48_spill] sm:$0xff] %v6937_v48  ;;  %12088 = vst [vmem:[#allocation49_spill] sm:$0xff] %v6941_v29  ;;  %v3164_v42 = vmul.f32 %v5980_v6, %v12092_v46  ;;  %v12093_v48 = vld [vmem:[#allocation61_spill] sm:$0xff]  ;;  %2676 = vperm.xlu0 %5261, %v5101_v1   ;;  %v6963_v24 = vadd.f32 %v1213_v23, %v6680_v5  ;;  %v6966_v51 = vadd.f32 %v3162_v0, %v6684_v37 }
 0x257   : > { %12089 = vst [vmem:[#allocation50_spill] sm:$0xff] %v6943_v60  ;;  %12090 = vst [vmem:[#allocation51_spill] sm:$0xff] %v6947_v31  ;;  %v1214_v8 = vmul.f32 %v6875_v47, %v12093_v48  ;;  %v3163_v13 = vmul.f32 %v5980_v6, %v12093_v48  ;;  %v5104_v60 = vld [vmem:[%s5319_s17 + $0x381] sm:$0xff]  ;;  %v6972_v31 = vadd.f32 %v3161_v41, %v6652_v43  ;;  %v6983_v5 = vpop.permute.xlu1 %2024 }
 0x258   : > { %12091 = vst [vmem:[#allocation52_spill] sm:$0xff] %v6951_v50  ;;  %12094 = vst [vmem:[#allocation53_spill] sm:$0xff] %v6963_v24  ;;  %v6969_v50 = vadd.f32 %v1212_v52, %v6648_v35  ;;  %v6977_v29 = vmul.f32 %v12035_v61, %v12092_v46  ;;  %v6981_v1 = vmul.f32 %v12035_v61, %v12093_v48  ;;  %v12100_v43 = vld [vmem:[#allocation62_spill] sm:$0xff]  ;;  %v12101_v52 = vld [vmem:[#allocation63_spill] sm:$0xff] }
 0x259   : > { %12095 = vst [vmem:[#allocation54_spill] sm:$0xff] %v6966_v51  ;;  %12097 = vst [vmem:[#allocation56_spill] sm:$0xff] %v6983_v5  ;;  %v6987_v37 = vmul.f32 %v6574_v2, %v12093_v48  ;;  %v6991_v35 = vmul.f32 %v6574_v2, %v12092_v46  ;;  %v1217_v23 = vmul.f32 %v6875_v47, %v12100_v43  ;;  %2691 = vperm.xlu1 %5262, %v5104_v60   ;;  %v5106_v51 = vld [vmem:[%s5319_s17 + $0x391] sm:$0xff] }
 0x25a   : > { %12096 = vst [vmem:[#allocation55_spill] sm:$0xff] %v6977_v29  ;;  %v3166_v0 = vmul.f32 %v5980_v6, %v12100_v43  ;;  %v1216_v41 = vmul.f32 %v6875_v47, %v12101_v52  ;;  %v3165_v5 = vmul.f32 %v5980_v6, %v12101_v52  ;;  %v7001_v29 = vpop.permute.xlu0 %2019  ;;  %v7004_v48 = vadd.f32 %v1215_v63, %v6704_v56  ;;  %v5105_v56 = vld [vmem:[%s5319_s17 + $0x389] sm:$0xff] }
 0x25b   : > { %12098 = vst [vmem:[#allocation57_spill] sm:$0xff] %v6987_v37  ;;  %12099 = vst [vmem:[#allocation58_spill] sm:$0xff] %v6991_v35  ;;  %v7007_v46 = vadd.f32 %v3164_v42, %v6693_v12  ;;  %v7010_v35 = vadd.f32 %v1214_v8, %v6673_v14  ;;  %v7013_v37 = vadd.f32 %v3163_v13, %v6677_v28  ;;  %2686 = vperm.xlu0 %5261, %v5103_v10   ;;  %v12107_v28 = vld [vmem:[#allocation64_spill] sm:$0xff]  ;;  %v12108_v8 = vld [vmem:[#allocation65_spill] sm:$0xff] }
 0x25c   : > { %12102 = vst [vmem:[#allocation59_spill] sm:$0xff] %v7001_v29  ;;  %v7018_v24 = vmul.f32 %v12035_v61, %v12100_v43  ;;  %v7022_v60 = vmul.f32 %v12035_v61, %v12101_v52  ;;  %v7027_v12 = vmul.f32 %v6574_v2, %v12101_v52  ;;  %v7031_v14 = vmul.f32 %v6574_v2, %v12100_v43  ;;  %v7041_v29 = vpop.permute.xlu1 %2034 }
 0x25d   : > { %12103 = vst [vmem:[#allocation60_spill] sm:$0xff] %v7007_v46  ;;  %v1219_v42 = vmul.f32 %v6875_v47, %v12107_v28  ;;  %v3168_v10 = vmul.f32 %v5980_v6, %v12107_v28  ;;  %v1218_v63 = vmul.f32 %v6875_v47, %v12108_v8  ;;  %v3167_v13 = vmul.f32 %v5980_v6, %v12108_v8 }
 0x25e   : > { %12104 = vst [vmem:[#allocation61_spill] sm:$0xff] %v7018_v24  ;;  %12105 = vst [vmem:[#allocation62_spill] sm:$0xff] %v7027_v12  ;;  %v7044_v52 = vadd.f32 %v1217_v23, %v6720_v53  ;;  %v7047_v43 = vadd.f32 %v3166_v0, %v6724_v7  ;;  %v7053_v12 = vadd.f32 %v3165_v5, %v6689_v11  ;;  %v7055_v24 = vpop.permute.xlu0 %2029  ;;  %2701 = vperm.xlu1 %5262, %v5106_v51   ;;  %v5108_v7 = vld [vmem:[%s5319_s17 + $0x3a1] sm:$0xff] }
 0x25f   : > { %12106 = vst [vmem:[#allocation63_spill] sm:$0xff] %v7031_v14  ;;  %12109 = vst [vmem:[#allocation64_spill] sm:$0xff] %v7041_v29  ;;  %v7050_v14 = vadd.f32 %v1216_v41, %v6701_v4  ;;  %v7059_v46 = vmul.f32 %v12035_v61, %v12107_v28  ;;  %v7063_v53 = vmul.f32 %v12035_v61, %v12108_v8  ;;  %2696 = vperm.xlu0 %5261, %v5105_v56   ;;  %v12114_v5 = vld [vmem:[#allocation66_spill] sm:$0xff]  ;;  %v12115_v0 = vld [vmem:[#allocation67_spill] sm:$0xff] }
 0x260   : > { %12110 = vst [vmem:[#allocation65_spill] sm:$0xff] %v7055_v24  ;;  %v7068_v4 = vmul.f32 %v6574_v2, %v12108_v8  ;;  %v7072_v11 = vmul.f32 %v6574_v2, %v12107_v28  ;;  %v1221_v51 = vmul.f32 %v6875_v47, %v12114_v5  ;;  %v3170_v23 = vmul.f32 %v5980_v6, %v12114_v5  ;;  %v5107_v24 = vld [vmem:[%s5319_s17 + $0x399] sm:$0xff]  ;;  %v7095_v29 = vpop.permute.xlu1 %2044 }
 0x261   : > { %12111 = vst [vmem:[#allocation169_spill] sm:$0xff] %v7059_v46  ;;  %v1220_v41 = vmul.f32 %v6875_v47, %v12115_v0  ;;  %v3169_v56 = vmul.f32 %v5980_v6, %v12115_v0  ;;  %v7084_v8 = vadd.f32 %v1219_v42, %v6745_v32  ;;  %v7087_v28 = vadd.f32 %v3168_v10, %v6734_v15  ;;  %v12122_v15 = vld [vmem:[#allocation68_spill] sm:$0xff] }
 0x262   : > { %12112 = vst [vmem:[#allocation170_spill] sm:$0xff] %v7068_v4  ;;  %12113 = vst [vmem:[#allocation171_spill] sm:$0xff] %v7072_v11  ;;  %v7090_v11 = vadd.f32 %v1218_v63, %v6713_v9  ;;  %v7093_v4 = vadd.f32 %v3167_v13, %v6717_v17  ;;  %v7099_v46 = vmul.f32 %v12035_v61, %v12114_v5  ;;  %v7105_v42 = vpop.permute.xlu0 %2039  ;;  %2711 = vperm.xlu1 %5262, %v5108_v7   ;;  %v12123_v13 = vld [vmem:[#allocation69_spill] sm:$0xff] }
 0x263   : > { %12116 = vst [vmem:[#allocation66_spill] sm:$0xff] %v7087_v28  ;;  %12117 = vst [vmem:[#allocation67_spill] sm:$0xff] %v7095_v29  ;;  %v7103_v32 = vmul.f32 %v12035_v61, %v12115_v0  ;;  %v7109_v9 = vmul.f32 %v6574_v2, %v12115_v0  ;;  %v7113_v17 = vmul.f32 %v6574_v2, %v12114_v5  ;;  %2706 = vperm.xlu0 %5261, %v5107_v24  }
 0x264   : > { %12118 = vst [vmem:[#allocation172_spill] sm:$0xff] %v7099_v46  ;;  %12119 = vst [vmem:[#allocation173_spill] sm:$0xff] %v7105_v42  ;;  %v1223_v10 = vmul.f32 %v6875_v47, %v12122_v15  ;;  %v3172_v63 = vmul.f32 %v5980_v6, %v12122_v15  ;;  %v1222_v29 = vmul.f32 %v6875_v47, %v12123_v13  ;;  %v5110_v42 = vld [vmem:[%s5319_s17 + $0x3b1] sm:$0xff]  ;;  %v5109_v46 = vld [vmem:[%s5319_s17 + $0x3a9] sm:$0xff] }
 0x265   : > { %12120 = vst [vmem:[#allocation174_spill] sm:$0xff] %v7109_v9  ;;  %12121 = vst [vmem:[#allocation175_spill] sm:$0xff] %v7113_v17  ;;  %v3171_v7 = vmul.f32 %v5980_v6, %v12123_v13  ;;  %v7125_v0 = vadd.f32 %v1221_v51, %v6760_v38  ;;  %v7128_v5 = vadd.f32 %v3170_v23, %v6764_v18  ;;  %v7145_v38 = vpop.permute.xlu1 %2054 }
 0x266   : > { %v7131_v17 = vadd.f32 %v1220_v41, %v6742_v19  ;;  %v7134_v9 = vadd.f32 %v3169_v56, %v6730_v21  ;;  %v7139_v28 = vmul.f32 %v12035_v61, %v12122_v15  ;;  %v7143_v24 = vmul.f32 %v12035_v61, %v12123_v13  ;;  %12125 = vst [vmem:[#allocation69_spill] sm:$0xff] %v7145_v38  ;;  %v12128_v21 = vld [vmem:[#allocation70_spill] sm:$0xff]  ;;  %v12129_v41 = vld [vmem:[#allocation71_spill] sm:$0xff]  ;;  %v7163_v38 = vpop.permute.xlu0 %2049 }
 0x267   : > { %v7149_v18 = vmul.f32 %v6574_v2, %v12123_v13  ;;  %v7153_v19 = vmul.f32 %v6574_v2, %v12122_v15  ;;  %v1225_v51 = vmul.f32 %v6875_v47, %v12128_v21  ;;  %v3174_v23 = vmul.f32 %v5980_v6, %v12128_v21  ;;  %12130 = vst [vmem:[#allocation70_spill] sm:$0xff] %v7163_v38 }
 0x268   : > { %12124 = vst [vmem:[#allocation68_spill] sm:$0xff] %v7139_v28  ;;  %v1224_v61 = vmul.f32 %v6875_v47, %v12129_v41  ;;  %v3173_v56 = vmul.f32 %v5980_v6, %v12129_v41  ;;  %2721 = vperm.xlu1 %5262, %v5110_v42   ;;  %v7166_v13 = vadd.f32 %v1223_v10, %v6786_v34  ;;  %v5112_v28 = vld [vmem:[%s5319_s17 + $0x108] sm:$0xff]  ;;  %v7181_v6 = vld [vmem:[%s11436_s1] ss:$0 sm:$0xff]  ;;  %v7205_v10 = vld [vmem:[%s11436_s1 + $0x1] ss:$0 sm:$0xff] }
 0x269   : > { %12126 = vst [vmem:[#allocation176_spill] sm:$0xff] %v7149_v18  ;;  %12127 = vst [vmem:[#allocation177_spill] sm:$0xff] %v7153_v19  ;;  %v7169_v15 = vadd.f32 %v3172_v63, %v6774_v62  ;;  %v7172_v19 = vadd.f32 %v1222_v29, %v6753_v25  ;;  %v7175_v18 = vadd.f32 %v3171_v7, %v6757_v27  ;;  %2716 = vperm.xlu0 %5261, %v5109_v46   ;;  %v5111_v25 = vld [vmem:[%s5319_s17 + $0x3b9] sm:$0x3]  ;;  %v12137_v46 = vld [vmem:[#allocation72_spill] sm:$0xff] }
 0x26a   : > { %12131 = vst [vmem:[#allocation71_spill] sm:$0xff] %v7166_v13  ;;  %v7185_v34 = vmul.f32 %v7181_v6, %v12128_v21  ;;  %v7189_v62 = vmul.f32 %v7181_v6, %v12129_v41  ;;  %v7194_v27 = vmul.f32 %v6574_v2, %v12129_v41  ;;  %v7198_v29 = vmul.f32 %v6574_v2, %v12128_v21  ;;  %v12138_v7 = vld [vmem:[#allocation73_spill] sm:$0xff]  ;;  %v7213_v21 = vpop.permute.xlu1 %2064 }
 0x26b   : > { %12132 = vst [vmem:[#allocation178_spill] sm:$0xff] %v7169_v15  ;;  %v1227_v42 = vmul.f32 %v6875_v47, %v12137_v46  ;;  %v3176_v63 = vmul.f32 %v7205_v10, %v12137_v46  ;;  %v1226_v41 = vmul.f32 %v6875_v47, %v12138_v7  ;;  %12139 = vst [vmem:[#allocation72_spill] sm:$0xff] %v7213_v21  ;;  %v12150_v21 = vld [vmem:[#allocation37_spill] sm:$0xff] }
 0x26c   : > { %12133 = vst [vmem:[#allocation179_spill] sm:$0xff] %v7185_v34  ;;  %12134 = vst [vmem:[#allocation180_spill] sm:$0xff] %v7189_v62  ;;  %v7219_v38 = vadd.f32 %v3174_v23, %v6794_v16  ;;  %v7222_v34 = vadd.f32 %v1224_v61, %v6783_v55  ;;  %v7225_v15 = vadd.f32 %v3173_v56, %v6770_v40  ;;  %v7227_v62 = vpop.permute.xlu0 %2059  ;;  %2920 = vperm.xlu1 %5262, %v5112_v28   ;;  %v5114_v16 = vld [vmem:[%s5319_s17 + $0x118] sm:$0xff]  ;;  %v12149_v61 = vld [vmem:[#allocation75_spill] sm:$0xff] }
 0x26d   : > { %12135 = vst [vmem:[#allocation181_spill] sm:$0xff] %v7194_v27  ;;  %12136 = vst [vmem:[#allocation182_spill] sm:$0xff] %v7198_v29  ;;  %v3175_v27 = vmul.f32 %v7205_v10, %v12138_v7  ;;  %v7216_v29 = vadd.f32 %v1225_v51, %v6801_v57  ;;  %v7231_v13 = vmul.f32 %v7181_v6, %v12137_v46  ;;  %2726 = vperm.xlu0 %5261, %v5111_v25   ;;  %v12148_v51 = vld [vmem:[#allocation74_spill] sm:$0xff] }
 0x26e   : > { %12141 = vst [vmem:[#allocation183_spill] sm:$0xff] %v7219_v38  ;;  %12142 = vst [vmem:[#allocation184_spill] sm:$0xff] %v7225_v15  ;;  %v7235_v57 = vmul.f32 %v7181_v6, %v12138_v7  ;;  %v7240_v55 = vmul.f32 %v6574_v2, %v12138_v7  ;;  %v7244_v40 = vmul.f32 %v6574_v2, %v12137_v46  ;;  %v12155_v38 = vld [vmem:[#allocation141_spill] sm:$0xff] }
 0x26f   : > { %12140 = vst [vmem:[#allocation73_spill] sm:$0xff] %v7216_v29  ;;  %12143 = vst [vmem:[#allocation185_spill] sm:$0xff] %v7227_v62  ;;  %v1229_v28 = vmul.f32 %v6875_v47, %v12148_v51  ;;  %v3178_v23 = vmul.f32 %v7205_v10, %v12148_v51  ;;  %v1228_v56 = vmul.f32 %v6875_v47, %v12149_v61  ;;  %v5113_v62 = vld [vmem:[%s5319_s17 + $0x110] sm:$0xff] }
 0x270   : > { %12144 = vst [vmem:[#allocation186_spill] sm:$0xff] %v7231_v13  ;;  %12145 = vst [vmem:[#allocation187_spill] sm:$0xff] %v7235_v57  ;;  %v3177_v25 = vmul.f32 %v7205_v10, %v12149_v61  ;;  %v7256_v7 = vadd.f32 %v1227_v42, %v12150_v21  ;;  %v7265_v29 = vadd.f32 %v3175_v27, %v12155_v38  ;;  %v7267_v57 = vpop.permute.xlu1 %2074  ;;  %v7277_v21 = vpop.permute.xlu0 %2069  ;;  %2930 = vperm.xlu1 %5262, %v5114_v16   ;;  %v12162_v27 = vld [vmem:[#allocation76_spill] sm:$0xff] }
 0x271   : > { %12146 = vst [vmem:[#allocation188_spill] sm:$0xff] %v7240_v55  ;;  %12147 = vst [vmem:[#allocation189_spill] sm:$0xff] %v7244_v40  ;;  %v12152_v55 = vld [vmem:[#allocation35_spill] sm:$0xff]  ;;  %v12154_v40 = vld [vmem:[#allocation136_spill] sm:$0xff]  ;;  %v7271_v15 = vmul.f32 %v7181_v6, %v12148_v51  ;;  %v7275_v42 = vmul.f32 %v7181_v6, %v12149_v61  ;;  %v7285_v38 = vmul.f32 %v6574_v2, %v12148_v51  ;;  %2925 = vperm.xlu0 %5261, %v5113_v62  }
 0x272   : > { %12151 = vst [vmem:[#allocation74_spill] sm:$0xff] %v7256_v7  ;;  %v7259_v46 = vadd.f32 %v3176_v63, %v12152_v55  ;;  %v7262_v13 = vadd.f32 %v1226_v41, %v12154_v40  ;;  %12156 = vst [vmem:[#allocation37_spill] sm:$0xff] %v7267_v57  ;;  %v7281_v63 = vmul.f32 %v6574_v2, %v12149_v61  ;;  %v12163_v40 = vld [vmem:[#allocation77_spill] sm:$0xff] }
 0x273   : > { %12157 = vst [vmem:[#allocation35_spill] sm:$0xff] %v7271_v15  ;;  %12158 = vst [vmem:[#allocation136_spill] sm:$0xff] %v7275_v42  ;;  %v1231_v41 = vmul.f32 %v6875_v47, %v12162_v27  ;;  %v3180_v55 = vmul.f32 %v7205_v10, %v12162_v27  ;;  %v1230_v57 = vmul.f32 %v6875_v47, %v12163_v40  ;;  %v12167_v15 = vld [vmem:[#allocation34_spill] sm:$0xff] }
 0x274   : > { %12153 = vst [vmem:[#allocation75_spill] sm:$0xff] %v7259_v46  ;;  %12159 = vst [vmem:[#allocation141_spill] sm:$0xff] %v7277_v21  ;;  %v3179_v16 = vmul.f32 %v7205_v10, %v12163_v40  ;;  %v5116_v21 = vld [vmem:[%s5319_s17 + $0x128] sm:$0xff]  ;;  %v7297_v61 = vadd.f32 %v1229_v28, %v6851_v36  ;;  %v7300_v51 = vadd.f32 %v3178_v23, %v6840_v49  ;;  %v5115_v42 = vld [vmem:[%s5319_s17 + $0x120] sm:$0xff]  ;;  %v7317_v36 = vpop.permute.xlu1 %2084 }
 0x275   : > { %12160 = vst [vmem:[#allocation190_spill] sm:$0xff] %v7281_v63  ;;  %12161 = vst [vmem:[#allocation191_spill] sm:$0xff] %v7285_v38  ;;  %v12166_v38 = vld [vmem:[#allocation36_spill] sm:$0xff]  ;;  %v7306_v46 = vadd.f32 %v3177_v25, %v12167_v15  ;;  %v7311_v7 = vmul.f32 %v7181_v6, %v12162_v27  ;;  %v7315_v62 = vmul.f32 %v7181_v6, %v12163_v40  ;;  %v12173_v28 = vld [vmem:[#allocation78_spill] sm:$0xff]  ;;  %2940 = vperm.xlu1 %5262, %v5116_v21  }
 0x276   : > { %12164 = vst [vmem:[#allocation76_spill] sm:$0xff] %v7297_v61  ;;  %12165 = vst [vmem:[#allocation77_spill] sm:$0xff] %v7300_v51  ;;  %v7303_v63 = vadd.f32 %v1228_v56, %v12166_v38  ;;  %v7321_v49 = vmul.f32 %v6574_v2, %v12163_v40  ;;  %v7325_v15 = vmul.f32 %v6574_v2, %v12162_v27  ;;  %v12174_v25 = vld [vmem:[#allocation79_spill] sm:$0xff]  ;;  %2935 = vperm.xlu0 %5261, %v5115_v42   ;;  %v5118_v61 = vld [vmem:[%s5319_s17 + $0x138] sm:$0xff] }
 0x277   : > { %12168 = vst [vmem:[#allocation36_spill] sm:$0xff] %v7311_v7  ;;  %12169 = vst [vmem:[#allocation34_spill] sm:$0xff] %v7315_v62  ;;  %v1233_v23 = vmul.f32 %v6875_v47, %v12173_v28  ;;  %v3182_v56 = vmul.f32 %v7205_v10, %v12173_v28  ;;  %v1232_v38 = vmul.f32 %v6875_v47, %v12174_v25  ;;  %v7335_v7 = vpop.permute.xlu0 %2079  ;;  %v12183_v42 = vld [vmem:[#allocation81_spill] sm:$0xff] }
 0x278   : > { %12170 = vst [vmem:[#allocation192_spill] sm:$0xff] %v7317_v36  ;;  %12171 = vst [vmem:[#allocation193_spill] sm:$0xff] %v7321_v49  ;;  %v3181_v36 = vmul.f32 %v7205_v10, %v12174_v25  ;;  %v7338_v40 = vadd.f32 %v1231_v41, %v6866_v44  ;;  %v7341_v27 = vadd.f32 %v3180_v55, %v6859_v26  ;;  %v12178_v49 = vld [vmem:[#allocation39_spill] sm:$0xff]  ;;  %v12181_v44 = vld [vmem:[#allocation80_spill] sm:$0xff] }
 0x279   : > { %12172 = vst [vmem:[#allocation194_spill] sm:$0xff] %v7325_v15  ;;  %12175 = vst [vmem:[#allocation78_spill] sm:$0xff] %v7335_v7  ;;  %v7344_v15 = vadd.f32 %v1230_v57, %v6848_v20  ;;  %v7347_v51 = vadd.f32 %v3179_v16, %v12178_v49  ;;  %v7352_v62 = vmul.f32 %v7181_v6, %v12173_v28  ;;  %v5117_v41 = vld [vmem:[%s5319_s17 + $0x130] sm:$0xff]  ;;  %v7371_v49 = vpop.permute.xlu1 %2094  ;;  %2950 = vperm.xlu1 %5262, %v5118_v61  }
 0x27a   : > { %12176 = vst [vmem:[#allocation79_spill] sm:$0xff] %v7338_v40  ;;  %12177 = vst [vmem:[#allocation195_spill] sm:$0xff] %v7341_v27  ;;  %v7356_v21 = vmul.f32 %v7181_v6, %v12174_v25  ;;  %v1235_v26 = vmul.f32 %v6875_v47, %v12181_v44  ;;  %v7363_v20 = vmul.f32 %v6574_v2, %v12173_v28  ;;  %v12186_v27 = vld [vmem:[#allocation40_spill] sm:$0xff]  ;;  %2945 = vperm.xlu0 %5261, %v5117_v41  }
 0x27b   : > { %12179 = vst [vmem:[#allocation39_spill] sm:$0xff] %v7352_v62  ;;  %v3184_v57 = vmul.f32 %v7205_v10, %v12181_v44  ;;  %v1234_v55 = vmul.f32 %v6875_v47, %v12183_v42  ;;  %v3183_v16 = vmul.f32 %v7205_v10, %v12183_v42  ;;  %12184 = vst [vmem:[#allocation81_spill] sm:$0xff] %v7371_v49 }
 0x27c   : > { %12180 = vst [vmem:[#allocation196_spill] sm:$0xff] %v7356_v21  ;;  %12182 = vst [vmem:[#allocation80_spill] sm:$0xff] %v7363_v20  ;;  %v7375_v7 = vmul.f32 %v6574_v2, %v12174_v25  ;;  %v7378_v62 = vadd.f32 %v1233_v23, %v6887_v33  ;;  %v7381_v28 = vadd.f32 %v3182_v56, %v6891_v45  ;;  %v7389_v21 = vpop.permute.xlu0 %2089  ;;  %v12190_v23 = vld [vmem:[#allocation82_spill] sm:$0xff] }
 0x27d   : > { %v7384_v20 = vadd.f32 %v1232_v38, %v6863_v39  ;;  %v7387_v40 = vadd.f32 %v3181_v36, %v12186_v27  ;;  %12187 = vst [vmem:[#allocation40_spill] sm:$0xff] %v7389_v21  ;;  %v7393_v25 = vmul.f32 %v7181_v6, %v12181_v44  ;;  %v7397_v33 = vmul.f32 %v7181_v6, %v12183_v42  ;;  %v7404_v39 = vld [vmem:[%s11436_s1 + $0x5] ss:$0 sm:$0xff]  ;;  %v5120_v36 = vld [vmem:[%s5319_s17 + $0x148] sm:$0xff] }
 0x27e   : > { %12185 = vst [vmem:[#allocation197_spill] sm:$0xff] %v7375_v7  ;;  %v1237_v45 = vmul.f32 %v6875_v47, %v12190_v23  ;;  %v7409_v61 = vmul.f32 %v6574_v2, %v12181_v44  ;;  %v3186_v56 = vmul.f32 %v7205_v10, %v12190_v23  ;;  %v12192_v38 = vld [vmem:[#allocation83_spill] sm:$0xff]  ;;  %v7416_v7 = vadd.f32 %v1235_v26, %v6903_v59  ;;  %v5119_v21 = vld [vmem:[%s5319_s17 + $0x140] sm:$0xff]  ;;  %v7434_v59 = vpop.permute.xlu1 %2272 }
 0x27f   : > { %12188 = vst [vmem:[#allocation198_spill] sm:$0xff] %v7393_v25  ;;  %12189 = vst [vmem:[#allocation199_spill] sm:$0xff] %v7397_v33  ;;  %v1236_v27 = vmul.f32 %v6875_v47, %v12192_v38  ;;  %v7421_v49 = vmul.f32 %v6574_v2, %v12183_v42  ;;  %v3185_v41 = vmul.f32 %v7205_v10, %v12192_v38  ;;  %2960 = vperm.xlu1 %5262, %v5120_v36   ;;  %v12205_v36 = vld [vmem:[#allocation85_spill] sm:$0xff] }
 0x280   : > { %12191 = vst [vmem:[#allocation82_spill] sm:$0xff] %v7409_v61  ;;  %12193 = vst [vmem:[#allocation83_spill] sm:$0xff] %v7416_v7  ;;  %v7426_v44 = vadd.f32 %v3184_v57, %v6907_v30  ;;  %v7429_v61 = vadd.f32 %v1234_v55, %v6880_v54  ;;  %v7432_v25 = vadd.f32 %v3183_v16, %v6884_v3  ;;  %v7446_v57 = vpop.permute.xlu0 %2099  ;;  %v12202_v3 = vld [vmem:[#allocation157_spill] sm:$0xff]  ;;  %2955 = vperm.xlu0 %5261, %v5119_v21  }
 0x281   : > { %12194 = vst [vmem:[#allocation200_spill] sm:$0xff] %v7421_v49  ;;  %12196 = vst [vmem:[#allocation202_spill] sm:$0xff] %v7434_v59  ;;  %v7438_v26 = vmul.f32 %v7181_v6, %v12190_v23  ;;  %v7442_v42 = vmul.f32 %v7181_v6, %v12192_v38  ;;  %v12199_v49 = vld [vmem:[#allocation84_spill] sm:$0xff]  ;;  %v7450_v54 = vmul.f32 %v6574_v2, %v12190_v23 }
 0x282   : > { %12195 = vst [vmem:[#allocation201_spill] sm:$0xff] %v7426_v44  ;;  %v1436_v30 = vmul.f32 %v7404_v39, %v12199_v49  ;;  %12200 = vst [vmem:[#allocation84_spill] sm:$0xff] %v7446_v57  ;;  %v3215_v55 = vmul.f32 %v12202_v3, %v12199_v49  ;;  %v4133_v16 = vmul.f32 %v7205_v10, %v12199_v49  ;;  %v12207_v44 = vld [vmem:[#allocation43_spill] sm:$0xff] }
 0x283   : > { %12197 = vst [vmem:[#allocation203_spill] sm:$0xff] %v7438_v26  ;;  %12198 = vst [vmem:[#allocation204_spill] sm:$0xff] %v7442_v42  ;;  %v7457_v59 = vadd.f32 %v1237_v45, %v6927_v58  ;;  %v5122_v26 = vld [vmem:[%s5319_s17 + $0x158] sm:$0xff]  ;;  %v7462_v42 = vmul.f32 %v6574_v2, %v12192_v38  ;;  %v1238_v57 = vmul.f32 %v6875_v47, %v12205_v36  ;;  %v5121_v58 = vld [vmem:[%s5319_s17 + $0x150] sm:$0xff] }
 0x284   : > { %12201 = vst [vmem:[#allocation205_spill] sm:$0xff] %v7450_v54  ;;  %v3187_v23 = vmul.f32 %v7205_v10, %v12205_v36  ;;  %v7469_v54 = vadd.f32 %v3186_v56, %v6931_v22  ;;  %v7472_v7 = vadd.f32 %v1236_v27, %v12207_v44  ;;  %v7477_v21 = vmul.f32 %v6875_v47, %v12199_v49  ;;  %v12209_v38 = vld [vmem:[#allocation86_spill] sm:$0xff]  ;;  %v7488_v22 = vpop.permute.xlu1 %2282 }
 0x285   : > { %12203 = vst [vmem:[#allocation157_spill] sm:$0xff] %v7457_v59  ;;  %12204 = vst [vmem:[#allocation206_spill] sm:$0xff] %v7462_v42  ;;  %v7481_v45 = vmul.f32 %v7181_v6, %v12205_v36  ;;  %v1438_v42 = vmul.f32 %v7404_v39, %v12209_v38  ;;  %v12210_v59 = vld [vmem:[#allocation44_spill] sm:$0xff]  ;;  %v3217_v56 = vmul.f32 %v12202_v3, %v12209_v38  ;;  %v7497_v6 = vpop.permute.xlu0 %2277  ;;  %2970 = vperm.xlu1 %5262, %v5122_v26   ;;  %v7508_v3 = vld [vmem:[%s11436_s1 + $0x2] ss:$0 sm:$0xff] }
 0x286   : > { %12206 = vst [vmem:[#allocation85_spill] sm:$0xff] %v7469_v54  ;;  %12208 = vst [vmem:[#allocation43_spill] sm:$0xff] %v7477_v21  ;;  %v7486_v33 = vadd.f32 %v3185_v41, %v12210_v59  ;;  %v4135_v49 = vmul.f32 %v7205_v10, %v12209_v38  ;;  %v7495_v27 = vadd.f32 %v1436_v30, %v6969_v50  ;;  %v12215_v41 = vld [vmem:[#allocation87_spill] sm:$0xff]  ;;  %2965 = vperm.xlu0 %5261, %v5121_v58   ;;  %v12217_v30 = vld [vmem:[#allocation49_spill] sm:$0xff] }
 0x287   : > { %12211 = vst [vmem:[#allocation86_spill] sm:$0xff] %v7488_v22  ;;  %12213 = vst [vmem:[#allocation207_spill] sm:$0xff] %v7497_v6  ;;  %v7501_v44 = vmul.f32 %v6574_v2, %v12205_v36  ;;  %v1437_v59 = vmul.f32 %v7404_v39, %v12215_v41  ;;  %v3216_v21 = vmul.f32 %v7508_v3, %v12215_v41  ;;  %v5124_v26 = vld [vmem:[%s5319_s17 + $0x168] sm:$0xff] }
 0x288   : > { %12212 = vst [vmem:[#allocation44_spill] sm:$0xff] %v7495_v27  ;;  %v7513_v50 = vadd.f32 %v3215_v55, %v6972_v31  ;;  %v7517_v6 = vadd.f32 %v4133_v16, %v12217_v30  ;;  %v7521_v2 = vmul.f32 %v6875_v47, %v12209_v38  ;;  %v4134_v36 = vmul.f32 %v7205_v10, %v12215_v41  ;;  %v12221_v27 = vld [vmem:[#allocation46_spill] sm:$0xff]  ;;  %v12223_v16 = vld [vmem:[#allocation88_spill] sm:$0xff] }
 0x289   : > { %12214 = vst [vmem:[#allocation208_spill] sm:$0xff] %v7501_v44  ;;  %v12220_v44 = vld [vmem:[#allocation45_spill] sm:$0xff]  ;;  %v7529_v54 = vadd.f32 %v3187_v23, %v12221_v27  ;;  %v5123_v31 = vld [vmem:[%s5319_s17 + $0x160] sm:$0xff]  ;;  %v7534_v55 = vmul.f32 %v6875_v47, %v12215_v41  ;;  %v1440_v58 = vmul.f32 %v7404_v39, %v12223_v16  ;;  %v3219_v38 = vmul.f32 %v7508_v3, %v12223_v16 }
 0x28a   : > { %12216 = vst [vmem:[#allocation87_spill] sm:$0xff] %v7513_v50  ;;  %12218 = vst [vmem:[#allocation49_spill] sm:$0xff] %v7517_v6  ;;  %v7526_v22 = vadd.f32 %v1238_v57, %v12220_v44  ;;  %v7541_v30 = vadd.f32 %v1438_v42, %v7010_v35  ;;  %v7543_v57 = vpop.permute.xlu1 %2292  ;;  %v4137_v23 = vmul.f32 %v7205_v10, %v12223_v16  ;;  %v12226_v27 = vld [vmem:[#allocation89_spill] sm:$0xff]  ;;  %v7552_v6 = vpop.permute.xlu0 %2287  ;;  %2980 = vperm.xlu1 %5262, %v5124_v26  }
 0x28b   : > { %12219 = vst [vmem:[#allocation209_spill] sm:$0xff] %v7521_v2  ;;  %12222 = vst [vmem:[#allocation45_spill] sm:$0xff] %v7534_v55  ;;  %v1439_v44 = vmul.f32 %v7404_v39, %v12226_v27  ;;  %v7550_v41 = vadd.f32 %v3217_v56, %v7013_v37  ;;  %v7555_v55 = vadd.f32 %v4135_v49, %v6981_v1  ;;  %v12229_v2 = vld [vmem:[#allocation53_spill] sm:$0xff]  ;;  %2975 = vperm.xlu0 %5261, %v5123_v31   ;;  %v12233_v49 = vld [vmem:[#allocation90_spill] sm:$0xff] }
 0x28c   : > { %12224 = vst [vmem:[#allocation46_spill] sm:$0xff] %v7541_v30  ;;  %12225 = vst [vmem:[#allocation88_spill] sm:$0xff] %v7543_v57  ;;  %v3218_v35 = vmul.f32 %v7508_v3, %v12226_v27  ;;  %v4136_v42 = vmul.f32 %v7205_v10, %v12226_v27  ;;  %v7562_v57 = vadd.f32 %v1437_v59, %v12229_v2  ;;  %v12230_v30 = vld [vmem:[#allocation54_spill] sm:$0xff]  ;;  %v5126_v37 = vld [vmem:[%s5319_s17 + $0x178] sm:$0xff] }
 0x28d   : > { %12227 = vst [vmem:[#allocation89_spill] sm:$0xff] %v7552_v6  ;;  %12228 = vst [vmem:[#allocation210_spill] sm:$0xff] %v7555_v55  ;;  %v7565_v50 = vadd.f32 %v3216_v21, %v12230_v30  ;;  %v7570_v56 = vmul.f32 %v6875_v47, %v12223_v16  ;;  %v7574_v1 = vmul.f32 %v6875_v47, %v12226_v27  ;;  %v5125_v55 = vld [vmem:[%s5319_s17 + $0x170] sm:$0xff]  ;;  %v12237_v27 = vld [vmem:[#allocation91_spill] sm:$0xff] }
 0x28e   : > { %v1442_v26 = vmul.f32 %v7404_v39, %v12233_v49  ;;  %v12234_v6 = vld [vmem:[#allocation48_spill] sm:$0xff]  ;;  %v3221_v21 = vmul.f32 %v7508_v3, %v12233_v49  ;;  %v4139_v2 = vmul.f32 %v7205_v10, %v12233_v49  ;;  %v7587_v31 = vadd.f32 %v1440_v58, %v7050_v14  ;;  %v7592_v30 = vpop.permute.xlu1 %2302  ;;  %2990 = vperm.xlu1 %5262, %v5126_v37  }
 0x28f   : > { %12231 = vst [vmem:[#allocation53_spill] sm:$0xff] %v7570_v56  ;;  %12232 = vst [vmem:[#allocation54_spill] sm:$0xff] %v7574_v1  ;;  %v7580_v59 = vadd.f32 %v4134_v36, %v12234_v6  ;;  %v7590_v16 = vadd.f32 %v3219_v38, %v7053_v12  ;;  %v1441_v1 = vmul.f32 %v7404_v39, %v12237_v27  ;;  %v12241_v38 = vld [vmem:[#allocation60_spill] sm:$0xff]  ;;  %2985 = vperm.xlu0 %5261, %v5125_v55  }
 0x290   : > { %12236 = vst [vmem:[#allocation48_spill] sm:$0xff] %v7592_v30  ;;  %v3220_v6 = vmul.f32 %v7508_v3, %v12237_v27  ;;  %v7599_v36 = vadd.f32 %v1439_v44, %v7004_v48  ;;  %v7604_v14 = vadd.f32 %v4137_v23, %v7022_v60  ;;  %v7608_v12 = vmul.f32 %v6875_v47, %v12233_v49  ;;  %v5128_v30 = vld [vmem:[%s5319_s17 + $0x188] sm:$0xff]  ;;  %v12245_v60 = vld [vmem:[#allocation92_spill] sm:$0xff] }
 0x291   : > { %12235 = vst [vmem:[#allocation90_spill] sm:$0xff] %v7580_v59  ;;  %v7601_v59 = vpop.permute.xlu0 %2297  ;;  %v4138_v58 = vmul.f32 %v7205_v10, %v12237_v27  ;;  %v7613_v56 = vadd.f32 %v3218_v35, %v12241_v38  ;;  %v12242_v48 = vld [vmem:[#allocation55_spill] sm:$0xff]  ;;  %v7621_v37 = vmul.f32 %v6875_v47, %v12237_v27  ;;  %v1444_v23 = vmul.f32 %v7404_v39, %v12245_v60  ;;  %v5127_v35 = vld [vmem:[%s5319_s17 + $0x180] sm:$0xff] }
 0x292   : > { %12238 = vst [vmem:[#allocation91_spill] sm:$0xff] %v7601_v59  ;;  %12239 = vst [vmem:[#allocation211_spill] sm:$0xff] %v7604_v14  ;;  %v7617_v44 = vadd.f32 %v4136_v42, %v12242_v48  ;;  %v3223_v49 = vmul.f32 %v7508_v3, %v12245_v60  ;;  %v7628_v14 = vadd.f32 %v1442_v26, %v7090_v11  ;;  %v12246_v42 = vld [vmem:[#allocation93_spill] sm:$0xff]  ;;  %v7638_v48 = vpop.permute.xlu1 %2312  ;;  %3000 = vperm.xlu1 %5262, %v5128_v30  }
 0x293   : > { %12240 = vst [vmem:[#allocation212_spill] sm:$0xff] %v7608_v12  ;;  %12244 = vst [vmem:[#allocation55_spill] sm:$0xff] %v7621_v37  ;;  %v4141_v55 = vmul.f32 %v7205_v10, %v12245_v60  ;;  %v1443_v38 = vmul.f32 %v7404_v39, %v12246_v42  ;;  %v7636_v27 = vadd.f32 %v3221_v21, %v7093_v4  ;;  %2995 = vperm.xlu0 %5261, %v5127_v35  }
 0x294   : > { %12243 = vst [vmem:[#allocation60_spill] sm:$0xff] %v7617_v44  ;;  %12247 = vst [vmem:[#allocation92_spill] sm:$0xff] %v7638_v48  ;;  %v7641_v44 = vadd.f32 %v4139_v2, %v7063_v53  ;;  %v3222_v11 = vmul.f32 %v7508_v3, %v12246_v42  ;;  %v4140_v26 = vmul.f32 %v7205_v10, %v12246_v42  ;;  %v12252_v2 = vld [vmem:[#allocation94_spill] sm:$0xff] }
 0x295   : > { %v7648_v37 = vadd.f32 %v1441_v1, %v7044_v52  ;;  %v7651_v12 = vadd.f32 %v3220_v6, %v7047_v43  ;;  %v7653_v4 = vpop.permute.xlu0 %2307  ;;  %v7657_v53 = vmul.f32 %v6875_v47, %v12245_v60  ;;  %v7661_v21 = vmul.f32 %v6875_v47, %v12246_v42  ;;  %v5130_v52 = vld [vmem:[%s5319_s17 + $0x198] sm:$0xff]  ;;  %v5129_v42 = vld [vmem:[%s5319_s17 + $0x190] sm:$0xff] }
 0x296   : > { %12248 = vst [vmem:[#allocation93_spill] sm:$0xff] %v7641_v44  ;;  %12249 = vst [vmem:[#allocation213_spill] sm:$0xff] %v7653_v4  ;;  %v1446_v44 = vmul.f32 %v7404_v39, %v12252_v2  ;;  %v12253_v1 = vld [vmem:[#allocation61_spill] sm:$0xff]  ;;  %v3225_v43 = vmul.f32 %v7508_v3, %v12252_v2  ;;  %v4143_v30 = vmul.f32 %v7205_v10, %v12252_v2  ;;  %3010 = vperm.xlu1 %5262, %v5130_v52  }
 0x297   : > { %12250 = vst [vmem:[#allocation214_spill] sm:$0xff] %v7657_v53  ;;  %12251 = vst [vmem:[#allocation215_spill] sm:$0xff] %v7661_v21  ;;  %v7667_v48 = vadd.f32 %v4138_v58, %v12253_v1  ;;  %v7674_v6 = vadd.f32 %v1444_v23, %v7131_v17  ;;  %v7677_v60 = vadd.f32 %v3223_v49, %v7134_v9  ;;  %v12255_v21 = vld [vmem:[#allocation95_spill] sm:$0xff]  ;;  %v12259_v23 = vld [vmem:[#allocation66_spill] sm:$0xff]  ;;  %3005 = vperm.xlu0 %5261, %v5129_v42  }
 0x298   : > { %v1445_v35 = vmul.f32 %v7404_v39, %v12255_v21  ;;  %v3224_v58 = vmul.f32 %v7508_v3, %v12255_v21  ;;  %v7685_v1 = vadd.f32 %v1443_v38, %v7084_v8  ;;  %v7690_v53 = vadd.f32 %v4141_v55, %v7103_v32  ;;  %v12261_v8 = vld [vmem:[#allocation169_spill] sm:$0xff]  ;;  %v12264_v55 = vld [vmem:[#allocation96_spill] sm:$0xff] }
 0x299   : > { %12254 = vst [vmem:[#allocation94_spill] sm:$0xff] %v7667_v48  ;;  %v7687_v48 = vpop.permute.xlu1 %2322  ;;  %v7694_v9 = vmul.f32 %v6875_v47, %v12252_v2  ;;  %v4142_v17 = vmul.f32 %v7205_v10, %v12255_v21  ;;  %v7699_v49 = vadd.f32 %v3222_v11, %v12259_v23  ;;  %v7701_v4 = vpop.permute.xlu0 %2317  ;;  %v7704_v38 = vadd.f32 %v4140_v26, %v12261_v8  ;;  %v5132_v11 = vld [vmem:[%s5319_s17 + $0x1a8] sm:$0xff]  ;;  %v12265_v26 = vld [vmem:[#allocation97_spill] sm:$0xff]  ;;  %v5131_v8 = vld [vmem:[%s5319_s17 + $0x1a0] sm:$0xff] }
 0x29a   : > { %12256 = vst [vmem:[#allocation61_spill] sm:$0xff] %v7687_v48  ;;  %12257 = vst [vmem:[#allocation95_spill] sm:$0xff] %v7690_v53  ;;  %v7708_v32 = vmul.f32 %v6875_v47, %v12255_v21  ;;  %v1448_v2 = vmul.f32 %v7404_v39, %v12264_v55  ;;  %v3227_v53 = vmul.f32 %v7508_v3, %v12264_v55  ;;  %3020 = vperm.xlu1 %5262, %v5132_v11   ;;  %v12280_v48 = vld [vmem:[#allocation180_spill] sm:$0xff] }
 0x29b   : > { %12258 = vst [vmem:[#allocation216_spill] sm:$0xff] %v7694_v9  ;;  %12260 = vst [vmem:[#allocation66_spill] sm:$0xff] %v7701_v4  ;;  %v7715_v9 = vadd.f32 %v1446_v44, %v7172_v19  ;;  %v4145_v52 = vmul.f32 %v7205_v10, %v12264_v55  ;;  %v1447_v23 = vmul.f32 %v7404_v39, %v12265_v26  ;;  %3015 = vperm.xlu0 %5261, %v5131_v8   ;;  %v12283_v8 = vld [vmem:[#allocation178_spill] sm:$0xff] }
 0x29c   : > { %12262 = vst [vmem:[#allocation169_spill] sm:$0xff] %v7704_v38  ;;  %12263 = vst [vmem:[#allocation217_spill] sm:$0xff] %v7708_v32  ;;  %v7723_v21 = vadd.f32 %v3225_v43, %v7175_v18  ;;  %v7727_v38 = vadd.f32 %v4143_v30, %v7143_v24  ;;  %v3226_v32 = vmul.f32 %v7508_v3, %v12265_v26  ;;  %v12271_v43 = vld [vmem:[#allocation98_spill] sm:$0xff] }
 0x29d   : > { %v4144_v19 = vmul.f32 %v7205_v10, %v12265_v26  ;;  %v7734_v44 = vadd.f32 %v1445_v35, %v7125_v0  ;;  %v7737_v42 = vadd.f32 %v3224_v58, %v7128_v5  ;;  %v7739_v4 = vpop.permute.xlu1 %2332  ;;  %v7743_v24 = vmul.f32 %v6875_v47, %v12264_v55  ;;  %v12273_v0 = vld [vmem:[#allocation172_spill] sm:$0xff] }
 0x29e   : > { %12266 = vst [vmem:[#allocation96_spill] sm:$0xff] %v7723_v21  ;;  %12267 = vst [vmem:[#allocation97_spill] sm:$0xff] %v7727_v38  ;;  %v7747_v18 = vmul.f32 %v6875_v47, %v12265_v26  ;;  %v1450_v30 = vmul.f32 %v7404_v39, %v12271_v43  ;;  %v7751_v38 = vpop.permute.xlu0 %2327  ;;  %v7754_v5 = vadd.f32 %v4142_v17, %v12273_v0  ;;  %v12276_v26 = vld [vmem:[#allocation184_spill] sm:$0xff]  ;;  %v12279_v0 = vld [vmem:[#allocation71_spill] sm:$0xff] }
 0x29f   : > { %12268 = vst [vmem:[#allocation218_spill] sm:$0xff] %v7739_v4  ;;  %12269 = vst [vmem:[#allocation219_spill] sm:$0xff] %v7743_v24  ;;  %v3229_v35 = vmul.f32 %v7508_v3, %v12271_v43  ;;  %v4147_v58 = vmul.f32 %v7205_v10, %v12271_v43  ;;  %v7761_v55 = vadd.f32 %v1448_v2, %v7222_v34  ;;  %v5134_v24 = vld [vmem:[%s5319_s17 + $0x1b8] sm:$0xff]  ;;  %v12278_v4 = vld [vmem:[#allocation99_spill] sm:$0xff] }
 0x2a0   : > { %12270 = vst [vmem:[#allocation220_spill] sm:$0xff] %v7747_v18  ;;  %12272 = vst [vmem:[#allocation98_spill] sm:$0xff] %v7751_v38  ;;  %v7764_v18 = vadd.f32 %v3227_v53, %v12276_v26  ;;  %v1449_v11 = vmul.f32 %v7404_v39, %v12278_v4  ;;  %v3228_v17 = vmul.f32 %v7508_v3, %v12278_v4  ;;  %v5133_v38 = vld [vmem:[%s5319_s17 + $0x1b0] sm:$0xff]  ;;  %3030 = vperm.xlu1 %5262, %v5134_v24  }
 0x2a1   : > { %12274 = vst [vmem:[#allocation172_spill] sm:$0xff] %v7754_v5  ;;  %12275 = vst [vmem:[#allocation221_spill] sm:$0xff] %v7761_v55  ;;  %v7772_v5 = vadd.f32 %v1447_v23, %v12279_v0  ;;  %v7776_v59 = vadd.f32 %v4145_v52, %v12280_v48  ;;  %v4146_v34 = vmul.f32 %v7205_v10, %v12278_v4  ;;  %v12282_v53 = vld [vmem:[#allocation100_spill] sm:$0xff]  ;;  %3025 = vperm.xlu0 %5261, %v5133_v38  }
 0x2a2   : > { %12277 = vst [vmem:[#allocation184_spill] sm:$0xff] %v7764_v18  ;;  %v1452_v2 = vmul.f32 %v7404_v39, %v12282_v53  ;;  %v7783_v26 = vadd.f32 %v3226_v32, %v12283_v8  ;;  %v7785_v18 = vpop.permute.xlu1 %2342  ;;  %v12285_v55 = vld [vmem:[#allocation68_spill] sm:$0xff]  ;;  %v7792_v23 = vmul.f32 %v6875_v47, %v12271_v43  ;;  %v7796_v48 = vmul.f32 %v6875_v47, %v12278_v4  ;;  %v7803_v0 = vpop.permute.xlu0 %2337  ;;  %v5136_v4 = vld [vmem:[%s5319_s17 + $0x1c8] sm:$0xff] }
 0x2a3   : > { %12281 = vst [vmem:[#allocation99_spill] sm:$0xff] %v7776_v59  ;;  %12284 = vst [vmem:[#allocation71_spill] sm:$0xff] %v7785_v18  ;;  %v7788_v21 = vadd.f32 %v4144_v19, %v12285_v55  ;;  %v3231_v52 = vmul.f32 %v7508_v3, %v12282_v53  ;;  %v7801_v32 = vadd.f32 %v1450_v30, %v7262_v13  ;;  %v12291_v55 = vld [vmem:[#allocation101_spill] sm:$0xff]  ;;  %v12293_v59 = vld [vmem:[#allocation187_spill] sm:$0xff] }
 0x2a4   : > { %12287 = vst [vmem:[#allocation100_spill] sm:$0xff] %v7792_v23  ;;  %12288 = vst [vmem:[#allocation178_spill] sm:$0xff] %v7796_v48  ;;  %v4149_v19 = vmul.f32 %v7205_v10, %v12282_v53  ;;  %v1451_v43 = vmul.f32 %v7404_v39, %v12291_v55  ;;  %v7810_v8 = vadd.f32 %v3229_v35, %v7265_v29  ;;  %v12295_v30 = vld [vmem:[#allocation73_spill] sm:$0xff]  ;;  %v12296_v23 = vld [vmem:[#allocation183_spill] sm:$0xff]  ;;  %3040 = vperm.xlu1 %5262, %v5136_v4  }
 0x2a5   : > { %12286 = vst [vmem:[#allocation180_spill] sm:$0xff] %v7788_v21  ;;  %12289 = vst [vmem:[#allocation68_spill] sm:$0xff] %v7801_v32  ;;  %v7814_v21 = vadd.f32 %v4147_v58, %v12293_v59  ;;  %v3230_v13 = vmul.f32 %v7508_v3, %v12291_v55  ;;  %v4148_v24 = vmul.f32 %v7205_v10, %v12291_v55  ;;  %v5135_v18 = vld [vmem:[%s5319_s17 + $0x1c0] sm:$0xff]  ;;  %v12301_v58 = vld [vmem:[#allocation179_spill] sm:$0xff] }
 0x2a6   : > { %12290 = vst [vmem:[#allocation222_spill] sm:$0xff] %v7803_v0  ;;  %12292 = vst [vmem:[#allocation101_spill] sm:$0xff] %v7810_v8  ;;  %v7821_v48 = vadd.f32 %v1449_v11, %v12295_v30  ;;  %v7824_v0 = vadd.f32 %v3228_v17, %v12296_v23  ;;  %v7829_v29 = vmul.f32 %v6875_v47, %v12282_v53  ;;  %v7838_v35 = vpop.permute.xlu1 %2352  ;;  %v12303_v17 = vld [vmem:[#allocation102_spill] sm:$0xff]  ;;  %3035 = vperm.xlu0 %5261, %v5135_v18   ;;  %v12311_v4 = vld [vmem:[#allocation75_spill] sm:$0xff] }
 0x2a7   : > { %12294 = vst [vmem:[#allocation187_spill] sm:$0xff] %v7814_v21  ;;  %v7833_v59 = vmul.f32 %v6875_v47, %v12291_v55  ;;  %v7836_v38 = vadd.f32 %v1452_v2, %v7303_v63  ;;  %12300 = vst [vmem:[#allocation224_spill] sm:$0xff] %v7838_v35  ;;  %v7841_v11 = vadd.f32 %v4146_v34, %v12301_v58  ;;  %v7852_v63 = vpop.permute.xlu0 %2347  ;;  %v12306_v2 = vld [vmem:[#allocation103_spill] sm:$0xff]  ;;  %v12307_v21 = vld [vmem:[#allocation74_spill] sm:$0xff] }
 0x2a8   : > { %12297 = vst [vmem:[#allocation73_spill] sm:$0xff] %v7829_v29  ;;  %v1454_v23 = vmul.f32 %v7404_v39, %v12303_v17  ;;  %v3233_v53 = vmul.f32 %v7508_v3, %v12303_v17  ;;  %v4151_v30 = vmul.f32 %v7205_v10, %v12303_v17  ;;  %v7850_v55 = vadd.f32 %v3231_v52, %v7306_v46  ;;  %v12308_v29 = vld [vmem:[#allocation136_spill] sm:$0xff] }
 0x2a9   : > { %12298 = vst [vmem:[#allocation183_spill] sm:$0xff] %v7833_v59  ;;  %12299 = vst [vmem:[#allocation223_spill] sm:$0xff] %v7836_v38  ;;  %v1453_v34 = vmul.f32 %v7404_v39, %v12306_v2  ;;  %v3232_v58 = vmul.f32 %v7508_v3, %v12306_v2  ;;  %v5138_v59 = vld [vmem:[%s5319_s17 + $0x1d8] sm:$0x3]  ;;  %v7863_v35 = vadd.f32 %v4149_v19, %v12308_v29  ;;  %v12312_v38 = vld [vmem:[#allocation186_spill] sm:$0xff] }
 0x2aa   : > { %12302 = vst [vmem:[#allocation179_spill] sm:$0xff] %v7841_v11  ;;  %12304 = vst [vmem:[#allocation102_spill] sm:$0xff] %v7850_v55  ;;  %v7859_v11 = vadd.f32 %v1451_v43, %v12307_v21  ;;  %v7867_v46 = vmul.f32 %v6875_v47, %v12303_v17  ;;  %v4150_v52 = vmul.f32 %v7205_v10, %v12306_v2  ;;  %v5137_v55 = vld [vmem:[%s5319_s17 + $0x1d0] sm:$0xff]  ;;  %v12317_v17 = vld [vmem:[#allocation105_spill] sm:$0xff]  ;;  %3050 = vperm.xlu1 %5262, %v5138_v59  }
 0x2ab   : > { %12305 = vst [vmem:[#allocation225_spill] sm:$0xff] %v7852_v63  ;;  %12309 = vst [vmem:[#allocation103_spill] sm:$0xff] %v7863_v35  ;;  %v7872_v63 = vadd.f32 %v3230_v13, %v12311_v4  ;;  %v7876_v8 = vadd.f32 %v4148_v24, %v12312_v38  ;;  %v7880_v21 = vmul.f32 %v6875_v47, %v12306_v2  ;;  %v12315_v18 = vld [vmem:[#allocation104_spill] sm:$0xff]  ;;  %v7888_v13 = vpop.permute.xlu1 %2362  ;;  %v7898_v4 = vpop.permute.xlu0 %2357  ;;  %v12319_v35 = vld [vmem:[#allocation34_spill] sm:$0xff]  ;;  %3045 = vperm.xlu0 %5261, %v5137_v55  }
 0x2ac   : > { %12310 = vst [vmem:[#allocation74_spill] sm:$0xff] %v7867_v46  ;;  %v1456_v19 = vmul.f32 %v7404_v39, %v12315_v18  ;;  %v3235_v43 = vmul.f32 %v7508_v3, %v12315_v18  ;;  %v4153_v29 = vmul.f32 %v7205_v10, %v12315_v18  ;;  %12316 = vst [vmem:[#allocation186_spill] sm:$0xff] %v7888_v13  ;;  %v12321_v13 = vld [vmem:[#allocation76_spill] sm:$0xff] }
 0x2ad   : > { %12313 = vst [vmem:[#allocation136_spill] sm:$0xff] %v7876_v8  ;;  %12314 = vst [vmem:[#allocation75_spill] sm:$0xff] %v7880_v21  ;;  %v1455_v24 = vmul.f32 %v7404_v39, %v12317_v17  ;;  %v7893_v38 = vadd.f32 %v1454_v23, %v7344_v15  ;;  %v7896_v2 = vadd.f32 %v3233_v53, %v7347_v51  ;;  %v12322_v15 = vld [vmem:[#allocation77_spill] sm:$0xff]  ;;  %v5140_v51 = vld [vmem:[%s5319_s17 + $0x207] sm:$0xff] }
 0x2ae   : > { %12318 = vst [vmem:[#allocation104_spill] sm:$0xff] %v7898_v4  ;;  %v7901_v8 = vadd.f32 %v4151_v30, %v12319_v35  ;;  %v3234_v21 = vmul.f32 %v7508_v3, %v12317_v17  ;;  %v4152_v46 = vmul.f32 %v7205_v10, %v12317_v17  ;;  %v7908_v32 = vadd.f32 %v1453_v34, %v12321_v13  ;;  %v12325_v53 = vld [vmem:[#allocation106_spill] sm:$0xff]  ;;  %v12326_v4 = vld [vmem:[#allocation35_spill] sm:$0xff] }
 0x2af   : > { %v7911_v23 = vadd.f32 %v3232_v58, %v12322_v15  ;;  %v7916_v59 = vmul.f32 %v6875_v47, %v12315_v18  ;;  %v7920_v35 = vmul.f32 %v6875_v47, %v12317_v17  ;;  %v1458_v30 = vmul.f32 %v7404_v39, %v12325_v53  ;;  %v7936_v13 = vpop.permute.xlu1 %2372  ;;  %v12331_v17 = vld [vmem:[#allocation196_spill] sm:$0xff]  ;;  %3465 = vperm.xlu1 %5262, %v5140_v51  }
 0x2b0   : > { %12320 = vst [vmem:[#allocation105_spill] sm:$0xff] %v7901_v8  ;;  %v5139_v8 = vld [vmem:[%s5319_s17 + $0x1ff] sm:$0xff]  ;;  %v7926_v34 = vadd.f32 %v4150_v52, %v12326_v4  ;;  %v3237_v55 = vmul.f32 %v7508_v3, %v12325_v53  ;;  %v7931_v58 = vadd.f32 %v1456_v19, %v7384_v20  ;;  %v7934_v18 = vadd.f32 %v3235_v43, %v7387_v40  ;;  %v12333_v52 = vld [vmem:[#allocation107_spill] sm:$0xff]  ;;  %v7950_v40 = vpop.permute.xlu0 %2367 }
 0x2b1   : > { %12323 = vst [vmem:[#allocation34_spill] sm:$0xff] %v7916_v59  ;;  %12324 = vst [vmem:[#allocation76_spill] sm:$0xff] %v7920_v35  ;;  %v7939_v15 = vadd.f32 %v4153_v29, %v12331_v17  ;;  %v4155_v35 = vmul.f32 %v7205_v10, %v12325_v53  ;;  %v1457_v4 = vmul.f32 %v7404_v39, %v12333_v52  ;;  %v12334_v20 = vld [vmem:[#allocation79_spill] sm:$0xff]  ;;  %v12336_v29 = vld [vmem:[#allocation108_spill] sm:$0xff]  ;;  %3460 = vperm.xlu0 %5261, %v5139_v8  }
 0x2b2   : > { %12327 = vst [vmem:[#allocation77_spill] sm:$0xff] %v7926_v34  ;;  %12328 = vst [vmem:[#allocation106_spill] sm:$0xff] %v7931_v58  ;;  %v3236_v34 = vmul.f32 %v7508_v3, %v12333_v52  ;;  %v7948_v19 = vadd.f32 %v1455_v24, %v12334_v20  ;;  %v4154_v43 = vmul.f32 %v7205_v10, %v12333_v52 }
 0x2b3   : > { %12329 = vst [vmem:[#allocation35_spill] sm:$0xff] %v7934_v18  ;;  %12330 = vst [vmem:[#allocation226_spill] sm:$0xff] %v7936_v13  ;;  %v1460_v17 = vmul.f32 %v7404_v39, %v12336_v29  ;;  %v5142_v13 = vld [vmem:[%s5319_s17 + $0x217] sm:$0xff]  ;;  %v7965_v24 = vmul.f32 %v6875_v47, %v12325_v53  ;;  %v7969_v51 = vmul.f32 %v6875_v47, %v12333_v52  ;;  %v7986_v52 = vpop.permute.xlu1 %2382 }
 0x2b4   : > { %12332 = vst [vmem:[#allocation196_spill] sm:$0xff] %v7939_v15  ;;  %12335 = vst [vmem:[#allocation107_spill] sm:$0xff] %v7950_v40  ;;  %v12337_v15 = vld [vmem:[#allocation195_spill] sm:$0xff]  ;;  %v12338_v18 = vld [vmem:[#allocation36_spill] sm:$0xff]  ;;  %v3239_v20 = vmul.f32 %v7508_v3, %v12336_v29  ;;  %v7974_v40 = vadd.f32 %v1458_v30, %v7429_v61  ;;  %v4157_v8 = vmul.f32 %v7205_v10, %v12336_v29  ;;  %3475 = vperm.xlu1 %5262, %v5142_v13  }
 0x2b5   : > { %v7957_v59 = vadd.f32 %v3234_v21, %v12337_v15  ;;  %v7961_v58 = vadd.f32 %v4152_v46, %v12338_v18  ;;  %12340 = vst [vmem:[#allocation108_spill] sm:$0xff] %v7965_v24  ;;  %12341 = vst [vmem:[#allocation195_spill] sm:$0xff] %v7969_v51  ;;  %v5141_v21 = vld [vmem:[%s5319_s17 + $0x20f] sm:$0xff]  ;;  %v12343_v46 = vld [vmem:[#allocation109_spill] sm:$0xff]  ;;  %v7984_v15 = vadd.f32 %v3237_v55, %v7432_v25  ;;  %v7996_v51 = vpop.permute.xlu0 %2377 }
 0x2b6   : > { %12342 = vst [vmem:[#allocation36_spill] sm:$0xff] %v7974_v40  ;;  %v1459_v18 = vmul.f32 %v7404_v39, %v12343_v46  ;;  %v3238_v53 = vmul.f32 %v7508_v3, %v12343_v46  ;;  %12344 = vst [vmem:[#allocation109_spill] sm:$0xff] %v7986_v52  ;;  %v4156_v61 = vmul.f32 %v7205_v10, %v12343_v46  ;;  %v12346_v24 = vld [vmem:[#allocation199_spill] sm:$0xff]  ;;  %3470 = vperm.xlu0 %5261, %v5141_v21  }
 0x2b7   : > { %12339 = vst [vmem:[#allocation79_spill] sm:$0xff] %v7961_v58  ;;  %v7991_v30 = vadd.f32 %v1457_v4, %v7378_v62  ;;  %v7994_v58 = vadd.f32 %v3236_v34, %v7381_v28  ;;  %12345 = vst [vmem:[#allocation227_spill] sm:$0xff] %v7996_v51  ;;  %v7999_v40 = vadd.f32 %v4155_v35, %v12346_v24  ;;  %v8012_v62 = vld [vmem:[%s11436_s1 + $0x6] ss:$0 sm:$0xff]  ;;  %v5144_v34 = vld [vmem:[%s5319_s17 + $0x227] sm:$0xff] }
 0x2b8   : > { %v8003_v25 = vmul.f32 %v6875_v47, %v12336_v29  ;;  %v8007_v55 = vmul.f32 %v6875_v47, %v12343_v46  ;;  %v8015_v28 = vadd.f32 %v1460_v17, %v7472_v7  ;;  %v12350_v35 = vld [vmem:[#allocation39_spill] sm:$0xff]  ;;  %v12352_v4 = vld [vmem:[#allocation110_spill] sm:$0xff]  ;;  %v12357_v51 = vld [vmem:[#allocation204_spill] sm:$0xff]  ;;  %3485 = vperm.xlu1 %5262, %v5144_v34  }
 0x2b9   : > { %12347 = vst [vmem:[#allocation199_spill] sm:$0xff] %v7999_v40  ;;  %v8019_v13 = vadd.f32 %v4154_v43, %v12350_v35  ;;  %v1462_v29 = vmul.f32 %v7404_v39, %v12352_v4  ;;  %v3241_v24 = vmul.f32 %v7508_v3, %v12352_v4  ;;  %v4159_v46 = vmul.f32 %v7205_v10, %v12352_v4  ;;  %v12353_v7 = vld [vmem:[#allocation111_spill] sm:$0xff]  ;;  %v12355_v43 = vld [vmem:[#allocation201_spill] sm:$0xff] }
 0x2ba   : > { %12348 = vst [vmem:[#allocation228_spill] sm:$0xff] %v8003_v25  ;;  %12349 = vst [vmem:[#allocation229_spill] sm:$0xff] %v8007_v55  ;;  %v8028_v40 = vadd.f32 %v3239_v20, %v7486_v33  ;;  %v5143_v55 = vld [vmem:[%s5319_s17 + $0x21f] sm:$0xff]  ;;  %v1461_v17 = vmul.f32 %v7404_v39, %v12353_v7  ;;  %v12354_v21 = vld [vmem:[#allocation83_spill] sm:$0xff]  ;;  %v8037_v35 = vadd.f32 %v3238_v53, %v12355_v43 }
 0x2bb   : > { %12351 = vst [vmem:[#allocation39_spill] sm:$0xff] %v8019_v13  ;;  %v8034_v25 = vadd.f32 %v1459_v18, %v12354_v21  ;;  %v8039_v13 = vpop.permute.xlu1 %2392  ;;  %v8042_v52 = vadd.f32 %v4157_v8, %v12357_v51  ;;  %v3240_v33 = vmul.f32 %v7508_v3, %v12353_v7  ;;  %v4158_v20 = vmul.f32 %v7205_v10, %v12353_v7  ;;  %v12359_v39 = vld [vmem:[#allocation112_spill] sm:$0xff]  ;;  %v8050_v21 = vpop.permute.xlu0 %2387  ;;  %v12361_v53 = vld [vmem:[#allocation198_spill] sm:$0xff]  ;;  %v12364_v8 = vld [vmem:[#allocation113_spill] sm:$0xff] }
 0x2bc   : > { %12356 = vst [vmem:[#allocation110_spill] sm:$0xff] %v8039_v13  ;;  %v1661_v18 = vmul.f32 %v8012_v62, %v12359_v39  ;;  %12360 = vst [vmem:[#allocation83_spill] sm:$0xff] %v8050_v21  ;;  %v8053_v43 = vadd.f32 %v4156_v61, %v12361_v53  ;;  %v8057_v51 = vmul.f32 %v6875_v47, %v12352_v4  ;;  %v8062_v3 = vld [vmem:[%s11436_s1 + $0x3] ss:$0 sm:$0xff]  ;;  %3480 = vperm.xlu0 %5261, %v5143_v55   ;;  %v5146_v61 = vld [vmem:[%s5319_s17 + $0x237] sm:$0xff] }
 0x2bd   : > { %12358 = vst [vmem:[#allocation111_spill] sm:$0xff] %v8042_v52  ;;  %v3270_v10 = vmul.f32 %v8062_v3, %v12359_v39  ;;  %v1660_v52 = vmul.f32 %v8012_v62, %v12364_v8  ;;  %v3269_v34 = vmul.f32 %v8062_v3, %v12364_v8  ;;  %v8073_v4 = vmul.f32 %v6875_v47, %v12353_v7  ;;  %v12367_v21 = vld [vmem:[#allocation114_spill] sm:$0xff]  ;;  %v12368_v8 = vld [vmem:[#allocation115_spill] sm:$0xff]  ;;  %v12369_v7 = vld [vmem:[#allocation157_spill] sm:$0xff] }
 0x2be   : > { %12362 = vst [vmem:[#allocation201_spill] sm:$0xff] %v8053_v43  ;;  %12363 = vst [vmem:[#allocation204_spill] sm:$0xff] %v8057_v51  ;;  %v8076_v53 = vadd.f32 %v1462_v29, %v7526_v22  ;;  %v8079_v43 = vadd.f32 %v3241_v24, %v7529_v54  ;;  %v5145_v51 = vld [vmem:[%s5319_s17 + $0x22f] sm:$0xff]  ;;  %v8083_v39 = vadd.f32 %v4159_v46, %v7481_v45  ;;  %v12372_v24 = vld [vmem:[#allocation85_spill] sm:$0xff]  ;;  %3495 = vperm.xlu1 %5262, %v5146_v61  }
 0x2bf   : > { %12365 = vst [vmem:[#allocation112_spill] sm:$0xff] %v8073_v4  ;;  %v1663_v13 = vmul.f32 %v8012_v62, %v12367_v21  ;;  %v3272_v55 = vmul.f32 %v8062_v3, %v12367_v21  ;;  %v1662_v47 = vmul.f32 %v8012_v62, %v12368_v8  ;;  %v8092_v22 = vadd.f32 %v1461_v17, %v12369_v7  ;;  %v8094_v29 = vpop.permute.xlu1 %2402  ;;  %v12374_v21 = vld [vmem:[#allocation203_spill] sm:$0xff]  ;;  %v12376_v7 = vld [vmem:[#allocation44_spill] sm:$0xff] }
 0x2c0   : > { %12366 = vst [vmem:[#allocation198_spill] sm:$0xff] %v8083_v39  ;;  %12370 = vst [vmem:[#allocation113_spill] sm:$0xff] %v8094_v29  ;;  %v8097_v54 = vadd.f32 %v1661_v18, %v7562_v57  ;;  %v3271_v45 = vmul.f32 %v8062_v3, %v12368_v8  ;;  %v8102_v46 = vadd.f32 %v3240_v33, %v12372_v24  ;;  %v8104_v39 = vpop.permute.xlu0 %2397  ;;  %v12377_v57 = vld [vmem:[#allocation87_spill] sm:$0xff]  ;;  %3490 = vperm.xlu0 %5261, %v5145_v51   ;;  %v12379_v24 = vld [vmem:[#allocation117_spill] sm:$0xff] }
 0x2c1   : > { %12373 = vst [vmem:[#allocation115_spill] sm:$0xff] %v8104_v39  ;;  %v8107_v4 = vadd.f32 %v4158_v20, %v12374_v21  ;;  %v8110_v17 = vadd.f32 %v3270_v10, %v7565_v50  ;;  %v8113_v29 = vadd.f32 %v1660_v52, %v12376_v7  ;;  %v8116_v18 = vadd.f32 %v3269_v34, %v12377_v57  ;;  %v5148_v33 = vld [vmem:[%s5319_s17 + $0x247] sm:$0xff]  ;;  %v5147_v21 = vld [vmem:[%s5319_s17 + $0x23f] sm:$0xff] }
 0x2c2   : > { %12371 = vst [vmem:[#allocation114_spill] sm:$0xff] %v8097_v54  ;;  %v12378_v54 = vld [vmem:[#allocation116_spill] sm:$0xff]  ;;  %v1664_v20 = vmul.f32 %v8012_v62, %v12379_v24  ;;  %v3273_v50 = vmul.f32 %v8062_v3, %v12379_v24  ;;  %v12380_v10 = vld [vmem:[#allocation118_spill] sm:$0xff]  ;;  %v8131_v34 = vadd.f32 %v1663_v13, %v7599_v36  ;;  %v8134_v51 = vadd.f32 %v3272_v55, %v7613_v56  ;;  %v12384_v39 = vld [vmem:[#allocation119_spill] sm:$0xff] }
 0x2c3   : > { %12375 = vst [vmem:[#allocation157_spill] sm:$0xff] %v8107_v4  ;;  %v1665_v8 = vmul.f32 %v8012_v62, %v12378_v54  ;;  %v3274_v61 = vmul.f32 %v8062_v3, %v12378_v54  ;;  %v1667_v52 = vmul.f32 %v8012_v62, %v12380_v10  ;;  %v12382_v7 = vld [vmem:[#allocation46_spill] sm:$0xff]  ;;  %v3276_v54 = vmul.f32 %v8062_v3, %v12380_v10  ;;  %v8141_v4 = vpop.permute.xlu1 %2601  ;;  %v12385_v56 = vld [vmem:[#allocation120_spill] sm:$0xff] }
 0x2c4   : > { %12381 = vst [vmem:[#allocation85_spill] sm:$0xff] %v8134_v51  ;;  %v8137_v57 = vadd.f32 %v1662_v47, %v12382_v7  ;;  %12383 = vst [vmem:[#allocation203_spill] sm:$0xff] %v8141_v4  ;;  %v8144_v24 = vadd.f32 %v3271_v45, %v7550_v41  ;;  %v1666_v36 = vmul.f32 %v8012_v62, %v12384_v39  ;;  %v8152_v47 = vpop.permute.xlu0 %2596  ;;  %3505 = vperm.xlu1 %5262, %v5148_v33   ;;  %v12388_v45 = vld [vmem:[#allocation121_spill] sm:$0xff]  ;;  %v5149_v33 = vld [vmem:[%s5319_s17 + $0x24f] sm:$0xff] }
 0x2c5   : > { %v3275_v13 = vmul.f32 %v8062_v3, %v12384_v39  ;;  %v1669_v55 = vmul.f32 %v8012_v62, %v12385_v56  ;;  %12386 = vst [vmem:[#allocation44_spill] sm:$0xff] %v8152_v47  ;;  %v8155_v10 = vadd.f32 %v1665_v8, %v7648_v37  ;;  %v3278_v41 = vmul.f32 %v8062_v3, %v12385_v56  ;;  %v5150_v39 = vld [vmem:[%s5319_s17 + $0x257] sm:$0xff] }
 0x2c6   : > { %v1668_v7 = vmul.f32 %v8012_v62, %v12388_v45  ;;  %v3277_v4 = vmul.f32 %v8062_v3, %v12388_v45  ;;  %3500 = vperm.xlu0 %5261, %v5147_v21   ;;  %v8165_v51 = vadd.f32 %v3274_v61, %v7651_v12  ;;  %v8168_v47 = vadd.f32 %v1664_v20, %v7587_v31  ;;  %v12390_v61 = vld [vmem:[#allocation123_spill] sm:$0xff] }
 0x2c7   : > { %12387 = vst [vmem:[#allocation87_spill] sm:$0xff] %v8155_v10  ;;  %v8171_v37 = vadd.f32 %v3273_v50, %v7590_v16  ;;  %v8174_v8 = vadd.f32 %v1667_v52, %v7685_v1  ;;  %v8178_v56 = vadd.f32 %v3276_v54, %v7699_v49  ;;  %v12389_v10 = vld [vmem:[#allocation122_spill] sm:$0xff]  ;;  %v1670_v31 = vmul.f32 %v8012_v62, %v12390_v61  ;;  %v8186_v20 = vpop.permute.xlu1 %2611 }
 0x2c8   : > { %v1671_v21 = vmul.f32 %v8012_v62, %v12389_v10  ;;  %v3280_v12 = vmul.f32 %v8062_v3, %v12389_v10  ;;  %12391 = vst [vmem:[#allocation116_spill] sm:$0xff] %v8186_v20  ;;  %v8189_v16 = vadd.f32 %v1666_v36, %v7628_v14  ;;  %v8192_v1 = vadd.f32 %v3275_v13, %v7636_v27  ;;  %v8199_v52 = vpop.permute.xlu0 %2606  ;;  %v12393_v27 = vld [vmem:[#allocation124_spill] sm:$0xff] }
 0x2c9   : > { %v8195_v49 = vadd.f32 %v1669_v55, %v7734_v44  ;;  %v3279_v50 = vmul.f32 %v8062_v3, %v12390_v61  ;;  %12392 = vst [vmem:[#allocation117_spill] sm:$0xff] %v8199_v52  ;;  %3515 = vperm.xlu1 %5262, %v5150_v39   ;;  %v8202_v54 = vadd.f32 %v3278_v41, %v7737_v42  ;;  %v5152_v44 = vld [vmem:[%s5319_s17 + $0x267] sm:$0xff]  ;;  %v12394_v55 = vld [vmem:[#allocation125_spill] sm:$0xff] }
 0x2ca   : > { %v8205_v10 = vadd.f32 %v1668_v7, %v7674_v6  ;;  %v8208_v14 = vadd.f32 %v3277_v4, %v7677_v60  ;;  %v1673_v36 = vmul.f32 %v8012_v62, %v12393_v27  ;;  %3510 = vperm.xlu0 %5261, %v5149_v33   ;;  %v3282_v13 = vmul.f32 %v8062_v3, %v12393_v27  ;;  %v12395_v41 = vld [vmem:[#allocation126_spill] sm:$0xff]  ;;  %v12399_v27 = vld [vmem:[#allocation96_spill] sm:$0xff]  ;;  %v12400_v52 = vld [vmem:[#allocation127_spill] sm:$0xff] }
 0x2cb   : > { %v1672_v45 = vmul.f32 %v8012_v62, %v12394_v55  ;;  %v3281_v42 = vmul.f32 %v8062_v3, %v12394_v55  ;;  %v1675_v6 = vmul.f32 %v8012_v62, %v12395_v41  ;;  %v5151_v7 = vld [vmem:[%s5319_s17 + $0x25f] sm:$0xff]  ;;  %v8223_v60 = vadd.f32 %v1671_v21, %v7772_v5  ;;  %v8233_v61 = vpop.permute.xlu1 %2621 }
 0x2cc   : > { %v8226_v4 = vadd.f32 %v3280_v12, %v7783_v26  ;;  %v8229_v39 = vadd.f32 %v1670_v31, %v7715_v9  ;;  %v3284_v33 = vmul.f32 %v8062_v3, %v12395_v41  ;;  %12398 = vst [vmem:[#allocation119_spill] sm:$0xff] %v8233_v61  ;;  %v8236_v55 = vadd.f32 %v3279_v50, %v12399_v27  ;;  %v12401_v26 = vld [vmem:[#allocation128_spill] sm:$0xff]  ;;  %v8244_v9 = vpop.permute.xlu0 %2616  ;;  %v12404_v41 = vld [vmem:[#allocation129_spill] sm:$0xff] }
 0x2cd   : > { %12396 = vst [vmem:[#allocation118_spill] sm:$0xff] %v8223_v60  ;;  %v1674_v5 = vmul.f32 %v8012_v62, %v12400_v52  ;;  %v3283_v21 = vmul.f32 %v8062_v3, %v12400_v52  ;;  %v1677_v12 = vmul.f32 %v8012_v62, %v12401_v26  ;;  %12402 = vst [vmem:[#allocation120_spill] sm:$0xff] %v8244_v9  ;;  %3525 = vperm.xlu1 %5262, %v5152_v44   ;;  %v5154_v52 = vld [vmem:[%s5319_s17 + $0x277] sm:$0xff]  ;;  %v12408_v60 = vld [vmem:[#allocation130_spill] sm:$0xff] }
 0x2ce   : > { %12397 = vst [vmem:[#allocation46_spill] sm:$0xff] %v8226_v4  ;;  %v8247_v31 = vadd.f32 %v1673_v36, %v7821_v48  ;;  %v3286_v50 = vmul.f32 %v8062_v3, %v12401_v26  ;;  %v1676_v27 = vmul.f32 %v8012_v62, %v12404_v41  ;;  %v3285_v61 = vmul.f32 %v8062_v3, %v12404_v41  ;;  %v12405_v4 = vld [vmem:[#allocation221_spill] sm:$0xff]  ;;  %v12406_v44 = vld [vmem:[#allocation184_spill] sm:$0xff] }
 0x2cf   : > { %3520 = vperm.xlu0 %5261, %v5151_v7   ;;  %v8257_v20 = vadd.f32 %v3282_v13, %v7824_v0  ;;  %v8260_v9 = vadd.f32 %v1672_v45, %v12405_v4  ;;  %v8263_v48 = vadd.f32 %v3281_v42, %v12406_v44  ;;  %v8266_v36 = vadd.f32 %v1675_v6, %v7859_v11  ;;  %v5153_v26 = vld [vmem:[%s5319_s17 + $0x26f] sm:$0xff]  ;;  %v8278_v4 = vpop.permute.xlu1 %2631  ;;  %v12412_v11 = vld [vmem:[#allocation101_spill] sm:$0xff] }
 0x2d0   : > { %12403 = vst [vmem:[#allocation121_spill] sm:$0xff] %v8247_v31  ;;  %v8270_v31 = vadd.f32 %v3284_v33, %v7872_v63  ;;  %v1679_v7 = vmul.f32 %v8012_v62, %v12408_v60  ;;  %v3288_v0 = vmul.f32 %v8062_v3, %v12408_v60  ;;  %v12409_v13 = vld [vmem:[#allocation131_spill] sm:$0xff]  ;;  %12410 = vst [vmem:[#allocation123_spill] sm:$0xff] %v8278_v4  ;;  %v12411_v42 = vld [vmem:[#allocation68_spill] sm:$0xff]  ;;  %v8291_v44 = vpop.permute.xlu0 %2626 }
 0x2d1   : > { %v1678_v45 = vmul.f32 %v8012_v62, %v12409_v13  ;;  %v8281_v41 = vadd.f32 %v1674_v5, %v12411_v42  ;;  %v8284_v6 = vadd.f32 %v3283_v21, %v12412_v11  ;;  %v8287_v63 = vadd.f32 %v1677_v12, %v7908_v32  ;;  %12414 = vst [vmem:[#allocation125_spill] sm:$0xff] %v8291_v44  ;;  %v12416_v4 = vld [vmem:[#allocation223_spill] sm:$0xff]  ;;  %v12417_v5 = vld [vmem:[#allocation102_spill] sm:$0xff]  ;;  %v12418_v21 = vld [vmem:[#allocation132_spill] sm:$0xff] }
 0x2d2   : > { %12407 = vst [vmem:[#allocation122_spill] sm:$0xff] %v8270_v31  ;;  %v3287_v33 = vmul.f32 %v8062_v3, %v12409_v13  ;;  %3535 = vperm.xlu1 %5262, %v5154_v52   ;;  %v8294_v60 = vadd.f32 %v3286_v50, %v7911_v23  ;;  %v8297_v31 = vadd.f32 %v1676_v27, %v12416_v4  ;;  %v5156_v32 = vld [vmem:[%s5319_s17 + $0x287] sm:$0xff]  ;;  %v12419_v13 = vld [vmem:[#allocation133_spill] sm:$0xff] }
 0x2d3   : > { %12413 = vst [vmem:[#allocation124_spill] sm:$0xff] %v8287_v63  ;;  %v8300_v42 = vadd.f32 %v3285_v61, %v12417_v5  ;;  %v1681_v11 = vmul.f32 %v8012_v62, %v12418_v21  ;;  %3530 = vperm.xlu0 %5261, %v5153_v26   ;;  %v3290_v12 = vmul.f32 %v8062_v3, %v12418_v21  ;;  %v12420_v50 = vld [vmem:[#allocation134_spill] sm:$0xff]  ;;  %v8325_v44 = vpop.permute.xlu1 %2641 }
 0x2d4   : > { %12415 = vst [vmem:[#allocation126_spill] sm:$0xff] %v8294_v60  ;;  %v1680_v52 = vmul.f32 %v8012_v62, %v12419_v13  ;;  %v3289_v23 = vmul.f32 %v8062_v3, %v12419_v13  ;;  %v1683_v27 = vmul.f32 %v8012_v62, %v12420_v50  ;;  %v5155_v4 = vld [vmem:[%s5319_s17 + $0x27f] sm:$0xff]  ;;  %v8315_v61 = vadd.f32 %v1679_v7, %v7948_v19  ;;  %v12425_v60 = vld [vmem:[#allocation135_spill] sm:$0xff] }
 0x2d5   : > { %v8318_v5 = vadd.f32 %v3288_v0, %v7957_v59  ;;  %v8321_v26 = vadd.f32 %v1678_v45, %v7893_v38  ;;  %v3292_v21 = vmul.f32 %v8062_v3, %v12420_v50  ;;  %12423 = vst [vmem:[#allocation128_spill] sm:$0xff] %v8325_v44  ;;  %v8328_v13 = vadd.f32 %v3287_v33, %v7896_v2  ;;  %v12426_v19 = vld [vmem:[#allocation137_spill] sm:$0xff]  ;;  %v8339_v38 = vld [vmem:[%s11436_s1 + $0x7] ss:$0 sm:$0xff]  ;;  %v8341_v0 = vpop.permute.xlu0 %2636 }
 0x2d6   : > { %12421 = vst [vmem:[#allocation96_spill] sm:$0xff] %v8315_v61  ;;  %v1682_v63 = vmul.f32 %v8012_v62, %v12425_v60  ;;  %v3291_v59 = vmul.f32 %v8062_v3, %v12425_v60  ;;  %v1685_v7 = vmul.f32 %v8012_v62, %v12426_v19  ;;  %12427 = vst [vmem:[#allocation221_spill] sm:$0xff] %v8341_v0  ;;  %3545 = vperm.xlu1 %5262, %v5156_v32   ;;  %v12429_v33 = vld [vmem:[#allocation138_spill] sm:$0xff]  ;;  %v5158_v44 = vld [vmem:[%s5319_s17 + $0x297] sm:$0xff] }
 0x2d7   : > { %12422 = vst [vmem:[#allocation127_spill] sm:$0xff] %v8318_v5  ;;  %12424 = vst [vmem:[#allocation129_spill] sm:$0xff] %v8328_v13  ;;  %v8344_v2 = vadd.f32 %v1681_v11, %v7991_v30  ;;  %v3294_v45 = vmul.f32 %v8062_v3, %v12426_v19  ;;  %v1684_v60 = vmul.f32 %v8012_v62, %v12429_v33  ;;  %3540 = vperm.xlu0 %5261, %v5155_v4   ;;  %v12430_v61 = vld [vmem:[#allocation106_spill] sm:$0xff]  ;;  %v12431_v32 = vld [vmem:[#allocation35_spill] sm:$0xff] }
 0x2d8   : > { %v3293_v50 = vmul.f32 %v8062_v3, %v12429_v33  ;;  %v8354_v5 = vadd.f32 %v3290_v12, %v7994_v58  ;;  %v8357_v0 = vadd.f32 %v1680_v52, %v12430_v61  ;;  %v8360_v30 = vadd.f32 %v3289_v23, %v12431_v32  ;;  %v5157_v19 = vld [vmem:[%s5319_s17 + $0x28f] sm:$0xff]  ;;  %v8374_v58 = vld [vmem:[%s11436_s1 + $0x4] ss:$0 sm:$0xff]  ;;  %v8380_v23 = vpop.permute.xlu1 %2651 }
 0x2d9   : > { %12428 = vst [vmem:[#allocation184_spill] sm:$0xff] %v8344_v2  ;;  %v8363_v11 = vadd.f32 %v1683_v27, %v8034_v25  ;;  %v8367_v2 = vadd.f32 %v3292_v21, %v8037_v35  ;;  %v12433_v13 = vld [vmem:[#allocation139_spill] sm:$0xff]  ;;  %v12434_v52 = vld [vmem:[#allocation140_spill] sm:$0xff]  ;;  %12435 = vst [vmem:[#allocation131_spill] sm:$0xff] %v8380_v23  ;;  %v8386_v61 = vadd.f32 %v3291_v59, %v7984_v15  ;;  %v8393_v32 = vpop.permute.xlu0 %2646 }
 0x2da   : > { %v1884_v4 = vmul.f32 %v8339_v38, %v12433_v13  ;;  %v3323_v12 = vmul.f32 %v8374_v58, %v12433_v13  ;;  %v1686_v25 = vmul.f32 %v8012_v62, %v12434_v52  ;;  %v12436_v27 = vld [vmem:[#allocation36_spill] sm:$0xff]  ;;  %v8389_v21 = vadd.f32 %v1685_v7, %v8092_v22  ;;  %12437 = vst [vmem:[#allocation68_spill] sm:$0xff] %v8393_v32  ;;  %v5160_v22 = vld [vmem:[%s5319_s17 + $0x2a7] sm:$0xff] }
 0x2db   : > { %12432 = vst [vmem:[#allocation130_spill] sm:$0xff] %v8367_v2  ;;  %v8383_v35 = vadd.f32 %v1682_v63, %v12436_v27  ;;  %v3295_v33 = vmul.f32 %v8062_v3, %v12434_v52  ;;  %3555 = vperm.xlu1 %5262, %v5158_v44   ;;  %v8396_v2 = vadd.f32 %v3294_v45, %v8102_v46  ;;  %v12440_v44 = vld [vmem:[#allocation144_spill] sm:$0xff]  ;;  %v12441_v7 = vld [vmem:[#allocation147_spill] sm:$0xff]  ;;  %v5159_v45 = vld [vmem:[%s5319_s17 + $0x29f] sm:$0xff] }
 0x2dc   : > { %v8399_v23 = vadd.f32 %v1684_v60, %v8015_v28  ;;  %v8402_v63 = vadd.f32 %v3293_v50, %v8028_v40  ;;  %v8406_v15 = vmul.f32 %v8012_v62, %v12433_v13  ;;  %3550 = vperm.xlu0 %5261, %v5157_v19   ;;  %v8411_v59 = vmul.f32 %v8062_v3, %v12433_v13  ;;  %v8428_v19 = vpop.permute.xlu1 %2661  ;;  %v5162_v32 = vld [vmem:[%s5319_s17 + $0x2b7] sm:$0xff] }
 0x2dd   : > { %v1886_v46 = vmul.f32 %v8339_v38, %v12440_v44  ;;  %v3325_v28 = vmul.f32 %v8374_v58, %v12440_v44  ;;  %v1885_v40 = vmul.f32 %v8339_v38, %v12441_v7  ;;  %v8421_v60 = vadd.f32 %v1884_v4, %v8113_v29  ;;  %12442 = vst [vmem:[#allocation102_spill] sm:$0xff] %v8428_v19  ;;  %v12449_v19 = vld [vmem:[#allocation149_spill] sm:$0xff] }
 0x2de   : > { %12438 = vst [vmem:[#allocation101_spill] sm:$0xff] %v8406_v15  ;;  %12439 = vst [vmem:[#allocation223_spill] sm:$0xff] %v8411_v59  ;;  %v8424_v50 = vadd.f32 %v1686_v25, %v8076_v53  ;;  %v3324_v13 = vmul.f32 %v8374_v58, %v12441_v7  ;;  %v8431_v52 = vadd.f32 %v3323_v12, %v8116_v18  ;;  %v8448_v25 = vpop.permute.xlu0 %2656 }
 0x2df   : > { %v8434_v27 = vadd.f32 %v3295_v33, %v8079_v43  ;;  %v8438_v29 = vmul.f32 %v8012_v62, %v12440_v44  ;;  %v8442_v53 = vmul.f32 %v8062_v3, %v12440_v44  ;;  %v8446_v4 = vmul.f32 %v8012_v62, %v12441_v7  ;;  %12446 = vst [vmem:[#allocation135_spill] sm:$0xff] %v8448_v25  ;;  %v12448_v43 = vld [vmem:[#allocation148_spill] sm:$0xff]  ;;  %v12450_v25 = vld [vmem:[#allocation114_spill] sm:$0xff] }
 0x2e0   : > { %3565 = vperm.xlu1 %5262, %v5160_v22   ;;  %v8452_v18 = vmul.f32 %v8062_v3, %v12441_v7  ;;  %v1888_v12 = vmul.f32 %v8339_v38, %v12448_v43  ;;  %v3327_v33 = vmul.f32 %v8374_v58, %v12448_v43  ;;  %v1887_v44 = vmul.f32 %v8339_v38, %v12449_v19 }
 0x2e1   : > { %12443 = vst [vmem:[#allocation132_spill] sm:$0xff] %v8438_v29  ;;  %12444 = vst [vmem:[#allocation133_spill] sm:$0xff] %v8442_v53  ;;  %3560 = vperm.xlu0 %5261, %v5159_v45   ;;  %v8462_v53 = vadd.f32 %v1886_v46, %v8137_v57  ;;  %v8465_v22 = vadd.f32 %v1885_v40, %v12450_v25  ;;  %v3326_v7 = vmul.f32 %v8374_v58, %v12449_v19  ;;  %v5161_v29 = vld [vmem:[%s5319_s17 + $0x2af] sm:$0xff]  ;;  %v8485_v46 = vpop.permute.xlu1 %2671 }
 0x2e2   : > { %12445 = vst [vmem:[#allocation134_spill] sm:$0xff] %v8446_v4  ;;  %12447 = vst [vmem:[#allocation137_spill] sm:$0xff] %v8452_v18  ;;  %v8471_v59 = vadd.f32 %v3325_v28, %v8144_v24  ;;  %v8475_v15 = vmul.f32 %v8012_v62, %v12448_v43  ;;  %v8479_v45 = vmul.f32 %v8062_v3, %v12448_v43  ;;  %v12456_v28 = vld [vmem:[#allocation150_spill] sm:$0xff] }
 0x2e3   : > { %v8483_v57 = vmul.f32 %v8012_v62, %v12449_v19  ;;  %12454 = vst [vmem:[#allocation139_spill] sm:$0xff] %v8485_v46  ;;  %v8488_v40 = vadd.f32 %v3324_v13, %v8110_v17  ;;  %v8492_v24 = vmul.f32 %v8062_v3, %v12449_v19  ;;  %v1890_v25 = vmul.f32 %v8339_v38, %v12456_v28  ;;  %v5164_v46 = vld [vmem:[%s5319_s17 + $0x2c7] sm:$0xff] }
 0x2e4   : > { %12451 = vst [vmem:[#allocation138_spill] sm:$0xff] %v8475_v15  ;;  %12452 = vst [vmem:[#allocation106_spill] sm:$0xff] %v8479_v45  ;;  %v3329_v43 = vmul.f32 %v8374_v58, %v12456_v28  ;;  %v12457_v45 = vld [vmem:[#allocation151_spill] sm:$0xff]  ;;  %3575 = vperm.xlu1 %5262, %v5162_v32   ;;  %v8503_v17 = vadd.f32 %v1888_v12, %v8168_v47  ;;  %v8506_v13 = vadd.f32 %v1887_v44, %v8131_v34  ;;  %v5163_v47 = vld [vmem:[%s5319_s17 + $0x2bf] sm:$0xff] }
 0x2e5   : > { %12453 = vst [vmem:[#allocation35_spill] sm:$0xff] %v8483_v57  ;;  %12455 = vst [vmem:[#allocation140_spill] sm:$0xff] %v8492_v24  ;;  %v1889_v15 = vmul.f32 %v8339_v38, %v12457_v45  ;;  %v8500_v57 = vpop.permute.xlu0 %2666  ;;  %v3328_v19 = vmul.f32 %v8374_v58, %v12457_v45  ;;  %3570 = vperm.xlu0 %5261, %v5161_v29   ;;  %v8512_v24 = vadd.f32 %v3327_v33, %v8171_v37  ;;  %v12463_v12 = vld [vmem:[#allocation85_spill] sm:$0xff]  ;;  %v12465_v29 = vld [vmem:[#allocation152_spill] sm:$0xff] }
 0x2e6   : > { %12458 = vst [vmem:[#allocation36_spill] sm:$0xff] %v8500_v57  ;;  %v8516_v18 = vmul.f32 %v8012_v62, %v12456_v28  ;;  %v8520_v32 = vmul.f32 %v8062_v3, %v12456_v28  ;;  %v8524_v34 = vmul.f32 %v8012_v62, %v12457_v45  ;;  %v8528_v44 = vadd.f32 %v3326_v7, %v12463_v12  ;;  %v12466_v57 = vld [vmem:[#allocation154_spill] sm:$0xff]  ;;  %v12468_v12 = vld [vmem:[#allocation87_spill] sm:$0xff] }
 0x2e7   : > { %12459 = vst [vmem:[#allocation144_spill] sm:$0xff] %v8512_v24  ;;  %v8532_v37 = vmul.f32 %v8062_v3, %v12457_v45  ;;  %v1892_v33 = vmul.f32 %v8339_v38, %v12465_v29  ;;  %v3331_v28 = vmul.f32 %v8374_v58, %v12465_v29  ;;  %v8543_v7 = vadd.f32 %v1890_v25, %v8189_v16  ;;  %v5166_v25 = vld [vmem:[%s5319_s17 + $0x2f7] sm:$0xff] }
 0x2e8   : > { %12460 = vst [vmem:[#allocation147_spill] sm:$0xff] %v8516_v18  ;;  %12461 = vst [vmem:[#allocation148_spill] sm:$0xff] %v8520_v32  ;;  %v1891_v32 = vmul.f32 %v8339_v38, %v12466_v57  ;;  %v8540_v18 = vpop.permute.xlu1 %2681  ;;  %v3330_v45 = vmul.f32 %v8374_v58, %v12466_v57  ;;  %3585 = vperm.xlu1 %5262, %v5164_v46   ;;  %v8553_v4 = vadd.f32 %v3329_v43, %v8192_v1  ;;  %v12474_v46 = vld [vmem:[#allocation158_spill] sm:$0xff] }
 0x2e9   : > { %12462 = vst [vmem:[#allocation149_spill] sm:$0xff] %v8524_v34  ;;  %12464 = vst [vmem:[#allocation114_spill] sm:$0xff] %v8532_v37  ;;  %v8546_v34 = vadd.f32 %v1889_v15, %v12468_v12  ;;  %v8550_v37 = vpop.permute.xlu0 %2676  ;;  %v8557_v24 = vmul.f32 %v8012_v62, %v12465_v29  ;;  %v8561_v16 = vmul.f32 %v8062_v3, %v12465_v29  ;;  %3580 = vperm.xlu0 %5261, %v5163_v47  }
 0x2ea   : > { %12467 = vst [vmem:[#allocation150_spill] sm:$0xff] %v8540_v18  ;;  %12469 = vst [vmem:[#allocation151_spill] sm:$0xff] %v8550_v37  ;;  %v8565_v15 = vmul.f32 %v8012_v62, %v12466_v57  ;;  %v8569_v12 = vadd.f32 %v3328_v19, %v8165_v51  ;;  %v8573_v1 = vmul.f32 %v8062_v3, %v12466_v57  ;;  %v12475_v37 = vld [vmem:[#allocation162_spill] sm:$0xff]  ;;  %v5165_v18 = vld [vmem:[%s5319_s17 + $0x2cf] sm:$0x3] }
 0x2eb   : > { %12470 = vst [vmem:[#allocation85_spill] sm:$0xff] %v8557_v24  ;;  %12471 = vst [vmem:[#allocation152_spill] sm:$0xff] %v8561_v16  ;;  %v1894_v43 = vmul.f32 %v8339_v38, %v12474_v46  ;;  %v1893_v29 = vmul.f32 %v8339_v38, %v12475_v37  ;;  %v3333_v16 = vmul.f32 %v8374_v58, %v12474_v46 }
 0x2ec   : > { %12472 = vst [vmem:[#allocation154_spill] sm:$0xff] %v8565_v15  ;;  %12473 = vst [vmem:[#allocation87_spill] sm:$0xff] %v8573_v1  ;;  %v8583_v47 = vadd.f32 %v1892_v33, %v8205_v10  ;;  %v8586_v51 = vadd.f32 %v1891_v32, %v8174_v8  ;;  %v3332_v57 = vmul.f32 %v8374_v58, %v12475_v37  ;;  %v8590_v19 = vpop.permute.xlu1 %2691  ;;  %3676 = vperm.xlu1 %5262, %v5166_v25  }
 0x2ed   : > { %12476 = vst [vmem:[#allocation158_spill] sm:$0xff] %v8590_v19  ;;  %v8593_v24 = vadd.f32 %v3331_v28, %v8208_v14  ;;  %v8597_v1 = vmul.f32 %v8012_v62, %v12474_v46  ;;  %v8601_v10 = vmul.f32 %v8062_v3, %v12474_v46  ;;  %v8605_v8 = vmul.f32 %v8012_v62, %v12475_v37  ;;  %v8607_v32 = vpop.permute.xlu0 %2686  ;;  %v12482_v28 = vld [vmem:[#allocation4_spill] sm:$0xff] }
 0x2ee   : > { %12480 = vst [vmem:[#allocation232_spill] sm:$0xff] %v8607_v32  ;;  %v8610_v33 = vadd.f32 %v3330_v45, %v8178_v56  ;;  %v8614_v14 = vmul.f32 %v8062_v3, %v12475_v37  ;;  %v1896_v19 = vmul.f32 %v8339_v38, %v12482_v28  ;;  %3590 = vperm.xlu0 %5261, %v5165_v18   ;;  %v5167_v45 = vld [vmem:[%s5319_s17 + $0x2ff] sm:$0xff] }
 0x2ef   : > { %12477 = vst [vmem:[#allocation162_spill] sm:$0xff] %v8597_v1  ;;  %12478 = vst [vmem:[#allocation230_spill] sm:$0xff] %v8601_v10  ;;  %v12483_v1 = vld [vmem:[#allocation6_spill] sm:$0xff]  ;;  %v8624_v25 = vadd.f32 %v1894_v43, %v8229_v39  ;;  %v8627_v56 = vadd.f32 %v1893_v29, %v8195_v49  ;;  %v8633_v32 = vadd.f32 %v3333_v16, %v8236_v55  ;;  %v12489_v16 = vld [vmem:[#allocation143_spill] sm:$0xff] }
 0x2f0   : > { %12479 = vst [vmem:[#allocation231_spill] sm:$0xff] %v8605_v8  ;;  %12481 = vst [vmem:[#allocation233_spill] sm:$0xff] %v8614_v14  ;;  %v1895_v46 = vmul.f32 %v8339_v38, %v12483_v1  ;;  %v5168_v10 = vld [vmem:[%s5319_s17 + $0x307] sm:$0xff]  ;;  %v3335_v8 = vmul.f32 %v8374_v58, %v12482_v28  ;;  %v3334_v37 = vmul.f32 %v8374_v58, %v12483_v1  ;;  %v8647_v39 = vpop.permute.xlu1 %2701 }
 0x2f1   : > { %v8637_v18 = vmul.f32 %v8012_v62, %v12482_v28  ;;  %v8641_v14 = vmul.f32 %v8062_v3, %v12482_v28  ;;  %v8645_v49 = vmul.f32 %v8012_v62, %v12483_v1  ;;  %12487 = vst [vmem:[#allocation235_spill] sm:$0xff] %v8647_v39  ;;  %v8650_v43 = vadd.f32 %v3332_v57, %v8202_v54  ;;  %v12493_v57 = vld [vmem:[#allocation118_spill] sm:$0xff] }
 0x2f2   : > { %v8654_v55 = vmul.f32 %v8062_v3, %v12483_v1  ;;  %v1898_v29 = vmul.f32 %v8339_v38, %v12489_v16  ;;  %3686 = vperm.xlu1 %5262, %v5168_v10   ;;  %v3337_v39 = vmul.f32 %v8374_v58, %v12489_v16  ;;  %v8665_v54 = vadd.f32 %v1896_v19, %v8260_v9  ;;  %v5170_v1 = vld [vmem:[%s5319_s17 + $0x317] sm:$0xff]  ;;  %v5169_v19 = vld [vmem:[%s5319_s17 + $0x30f] sm:$0xff] }
 0x2f3   : > { %12484 = vst [vmem:[#allocation4_spill] sm:$0xff] %v8637_v18  ;;  %12485 = vst [vmem:[#allocation6_spill] sm:$0xff] %v8641_v14  ;;  %v12490_v18 = vld [vmem:[#allocation145_spill] sm:$0xff]  ;;  %v8660_v14 = vpop.permute.xlu0 %2696  ;;  %3681 = vperm.xlu0 %5261, %v5167_v45   ;;  %v8674_v15 = vadd.f32 %v3335_v8, %v8263_v48  ;;  %v8678_v10 = vmul.f32 %v8012_v62, %v12489_v16  ;;  %v12500_v8 = vld [vmem:[#allocation12_spill] sm:$0xff] }
 0x2f4   : > { %12486 = vst [vmem:[#allocation234_spill] sm:$0xff] %v8645_v49  ;;  %12488 = vst [vmem:[#allocation236_spill] sm:$0xff] %v8654_v55  ;;  %v1897_v28 = vmul.f32 %v8339_v38, %v12490_v18  ;;  %v8668_v49 = vadd.f32 %v1895_v46, %v12493_v57  ;;  %v3336_v55 = vmul.f32 %v8374_v58, %v12490_v18  ;;  %v12498_v46 = vld [vmem:[#allocation46_spill] sm:$0xff] }
 0x2f5   : > { %12491 = vst [vmem:[#allocation143_spill] sm:$0xff] %v8660_v14  ;;  %12492 = vst [vmem:[#allocation145_spill] sm:$0xff] %v8665_v54  ;;  %v8682_v14 = vmul.f32 %v8062_v3, %v12489_v16  ;;  %v8686_v9 = vmul.f32 %v8012_v62, %v12490_v18  ;;  %v8690_v45 = vadd.f32 %v3334_v37, %v12498_v46  ;;  %v12503_v46 = vld [vmem:[#allocation121_spill] sm:$0xff] }
 0x2f6   : > { %12494 = vst [vmem:[#allocation118_spill] sm:$0xff] %v8674_v15  ;;  %12495 = vst [vmem:[#allocation237_spill] sm:$0xff] %v8678_v10  ;;  %v8694_v48 = vmul.f32 %v8062_v3, %v12490_v18  ;;  %v1900_v57 = vmul.f32 %v8339_v38, %v12500_v8  ;;  %v12501_v10 = vld [vmem:[#allocation14_spill] sm:$0xff]  ;;  %v8705_v37 = vadd.f32 %v1898_v29, %v8281_v41  ;;  %3696 = vperm.xlu1 %5262, %v5170_v1  }
 0x2f7   : > { %12496 = vst [vmem:[#allocation238_spill] sm:$0xff] %v8682_v14  ;;  %12497 = vst [vmem:[#allocation239_spill] sm:$0xff] %v8686_v9  ;;  %v1899_v16 = vmul.f32 %v8339_v38, %v12501_v10  ;;  %v8700_v14 = vpop.permute.xlu1 %2711  ;;  %v3339_v9 = vmul.f32 %v8374_v58, %v12500_v8  ;;  %v8708_v15 = vadd.f32 %v1897_v28, %v12503_v46  ;;  %v8710_v18 = vpop.permute.xlu0 %2706  ;;  %3691 = vperm.xlu0 %5261, %v5169_v19   ;;  %v5172_v28 = vld [vmem:[%s5319_s17 + $0x327] sm:$0xff] }
 0x2f8   : > { %12499 = vst [vmem:[#allocation46_spill] sm:$0xff] %v8694_v48  ;;  %12502 = vst [vmem:[#allocation12_spill] sm:$0xff] %v8700_v14  ;;  %v3338_v48 = vmul.f32 %v8374_v58, %v12501_v10  ;;  %v8715_v54 = vadd.f32 %v3337_v39, %v8284_v6  ;;  %v8719_v14 = vmul.f32 %v8012_v62, %v12500_v8  ;;  %v12510_v39 = vld [vmem:[#allocation17_spill] sm:$0xff] }
 0x2f9   : > { %12504 = vst [vmem:[#allocation14_spill] sm:$0xff] %v8710_v18  ;;  %v8723_v41 = vmul.f32 %v8062_v3, %v12500_v8  ;;  %v8727_v29 = vmul.f32 %v8012_v62, %v12501_v10  ;;  %v8731_v1 = vadd.f32 %v3336_v55, %v8257_v20  ;;  %v8735_v6 = vmul.f32 %v8062_v3, %v12501_v10  ;;  %v12511_v18 = vld [vmem:[#allocation18_spill] sm:$0xff] }
 0x2fa   : > { %12505 = vst [vmem:[#allocation121_spill] sm:$0xff] %v8715_v54  ;;  %12506 = vst [vmem:[#allocation240_spill] sm:$0xff] %v8719_v14  ;;  %v1902_v46 = vmul.f32 %v8339_v38, %v12510_v39  ;;  %v1901_v8 = vmul.f32 %v8339_v38, %v12511_v18  ;;  %v3341_v14 = vmul.f32 %v8374_v58, %v12510_v39  ;;  %3706 = vperm.xlu1 %5262, %v5172_v28  }
 0x2fb   : > { %12507 = vst [vmem:[#allocation241_spill] sm:$0xff] %v8723_v41  ;;  %12508 = vst [vmem:[#allocation242_spill] sm:$0xff] %v8727_v29  ;;  %v5171_v41 = vld [vmem:[%s5319_s17 + $0x31f] sm:$0xff]  ;;  %v8745_v19 = vadd.f32 %v1900_v57, %v8297_v31  ;;  %v8748_v20 = vadd.f32 %v1899_v16, %v8266_v36  ;;  %v8750_v55 = vpop.permute.xlu1 %2721  ;;  %v3340_v10 = vmul.f32 %v8374_v58, %v12511_v18  ;;  %v8769_v57 = vpop.permute.xlu0 %2716 }
 0x2fc   : > { %12509 = vst [vmem:[#allocation243_spill] sm:$0xff] %v8735_v6  ;;  %12513 = vst [vmem:[#allocation18_spill] sm:$0xff] %v8750_v55  ;;  %v8755_v6 = vadd.f32 %v3339_v9, %v8300_v42  ;;  %v8759_v29 = vmul.f32 %v8012_v62, %v12510_v39  ;;  %v8763_v31 = vmul.f32 %v8062_v3, %v12510_v39  ;;  %v12519_v16 = vld [vmem:[#allocation122_spill] sm:$0xff]  ;;  %v12521_v9 = vld [vmem:[#allocation21_spill] sm:$0xff]  ;;  %3701 = vperm.xlu0 %5261, %v5171_v41  }
 0x2fd   : > { %12512 = vst [vmem:[#allocation17_spill] sm:$0xff] %v8745_v19  ;;  %v8767_v36 = vmul.f32 %v8012_v62, %v12511_v18  ;;  %12518 = vst [vmem:[#allocation248_spill] sm:$0xff] %v8769_v57  ;;  %v8772_v55 = vadd.f32 %v3338_v48, %v12519_v16  ;;  %v8776_v42 = vmul.f32 %v8062_v3, %v12511_v18  ;;  %v12524_v48 = vld [vmem:[#allocation124_spill] sm:$0xff] }
 0x2fe   : > { %12514 = vst [vmem:[#allocation244_spill] sm:$0xff] %v8755_v6  ;;  %12515 = vst [vmem:[#allocation245_spill] sm:$0xff] %v8759_v29  ;;  %v1904_v29 = vmul.f32 %v8339_v38, %v12521_v9  ;;  %v12522_v6 = vld [vmem:[#allocation23_spill] sm:$0xff]  ;;  %v8786_v28 = vadd.f32 %v1902_v46, %v8321_v26  ;;  %v8789_v16 = vadd.f32 %v1901_v8, %v12524_v48  ;;  %v12531_v8 = vld [vmem:[#allocation126_spill] sm:$0xff] }
 0x2ff   : > { %12516 = vst [vmem:[#allocation246_spill] sm:$0xff] %v8763_v31  ;;  %12517 = vst [vmem:[#allocation247_spill] sm:$0xff] %v8767_v36  ;;  %v1903_v39 = vmul.f32 %v8339_v38, %v12522_v6  ;;  %v5174_v31 = vld [vmem:[%s5319_s17 + $0x337] sm:$0xff]  ;;  %v3343_v36 = vmul.f32 %v8374_v58, %v12521_v9  ;;  %v5173_v57 = vld [vmem:[%s5319_s17 + $0x32f] sm:$0xff]  ;;  %v3342_v18 = vmul.f32 %v8374_v58, %v12522_v6  ;;  %v8809_v46 = vpop.permute.xlu1 %2920 }
 0x300   : > { %12520 = vst [vmem:[#allocation122_spill] sm:$0xff] %v8776_v42  ;;  %12523 = vst [vmem:[#allocation21_spill] sm:$0xff] %v8786_v28  ;;  %v12525_v42 = vld [vmem:[#allocation129_spill] sm:$0xff]  ;;  %v8799_v41 = vmul.f32 %v8012_v62, %v12521_v9  ;;  %v8803_v54 = vmul.f32 %v8062_v3, %v12521_v9  ;;  %v8807_v26 = vmul.f32 %v8012_v62, %v12522_v6  ;;  %3716 = vperm.xlu1 %5262, %v5174_v31  }
 0x301   : > { %v8795_v19 = vadd.f32 %v3341_v14, %v12525_v42  ;;  %12530 = vst [vmem:[#allocation250_spill] sm:$0xff] %v8809_v46  ;;  %v8812_v48 = vadd.f32 %v3340_v10, %v12531_v8  ;;  %v8816_v14 = vmul.f32 %v8062_v3, %v12522_v6  ;;  %v12533_v42 = vld [vmem:[#allocation25_spill] sm:$0xff]  ;;  %v8827_v10 = vadd.f32 %v1904_v29, %v8357_v0  ;;  %v12537_v8 = vld [vmem:[#allocation96_spill] sm:$0xff]  ;;  %v5176_v6 = vld [vmem:[%s5319_s17 + $0x347] sm:$0xff] }
 0x302   : > { %12527 = vst [vmem:[#allocation124_spill] sm:$0xff] %v8799_v41  ;;  %12528 = vst [vmem:[#allocation129_spill] sm:$0xff] %v8803_v54  ;;  %v1906_v41 = vmul.f32 %v8339_v38, %v12533_v42  ;;  %v8822_v54 = vpop.permute.xlu0 %2726  ;;  %v3345_v46 = vmul.f32 %v8374_v58, %v12533_v42  ;;  %3711 = vperm.xlu0 %5261, %v5173_v57   ;;  %v8836_v28 = vadd.f32 %v3343_v36, %v8360_v30  ;;  %v5175_v29 = vld [vmem:[%s5319_s17 + $0x33f] sm:$0xff]  ;;  %v12542_v57 = vld [vmem:[#allocation127_spill] sm:$0xff] }
 0x303   : > { %12526 = vst [vmem:[#allocation23_spill] sm:$0xff] %v8795_v19  ;;  %12529 = vst [vmem:[#allocation249_spill] sm:$0xff] %v8807_v26  ;;  %v12534_v19 = vld [vmem:[#allocation26_spill] sm:$0xff]  ;;  %v8830_v26 = vadd.f32 %v1903_v39, %v12537_v8  ;;  %v8840_v31 = vmul.f32 %v8012_v62, %v12533_v42  ;;  %v8852_v39 = vadd.f32 %v3342_v18, %v12542_v57  ;;  %v12544_v36 = vld [vmem:[#allocation29_spill] sm:$0xff] }
 0x304   : > { %12532 = vst [vmem:[#allocation126_spill] sm:$0xff] %v8816_v14  ;;  %v1905_v9 = vmul.f32 %v8339_v38, %v12534_v19  ;;  %12535 = vst [vmem:[#allocation25_spill] sm:$0xff] %v8822_v54  ;;  %v3344_v14 = vmul.f32 %v8374_v58, %v12534_v19  ;;  %v8844_v54 = vmul.f32 %v8062_v3, %v12533_v42  ;;  %v12547_v18 = vld [vmem:[#allocation184_spill] sm:$0xff]  ;;  %3726 = vperm.xlu1 %5262, %v5176_v6  }
 0x305   : > { %12536 = vst [vmem:[#allocation26_spill] sm:$0xff] %v8827_v10  ;;  %12538 = vst [vmem:[#allocation96_spill] sm:$0xff] %v8836_v28  ;;  %v8848_v0 = vmul.f32 %v8012_v62, %v12534_v19  ;;  %v8856_v30 = vmul.f32 %v8062_v3, %v12534_v19  ;;  %v1908_v8 = vmul.f32 %v8339_v38, %v12544_v36 }
 0x306   : > { %12539 = vst [vmem:[#allocation251_spill] sm:$0xff] %v8840_v31  ;;  %12540 = vst [vmem:[#allocation252_spill] sm:$0xff] %v8844_v54  ;;  %v12545_v31 = vld [vmem:[#allocation156_spill] sm:$0xff]  ;;  %v8862_v54 = vpop.permute.xlu1 %2930  ;;  %v8867_v28 = vadd.f32 %v1906_v41, %v8383_v35  ;;  %v8870_v57 = vadd.f32 %v1905_v9, %v12547_v18  ;;  %v8872_v19 = vpop.permute.xlu0 %2925  ;;  %v8877_v10 = vadd.f32 %v3345_v46, %v8386_v61  ;;  %3721 = vperm.xlu0 %5261, %v5175_v29   ;;  %v12554_v46 = vld [vmem:[#allocation31_spill] sm:$0xff] }
 0x307   : > { %12541 = vst [vmem:[#allocation253_spill] sm:$0xff] %v8848_v0  ;;  %12543 = vst [vmem:[#allocation127_spill] sm:$0xff] %v8856_v30  ;;  %v1907_v42 = vmul.f32 %v8339_v38, %v12545_v31  ;;  %v3347_v0 = vmul.f32 %v8374_v58, %v12544_v36  ;;  %v3346_v30 = vmul.f32 %v8374_v58, %v12545_v31  ;;  %v5178_v9 = vld [vmem:[%s5319_s17 + $0x357] sm:$0xff]  ;;  %v5177_v29 = vld [vmem:[%s5319_s17 + $0x34f] sm:$0xff] }
 0x308   : > { %12546 = vst [vmem:[#allocation29_spill] sm:$0xff] %v8862_v54  ;;  %12548 = vst [vmem:[#allocation156_spill] sm:$0xff] %v8872_v19  ;;  %v8881_v54 = vmul.f32 %v8012_v62, %v12544_v36  ;;  %v8885_v35 = vmul.f32 %v8062_v3, %v12544_v36  ;;  %v8889_v41 = vmul.f32 %v8012_v62, %v12545_v31  ;;  %v12555_v19 = vld [vmem:[#allocation160_spill] sm:$0xff]  ;;  %3736 = vperm.xlu1 %5262, %v5178_v9  }
 0x309   : > { %12549 = vst [vmem:[#allocation184_spill] sm:$0xff] %v8877_v10  ;;  %v8893_v6 = vadd.f32 %v3344_v14, %v8354_v5  ;;  %v8897_v61 = vmul.f32 %v8062_v3, %v12545_v31  ;;  %v1910_v18 = vmul.f32 %v8339_v38, %v12554_v46  ;;  %v1909_v36 = vmul.f32 %v8339_v38, %v12555_v19 }
 0x30a   : > { %12550 = vst [vmem:[#allocation254_spill] sm:$0xff] %v8881_v54  ;;  %12551 = vst [vmem:[#allocation255_spill] sm:$0xff] %v8885_v35  ;;  %v8906_v35 = vld [vmem:[%s11436_s1 + $0x8] ss:$0 sm:$0xff]  ;;  %v3349_v5 = vmul.f32 %v8374_v58, %v12554_v46  ;;  %v8912_v14 = vadd.f32 %v1908_v8, %v8399_v23  ;;  %v8915_v31 = vadd.f32 %v1907_v42, %v8363_v11  ;;  %v8917_v54 = vpop.permute.xlu1 %2940  ;;  %v8936_v8 = vpop.permute.xlu0 %2935  ;;  %v12562_v42 = vld [vmem:[#allocation130_spill] sm:$0xff]  ;;  %3731 = vperm.xlu0 %5261, %v5177_v29  }
 0x30b   : > { %12552 = vst [vmem:[#allocation256_spill] sm:$0xff] %v8889_v41  ;;  %12553 = vst [vmem:[#allocation257_spill] sm:$0xff] %v8897_v61  ;;  %v3348_v61 = vmul.f32 %v8374_v58, %v12555_v19  ;;  %v8922_v41 = vadd.f32 %v3347_v0, %v8402_v63  ;;  %v8926_v10 = vmul.f32 %v8012_v62, %v12554_v46  ;;  %v12564_v0 = vld [vmem:[#allocation32_spill] sm:$0xff] }
 0x30c   : > { %12556 = vst [vmem:[#allocation31_spill] sm:$0xff] %v8917_v54  ;;  %v8930_v23 = vmul.f32 %v8062_v3, %v12554_v46  ;;  %v8934_v11 = vmul.f32 %v8012_v62, %v12555_v19  ;;  %12561 = vst [vmem:[#allocation261_spill] sm:$0xff] %v8936_v8  ;;  %v8939_v54 = vadd.f32 %v3346_v30, %v12562_v42  ;;  %v8953_v62 = vld [vmem:[%s11436_s1 + $0x5] ss:$0 sm:$0xff] }
 0x30d   : > { %12557 = vst [vmem:[#allocation160_spill] sm:$0xff] %v8922_v41  ;;  %12558 = vst [vmem:[#allocation258_spill] sm:$0xff] %v8926_v10  ;;  %v8943_v63 = vmul.f32 %v8062_v3, %v12555_v19  ;;  %v2109_v10 = vmul.f32 %v8906_v35, %v12564_v0  ;;  %v12565_v41 = vld [vmem:[#allocation33_spill] sm:$0xff]  ;;  %v3378_v30 = vmul.f32 %v8953_v62, %v12564_v0 }
 0x30e   : > { %12559 = vst [vmem:[#allocation259_spill] sm:$0xff] %v8930_v23  ;;  %12560 = vst [vmem:[#allocation260_spill] sm:$0xff] %v8934_v11  ;;  %v2108_v46 = vmul.f32 %v8906_v35, %v12565_v41  ;;  %v5180_v23 = vld [vmem:[%s5319_s17 + $0x367] sm:$0xff]  ;;  %v8958_v9 = vadd.f32 %v1910_v18, %v8424_v50  ;;  %v8961_v3 = vadd.f32 %v1909_v36, %v8389_v21  ;;  %v5179_v19 = vld [vmem:[%s5319_s17 + $0x35f] sm:$0xff]  ;;  %v8981_v50 = vpop.permute.xlu1 %2950 }
 0x30f   : > { %12563 = vst [vmem:[#allocation130_spill] sm:$0xff] %v8943_v63  ;;  %v3377_v42 = vmul.f32 %v8953_v62, %v12565_v41  ;;  %v8967_v29 = vadd.f32 %v3349_v5, %v8434_v27  ;;  %v8971_v8 = vmul.f32 %v8339_v38, %v12564_v0  ;;  %v8975_v63 = vmul.f32 %v8374_v58, %v12564_v0  ;;  %v12570_v36 = vld [vmem:[#allocation142_spill] sm:$0xff] }
 0x310   : > { %v8979_v21 = vmul.f32 %v8339_v38, %v12565_v41  ;;  %12568 = vst [vmem:[#allocation262_spill] sm:$0xff] %v8981_v50  ;;  %v8984_v18 = vadd.f32 %v3348_v61, %v8396_v2  ;;  %v8988_v27 = vmul.f32 %v8374_v58, %v12565_v41  ;;  %v2111_v5 = vmul.f32 %v8906_v35, %v12570_v36  ;;  %v12571_v11 = vld [vmem:[#allocation2_spill] sm:$0xff]  ;;  %v5182_v41 = vld [vmem:[%s5319_s17 + $0x377] sm:$0xff] }
 0x311   : > { %12566 = vst [vmem:[#allocation32_spill] sm:$0xff] %v8975_v63  ;;  %v2110_v0 = vmul.f32 %v8906_v35, %v12571_v11  ;;  %v8994_v63 = vpop.permute.xlu0 %2945  ;;  %3746 = vperm.xlu1 %5262, %v5180_v23   ;;  %v3380_v50 = vmul.f32 %v8953_v62, %v12570_v36  ;;  %v8999_v2 = vadd.f32 %v2108_v46, %v8421_v60  ;;  %v12577_v46 = vld [vmem:[#allocation5_spill] sm:$0xff] }
 0x312   : > { %12567 = vst [vmem:[#allocation33_spill] sm:$0xff] %v8979_v21  ;;  %12569 = vst [vmem:[#allocation263_spill] sm:$0xff] %v8988_v27  ;;  %v9002_v61 = vadd.f32 %v2109_v10, %v8465_v22  ;;  %3741 = vperm.xlu0 %5261, %v5179_v19   ;;  %v9006_v27 = vadd.f32 %v3378_v30, %v8488_v40  ;;  %v3379_v21 = vmul.f32 %v8953_v62, %v12571_v11  ;;  %v5181_v22 = vld [vmem:[%s5319_s17 + $0x36f] sm:$0xff]  ;;  %v12578_v19 = vld [vmem:[#allocation38_spill] sm:$0xff] }
 0x313   : > { %12572 = vst [vmem:[#allocation142_spill] sm:$0xff] %v8994_v63  ;;  %12573 = vst [vmem:[#allocation2_spill] sm:$0xff] %v8999_v2  ;;  %v9012_v23 = vmul.f32 %v8339_v38, %v12570_v36  ;;  %v9016_v63 = vmul.f32 %v8374_v58, %v12570_v36  ;;  %v9020_v60 = vmul.f32 %v8339_v38, %v12571_v11 }
 0x314   : > { %12574 = vst [vmem:[#allocation264_spill] sm:$0xff] %v9002_v61  ;;  %12575 = vst [vmem:[#allocation265_spill] sm:$0xff] %v9006_v27  ;;  %v9024_v10 = vadd.f32 %v3377_v42, %v8431_v52  ;;  %v9028_v40 = vmul.f32 %v8374_v58, %v12571_v11  ;;  %v2113_v30 = vmul.f32 %v8906_v35, %v12577_v46  ;;  %v9034_v27 = vpop.permute.xlu1 %2960 }
 0x315   : > { %v2112_v36 = vmul.f32 %v8906_v35, %v12578_v19  ;;  %12579 = vst [vmem:[#allocation5_spill] sm:$0xff] %v9034_v27  ;;  %v3382_v61 = vmul.f32 %v8953_v62, %v12577_v46  ;;  %v9039_v52 = vadd.f32 %v2110_v0, %v8462_v53  ;;  %v9042_v42 = vadd.f32 %v2111_v5, %v8506_v13  ;;  %v9044_v11 = vpop.permute.xlu0 %2955  ;;  %v5184_v5 = vld [vmem:[%s5319_s17 + $0x387] sm:$0xff]  ;;  %v12585_v0 = vld [vmem:[#allocation41_spill] sm:$0xff] }
 0x316   : > { %12576 = vst [vmem:[#allocation266_spill] sm:$0xff] %v9024_v10  ;;  %12582 = vst [vmem:[#allocation268_spill] sm:$0xff] %v9044_v11  ;;  %3756 = vperm.xlu1 %5262, %v5182_v41   ;;  %v9047_v10 = vadd.f32 %v3380_v50, %v8528_v44  ;;  %v3381_v2 = vmul.f32 %v8953_v62, %v12578_v19  ;;  %v9053_v27 = vmul.f32 %v8339_v38, %v12577_v46  ;;  %v5183_v11 = vld [vmem:[%s5319_s17 + $0x37f] sm:$0xff] }
 0x317   : > { %12580 = vst [vmem:[#allocation38_spill] sm:$0xff] %v9039_v52  ;;  %12581 = vst [vmem:[#allocation267_spill] sm:$0xff] %v9042_v42  ;;  %v9057_v53 = vmul.f32 %v8374_v58, %v12577_v46  ;;  %v9061_v13 = vmul.f32 %v8339_v38, %v12578_v19  ;;  %3751 = vperm.xlu0 %5261, %v5181_v22   ;;  %v9065_v44 = vadd.f32 %v3379_v21, %v8471_v59 }
 0x318   : > { %12583 = vst [vmem:[#allocation269_spill] sm:$0xff] %v9047_v10  ;;  %v9069_v50 = vmul.f32 %v8374_v58, %v12578_v19  ;;  %v2115_v41 = vmul.f32 %v8906_v35, %v12585_v0  ;;  %v12586_v10 = vld [vmem:[#allocation42_spill] sm:$0xff]  ;;  %v3384_v42 = vmul.f32 %v8953_v62, %v12585_v0  ;;  %v9079_v22 = vadd.f32 %v2112_v36, %v8503_v17  ;;  %v9084_v21 = vpop.permute.xlu1 %2970 }
 0x319   : > { %12584 = vst [vmem:[#allocation270_spill] sm:$0xff] %v9065_v44  ;;  %v2114_v46 = vmul.f32 %v8906_v35, %v12586_v10  ;;  %v9082_v59 = vadd.f32 %v2113_v30, %v8546_v34  ;;  %12589 = vst [vmem:[#allocation271_spill] sm:$0xff] %v9084_v21  ;;  %v9087_v19 = vadd.f32 %v3382_v61, %v8569_v12  ;;  %v9103_v30 = vpop.permute.xlu0 %2965  ;;  %v12593_v12 = vld [vmem:[#allocation144_spill] sm:$0xff] }
 0x31a   : > { %12587 = vst [vmem:[#allocation41_spill] sm:$0xff] %v9079_v22  ;;  %v3383_v44 = vmul.f32 %v8953_v62, %v12586_v10  ;;  %v9093_v52 = vmul.f32 %v8339_v38, %v12585_v0  ;;  %v9097_v17 = vmul.f32 %v8374_v58, %v12585_v0  ;;  %v9101_v34 = vmul.f32 %v8339_v38, %v12586_v10  ;;  %v5186_v22 = vld [vmem:[%s5319_s17 + $0x397] sm:$0xff] }
 0x31b   : > { %12588 = vst [vmem:[#allocation42_spill] sm:$0xff] %v9082_v59  ;;  %12590 = vst [vmem:[#allocation272_spill] sm:$0xff] %v9087_v19  ;;  %3766 = vperm.xlu1 %5262, %v5184_v5   ;;  %v9106_v61 = vadd.f32 %v3381_v2, %v12593_v12  ;;  %v9110_v36 = vmul.f32 %v8374_v58, %v12586_v10  ;;  %v12595_v19 = vld [vmem:[#allocation47_spill] sm:$0xff]  ;;  %v12596_v59 = vld [vmem:[#allocation50_spill] sm:$0xff]  ;;  %3761 = vperm.xlu0 %5261, %v5183_v11  }
 0x31c   : > { %12591 = vst [vmem:[#allocation273_spill] sm:$0xff] %v9097_v17  ;;  %12592 = vst [vmem:[#allocation274_spill] sm:$0xff] %v9103_v30  ;;  %v2117_v21 = vmul.f32 %v8906_v35, %v12595_v19  ;;  %v2116_v0 = vmul.f32 %v8906_v35, %v12596_v59  ;;  %v3386_v17 = vmul.f32 %v8953_v62, %v12595_v19  ;;  %v5185_v12 = vld [vmem:[%s5319_s17 + $0x38f] sm:$0xff] }
 0x31d   : > { %12594 = vst [vmem:[#allocation144_spill] sm:$0xff] %v9106_v61  ;;  %v9120_v5 = vadd.f32 %v2114_v46, %v8543_v7  ;;  %v9123_v2 = vadd.f32 %v2115_v41, %v8586_v51  ;;  %v9127_v10 = vadd.f32 %v3384_v42, %v8610_v33  ;;  %v3385_v61 = vmul.f32 %v8953_v62, %v12596_v59  ;;  %v9143_v51 = vpop.permute.xlu1 %2980  ;;  %v12603_v41 = vld [vmem:[#allocation56_spill] sm:$0xff] }
 0x31e   : > { %v9133_v11 = vmul.f32 %v8339_v38, %v12595_v19  ;;  %v9137_v30 = vmul.f32 %v8374_v58, %v12595_v19  ;;  %v9141_v7 = vmul.f32 %v8339_v38, %v12596_v59  ;;  %12600 = vst [vmem:[#allocation276_spill] sm:$0xff] %v9143_v51  ;;  %v9146_v33 = vadd.f32 %v3383_v44, %v8553_v4 }
 0x31f   : > { %12597 = vst [vmem:[#allocation47_spill] sm:$0xff] %v9120_v5  ;;  %12598 = vst [vmem:[#allocation50_spill] sm:$0xff] %v9123_v2  ;;  %v9150_v42 = vmul.f32 %v8374_v58, %v12596_v59  ;;  %v2119_v46 = vmul.f32 %v8906_v35, %v12603_v41  ;;  %v9156_v2 = vpop.permute.xlu0 %2975  ;;  %3776 = vperm.xlu1 %5262, %v5186_v22   ;;  %v3388_v51 = vmul.f32 %v8953_v62, %v12603_v41  ;;  %v5188_v59 = vld [vmem:[%s5319_s17 + $0x3a7] sm:$0xff] }
 0x320   : > { %12599 = vst [vmem:[#allocation275_spill] sm:$0xff] %v9127_v10  ;;  %12601 = vst [vmem:[#allocation277_spill] sm:$0xff] %v9146_v33  ;;  %v12604_v10 = vld [vmem:[#allocation59_spill] sm:$0xff]  ;;  %v9161_v4 = vadd.f32 %v2116_v0, %v8583_v47  ;;  %v9164_v44 = vadd.f32 %v2117_v21, %v8627_v56  ;;  %3771 = vperm.xlu0 %5261, %v5185_v12   ;;  %v9168_v33 = vadd.f32 %v3386_v17, %v8650_v43  ;;  %v5187_v56 = vld [vmem:[%s5319_s17 + $0x39f] sm:$0xff] }
 0x321   : > { %12602 = vst [vmem:[#allocation278_spill] sm:$0xff] %v9150_v42  ;;  %v2118_v19 = vmul.f32 %v8906_v35, %v12604_v10  ;;  %12605 = vst [vmem:[#allocation56_spill] sm:$0xff] %v9156_v2  ;;  %v3387_v5 = vmul.f32 %v8953_v62, %v12604_v10  ;;  %v9174_v22 = vmul.f32 %v8339_v38, %v12603_v41  ;;  %v12614_v17 = vld [vmem:[#allocation64_spill] sm:$0xff]  ;;  %v12615_v12 = vld [vmem:[#allocation65_spill] sm:$0xff] }
 0x322   : > { %12606 = vst [vmem:[#allocation59_spill] sm:$0xff] %v9161_v4  ;;  %12607 = vst [vmem:[#allocation279_spill] sm:$0xff] %v9164_v44  ;;  %v9178_v2 = vmul.f32 %v8374_v58, %v12603_v41  ;;  %v9182_v47 = vmul.f32 %v8339_v38, %v12604_v10  ;;  %v9186_v21 = vadd.f32 %v3385_v61, %v8593_v24  ;;  %v12823_v42 = vld [vmem:[#allocation30_spill] sm:$0xff] }
 0x323   : > { %12608 = vst [vmem:[#allocation280_spill] sm:$0xff] %v9168_v33  ;;  %12609 = vst [vmem:[#allocation281_spill] sm:$0xff] %v9174_v22  ;;  %v9190_v43 = vmul.f32 %v8374_v58, %v12604_v10  ;;  %v2121_v0 = vmul.f32 %v8906_v35, %v12614_v17  ;;  %v2120_v41 = vmul.f32 %v8906_v35, %v12615_v12  ;;  %v9196_v33 = vpop.permute.xlu1 %2990  ;;  %v9206_v10 = vpop.permute.xlu0 %2985  ;;  %3786 = vperm.xlu1 %5262, %v5188_v59   ;;  %v12822_v22 = vld [vmem:[#allocation206_spill] sm:$0xff] }
 0x324   : > { %12610 = vst [vmem:[#allocation282_spill] sm:$0xff] %v9178_v2  ;;  %12611 = vst [vmem:[#allocation283_spill] sm:$0xff] %v9182_v47  ;;  %v3390_v44 = vmul.f32 %v8953_v62, %v12614_v17  ;;  %v9201_v24 = vadd.f32 %v2118_v19, %v8624_v25  ;;  %v9204_v61 = vadd.f32 %v2119_v46, %v8668_v49  ;;  %3781 = vperm.xlu0 %5261, %v5187_v56   ;;  %v5190_v46 = vld [vmem:[%s5319_s17 + $0x3b7] sm:$0xff]  ;;  %v12626_v19 = vld [vmem:[#allocation67_spill] sm:$0xff] }
 0x325   : > { %12612 = vst [vmem:[#allocation284_spill] sm:$0xff] %v9186_v21  ;;  %12613 = vst [vmem:[#allocation285_spill] sm:$0xff] %v9190_v43  ;;  %v9209_v21 = vadd.f32 %v3388_v51, %v8690_v45  ;;  %v3389_v4 = vmul.f32 %v8953_v62, %v12615_v12  ;;  %v9219_v25 = vmul.f32 %v8374_v58, %v12614_v17  ;;  %v12819_v47 = vld [vmem:[#allocation161_spill] sm:$0xff] }
 0x326   : > { %12616 = vst [vmem:[#allocation64_spill] sm:$0xff] %v9196_v33  ;;  %12617 = vst [vmem:[#allocation65_spill] sm:$0xff] %v9201_v24  ;;  %v9215_v33 = vmul.f32 %v8339_v38, %v12614_v17  ;;  %v9223_v49 = vmul.f32 %v8339_v38, %v12615_v12  ;;  %v9227_v45 = vadd.f32 %v3387_v5, %v8633_v32  ;;  %v5189_v24 = vld [vmem:[%s5319_s17 + $0x3af] sm:$0xff] }
 0x327   : > { %12618 = vst [vmem:[#allocation286_spill] sm:$0xff] %v9204_v61  ;;  %12619 = vst [vmem:[#allocation287_spill] sm:$0xff] %v9206_v10  ;;  %v9231_v51 = vmul.f32 %v8374_v58, %v12615_v12  ;;  %v2123_v59 = vmul.f32 %v8906_v35, %v12626_v19  ;;  %v12627_v61 = vld [vmem:[#allocation173_spill] sm:$0xff]  ;;  %v3392_v10 = vmul.f32 %v8953_v62, %v12626_v19  ;;  %v9246_v5 = vpop.permute.xlu1 %3000  ;;  %3796 = vperm.xlu1 %5262, %v5190_v46  }
 0x328   : > { %12620 = vst [vmem:[#allocation288_spill] sm:$0xff] %v9209_v21  ;;  %12621 = vst [vmem:[#allocation289_spill] sm:$0xff] %v9215_v33  ;;  %v2122_v17 = vmul.f32 %v8906_v35, %v12627_v61  ;;  %v12628_v21 = vld [vmem:[#allocation145_spill] sm:$0xff]  ;;  %v9244_v32 = vadd.f32 %v2121_v0, %v8708_v15  ;;  %v9249_v12 = vadd.f32 %v3390_v44, %v8731_v1  ;;  %v9265_v0 = vpop.permute.xlu0 %2995  ;;  %v12637_v1 = vld [vmem:[#allocation118_spill] sm:$0xff]  ;;  %3791 = vperm.xlu0 %5261, %v5189_v24  }
 0x329   : > { %12622 = vst [vmem:[#allocation290_spill] sm:$0xff] %v9219_v25  ;;  %12623 = vst [vmem:[#allocation291_spill] sm:$0xff] %v9223_v49  ;;  %v9241_v56 = vadd.f32 %v2120_v41, %v12628_v21  ;;  %v9259_v21 = vmul.f32 %v8374_v58, %v12626_v19  ;;  %v9263_v15 = vmul.f32 %v8339_v38, %v12627_v61  ;;  %v12795_v49 = vld [vmem:[#allocation24_spill] sm:$0xff] }
 0x32a   : > { %12624 = vst [vmem:[#allocation292_spill] sm:$0xff] %v9227_v45  ;;  %12625 = vst [vmem:[#allocation293_spill] sm:$0xff] %v9231_v51  ;;  %v3391_v45 = vmul.f32 %v8953_v62, %v12627_v61  ;;  %v9255_v51 = vmul.f32 %v8339_v38, %v12626_v19  ;;  %v9268_v44 = vadd.f32 %v3389_v4, %v12637_v1  ;;  %v5191_v1 = vld [vmem:[%s5319_s17 + $0x3bf] sm:$0xff]  ;;  %v12797_v33 = vld [vmem:[#allocation220_spill] sm:$0xff] }
 0x32b   : > { %12629 = vst [vmem:[#allocation67_spill] sm:$0xff] %v9241_v56  ;;  %12630 = vst [vmem:[#allocation173_spill] sm:$0xff] %v9244_v32  ;;  %v9272_v41 = vmul.f32 %v8374_v58, %v12627_v61  ;;  %v12640_v32 = vld [vmem:[#allocation69_spill] sm:$0xff]  ;;  %v9282_v46 = vadd.f32 %v2122_v17, %v8705_v37  ;;  %v9285_v4 = vadd.f32 %v2123_v59, %v8748_v20  ;;  %v9305_v20 = vpop.permute.xlu1 %3010  ;;  %v12652_v17 = vld [vmem:[#allocation72_spill] sm:$0xff] }
 0x32c   : > { %12631 = vst [vmem:[#allocation145_spill] sm:$0xff] %v9246_v5  ;;  %12632 = vst [vmem:[#allocation294_spill] sm:$0xff] %v9249_v12  ;;  %v2125_v56 = vmul.f32 %v8906_v35, %v12640_v32  ;;  %v12641_v5 = vld [vmem:[#allocation70_spill] sm:$0xff]  ;;  %v9289_v61 = vadd.f32 %v3392_v10, %v8772_v55  ;;  %v9295_v24 = vmul.f32 %v8339_v38, %v12640_v32  ;;  %v12649_v55 = vld [vmem:[#allocation121_spill] sm:$0xff]  ;;  %3801 = vperm.xlu0 %5261, %v5191_v1  }
 0x32d   : > { %12633 = vst [vmem:[#allocation295_spill] sm:$0xff] %v9255_v51  ;;  %12634 = vst [vmem:[#allocation296_spill] sm:$0xff] %v9259_v21  ;;  %v2124_v19 = vmul.f32 %v8906_v35, %v12641_v5  ;;  %v5192_v12 = vld [vmem:[%s5319_s17 + $0x3c7] sm:$0x3]  ;;  %v3394_v21 = vmul.f32 %v8953_v62, %v12640_v32  ;;  %v9303_v37 = vmul.f32 %v8339_v38, %v12641_v5  ;;  %v12665_v1 = vld [vmem:[#allocation37_spill] sm:$0xff] }
 0x32e   : > { %12635 = vst [vmem:[#allocation297_spill] sm:$0xff] %v9263_v15  ;;  %12636 = vst [vmem:[#allocation298_spill] sm:$0xff] %v9265_v0  ;;  %v3393_v0 = vmul.f32 %v8953_v62, %v12641_v5  ;;  %v9308_v10 = vadd.f32 %v3391_v45, %v12649_v55  ;;  %v9312_v59 = vmul.f32 %v8374_v58, %v12641_v5  ;;  %3806 = vperm.xlu1 %5262, %v5192_v12   ;;  %v5194_v5 = vld [vmem:[%s5319_s17 + $0x208] sm:$0xff]  ;;  %v12789_v15 = vld [vmem:[#allocation182_spill] sm:$0xff] }
 0x32f   : > { %12638 = vst [vmem:[#allocation118_spill] sm:$0xff] %v9268_v44  ;;  %12639 = vst [vmem:[#allocation299_spill] sm:$0xff] %v9272_v41  ;;  %v9299_v44 = vmul.f32 %v8374_v58, %v12640_v32  ;;  %v9326_v55 = vadd.f32 %v2125_v56, %v8789_v16  ;;  %v9336_v12 = vmul.f32 %v8339_v38, %v12652_v17  ;;  %v5193_v56 = vld [vmem:[%s5319_s17 + $0x200] sm:$0xff]  ;;  %v12792_v51 = vld [vmem:[#allocation219_spill] sm:$0xff] }
 0x330   : > { %12642 = vst [vmem:[#allocation69_spill] sm:$0xff] %v9282_v46  ;;  %12643 = vst [vmem:[#allocation70_spill] sm:$0xff] %v9285_v4  ;;  %v2127_v4 = vmul.f32 %v8906_v35, %v12652_v17  ;;  %v12653_v46 = vld [vmem:[#allocation185_spill] sm:$0xff]  ;;  %3892 = vperm.xlu0 %5261, %v5193_v56  }
 0x331   : > { %12644 = vst [vmem:[#allocation300_spill] sm:$0xff] %v9289_v61  ;;  %12645 = vst [vmem:[#allocation301_spill] sm:$0xff] %v9295_v24  ;;  %v2126_v32 = vmul.f32 %v8906_v35, %v12653_v46  ;;  %v9318_v61 = vpop.permute.xlu0 %3005  ;;  %v9344_v16 = vmul.f32 %v8339_v38, %v12653_v46 }
 0x332   : > { %12646 = vst [vmem:[#allocation302_spill] sm:$0xff] %v9299_v44  ;;  %12647 = vst [vmem:[#allocation303_spill] sm:$0xff] %v9303_v37  ;;  %v12655_v37 = vld [vmem:[#allocation17_spill] sm:$0xff]  ;;  %3897 = vperm.xlu1 %5262, %v5194_v5  }
 0x333   : > { %12648 = vst [vmem:[#allocation304_spill] sm:$0xff] %v9305_v20  ;;  %12650 = vst [vmem:[#allocation121_spill] sm:$0xff] %v9308_v10  ;;  %v3396_v20 = vmul.f32 %v8953_v62, %v12652_v17  ;;  %v9323_v45 = vadd.f32 %v2124_v19, %v12655_v37  ;;  %v9330_v10 = vadd.f32 %v3394_v21, %v8812_v48  ;;  %v12662_v19 = vld [vmem:[#allocation244_spill] sm:$0xff] }
 0x334   : > { %12651 = vst [vmem:[#allocation305_spill] sm:$0xff] %v9312_v59  ;;  %12654 = vst [vmem:[#allocation72_spill] sm:$0xff] %v9318_v61  ;;  %v3395_v59 = vmul.f32 %v8953_v62, %v12653_v46  ;;  %v9340_v61 = vmul.f32 %v8374_v58, %v12652_v17  ;;  %v9348_v48 = vadd.f32 %v3393_v0, %v12662_v19 }
 0x335   : > { %12656 = vst [vmem:[#allocation185_spill] sm:$0xff] %v9323_v45  ;;  %12657 = vst [vmem:[#allocation17_spill] sm:$0xff] %v9326_v55  ;;  %v9352_v21 = vmul.f32 %v8374_v58, %v12653_v46  ;;  %v2129_v37 = vmul.f32 %v8906_v35, %v12665_v1  ;;  %v12666_v55 = vld [vmem:[#allocation141_spill] sm:$0xff]  ;;  %v9358_v45 = vpop.permute.xlu1 %3020  ;;  %v9366_v0 = vadd.f32 %v2127_v4, %v8830_v26  ;;  %v9368_v46 = vpop.permute.xlu0 %3015  ;;  %v12675_v26 = vld [vmem:[#allocation23_spill] sm:$0xff] }
 0x336   : > { %12658 = vst [vmem:[#allocation306_spill] sm:$0xff] %v9330_v10  ;;  %12659 = vst [vmem:[#allocation307_spill] sm:$0xff] %v9336_v12  ;;  %v2128_v17 = vmul.f32 %v8906_v35, %v12666_v55  ;;  %v3398_v10 = vmul.f32 %v8953_v62, %v12665_v1  ;;  %v9371_v19 = vadd.f32 %v3396_v20, %v8852_v39 }
 0x337   : > { %12660 = vst [vmem:[#allocation308_spill] sm:$0xff] %v9340_v61  ;;  %12661 = vst [vmem:[#allocation309_spill] sm:$0xff] %v9344_v16  ;;  %v12668_v61 = vld [vmem:[#allocation21_spill] sm:$0xff]  ;;  %v9383_v4 = vadd.f32 %v3395_v59, %v12675_v26  ;;  %v9389_v39 = vmul.f32 %v8374_v58, %v12665_v1  ;;  %v9393_v20 = vmul.f32 %v8339_v38, %v12666_v55  ;;  %v12681_v26 = vld [vmem:[#allocation26_spill] sm:$0xff] }
 0x338   : > { %12663 = vst [vmem:[#allocation244_spill] sm:$0xff] %v9348_v48  ;;  %12664 = vst [vmem:[#allocation310_spill] sm:$0xff] %v9352_v21  ;;  %v9363_v16 = vadd.f32 %v2126_v32, %v12668_v61  ;;  %v3397_v48 = vmul.f32 %v8953_v62, %v12666_v55  ;;  %v12674_v21 = vld [vmem:[#allocation192_spill] sm:$0xff]  ;;  %v5196_v32 = vld [vmem:[%s5319_s17 + $0x218] sm:$0xff]  ;;  %v9402_v59 = vmul.f32 %v8374_v58, %v12666_v55 }
 0x339   : > { %12667 = vst [vmem:[#allocation37_spill] sm:$0xff] %v9358_v45  ;;  %12670 = vst [vmem:[#allocation21_spill] sm:$0xff] %v9366_v0  ;;  %v9377_v45 = vmul.f32 %v8339_v38, %v12665_v1  ;;  %v2131_v61 = vmul.f32 %v8906_v35, %v12674_v21  ;;  %v3400_v5 = vmul.f32 %v8953_v62, %v12674_v21  ;;  %v12679_v0 = vld [vmem:[#allocation78_spill] sm:$0xff]  ;;  %v9407_v1 = vpop.permute.xlu1 %3030  ;;  %3907 = vperm.xlu1 %5262, %v5196_v32  }
 0x33a   : > { %12669 = vst [vmem:[#allocation141_spill] sm:$0xff] %v9363_v16  ;;  %12671 = vst [vmem:[#allocation311_spill] sm:$0xff] %v9368_v46  ;;  %v2130_v16 = vmul.f32 %v8906_v35, %v12679_v0  ;;  %v5195_v46 = vld [vmem:[%s5319_s17 + $0x210] sm:$0xff]  ;;  %v3399_v56 = vmul.f32 %v8953_v62, %v12679_v0  ;;  %v9421_v55 = vmul.f32 %v8374_v58, %v12674_v21 }
 0x33b   : > { %12672 = vst [vmem:[#allocation312_spill] sm:$0xff] %v9371_v19  ;;  %12673 = vst [vmem:[#allocation313_spill] sm:$0xff] %v9377_v45  ;;  %v9405_v19 = vadd.f32 %v2128_v17, %v12681_v26  ;;  %v9425_v17 = vmul.f32 %v8339_v38, %v12679_v0  ;;  %v9427_v26 = vpop.permute.xlu0 %3025  ;;  %3902 = vperm.xlu0 %5261, %v5195_v46   ;;  %v12751_v45 = vld [vmem:[#allocation16_spill] sm:$0xff] }
 0x33c   : > { %12676 = vst [vmem:[#allocation192_spill] sm:$0xff] %v9383_v4  ;;  %12677 = vst [vmem:[#allocation23_spill] sm:$0xff] %v9389_v39  ;;  %v9410_v4 = vadd.f32 %v2129_v37, %v8870_v57  ;;  %v9413_v39 = vadd.f32 %v3398_v10, %v8893_v6  ;;  %v12690_v57 = vld [vmem:[#allocation96_spill] sm:$0xff]  ;;  %v9434_v6 = vmul.f32 %v8374_v58, %v12679_v0  ;;  %v12693_v10 = vld [vmem:[#allocation81_spill] sm:$0xff] }
 0x33d   : > { %12678 = vst [vmem:[#allocation314_spill] sm:$0xff] %v9393_v20  ;;  %12680 = vst [vmem:[#allocation78_spill] sm:$0xff] %v9402_v59  ;;  %v9417_v20 = vmul.f32 %v8339_v38, %v12674_v21  ;;  %v9430_v37 = vadd.f32 %v3397_v48, %v12690_v57  ;;  %v9439_v21 = vadd.f32 %v2131_v61, %v8915_v31  ;;  %v5197_v57 = vld [vmem:[%s5319_s17 + $0x220] sm:$0xff]  ;;  %v12698_v0 = vld [vmem:[#allocation184_spill] sm:$0xff] }
 0x33e   : > { %12682 = vst [vmem:[#allocation26_spill] sm:$0xff] %v9405_v19  ;;  %12683 = vst [vmem:[#allocation315_spill] sm:$0xff] %v9407_v1  ;;  %v5198_v19 = vld [vmem:[%s5319_s17 + $0x228] sm:$0xff]  ;;  %v9443_v1 = vadd.f32 %v3400_v5, %v8939_v54  ;;  %v9448_v48 = vadd.f32 %v2130_v16, %v8867_v28  ;;  %v3402_v46 = vmul.f32 %v8953_v62, %v12693_v10  ;;  %v9463_v54 = vld [vmem:[%s11436_s1 + $0x2] ss:$0 sm:$0xff] }
 0x33f   : > { %12684 = vst [vmem:[#allocation316_spill] sm:$0xff] %v9410_v4  ;;  %12685 = vst [vmem:[#allocation317_spill] sm:$0xff] %v9413_v39  ;;  %v2133_v4 = vmul.f32 %v8906_v35, %v12693_v10  ;;  %v9452_v39 = vadd.f32 %v3399_v56, %v12698_v0  ;;  %v9458_v31 = vmul.f32 %v8339_v38, %v12693_v10  ;;  %v12701_v61 = vld [vmem:[#allocation202_spill] sm:$0xff]  ;;  %v9469_v56 = vpop.permute.xlu1 %3040  ;;  %3917 = vperm.xlu1 %5262, %v5198_v19  }
 0x340   : > { %12686 = vst [vmem:[#allocation318_spill] sm:$0xff] %v9417_v20  ;;  %12687 = vst [vmem:[#allocation319_spill] sm:$0xff] %v9421_v55  ;;  %v2405_v28 = vmul.f32 %v9463_v54, %v12701_v61  ;;  %v12702_v16 = vld [vmem:[#allocation86_spill] sm:$0xff]  ;;  %3912 = vperm.xlu0 %5261, %v5197_v57   ;;  %v12713_v55 = vld [vmem:[#allocation91_spill] sm:$0xff] }
 0x341   : > { %12688 = vst [vmem:[#allocation320_spill] sm:$0xff] %v9425_v17  ;;  %12689 = vst [vmem:[#allocation321_spill] sm:$0xff] %v9427_v26  ;;  %v12696_v26 = vld [vmem:[#allocation40_spill] sm:$0xff]  ;;  %v2407_v5 = vmul.f32 %v9463_v54, %v12702_v16  ;;  %v12717_v17 = vld [vmem:[#allocation146_spill] sm:$0xff] }
 0x342   : > { %12691 = vst [vmem:[#allocation96_spill] sm:$0xff] %v9430_v37  ;;  %12692 = vst [vmem:[#allocation322_spill] sm:$0xff] %v9434_v6  ;;  %v2132_v32 = vmul.f32 %v8906_v35, %v12696_v26  ;;  %v3401_v0 = vmul.f32 %v8953_v62, %v12696_v26  ;;  %v9485_v37 = vpop.permute.xlu0 %3035  ;;  %v12718_v57 = vld [vmem:[#allocation84_spill] sm:$0xff] }
 0x343   : > { %12694 = vst [vmem:[#allocation81_spill] sm:$0xff] %v9439_v21  ;;  %12695 = vst [vmem:[#allocation323_spill] sm:$0xff] %v9443_v1  ;;  %v9475_v21 = vmul.f32 %v8374_v58, %v12693_v10  ;;  %v12706_v1 = vld [vmem:[#allocation207_spill] sm:$0xff]  ;;  %v9514_v20 = vpop.permute.xlu1 %3050 }
 0x344   : > { %12697 = vst [vmem:[#allocation40_spill] sm:$0xff] %v9448_v48  ;;  %12699 = vst [vmem:[#allocation184_spill] sm:$0xff] %v9452_v39  ;;  %v9479_v48 = vmul.f32 %v8339_v38, %v12696_v26  ;;  %v2406_v61 = vmul.f32 %v9463_v54, %v12706_v1  ;;  %v12707_v39 = vld [vmem:[#allocation88_spill] sm:$0xff]  ;;  %v5200_v1 = vld [vmem:[%s5319_s17 + $0x238] sm:$0xff] }
 0x345   : > { %12700 = vst [vmem:[#allocation324_spill] sm:$0xff] %v9458_v31  ;;  %12703 = vst [vmem:[#allocation202_spill] sm:$0xff] %v9469_v56  ;;  %v2409_v16 = vmul.f32 %v9463_v54, %v12707_v39  ;;  %v9489_v56 = vmul.f32 %v8374_v58, %v12696_v26  ;;  %v12710_v31 = vld [vmem:[#allocation89_spill] sm:$0xff]  ;;  %v2410_v39 = vmul.f32 %v9463_v54, %v12713_v55  ;;  %v12721_v55 = vld [vmem:[#allocation160_spill] sm:$0xff]  ;;  %3927 = vperm.xlu1 %5262, %v5200_v1  }
 0x346   : > { %12704 = vst [vmem:[#allocation86_spill] sm:$0xff] %v9475_v21  ;;  %12705 = vst [vmem:[#allocation325_spill] sm:$0xff] %v9479_v48  ;;  %v2408_v10 = vmul.f32 %v9463_v54, %v12710_v31  ;;  %v12711_v21 = vld [vmem:[#allocation48_spill] sm:$0xff]  ;;  %v9496_v48 = vadd.f32 %v2133_v4, %v8961_v3  ;;  %v9504_v26 = vadd.f32 %v2132_v32, %v8912_v14  ;;  %v12719_v4 = vld [vmem:[#allocation9_spill] sm:$0xff] }
 0x347   : > { %12708 = vst [vmem:[#allocation207_spill] sm:$0xff] %v9485_v37  ;;  %12709 = vst [vmem:[#allocation88_spill] sm:$0xff] %v9489_v56  ;;  %v2411_v6 = vmul.f32 %v9463_v54, %v12711_v21  ;;  %v12714_v37 = vld [vmem:[#allocation92_spill] sm:$0xff]  ;;  %v9508_v31 = vadd.f32 %v3402_v46, %v8984_v18  ;;  %v2432_v21 = vadd.f32 %v2405_v28, %v12717_v17  ;;  %v12725_v32 = vld [vmem:[#allocation11_spill] sm:$0xff]  ;;  %v9525_v46 = vpop.permute.xlu0 %3045 }
 0x348   : > { %12712 = vst [vmem:[#allocation89_spill] sm:$0xff] %v9496_v48  ;;  %v2413_v19 = vmul.f32 %v9463_v54, %v12714_v37  ;;  %12715 = vst [vmem:[#allocation48_spill] sm:$0xff] %v9504_v26  ;;  %v5199_v56 = vld [vmem:[%s5319_s17 + $0x230] sm:$0xff]  ;;  %v2134_v3 = vmul.f32 %v8906_v35, %v12718_v57  ;;  %v2434_v48 = vadd.f32 %v2407_v5, %v12719_v4  ;;  %v12724_v37 = vld [vmem:[#allocation7_spill] sm:$0xff] }
 0x349   : > { %12716 = vst [vmem:[#allocation91_spill] sm:$0xff] %v9508_v31  ;;  %12720 = vst [vmem:[#allocation92_spill] sm:$0xff] %v9514_v20  ;;  %v9517_v59 = vadd.f32 %v3401_v0, %v12721_v55  ;;  %v9521_v14 = vmul.f32 %v8339_v38, %v12718_v57  ;;  %v2433_v18 = vadd.f32 %v2406_v61, %v12724_v37  ;;  %v12727_v28 = vld [vmem:[#allocation8_spill] sm:$0xff]  ;;  %v12728_v4 = vld [vmem:[#allocation15_spill] sm:$0xff]  ;;  %3922 = vperm.xlu0 %5261, %v5199_v56  }
 0x34a   : > { %v2436_v17 = vadd.f32 %v2409_v16, %v12725_v32  ;;  %12726 = vst [vmem:[#allocation9_spill] sm:$0xff] %v9525_v46  ;;  %v3403_v35 = vmul.f32 %v8953_v62, %v12718_v57  ;;  %v2435_v5 = vadd.f32 %v2408_v10, %v12727_v28  ;;  %v2438_v0 = vadd.f32 %v2411_v6, %v12728_v4  ;;  %v12729_v55 = vld [vmem:[#allocation213_spill] sm:$0xff]  ;;  %v5202_v61 = vld [vmem:[%s5319_s17 + $0x248] sm:$0xff]  ;;  %v12732_v1 = vld [vmem:[#allocation10_spill] sm:$0xff] }
 0x34b   : > { %12722 = vst [vmem:[#allocation146_spill] sm:$0xff] %v9517_v59  ;;  %12723 = vst [vmem:[#allocation84_spill] sm:$0xff] %v9521_v14  ;;  %v2412_v26 = vmul.f32 %v9463_v54, %v12729_v55  ;;  %v12730_v38 = vld [vmem:[#allocation61_spill] sm:$0xff]  ;;  %v9538_v16 = vmul.f32 %v8374_v58, %v12718_v57  ;;  %v2437_v37 = vadd.f32 %v2410_v39, %v12732_v1  ;;  %v12733_v32 = vld [vmem:[#allocation163_spill] sm:$0xff]  ;;  %v9552_v58 = vpop.permute.xlu1 %3465  ;;  %3937 = vperm.xlu1 %5262, %v5202_v61  }
 0x34c   : > { %v2415_v20 = vmul.f32 %v9463_v54, %v12730_v38  ;;  %v2440_v46 = vadd.f32 %v2413_v19, %v12733_v32  ;;  %v12734_v31 = vld [vmem:[#allocation66_spill] sm:$0xff]  ;;  %v12735_v28 = vld [vmem:[#allocation51_spill] sm:$0xff]  ;;  %v12736_v55 = vld [vmem:[#allocation57_spill] sm:$0xff]  ;;  %v9550_v14 = vadd.f32 %v2134_v3, %v8958_v9  ;;  %12739 = vst [vmem:[#allocation11_spill] sm:$0xff] %v9552_v58 }
 0x34d   : > { %12731 = vst [vmem:[#allocation160_spill] sm:$0xff] %v9538_v16  ;;  %v2414_v10 = vmul.f32 %v9463_v54, %v12734_v31  ;;  %v5201_v6 = vld [vmem:[%s5319_s17 + $0x240] sm:$0xff]  ;;  %v2486_v4 = vadd.f32 %v12735_v28, %v2432_v21  ;;  %v2488_v59 = vadd.f32 %v12736_v55, %v2434_v48  ;;  %v12740_v39 = vld [vmem:[#allocation52_spill] sm:$0xff]  ;;  %v9558_v21 = vpop.permute.xlu0 %3460  ;;  %v9561_v48 = vadd.f32 %v3403_v35, %v8967_v29  ;;  %v12748_v58 = vld [vmem:[#allocation165_spill] sm:$0xff] }
 0x34e   : > { %v12737_v38 = vld [vmem:[#allocation218_spill] sm:$0xff]  ;;  %12738 = vst [vmem:[#allocation7_spill] sm:$0xff] %v9550_v14  ;;  %v2487_v57 = vadd.f32 %v12740_v39, %v2433_v18  ;;  %12743 = vst [vmem:[#allocation8_spill] sm:$0xff] %v9558_v21  ;;  %v2442_v18 = vadd.f32 %v2415_v20, %v12748_v58  ;;  %3932 = vperm.xlu0 %5261, %v5201_v6   ;;  %v5204_v39 = vld [vmem:[%s5319_s17 + $0x258] sm:$0xff] }
 0x34f   : > { %v2417_v56 = vmul.f32 %v9463_v54, %v12737_v38  ;;  %v12741_v19 = vld [vmem:[#allocation62_spill] sm:$0xff]  ;;  %12744 = vst [vmem:[#allocation15_spill] sm:$0xff] %v9561_v48  ;;  %v12747_v38 = vld [vmem:[#allocation13_spill] sm:$0xff]  ;;  %v2441_v21 = vadd.f32 %v2414_v10, %v12751_v45  ;;  %v12752_v61 = vld [vmem:[#allocation71_spill] sm:$0xff]  ;;  %3947 = vperm.xlu1 %5262, %v5204_v39  }
 0x350   : > { %v2490_v1 = vadd.f32 %v12741_v19, %v2436_v17  ;;  %v12742_v31 = vld [vmem:[#allocation98_spill] sm:$0xff]  ;;  %v2439_v14 = vadd.f32 %v2412_v26, %v12747_v38  ;;  %v12749_v17 = vld [vmem:[#allocation63_spill] sm:$0xff]  ;;  %v2419_v29 = vmul.f32 %v9463_v54, %v12752_v61  ;;  %v5203_v35 = vld [vmem:[%s5319_s17 + $0x250] sm:$0xff] }
 0x351   : > { %v2416_v32 = vmul.f32 %v9463_v54, %v12742_v31  ;;  %v12745_v28 = vld [vmem:[#allocation58_spill] sm:$0xff]  ;;  %v2491_v19 = vadd.f32 %v12749_v17, %v2437_v37  ;;  %v12753_v48 = vld [vmem:[#allocation20_spill] sm:$0xff]  ;;  %v12756_v6 = vld [vmem:[#allocation209_spill] sm:$0xff]  ;;  %v9583_v37 = vpop.permute.xlu1 %3475  ;;  %v9594_v17 = vpop.permute.xlu0 %3470 }
 0x352   : > { %v2489_v55 = vadd.f32 %v12745_v28, %v2435_v5  ;;  %v12746_v9 = vld [vmem:[#allocation170_spill] sm:$0xff]  ;;  %v2444_v5 = vadd.f32 %v2417_v56, %v12753_v48  ;;  %v9581_v58 = vadd.f32 %v12756_v6, %v2488_v59  ;;  %12757 = vst [vmem:[#allocation213_spill] sm:$0xff] %v9583_v37  ;;  %v12761_v48 = vld [vmem:[#allocation53_spill] sm:$0xff]  ;;  %12762 = vst [vmem:[#allocation61_spill] sm:$0xff] %v9594_v17  ;;  %3942 = vperm.xlu0 %5261, %v5203_v35  }
 0x353   : > { %v2492_v3 = vadd.f32 %v12746_v9, %v2438_v0  ;;  %v12750_v16 = vld [vmem:[#allocation174_spill] sm:$0xff]  ;;  %v12755_v0 = vld [vmem:[#allocation43_spill] sm:$0xff]  ;;  %v12760_v9 = vld [vmem:[#allocation45_spill] sm:$0xff]  ;;  %v9592_v38 = vadd.f32 %v12761_v48, %v2490_v1 }
 0x354   : > { %v2494_v31 = vadd.f32 %v12750_v16, %v2440_v46  ;;  %v12754_v28 = vld [vmem:[#allocation222_spill] sm:$0xff]  ;;  %v9578_v20 = vadd.f32 %v12755_v0, %v2486_v4  ;;  %v12758_v46 = vld [vmem:[#allocation164_spill] sm:$0xff]  ;;  %v9589_v56 = vadd.f32 %v12760_v9, %v2487_v57  ;;  %v12763_v4 = vld [vmem:[#allocation171_spill] sm:$0xff] }
 0x355   : > { %v2418_v26 = vmul.f32 %v9463_v54, %v12754_v28  ;;  %v2443_v45 = vadd.f32 %v2416_v32, %v12758_v46  ;;  %v12759_v16 = vld [vmem:[#allocation224_spill] sm:$0xff]  ;;  %v2493_v59 = vadd.f32 %v12763_v4, %v2439_v14  ;;  %v12765_v0 = vld [vmem:[#allocation54_spill] sm:$0xff]  ;;  %v12767_v57 = vld [vmem:[#allocation175_spill] sm:$0xff] }
 0x356   : > { %v2421_v10 = vmul.f32 %v9463_v54, %v12759_v16  ;;  %v12764_v61 = vld [vmem:[#allocation176_spill] sm:$0xff]  ;;  %v9599_v6 = vadd.f32 %v12765_v0, %v2489_v55  ;;  %v5206_v16 = vld [vmem:[%s5319_s17 + $0x268] sm:$0xff]  ;;  %v2495_v9 = vadd.f32 %v12767_v57, %v2441_v21  ;;  %v12768_v37 = vld [vmem:[#allocation166_spill] sm:$0xff] }
 0x357   : > { %v2496_v28 = vadd.f32 %v12764_v61, %v2442_v18  ;;  %v12766_v32 = vld [vmem:[#allocation212_spill] sm:$0xff]  ;;  %v2446_v1 = vadd.f32 %v2419_v29, %v12768_v37  ;;  %v12769_v48 = vld [vmem:[#allocation55_spill] sm:$0xff]  ;;  %v12770_v39 = vld [vmem:[#allocation214_spill] sm:$0xff]  ;;  %3957 = vperm.xlu1 %5262, %v5206_v16  }
 0x358   : > { %v9602_v46 = vadd.f32 %v12766_v32, %v2492_v3  ;;  %v9608_v12 = vadd.f32 %v12769_v48, %v2491_v19  ;;  %v9611_v17 = vadd.f32 %v12770_v39, %v2494_v31  ;;  %v5205_v14 = vld [vmem:[%s5319_s17 + $0x260] sm:$0xff]  ;;  %v12771_v18 = vld [vmem:[#allocation181_spill] sm:$0xff]  ;;  %v12772_v55 = vld [vmem:[#allocation19_spill] sm:$0xff]  ;;  %v9620_v32 = vpop.permute.xlu1 %3485 }
 0x359   : > { %v2498_v4 = vadd.f32 %v12771_v18, %v2444_v5  ;;  %v2445_v61 = vadd.f32 %v2418_v26, %v12772_v55  ;;  %v12773_v3 = vld [vmem:[#allocation225_spill] sm:$0xff]  ;;  %v12774_v0 = vld [vmem:[#allocation186_spill] sm:$0xff]  ;;  %12775 = vst [vmem:[#allocation10_spill] sm:$0xff] %v9620_v32  ;;  %v12778_v57 = vld [vmem:[#allocation104_spill] sm:$0xff]  ;;  %v9628_v26 = vpop.permute.xlu0 %3480  ;;  %3952 = vperm.xlu0 %5261, %v5205_v14  }
 0x35a   : > { %v2420_v35 = vmul.f32 %v9463_v54, %v12773_v3  ;;  %v2423_v21 = vmul.f32 %v9463_v54, %v12774_v0  ;;  %v12776_v29 = vld [vmem:[#allocation177_spill] sm:$0xff]  ;;  %v2422_v48 = vmul.f32 %v9463_v54, %v12778_v57  ;;  %v12779_v5 = vld [vmem:[#allocation226_spill] sm:$0xff]  ;;  %12780 = vst [vmem:[#allocation163_spill] sm:$0xff] %v9628_v26  ;;  %v12781_v18 = vld [vmem:[#allocation107_spill] sm:$0xff] }
 0x35b   : > { %v2497_v19 = vadd.f32 %v12776_v29, %v2443_v45  ;;  %v12777_v37 = vld [vmem:[#allocation153_spill] sm:$0xff]  ;;  %v2425_v39 = vmul.f32 %v9463_v54, %v12779_v5  ;;  %v2424_v55 = vmul.f32 %v9463_v54, %v12781_v18  ;;  %v12783_v32 = vld [vmem:[#allocation215_spill] sm:$0xff]  ;;  %v12784_v29 = vld [vmem:[#allocation216_spill] sm:$0xff]  ;;  %v9654_v25 = vadd.f32 %v12792_v51, %v2498_v4 }
 0x35c   : > { %v2448_v31 = vadd.f32 %v2421_v10, %v12777_v37  ;;  %v12782_v3 = vld [vmem:[#allocation109_spill] sm:$0xff]  ;;  %v9635_v45 = vadd.f32 %v12783_v32, %v2493_v59  ;;  %v9638_v10 = vadd.f32 %v12784_v29, %v2496_v28  ;;  %v12785_v57 = vld [vmem:[#allocation188_spill] sm:$0xff]  ;;  %v12786_v5 = vld [vmem:[#allocation227_spill] sm:$0xff]  ;;  %v2499_v59 = vadd.f32 %v12789_v15, %v2445_v61 }
 0x35d   : > { %v2427_v0 = vmul.f32 %v9463_v54, %v12782_v3  ;;  %v5208_v37 = vld [vmem:[%s5319_s17 + $0x278] sm:$0xff]  ;;  %v2500_v44 = vadd.f32 %v12785_v57, %v2446_v1  ;;  %v2426_v26 = vmul.f32 %v9463_v54, %v12786_v5  ;;  %v12787_v16 = vld [vmem:[#allocation110_spill] sm:$0xff]  ;;  %v5207_v3 = vld [vmem:[%s5319_s17 + $0x270] sm:$0xff]  ;;  %v9656_v1 = vpop.permute.xlu1 %3495  ;;  %v9662_v43 = vadd.f32 %v12797_v33, %v2497_v19  ;;  %v9664_v15 = vpop.permute.xlu0 %3490 }
 0x35e   : > { %v2429_v24 = vmul.f32 %v9463_v54, %v12787_v16  ;;  %v12788_v18 = vld [vmem:[#allocation217_spill] sm:$0xff]  ;;  %v12790_v32 = vld [vmem:[#allocation22_spill] sm:$0xff]  ;;  %v12791_v29 = vld [vmem:[#allocation168_spill] sm:$0xff]  ;;  %12793 = vst [vmem:[#allocation66_spill] sm:$0xff] %v9656_v1  ;;  %v2449_v16 = vadd.f32 %v2422_v48, %v12795_v49  ;;  %3967 = vperm.xlu1 %5262, %v5208_v37   ;;  %3962 = vperm.xlu0 %5261, %v5207_v3  }
 0x35f   : > { %v9647_v41 = vadd.f32 %v12788_v18, %v2495_v9  ;;  %v2447_v28 = vadd.f32 %v2420_v35, %v12790_v32  ;;  %v2450_v14 = vadd.f32 %v2423_v21, %v12791_v29  ;;  %v12794_v57 = vld [vmem:[#allocation190_spill] sm:$0xff]  ;;  %v12796_v9 = vld [vmem:[#allocation28_spill] sm:$0xff]  ;;  %12798 = vst [vmem:[#allocation51_spill] sm:$0xff] %v9664_v15  ;;  %v12799_v61 = vld [vmem:[#allocation167_spill] sm:$0xff] }
 0x360   : > { %v2502_v5 = vadd.f32 %v12794_v57, %v2448_v31  ;;  %v2452_v18 = vadd.f32 %v2425_v39, %v12796_v9  ;;  %v2451_v35 = vadd.f32 %v2424_v55, %v12799_v61  ;;  %v12800_v21 = vld [vmem:[#allocation155_spill] sm:$0xff]  ;;  %v12802_v29 = vld [vmem:[#allocation113_spill] sm:$0xff]  ;;  %v12806_v37 = vld [vmem:[#allocation100_spill] sm:$0xff] }
 0x361   : > { %v2454_v51 = vadd.f32 %v2427_v0, %v12800_v21  ;;  %v12801_v4 = vld [vmem:[#allocation83_spill] sm:$0xff]  ;;  %v2431_v31 = vmul.f32 %v9463_v54, %v12802_v29  ;;  %v9678_v15 = vadd.f32 %v12806_v37, %v2500_v44  ;;  %v5209_v55 = vld [vmem:[%s5319_s17 + $0x280] sm:$0xff]  ;;  %v12808_v0 = vld [vmem:[#allocation189_spill] sm:$0xff] }
 0x362   : > { %v2428_v32 = vmul.f32 %v9463_v54, %v12801_v4  ;;  %v5210_v49 = vld [vmem:[%s5319_s17 + $0x288] sm:$0xff]  ;;  %v2501_v61 = vadd.f32 %v12808_v0, %v2447_v28  ;;  %v12809_v21 = vld [vmem:[#allocation193_spill] sm:$0xff]  ;;  %v12811_v29 = vld [vmem:[#allocation178_spill] sm:$0xff]  ;;  %3972 = vperm.xlu0 %5261, %v5209_v55  }
 0x363   : > { %v12803_v48 = vld [vmem:[#allocation27_spill] sm:$0xff]  ;;  %12807 = vst [vmem:[#allocation57_spill] sm:$0xff] %v9678_v15  ;;  %v2504_v4 = vadd.f32 %v12809_v21, %v2450_v14  ;;  %v9686_v2 = vadd.f32 %v12811_v29, %v2499_v59  ;;  %v12815_v28 = vld [vmem:[#allocation73_spill] sm:$0xff]  ;;  %v9697_v14 = vpop.permute.xlu0 %3500  ;;  %3977 = vperm.xlu1 %5262, %v5210_v49   ;;  %v12817_v0 = vld [vmem:[#allocation194_spill] sm:$0xff] }
 0x364   : > { %v2453_v39 = vadd.f32 %v2426_v26, %v12803_v48  ;;  %v12804_v57 = vld [vmem:[#allocation3_spill] sm:$0xff]  ;;  %v9688_v26 = vpop.permute.xlu1 %3505  ;;  %v9695_v37 = vadd.f32 %v12815_v28, %v2502_v5  ;;  %12816 = vst [vmem:[#allocation52_spill] sm:$0xff] %v9697_v14  ;;  %v2505_v21 = vadd.f32 %v12817_v0, %v2451_v35  ;;  %v12818_v59 = vld [vmem:[#allocation200_spill] sm:$0xff] }
 0x365   : > { %v2456_v33 = vadd.f32 %v2429_v24, %v12804_v57  ;;  %v12805_v19 = vld [vmem:[#allocation115_spill] sm:$0xff]  ;;  %12812 = vst [vmem:[#allocation218_spill] sm:$0xff] %v9688_v26  ;;  %v12814_v57 = vld [vmem:[#allocation197_spill] sm:$0xff]  ;;  %v2508_v29 = vadd.f32 %v12818_v59, %v2454_v51  ;;  %v2455_v26 = vadd.f32 %v2428_v32, %v12819_v47  ;;  %v12824_v28 = vld [vmem:[#allocation44_spill] sm:$0xff] }
 0x366   : > { %v2430_v9 = vmul.f32 %v9463_v54, %v12805_v19  ;;  %v12810_v1 = vld [vmem:[#allocation203_spill] sm:$0xff]  ;;  %v2506_v44 = vadd.f32 %v12814_v57, %v2452_v18  ;;  %v12821_v18 = vld [vmem:[#allocation80_spill] sm:$0xff]  ;;  %v2729_v14 = vmul.f32 %v8953_v62, %v12824_v28  ;;  %v4187_v47 = vmul.f32 %v9463_v54, %v12824_v28  ;;  %v12826_v32 = vld [vmem:[#allocation74_spill] sm:$0xff] }
 0x367   : > { %v2730_v3 = vmul.f32 %v8953_v62, %v12810_v1  ;;  %v12813_v24 = vld [vmem:[#allocation191_spill] sm:$0xff]  ;;  %v4188_v19 = vmul.f32 %v9463_v54, %v12810_v1  ;;  %v2507_v57 = vadd.f32 %v12821_v18, %v2453_v39  ;;  %v2510_v1 = vadd.f32 %v12822_v22, %v2456_v33  ;;  %v5211_v49 = vld [vmem:[%s5319_s17 + $0x290] sm:$0xff]  ;;  %v12828_v22 = vld [vmem:[#allocation90_spill] sm:$0xff]  ;;  %v9730_v59 = vpop.permute.xlu0 %3510 }
 0x368   : > { %v2503_v48 = vadd.f32 %v12813_v24, %v2449_v16  ;;  %v12820_v15 = vld [vmem:[#allocation159_spill] sm:$0xff]  ;;  %v5212_v24 = vld [vmem:[%s5319_s17 + $0x298] sm:$0xff]  ;;  %v2457_v5 = vadd.f32 %v2430_v9, %v12823_v42  ;;  %v9719_v39 = vpop.permute.xlu1 %3515  ;;  %v12829_v33 = vld [vmem:[#allocation116_spill] sm:$0xff]  ;;  %12833 = vst [vmem:[#allocation58_spill] sm:$0xff] %v9730_v59  ;;  %3982 = vperm.xlu0 %5261, %v5211_v49  }
 0x369   : > { %v2458_v16 = vadd.f32 %v2431_v31, %v12820_v15  ;;  %v2757_v35 = vadd.f32 %v2730_v3, %v9589_v56  ;;  %v12825_v51 = vld [vmem:[#allocation183_spill] sm:$0xff]  ;;  %v9717_v31 = vadd.f32 %v12826_v32, %v2504_v4  ;;  %12827 = vst [vmem:[#allocation62_spill] sm:$0xff] %v9719_v39  ;;  %v4215_v42 = vadd.f32 %v4188_v19, %v12828_v22  ;;  %v12831_v3 = vld [vmem:[#allocation34_spill] sm:$0xff]  ;;  %v12835_v18 = vld [vmem:[#allocation208_spill] sm:$0xff] }
 0x36a   : > { %v9714_v15 = vadd.f32 %v12825_v51, %v2501_v61  ;;  %v2732_v9 = vmul.f32 %v8953_v62, %v12829_v33  ;;  %v12830_v55 = vld [vmem:[#allocation75_spill] sm:$0xff]  ;;  %v9728_v0 = vadd.f32 %v12831_v3, %v2506_v44  ;;  %3987 = vperm.xlu1 %5262, %v5212_v24   ;;  %v12834_v61 = vld [vmem:[#allocation82_spill] sm:$0xff]  ;;  %v12836_v51 = vld [vmem:[#allocation76_spill] sm:$0xff]  ;;  %v2756_v44 = vadd.f32 %v2729_v14, %v9578_v20 }
 0x36b   : > { %v9725_v56 = vadd.f32 %v12830_v55, %v2503_v48  ;;  %v2509_v4 = vadd.f32 %v12834_v61, %v2455_v26  ;;  %v2512_v28 = vadd.f32 %v12835_v18, %v2458_v16  ;;  %v9735_v32 = vadd.f32 %v12836_v51, %v2505_v21  ;;  %v12837_v19 = vld [vmem:[#allocation108_spill] sm:$0xff]  ;;  %v5214_v39 = vld [vmem:[%s5319_s17 + $0x2a8] sm:$0xff]  ;;  %v12839_v48 = vld [vmem:[#allocation205_spill] sm:$0xff] }
 0x36c   : > { %12832 = vst [vmem:[#allocation98_spill] sm:$0xff] %v9728_v0  ;;  %v9738_v22 = vadd.f32 %v12837_v19, %v2508_v29  ;;  %v2511_v55 = vadd.f32 %v12839_v48, %v2457_v5  ;;  %v12840_v3 = vld [vmem:[#allocation195_spill] sm:$0xff]  ;;  %v12841_v24 = vld [vmem:[#allocation228_spill] sm:$0xff]  ;;  %v5213_v26 = vld [vmem:[%s5319_s17 + $0x2a0] sm:$0xff]  ;;  %v4190_v29 = vmul.f32 %v9463_v54, %v12829_v33  ;;  %v9756_v51 = vpop.permute.xlu1 %3525 }
 0x36d   : > { %v9744_v0 = vadd.f32 %v12840_v3, %v2507_v57  ;;  %v9747_v59 = vadd.f32 %v12841_v24, %v2510_v1  ;;  %v12843_v16 = vld [vmem:[#allocation134_spill] sm:$0xff]  ;;  %v12844_v21 = vld [vmem:[#allocation49_spill] sm:$0xff]  ;;  %12846 = vst [vmem:[#allocation165_spill] sm:$0xff] %v9756_v51  ;;  %v2759_v57 = vadd.f32 %v2732_v9, %v9599_v6  ;;  %v12850_v48 = vld [vmem:[#allocation120_spill] sm:$0xff]  ;;  %3992 = vperm.xlu0 %5261, %v5213_v26  }
 0x36e   : > { %12838 = vst [vmem:[#allocation170_spill] sm:$0xff] %v9738_v22  ;;  %v2811_v61 = vadd.f32 %v12843_v16, %v2757_v35  ;;  %v4214_v18 = vadd.f32 %v4187_v47, %v12844_v21  ;;  %v12845_v49 = vld [vmem:[#allocation117_spill] sm:$0xff]  ;;  %v12848_v35 = vld [vmem:[#allocation119_spill] sm:$0xff]  ;;  %v9764_v47 = vpop.permute.xlu0 %3520  ;;  %3997 = vperm.xlu1 %5262, %v5214_v39   ;;  %v2733_v3 = vmul.f32 %v8953_v62, %v12850_v48  ;;  %v12853_v16 = vld [vmem:[#allocation204_spill] sm:$0xff] }
 0x36f   : > { %12842 = vst [vmem:[#allocation13_spill] sm:$0xff] %v9747_v59  ;;  %v2731_v5 = vmul.f32 %v8953_v62, %v12845_v49  ;;  %v12847_v20 = vld [vmem:[#allocation137_spill] sm:$0xff]  ;;  %v4189_v1 = vmul.f32 %v9463_v54, %v12845_v49  ;;  %v2734_v19 = vmul.f32 %v8953_v62, %v12848_v35  ;;  %12849 = vst [vmem:[#allocation63_spill] sm:$0xff] %v9764_v47  ;;  %v12856_v39 = vld [vmem:[#allocation123_spill] sm:$0xff] }
 0x370   : > { %v4269_v14 = vadd.f32 %v12847_v20, %v4215_v42  ;;  %v4192_v33 = vmul.f32 %v9463_v54, %v12848_v35  ;;  %v12851_v24 = vld [vmem:[#allocation229_spill] sm:$0xff]  ;;  %v9774_v6 = vadd.f32 %v12853_v16, %v2512_v28  ;;  %v4191_v20 = vmul.f32 %v9463_v54, %v12850_v48  ;;  %v12857_v35 = vld [vmem:[#allocation112_spill] sm:$0xff]  ;;  %v12859_v22 = vld [vmem:[#allocation223_spill] sm:$0xff] }
 0x371   : > { %v9771_v42 = vadd.f32 %v12851_v24, %v2509_v4  ;;  %v5216_v9 = vld [vmem:[%s5319_s17 + $0x2b8] sm:$0xff]  ;;  %v2736_v51 = vmul.f32 %v8953_v62, %v12856_v39  ;;  %v9783_v47 = vadd.f32 %v12857_v35, %v2511_v55  ;;  %v5215_v59 = vld [vmem:[%s5319_s17 + $0x2b0] sm:$0xff]  ;;  %v4268_v4 = vadd.f32 %v12859_v22, %v4214_v18  ;;  %v12862_v48 = vld [vmem:[#allocation35_spill] sm:$0xff] }
 0x372   : > { %12854 = vst [vmem:[#allocation16_spill] sm:$0xff] %v9774_v6  ;;  %v12855_v21 = vld [vmem:[#allocation101_spill] sm:$0xff]  ;;  %v12860_v24 = vld [vmem:[#allocation60_spill] sm:$0xff]  ;;  %v2758_v26 = vadd.f32 %v2731_v5, %v9581_v58  ;;  %v9790_v16 = vadd.f32 %v8971_v8, %v2811_v61  ;;  %v12863_v6 = vld [vmem:[#allocation210_spill] sm:$0xff]  ;;  %v2761_v55 = vadd.f32 %v2734_v19, %v9608_v12  ;;  %v9800_v22 = vpop.permute.xlu0 %3530  ;;  %4007 = vperm.xlu1 %5262, %v5216_v9  }
 0x373   : > { %12852 = vst [vmem:[#allocation174_spill] sm:$0xff] %v9771_v42  ;;  %v2810_v49 = vadd.f32 %v12855_v21, %v2756_v44  ;;  %12858 = vst [vmem:[#allocation71_spill] sm:$0xff] %v9783_v47  ;;  %v4217_v28 = vadd.f32 %v4190_v29, %v12860_v24  ;;  %v9792_v44 = vpop.permute.xlu1 %3535  ;;  %v2813_v21 = vadd.f32 %v12862_v48, %v2759_v57  ;;  %v12864_v35 = vld [vmem:[#allocation32_spill] sm:$0xff]  ;;  %v12866_v18 = vld [vmem:[#allocation94_spill] sm:$0xff]  ;;  %4002 = vperm.xlu0 %5261, %v5215_v59  }
 0x374   : > { %12861 = vst [vmem:[#allocation20_spill] sm:$0xff] %v9790_v16  ;;  %v4216_v42 = vadd.f32 %v4189_v1, %v12863_v6  ;;  %v9798_v47 = vadd.f32 %v12864_v35, %v4269_v14  ;;  %v4219_v58 = vadd.f32 %v4192_v33, %v12866_v18  ;;  %v2760_v8 = vadd.f32 %v2733_v3, %v9592_v38  ;;  %v12867_v29 = vld [vmem:[#allocation125_spill] sm:$0xff]  ;;  %v5218_v57 = vld [vmem:[%s5319_s17 + $0x2c8] sm:$0xff]  ;;  %v5217_v33 = vld [vmem:[%s5319_s17 + $0x2c0] sm:$0xff] }
 0x375   : > { %v4194_v61 = vmul.f32 %v9463_v54, %v12856_v39  ;;  %v2735_v5 = vmul.f32 %v8953_v62, %v12867_v29  ;;  %v12868_v1 = vld [vmem:[#allocation211_spill] sm:$0xff]  ;;  %v2763_v14 = vadd.f32 %v2736_v51, %v9635_v45  ;;  %v4193_v19 = vmul.f32 %v9463_v54, %v12867_v29  ;;  %v12869_v6 = vld [vmem:[#allocation33_spill] sm:$0xff]  ;;  %v12870_v38 = vld [vmem:[#allocation140_spill] sm:$0xff] }
 0x376   : > { %12865 = vst [vmem:[#allocation222_spill] sm:$0xff] %v9798_v47  ;;  %v4218_v12 = vadd.f32 %v4191_v20, %v12868_v1  ;;  %v9814_v9 = vadd.f32 %v12869_v6, %v2810_v49  ;;  %v4271_v3 = vadd.f32 %v12870_v38, %v4217_v28  ;;  %v12871_v24 = vld [vmem:[#allocation132_spill] sm:$0xff]  ;;  %v12873_v35 = vld [vmem:[#allocation263_spill] sm:$0xff]  ;;  %v12875_v45 = vld [vmem:[#allocation133_spill] sm:$0xff]  ;;  %v9831_v28 = vadd.f32 %v9012_v23, %v2813_v21 }
 0x377   : > { %v2812_v39 = vadd.f32 %v12871_v24, %v2758_v26  ;;  %v12872_v48 = vld [vmem:[#allocation128_spill] sm:$0xff]  ;;  %v9822_v18 = vadd.f32 %v12873_v35, %v4268_v4  ;;  %v9824_v20 = vpop.permute.xlu1 %3545  ;;  %v4270_v51 = vadd.f32 %v12875_v45, %v4216_v42  ;;  %v12876_v29 = vld [vmem:[#allocation149_spill] sm:$0xff]  ;;  %v9833_v26 = vpop.permute.xlu0 %3540  ;;  %4017 = vperm.xlu1 %5262, %v5218_v57   ;;  %v12878_v6 = vld [vmem:[#allocation114_spill] sm:$0xff]  ;;  %v2762_v42 = vadd.f32 %v2735_v5, %v9602_v46 }
 0x378   : > { %v2738_v59 = vmul.f32 %v8953_v62, %v12872_v48  ;;  %12874 = vst [vmem:[#allocation43_spill] sm:$0xff] %v9824_v20  ;;  %v2815_v49 = vadd.f32 %v12876_v29, %v2761_v55  ;;  %v4196_v1 = vmul.f32 %v9463_v54, %v12872_v48  ;;  %12877 = vst [vmem:[#allocation209_spill] sm:$0xff] %v9831_v28  ;;  %v12879_v4 = vld [vmem:[#allocation138_spill] sm:$0xff]  ;;  %v12880_v35 = vld [vmem:[#allocation169_spill] sm:$0xff]  ;;  %4012 = vperm.xlu0 %5261, %v5217_v33  }
 0x379   : > { %v4273_v38 = vadd.f32 %v12878_v6, %v4219_v58  ;;  %v2814_v24 = vadd.f32 %v12879_v4, %v2760_v8  ;;  %v4221_v20 = vadd.f32 %v4194_v61, %v12880_v35  ;;  %v5220_v45 = vld [vmem:[%s5319_s17 + $0x2f8] sm:$0xff]  ;;  %v12881_v55 = vld [vmem:[#allocation106_spill] sm:$0xff]  ;;  %v5219_v57 = vld [vmem:[%s5319_s17 + $0x2d0] sm:$0x3]  ;;  %v9850_v46 = vadd.f32 %v9020_v60, %v2812_v39 }
 0x37a   : > { %v4272_v29 = vadd.f32 %v12881_v55, %v4218_v12  ;;  %v12882_v47 = vld [vmem:[#allocation154_spill] sm:$0xff]  ;;  %v12883_v16 = vld [vmem:[#allocation93_spill] sm:$0xff]  ;;  %v2765_v58 = vadd.f32 %v2738_v59, %v9647_v41  ;;  %v9853_v61 = vadd.f32 %v9016_v63, %v4271_v3  ;;  %v12886_v12 = vld [vmem:[#allocation131_spill] sm:$0xff]  ;;  %v9861_v41 = vadd.f32 %v9028_v40, %v4270_v51 }
 0x37b   : > { %v2817_v48 = vadd.f32 %v12882_v47, %v2763_v14  ;;  %v4220_v23 = vadd.f32 %v4193_v19, %v12883_v16  ;;  %v12884_v21 = vld [vmem:[#allocation221_spill] sm:$0xff]  ;;  %v9855_v5 = vpop.permute.xlu1 %3555  ;;  %v12885_v47 = vld [vmem:[#allocation172_spill] sm:$0xff]  ;;  %v2740_v14 = vmul.f32 %v8953_v62, %v12886_v12  ;;  %v9864_v19 = vadd.f32 %v9053_v27, %v2815_v49  ;;  %v9866_v33 = vpop.permute.xlu0 %3550  ;;  %4540 = vperm.xlu1 %5262, %v5220_v45   ;;  %v12887_v60 = vld [vmem:[#allocation87_spill] sm:$0xff] }
 0x37c   : > { %v2737_v28 = vmul.f32 %v8953_v62, %v12884_v21  ;;  %v4195_v8 = vmul.f32 %v9463_v54, %v12884_v21  ;;  %v4223_v16 = vadd.f32 %v4196_v1, %v12885_v47  ;;  %v4275_v63 = vadd.f32 %v12887_v60, %v4221_v20  ;;  %v12888_v3 = vld [vmem:[#allocation147_spill] sm:$0xff]  ;;  %4022 = vperm.xlu0 %5261, %v5219_v57   ;;  %v12889_v40 = vld [vmem:[#allocation148_spill] sm:$0xff]  ;;  %v5221_v20 = vld [vmem:[%s5319_s17 + $0x300] sm:$0xff] }
 0x37d   : > { %v2816_v39 = vadd.f32 %v12888_v3, %v2762_v42  ;;  %v9871_v59 = vadd.f32 %v9061_v13, %v2814_v24  ;;  %v9874_v1 = vadd.f32 %v9057_v53, %v4273_v38  ;;  %v5222_v6 = vld [vmem:[%s5319_s17 + $0x308] sm:$0xff]  ;;  %v4274_v51 = vadd.f32 %v12889_v40, %v4220_v23  ;;  %v12892_v38 = vld [vmem:[#allocation68_spill] sm:$0xff]  ;;  %v12896_v47 = vld [vmem:[#allocation273_spill] sm:$0xff] }
 0x37e   : > { %v2764_v27 = vadd.f32 %v2737_v28, %v9611_v17  ;;  %v9880_v49 = vadd.f32 %v9069_v50, %v4272_v29  ;;  %v9883_v4 = vadd.f32 %v9093_v52, %v2817_v48  ;;  %v12890_v35 = vld [vmem:[#allocation231_spill] sm:$0xff]  ;;  %v4198_v53 = vmul.f32 %v9463_v54, %v12886_v12  ;;  %v12893_v17 = vld [vmem:[#allocation233_spill] sm:$0xff]  ;;  %v12894_v29 = vld [vmem:[#allocation102_spill] sm:$0xff] }
 0x37f   : > { %v2819_v42 = vadd.f32 %v12890_v35, %v2765_v58  ;;  %v12891_v13 = vld [vmem:[#allocation95_spill] sm:$0xff]  ;;  %v2739_v45 = vmul.f32 %v8953_v62, %v12892_v38  ;;  %v9892_v55 = vpop.permute.xlu1 %3565  ;;  %v4277_v50 = vadd.f32 %v12893_v17, %v4223_v16  ;;  %v2767_v52 = vadd.f32 %v2740_v14, %v9662_v43  ;;  %v9900_v23 = vpop.permute.xlu0 %3560  ;;  %4550 = vperm.xlu1 %5262, %v5222_v6   ;;  %v5224_v16 = vld [vmem:[%s5319_s17 + $0x318] sm:$0xff]  ;;  %v5223_v35 = vld [vmem:[%s5319_s17 + $0x310] sm:$0xff] }
 0x380   : > { %v4222_v24 = vadd.f32 %v4195_v8, %v12891_v13  ;;  %v4197_v28 = vmul.f32 %v9463_v54, %v12892_v38  ;;  %v2742_v48 = vmul.f32 %v8953_v62, %v12894_v29  ;;  %v4200_v21 = vmul.f32 %v9463_v54, %v12894_v29  ;;  %v12895_v57 = vld [vmem:[#allocation135_spill] sm:$0xff]  ;;  %4545 = vperm.xlu0 %5261, %v5221_v20   ;;  %v12897_v12 = vld [vmem:[#allocation85_spill] sm:$0xff]  ;;  %v12899_v13 = vld [vmem:[#allocation152_spill] sm:$0xff] }
 0x381   : > { %v2741_v58 = vmul.f32 %v8953_v62, %v12895_v57  ;;  %v9907_v8 = vadd.f32 %v9101_v34, %v2816_v39  ;;  %v9910_v43 = vadd.f32 %v12896_v47, %v4275_v63  ;;  %v2818_v14 = vadd.f32 %v12897_v12, %v2764_v27  ;;  %v12898_v3 = vld [vmem:[#allocation139_spill] sm:$0xff]  ;;  %v12900_v39 = vld [vmem:[#allocation180_spill] sm:$0xff]  ;;  %v12902_v17 = vld [vmem:[#allocation234_spill] sm:$0xff] }
 0x382   : > { %v4199_v60 = vmul.f32 %v9463_v54, %v12895_v57  ;;  %v2744_v6 = vmul.f32 %v8953_v62, %v12898_v3  ;;  %v9919_v40 = vadd.f32 %v9110_v36, %v4274_v51  ;;  %v4276_v34 = vadd.f32 %v12899_v13, %v4222_v24  ;;  %v12903_v57 = vld [vmem:[#allocation97_spill] sm:$0xff]  ;;  %v12907_v12 = vld [vmem:[#allocation99_spill] sm:$0xff] }
 0x383   : > { %v4225_v63 = vadd.f32 %v4198_v53, %v12900_v39  ;;  %v2766_v20 = vadd.f32 %v2739_v45, %v9638_v10  ;;  %v9926_v38 = vadd.f32 %v9133_v11, %v2819_v42  ;;  %v9928_v27 = vpop.permute.xlu1 %3575  ;;  %v2821_v29 = vadd.f32 %v12902_v17, %v2767_v52  ;;  %v9936_v24 = vpop.permute.xlu0 %3570  ;;  %4560 = vperm.xlu1 %5262, %v5224_v16   ;;  %v12905_v53 = vld [vmem:[#allocation179_spill] sm:$0xff]  ;;  %v12906_v45 = vld [vmem:[#allocation36_spill] sm:$0xff]  ;;  %v12909_v16 = vld [vmem:[#allocation162_spill] sm:$0xff] }
 0x384   : > { %v4224_v47 = vadd.f32 %v4197_v28, %v12903_v57  ;;  %v2769_v36 = vadd.f32 %v2742_v48, %v9686_v2  ;;  %v9934_v51 = vadd.f32 %v9137_v30, %v4277_v50  ;;  %v4227_v10 = vadd.f32 %v4200_v21, %v12905_v53  ;;  %4555 = vperm.xlu0 %5261, %v5223_v35   ;;  %v5226_v28 = vld [vmem:[%s5319_s17 + $0x328] sm:$0xff]  ;;  %v5225_v21 = vld [vmem:[%s5319_s17 + $0x320] sm:$0xff]  ;;  %v12915_v17 = vld [vmem:[#allocation281_spill] sm:$0xff] }
 0x385   : > { %12901 = vst [vmem:[#allocation164_spill] sm:$0xff] %v9926_v38  ;;  %v2768_v11 = vadd.f32 %v2741_v58, %v9654_v25  ;;  %v4202_v42 = vmul.f32 %v9463_v54, %v12898_v3  ;;  %v2743_v52 = vmul.f32 %v8953_v62, %v12906_v45  ;;  %v4226_v2 = vadd.f32 %v4199_v60, %v12907_v12  ;;  %v12908_v25 = vld [vmem:[#allocation236_spill] sm:$0xff]  ;;  %v9958_v62 = vld [vmem:[%s11436_s1 + $0x5] ss:$0 sm:$0xff]  ;;  %v12914_v39 = vld [vmem:[#allocation239_spill] sm:$0xff] }
 0x386   : > { %12904 = vst [vmem:[#allocation224_spill] sm:$0xff] %v9934_v51  ;;  %v2771_v30 = vadd.f32 %v2744_v6, %v9714_v15  ;;  %v4201_v50 = vmul.f32 %v9463_v54, %v12906_v45  ;;  %v9950_v48 = vadd.f32 %v9141_v7, %v2818_v14  ;;  %v4279_v58 = vadd.f32 %v12908_v25, %v4225_v63  ;;  %v12910_v60 = vld [vmem:[#allocation150_spill] sm:$0xff]  ;;  %v12920_v51 = vld [vmem:[#allocation57_spill] sm:$0xff] }
 0x387   : > { %v2820_v3 = vadd.f32 %v12909_v16, %v2766_v20  ;;  %v2746_v15 = vmul.f32 %v9958_v62, %v12910_v60  ;;  %v12911_v6 = vld [vmem:[#allocation278_spill] sm:$0xff]  ;;  %v9965_v13 = vpop.permute.xlu1 %3585  ;;  %v2823_v63 = vadd.f32 %v12914_v39, %v2769_v36  ;;  %v4204_v20 = vmul.f32 %v9463_v54, %v12910_v60  ;;  %v9974_v53 = vpop.permute.xlu0 %3580  ;;  %4570 = vperm.xlu1 %5262, %v5226_v28   ;;  %v12919_v16 = vld [vmem:[#allocation136_spill] sm:$0xff] }
 0x388   : > { %v9963_v35 = vadd.f32 %v12911_v6, %v4276_v34  ;;  %12912 = vst [vmem:[#allocation45_spill] sm:$0xff] %v9965_v13  ;;  %v12913_v7 = vld [vmem:[#allocation230_spill] sm:$0xff]  ;;  %v9972_v57 = vadd.f32 %v12915_v17, %v2821_v29  ;;  %v12918_v34 = vld [vmem:[#allocation4_spill] sm:$0xff]  ;;  %v4229_v6 = vadd.f32 %v4202_v42, %v12919_v16  ;;  %4565 = vperm.xlu0 %5261, %v5225_v21   ;;  %v12923_v13 = vld [vmem:[#allocation187_spill] sm:$0xff] }
 0x389   : > { %v4278_v14 = vadd.f32 %v12913_v7, %v4224_v47  ;;  %v12917_v45 = vld [vmem:[#allocation46_spill] sm:$0xff]  ;;  %v2822_v25 = vadd.f32 %v12918_v34, %v2768_v11  ;;  %v2770_v47 = vadd.f32 %v2743_v52, %v12920_v51  ;;  %v5228_v7 = vld [vmem:[%s5319_s17 + $0x338] sm:$0xff]  ;;  %v4228_v29 = vadd.f32 %v4201_v50, %v12923_v13  ;;  %v12924_v17 = vld [vmem:[#allocation151_spill] sm:$0xff] }
 0x38a   : > { %12916 = vst [vmem:[#allocation53_spill] sm:$0xff] %v9972_v57  ;;  %v4281_v12 = vadd.f32 %v12917_v45, %v4227_v10  ;;  %v12921_v36 = vld [vmem:[#allocation6_spill] sm:$0xff]  ;;  %v2745_v57 = vmul.f32 %v9958_v62, %v12924_v17  ;;  %v5227_v28 = vld [vmem:[%s5319_s17 + $0x330] sm:$0xff]  ;;  %v2773_v10 = vadd.f32 %v2746_v15, %v9725_v56  ;;  %v4203_v11 = vmul.f32 %v9463_v54, %v12924_v17  ;;  %v12925_v42 = vld [vmem:[#allocation283_spill] sm:$0xff] }
 0x38b   : > { %v4280_v39 = vadd.f32 %v12921_v36, %v4226_v2  ;;  %v12922_v38 = vld [vmem:[#allocation242_spill] sm:$0xff]  ;;  %v9991_v51 = vadd.f32 %v12925_v42, %v2820_v3  ;;  %v9996_v2 = vpop.permute.xlu1 %3676  ;;  %v12931_v45 = vld [vmem:[#allocation285_spill] sm:$0xff]  ;;  %v10007_v16 = vpop.permute.xlu0 %3590  ;;  %4580 = vperm.xlu1 %5262, %v5228_v7   ;;  %v12934_v3 = vld [vmem:[#allocation243_spill] sm:$0xff] }
 0x38c   : > { %v2825_v60 = vadd.f32 %v12922_v38, %v2771_v30  ;;  %v12926_v52 = vld [vmem:[#allocation282_spill] sm:$0xff]  ;;  %12928 = vst [vmem:[#allocation176_spill] sm:$0xff] %v9996_v2  ;;  %v12929_v38 = vld [vmem:[#allocation77_spill] sm:$0xff]  ;;  %v10002_v56 = vadd.f32 %v12931_v45, %v4278_v14  ;;  %v12936_v42 = vld [vmem:[#allocation291_spill] sm:$0xff]  ;;  %4575 = vperm.xlu0 %5261, %v5227_v28  }
 0x38d   : > { %v9994_v21 = vadd.f32 %v12926_v52, %v4279_v58  ;;  %v4231_v30 = vadd.f32 %v4204_v20, %v12929_v38  ;;  %v12930_v50 = vld [vmem:[#allocation158_spill] sm:$0xff]  ;;  %v12932_v15 = vld [vmem:[#allocation289_spill] sm:$0xff]  ;;  %v4283_v58 = vadd.f32 %v12934_v3, %v4229_v6  ;;  %v10012_v52 = vadd.f32 %v12936_v42, %v2822_v25  ;;  %v5230_v2 = vld [vmem:[%s5319_s17 + $0x348] sm:$0xff] }
 0x38e   : > { %v2748_v13 = vmul.f32 %v9958_v62, %v12930_v50  ;;  %v10005_v34 = vadd.f32 %v12932_v15, %v2823_v63  ;;  %v12935_v36 = vld [vmem:[#allocation237_spill] sm:$0xff]  ;;  %v12937_v20 = vld [vmem:[#allocation290_spill] sm:$0xff]  ;;  %v2772_v63 = vadd.f32 %v2745_v57, %v9695_v37  ;;  %v12942_v7 = vld [vmem:[#allocation295_spill] sm:$0xff] }
 0x38f   : > { %12927 = vst [vmem:[#allocation171_spill] sm:$0xff] %v9994_v21  ;;  %v2824_v17 = vadd.f32 %v12935_v36, %v2770_v47  ;;  %v10015_v38 = vadd.f32 %v12937_v20, %v4281_v12  ;;  %v12939_v14 = vld [vmem:[#allocation238_spill] sm:$0xff]  ;;  %v12940_v15 = vld [vmem:[#allocation293_spill] sm:$0xff]  ;;  %v10024_v21 = vadd.f32 %v12942_v7, %v2825_v60  ;;  %v12944_v47 = vld [vmem:[#allocation247_spill] sm:$0xff]  ;;  %v4206_v12 = vmul.f32 %v9463_v54, %v12930_v50  ;;  %v10033_v42 = vpop.permute.xlu1 %3686 }
 0x390   : > { %12933 = vst [vmem:[#allocation54_spill] sm:$0xff] %v10005_v34  ;;  %v4282_v45 = vadd.f32 %v12939_v14, %v4228_v29  ;;  %v10021_v34 = vadd.f32 %v12940_v15, %v4280_v39  ;;  %v5229_v6 = vld [vmem:[%s5319_s17 + $0x340] sm:$0xff]  ;;  %v2827_v3 = vadd.f32 %v12944_v47, %v2773_v10  ;;  %v12945_v25 = vld [vmem:[#allocation103_spill] sm:$0xff]  ;;  %v12946_v28 = vld [vmem:[#allocation232_spill] sm:$0xff]  ;;  %v2775_v39 = vadd.f32 %v2748_v13, %v9735_v32 }
 0x391   : > { %12938 = vst [vmem:[#allocation212_spill] sm:$0xff] %v10015_v38  ;;  %12943 = vst [vmem:[#allocation166_spill] sm:$0xff] %v10024_v21  ;;  %v4230_v36 = vadd.f32 %v4203_v11, %v12945_v25  ;;  %v2747_v29 = vmul.f32 %v9958_v62, %v12946_v28  ;;  %v12948_v37 = vld [vmem:[#allocation122_spill] sm:$0xff]  ;;  %v4205_v60 = vmul.f32 %v9463_v54, %v12946_v28  ;;  %v12949_v10 = vld [vmem:[#allocation235_spill] sm:$0xff]  ;;  %v10041_v11 = vpop.permute.xlu0 %3681  ;;  %4590 = vperm.xlu1 %5262, %v5230_v2  }
 0x392   : > { %12941 = vst [vmem:[#allocation175_spill] sm:$0xff] %v10021_v34  ;;  %12947 = vst [vmem:[#allocation55_spill] sm:$0xff] %v10033_v42  ;;  %v4285_v57 = vadd.f32 %v12948_v37, %v4231_v30  ;;  %v2750_v20 = vmul.f32 %v9958_v62, %v12949_v10  ;;  %v4208_v50 = vmul.f32 %v9463_v54, %v12949_v10  ;;  %v12951_v14 = vld [vmem:[#allocation143_spill] sm:$0xff]  ;;  %v12952_v7 = vld [vmem:[#allocation297_spill] sm:$0xff]  ;;  %4585 = vperm.xlu0 %5261, %v5229_v6  }
 0x393   : > { %12950 = vst [vmem:[#allocation214_spill] sm:$0xff] %v10041_v11  ;;  %v2749_v15 = vmul.f32 %v9958_v62, %v12951_v14  ;;  %v10048_v30 = vadd.f32 %v12952_v7, %v2824_v17  ;;  %v12954_v47 = vld [vmem:[#allocation296_spill] sm:$0xff]  ;;  %v5232_v13 = vld [vmem:[%s5319_s17 + $0x358] sm:$0xff]  ;;  %v4207_v37 = vmul.f32 %v9463_v54, %v12951_v14  ;;  %v12958_v10 = vld [vmem:[#allocation299_spill] sm:$0xff]  ;;  %v2774_v6 = vadd.f32 %v2747_v29, %v9717_v31 }
 0x394   : > { %v10051_v32 = vadd.f32 %v12954_v47, %v4283_v58  ;;  %v12956_v25 = vld [vmem:[#allocation240_spill] sm:$0xff]  ;;  %v10060_v42 = vadd.f32 %v12958_v10, %v4282_v45  ;;  %v12960_v21 = vld [vmem:[#allocation241_spill] sm:$0xff]  ;;  %v12961_v7 = vld [vmem:[#allocation79_spill] sm:$0xff]  ;;  %v2777_v45 = vadd.f32 %v2750_v20, %v9744_v0 }
 0x395   : > { %12953 = vst [vmem:[#allocation181_spill] sm:$0xff] %v10048_v30  ;;  %v2826_v28 = vadd.f32 %v12956_v25, %v2772_v63  ;;  %v12957_v2 = vld [vmem:[#allocation12_spill] sm:$0xff]  ;;  %v4284_v17 = vadd.f32 %v12960_v21, %v4230_v36  ;;  %v4233_v58 = vadd.f32 %v4206_v12, %v12961_v7  ;;  %v12962_v47 = vld [vmem:[#allocation301_spill] sm:$0xff]  ;;  %v10069_v63 = vpop.permute.xlu1 %3696  ;;  %v12967_v10 = vld [vmem:[#allocation302_spill] sm:$0xff]  ;;  %v10077_v21 = vpop.permute.xlu0 %3691  ;;  %4600 = vperm.xlu1 %5262, %v5232_v13  }
 0x396   : > { %12955 = vst [vmem:[#allocation19_spill] sm:$0xff] %v10051_v32  ;;  %v2752_v11 = vmul.f32 %v9958_v62, %v12957_v2  ;;  %12959 = vst [vmem:[#allocation225_spill] sm:$0xff] %v10060_v42  ;;  %v5231_v38 = vld [vmem:[%s5319_s17 + $0x350] sm:$0xff]  ;;  %v10067_v32 = vadd.f32 %v12962_v47, %v2827_v3  ;;  %v12965_v14 = vld [vmem:[#allocation249_spill] sm:$0xff]  ;;  %v10075_v42 = vadd.f32 %v12967_v10, %v4285_v57 }
 0x397   : > { %12964 = vst [vmem:[#allocation177_spill] sm:$0xff] %v10069_v63  ;;  %v2829_v25 = vadd.f32 %v12965_v14, %v2775_v39  ;;  %v12966_v30 = vld [vmem:[#allocation105_spill] sm:$0xff]  ;;  %12969 = vst [vmem:[#allocation104_spill] sm:$0xff] %v10077_v21  ;;  %v12970_v36 = vld [vmem:[#allocation39_spill] sm:$0xff]  ;;  %v4210_v29 = vmul.f32 %v9463_v54, %v12957_v2  ;;  %4595 = vperm.xlu0 %5261, %v5231_v38  }
 0x398   : > { %12963 = vst [vmem:[#allocation186_spill] sm:$0xff] %v10067_v32  ;;  %v4232_v34 = vadd.f32 %v4205_v60, %v12966_v30  ;;  %12968 = vst [vmem:[#allocation153_spill] sm:$0xff] %v10075_v42  ;;  %v4235_v31 = vadd.f32 %v4208_v50, %v12970_v36  ;;  %v12971_v12 = vld [vmem:[#allocation98_spill] sm:$0xff]  ;;  %v5234_v60 = vld [vmem:[%s5319_s17 + $0x368] sm:$0xff] }
 0x399   : > { %v2776_v3 = vadd.f32 %v2749_v15, %v12971_v12  ;;  %v12972_v7 = vld [vmem:[#allocation14_spill] sm:$0xff]  ;;  %v12973_v30 = vld [vmem:[#allocation196_spill] sm:$0xff]  ;;  %v12975_v13 = vld [vmem:[#allocation303_spill] sm:$0xff]  ;;  %4610 = vperm.xlu1 %5262, %v5234_v60  }
 0x39a   : > { %v2751_v39 = vmul.f32 %v9958_v62, %v12972_v7  ;;  %v4234_v0 = vadd.f32 %v4207_v37, %v12973_v30  ;;  %v12974_v20 = vld [vmem:[#allocation174_spill] sm:$0xff]  ;;  %v4209_v47 = vmul.f32 %v9463_v54, %v12972_v7  ;;  %v10091_v14 = vadd.f32 %v12975_v13, %v2826_v28  ;;  %v12978_v36 = vld [vmem:[#allocation245_spill] sm:$0xff]  ;;  %v10101_v37 = vpop.permute.xlu1 %3706  ;;  %v5235_v60 = vld [vmem:[%s5319_s17 + $0x370] sm:$0xff] }
 0x39b   : > { %v2779_v57 = vadd.f32 %v2752_v11, %v12974_v20  ;;  %v5233_v50 = vld [vmem:[%s5319_s17 + $0x360] sm:$0xff]  ;;  %v2828_v2 = vadd.f32 %v12978_v36, %v2774_v6  ;;  %v12980_v21 = vld [vmem:[#allocation305_spill] sm:$0xff]  ;;  %12982 = vst [vmem:[#allocation109_spill] sm:$0xff] %v10101_v37  ;;  %v10110_v6 = vpop.permute.xlu0 %3701 }
 0x39c   : > { %12976 = vst [vmem:[#allocation226_spill] sm:$0xff] %v10091_v14  ;;  %v12977_v15 = vld [vmem:[#allocation126_spill] sm:$0xff]  ;;  %v10099_v63 = vadd.f32 %v12980_v21, %v4284_v17  ;;  %v12984_v7 = vld [vmem:[#allocation253_spill] sm:$0xff]  ;;  %12987 = vst [vmem:[#allocation216_spill] sm:$0xff] %v10110_v6  ;;  %4605 = vperm.xlu0 %5261, %v5233_v50  }
 0x39d   : > { %v4287_v10 = vadd.f32 %v12977_v15, %v4233_v58  ;;  %v12979_v12 = vld [vmem:[#allocation18_spill] sm:$0xff]  ;;  %v2831_v28 = vadd.f32 %v12984_v7, %v2777_v45  ;;  %v12985_v58 = vld [vmem:[#allocation307_spill] sm:$0xff]  ;;  %v12989_v17 = vld [vmem:[#allocation124_spill] sm:$0xff] }
 0x39e   : > { %v2754_v38 = vmul.f32 %v9958_v62, %v12979_v12  ;;  %12981 = vst [vmem:[#allocation107_spill] sm:$0xff] %v10099_v63  ;;  %v12983_v11 = vld [vmem:[#allocation246_spill] sm:$0xff]  ;;  %v4212_v20 = vmul.f32 %v9463_v54, %v12979_v12  ;;  %v10108_v13 = vadd.f32 %v12985_v58, %v2829_v25  ;;  %v12988_v15 = vld [vmem:[#allocation127_spill] sm:$0xff]  ;;  %v2830_v21 = vadd.f32 %v12989_v17, %v2776_v3  ;;  %v12990_v42 = vld [vmem:[#allocation201_spill] sm:$0xff] }
 0x39f   : > { %v4286_v30 = vadd.f32 %v12983_v11, %v4232_v34  ;;  %v4289_v36 = vadd.f32 %v12988_v15, %v4235_v31  ;;  %v4237_v37 = vadd.f32 %v4210_v29, %v12990_v42  ;;  %v12991_v32 = vld [vmem:[#allocation170_spill] sm:$0xff]  ;;  %v5236_v11 = vld [vmem:[%s5319_s17 + $0x378] sm:$0xff]  ;;  %v12993_v63 = vld [vmem:[#allocation256_spill] sm:$0xff]  ;;  %v10148_v15 = vpop.permute.xlu0 %3711 }
 0x3a0   : > { %12986 = vst [vmem:[#allocation215_spill] sm:$0xff] %v10108_v13  ;;  %v2778_v34 = vadd.f32 %v2751_v39, %v12991_v32  ;;  %v12992_v45 = vld [vmem:[#allocation129_spill] sm:$0xff]  ;;  %v2833_v12 = vadd.f32 %v12993_v63, %v2779_v57  ;;  %v12994_v14 = vld [vmem:[#allocation199_spill] sm:$0xff]  ;;  %v12995_v58 = vld [vmem:[#allocation248_spill] sm:$0xff]  ;;  %4620 = vperm.xlu1 %5262, %v5236_v11   ;;  %4615 = vperm.xlu0 %5261, %v5235_v60  }
 0x3a1   : > { %v4288_v7 = vadd.f32 %v12992_v45, %v4234_v0  ;;  %v4236_v25 = vadd.f32 %v4209_v47, %v12994_v14  ;;  %v2753_v6 = vmul.f32 %v9958_v62, %v12995_v58  ;;  %v12996_v13 = vld [vmem:[#allocation71_spill] sm:$0xff]  ;;  %v4211_v3 = vmul.f32 %v9463_v54, %v12995_v58  ;;  %v12997_v42 = vld [vmem:[#allocation309_spill] sm:$0xff]  ;;  %v12998_v29 = vld [vmem:[#allocation308_spill] sm:$0xff]  ;;  %v10132_v0 = vpop.permute.xlu1 %3716  ;;  %13006 = vst [vmem:[#allocation217_spill] sm:$0xff] %v10148_v15 }
 0x3a2   : > { %v2781_v31 = vadd.f32 %v2754_v38, %v12996_v13  ;;  %v10127_v32 = vadd.f32 %v12997_v42, %v2828_v2  ;;  %v10130_v39 = vadd.f32 %v12998_v29, %v4287_v10  ;;  %13000 = vst [vmem:[#allocation227_spill] sm:$0xff] %v10132_v0  ;;  %v13001_v63 = vld [vmem:[#allocation157_spill] sm:$0xff]  ;;  %v13002_v47 = vld [vmem:[#allocation310_spill] sm:$0xff]  ;;  %v13008_v45 = vld [vmem:[#allocation251_spill] sm:$0xff] }
 0x3a3   : > { %v4239_v57 = vadd.f32 %v4212_v20, %v13001_v63  ;;  %v10136_v14 = vadd.f32 %v13002_v47, %v4286_v30  ;;  %v13003_v50 = vld [vmem:[#allocation313_spill] sm:$0xff]  ;;  %v10144_v13 = vld [vmem:[%s11436_s1 + $0x6] ss:$0 sm:$0xff]  ;;  %v2832_v30 = vadd.f32 %v13008_v45, %v2778_v34  ;;  %v5238_v63 = vld [vmem:[%s5319_s17 + $0x388] sm:$0xff] }
 0x3a4   : > { %12999 = vst [vmem:[#allocation188_spill] sm:$0xff] %v10130_v39  ;;  %v10139_v38 = vadd.f32 %v13003_v50, %v2831_v28  ;;  %v13005_v2 = vld [vmem:[#allocation58_spill] sm:$0xff]  ;;  %v13007_v17 = vld [vmem:[#allocation257_spill] sm:$0xff]  ;;  %v13011_v28 = vld [vmem:[#allocation23_spill] sm:$0xff]  ;;  %4630 = vperm.xlu1 %5262, %v5238_v63  }
 0x3a5   : > { %v3603_v10 = vmul.f32 %v10144_v13, %v13005_v2  ;;  %v4291_v20 = vadd.f32 %v13007_v17, %v4237_v37  ;;  %v13009_v58 = vld [vmem:[#allocation314_spill] sm:$0xff]  ;;  %v10156_v29 = vadd.f32 %v13011_v28, %v4289_v36  ;;  %v13013_v47 = vld [vmem:[#allocation252_spill] sm:$0xff]  ;;  %v13014_v0 = vld [vmem:[#allocation13_spill] sm:$0xff] }
 0x3a6   : > { %13004 = vst [vmem:[#allocation110_spill] sm:$0xff] %v10139_v38  ;;  %v10153_v42 = vadd.f32 %v13009_v58, %v2830_v21  ;;  %v4290_v50 = vadd.f32 %v13013_v47, %v4236_v25  ;;  %v2780_v39 = vadd.f32 %v2753_v6, %v13014_v0  ;;  %v13015_v2 = vld [vmem:[#allocation78_spill] sm:$0xff]  ;;  %v13019_v34 = vld [vmem:[#allocation260_spill] sm:$0xff]  ;;  %v13020_v21 = vld [vmem:[#allocation111_spill] sm:$0xff]  ;;  %v10179_v25 = vpop.permute.xlu1 %3726 }
 0x3a7   : > { %13012 = vst [vmem:[#allocation22_spill] sm:$0xff] %v10156_v29  ;;  %v10162_v38 = vadd.f32 %v13015_v2, %v4288_v7  ;;  %v13017_v11 = vld [vmem:[#allocation318_spill] sm:$0xff]  ;;  %v2835_v17 = vadd.f32 %v13019_v34, %v2781_v31  ;;  %v4238_v45 = vadd.f32 %v4211_v3, %v13020_v21  ;;  %v10173_v36 = vld [vmem:[%s11436_s1 + $0x8] ss:$0 sm:$0xff]  ;;  %13022 = vst [vmem:[#allocation190_spill] sm:$0xff] %v10179_v25 }
 0x3a8   : > { %13010 = vst [vmem:[#allocation182_spill] sm:$0xff] %v10153_v42  ;;  %v10165_v15 = vadd.f32 %v13017_v11, %v2833_v12  ;;  %v5237_v37 = vld [vmem:[%s5319_s17 + $0x380] sm:$0xff]  ;;  %v13024_v58 = vld [vmem:[#allocation292_spill] sm:$0xff]  ;;  %v13025_v28 = vld [vmem:[#allocation63_spill] sm:$0xff]  ;;  %v10192_v11 = vpop.permute.xlu0 %3721 }
 0x3a9   : > { %13016 = vst [vmem:[#allocation168_spill] sm:$0xff] %v10162_v38  ;;  %v13021_v60 = vld [vmem:[#allocation250_spill] sm:$0xff]  ;;  %v3630_v31 = vadd.f32 %v3603_v10, %v13024_v58  ;;  %v3605_v3 = vmul.f32 %v10144_v13, %v13025_v28  ;;  %13026 = vst [vmem:[#allocation24_spill] sm:$0xff] %v10192_v11  ;;  %v13027_v34 = vld [vmem:[#allocation25_spill] sm:$0xff]  ;;  %4625 = vperm.xlu0 %5261, %v5237_v37  }
 0x3aa   : > { %13018 = vst [vmem:[#allocation219_spill] sm:$0xff] %v10165_v15  ;;  %v3053_v6 = vmul.f32 %v10173_v36, %v13021_v60  ;;  %v4349_v7 = vmul.f32 %v9958_v62, %v13021_v60  ;;  %v13023_v12 = vld [vmem:[#allocation130_spill] sm:$0xff]  ;;  %v13028_v21 = vld [vmem:[#allocation320_spill] sm:$0xff]  ;;  %v13030_v60 = vld [vmem:[#allocation319_spill] sm:$0xff]  ;;  %v4213_v11 = vmul.f32 %v9463_v54, %v13027_v34 }
 0x3ab   : > { %v4293_v0 = vadd.f32 %v13023_v12, %v4239_v57  ;;  %v10188_v47 = vld [vmem:[%s11436_s1 + $0x7] ss:$0 sm:$0xff]  ;;  %v2755_v57 = vmul.f32 %v9958_v62, %v13027_v34  ;;  %v10197_v10 = vadd.f32 %v13028_v21, %v2832_v30  ;;  %v10200_v12 = vadd.f32 %v13030_v60, %v4291_v20  ;;  %v5240_v29 = vld [vmem:[%s5319_s17 + $0x398] sm:$0xff]  ;;  %v5239_v30 = vld [vmem:[%s5319_s17 + $0x390] sm:$0xff] }
 0x3ac   : > { %v3819_v2 = vmul.f32 %v10188_v47, %v10179_v25  ;;  %v13031_v58 = vld [vmem:[#allocation62_spill] sm:$0xff]  ;;  %v13035_v21 = vld [vmem:[#allocation255_spill] sm:$0xff]  ;;  %v10216_v20 = vadd.f32 %v3053_v6, %v9814_v9  ;;  %v10219_v37 = vadd.f32 %v4349_v7, %v9822_v18  ;;  %v13037_v60 = vld [vmem:[#allocation324_spill] sm:$0xff]  ;;  %v10234_v6 = vpop.permute.xlu0 %3731  ;;  %4640 = vperm.xlu1 %5262, %v5240_v29  }
 0x3ad   : > { %13029 = vst [vmem:[#allocation28_spill] sm:$0xff] %v10197_v10  ;;  %v3604_v28 = vmul.f32 %v10144_v13, %v13031_v58  ;;  %v13032_v15 = vld [vmem:[#allocation254_spill] sm:$0xff]  ;;  %v4292_v10 = vadd.f32 %v13035_v21, %v4238_v45  ;;  %v3607_v45 = vmul.f32 %v10144_v13, %v9800_v22  ;;  %13041 = vst [vmem:[#allocation83_spill] sm:$0xff] %v10234_v6  ;;  %v13042_v18 = vld [vmem:[#allocation16_spill] sm:$0xff]  ;;  %4635 = vperm.xlu0 %5261, %v5239_v30  }
 0x3ae   : > { %v2834_v38 = vadd.f32 %v13032_v15, %v2780_v39  ;;  %v13033_v63 = vld [vmem:[#allocation322_spill] sm:$0xff]  ;;  %v10211_v42 = vadd.f32 %v3819_v2, %v3630_v31  ;;  %13036 = vst [vmem:[#allocation167_spill] sm:$0xff] %v10216_v20  ;;  %v10222_v39 = vadd.f32 %v13037_v60, %v2835_v17  ;;  %v10224_v15 = vpop.permute.xlu1 %3736  ;;  %v2782_v17 = vadd.f32 %v2755_v57, %v13042_v18  ;;  %v13043_v7 = vld [vmem:[#allocation288_spill] sm:$0xff]  ;;  %v13044_v58 = vld [vmem:[#allocation165_spill] sm:$0xff] }
 0x3af   : > { %v10209_v25 = vadd.f32 %v13033_v63, %v4290_v50  ;;  %13038 = vst [vmem:[#allocation155_spill] sm:$0xff] %v10224_v15  ;;  %v13039_v54 = vld [vmem:[#allocation86_spill] sm:$0xff]  ;;  %v3821_v9 = vmul.f32 %v10188_v47, %v10224_v15  ;;  %v3631_v34 = vadd.f32 %v3604_v28, %v13043_v7  ;;  %v3820_v63 = vmul.f32 %v10188_v47, %v10234_v6  ;;  %v13046_v60 = vld [vmem:[#allocation29_spill] sm:$0xff]  ;;  %v13049_v18 = vld [vmem:[#allocation156_spill] sm:$0xff] }
 0x3b0   : > { %13034 = vst [vmem:[#allocation220_spill] sm:$0xff] %v10211_v42  ;;  %v10227_v50 = vadd.f32 %v13039_v54, %v4293_v0  ;;  %v13040_v31 = vld [vmem:[#allocation118_spill] sm:$0xff]  ;;  %v3606_v0 = vmul.f32 %v10144_v13, %v13044_v58  ;;  %v3055_v54 = vmul.f32 %v10173_v36, %v13046_v60  ;;  %v4351_v28 = vmul.f32 %v9958_v62, %v13046_v60  ;;  %v13050_v30 = vld [vmem:[#allocation88_spill] sm:$0xff]  ;;  %v13057_v6 = vld [vmem:[#allocation259_spill] sm:$0xff] }
 0x3b1   : > { %v3632_v2 = vadd.f32 %v3605_v3, %v13040_v31  ;;  %v5242_v3 = vld [vmem:[%s5319_s17 + $0x3a8] sm:$0xff]  ;;  %v13045_v21 = vld [vmem:[#allocation198_spill] sm:$0xff]  ;;  %v13047_v31 = vld [vmem:[#allocation325_spill] sm:$0xff]  ;;  %v3054_v7 = vmul.f32 %v10173_v36, %v13049_v18  ;;  %v10257_v58 = vadd.f32 %v13050_v30, %v4292_v10  ;;  %v3609_v60 = vmul.f32 %v10144_v13, %v9833_v26 }
 0x3b2   : > { %v4240_v22 = vadd.f32 %v4213_v11, %v13045_v21  ;;  %v10247_v42 = vadd.f32 %v13047_v31, %v2834_v38  ;;  %v5241_v57 = vld [vmem:[%s5319_s17 + $0x3a0] sm:$0xff]  ;;  %v10259_v11 = vadd.f32 %v3820_v63, %v3631_v34  ;;  %v10261_v21 = vpop.permute.xlu1 %3746  ;;  %v4350_v38 = vmul.f32 %v9958_v62, %v13049_v18  ;;  %4650 = vperm.xlu1 %5262, %v5242_v3   ;;  %v5243_v34 = vld [vmem:[%s5319_s17 + $0x3b0] sm:$0xff]  ;;  %v13062_v20 = vld [vmem:[#allocation31_spill] sm:$0xff] }
 0x3b3   : > { %v10249_v29 = vadd.f32 %v3821_v9, %v3632_v2  ;;  %13052 = vst [vmem:[#allocation3_spill] sm:$0xff] %v10261_v21  ;;  %v13053_v2 = vld [vmem:[#allocation121_spill] sm:$0xff]  ;;  %v3823_v31 = vmul.f32 %v10188_v47, %v10261_v21  ;;  %v13055_v63 = vld [vmem:[#allocation294_spill] sm:$0xff]  ;;  %v3608_v18 = vmul.f32 %v10144_v13, %v9792_v44  ;;  %4645 = vperm.xlu0 %5261, %v5241_v57  }
 0x3b4   : > { %13051 = vst [vmem:[#allocation27_spill] sm:$0xff] %v10259_v11  ;;  %v3634_v9 = vadd.f32 %v3607_v45, %v13053_v2  ;;  %v3633_v30 = vadd.f32 %v3606_v0, %v13055_v63  ;;  %v5244_v2 = vld [vmem:[%s5319_s17 + $0x3b8] sm:$0xff]  ;;  %v13056_v26 = vld [vmem:[#allocation258_spill] sm:$0xff]  ;;  %v4294_v21 = vadd.f32 %v13057_v6, %v4240_v22  ;;  %v10283_v15 = vadd.f32 %v3055_v54, %v9850_v46  ;;  %v13060_v63 = vld [vmem:[#allocation20_spill] sm:$0xff] }
 0x3b5   : > { %13048 = vst [vmem:[#allocation113_spill] sm:$0xff] %v10249_v29  ;;  %v10270_v29 = vpop.permute.xlu0 %3741  ;;  %v2836_v11 = vadd.f32 %v13056_v26, %v2782_v17  ;;  %v10289_v0 = vadd.f32 %v4351_v28, %v9861_v41  ;;  %v10292_v44 = vadd.f32 %v3054_v7, %v13060_v63  ;;  %v3057_v57 = vmul.f32 %v10173_v36, %v13062_v20  ;;  %v13065_v6 = vld [vmem:[#allocation222_spill] sm:$0xff]  ;;  %v13066_v22 = vld [vmem:[#allocation244_spill] sm:$0xff]  ;;  %v13070_v26 = vld [vmem:[#allocation43_spill] sm:$0xff] }
 0x3b6   : > { %v3822_v45 = vmul.f32 %v10188_v47, %v10270_v29  ;;  %13058 = vst [vmem:[#allocation115_spill] sm:$0xff] %v10283_v15  ;;  %v10285_v3 = vadd.f32 %v3823_v31, %v3634_v9  ;;  %v10298_v17 = vpop.permute.xlu1 %3756  ;;  %v10301_v46 = vadd.f32 %v4350_v38, %v13065_v6  ;;  %v3636_v54 = vadd.f32 %v3609_v60, %v13066_v22  ;;  %v13068_v9 = vld [vmem:[#allocation261_spill] sm:$0xff]  ;;  %v5246_v63 = vld [vmem:[%s5319_s17 + $0x3c8] sm:$0x3]  ;;  %v13096_v15 = vld [vmem:[#allocation184_spill] sm:$0xff] }
 0x3b7   : > { %13061 = vst [vmem:[#allocation189_spill] sm:$0xff] %v10292_v44  ;;  %13064 = vst [vmem:[#allocation203_spill] sm:$0xff] %v10298_v17  ;;  %v3611_v41 = vmul.f32 %v10144_v13, %v9866_v33  ;;  %v3825_v28 = vmul.f32 %v10188_v47, %v10298_v17  ;;  %4660 = vperm.xlu1 %5262, %v5244_v2   ;;  %v3056_v31 = vmul.f32 %v10173_v36, %v13068_v9  ;;  %v13071_v2 = vld [vmem:[#allocation84_spill] sm:$0xff] }
 0x3b8   : > { %13059 = vst [vmem:[#allocation100_spill] sm:$0xff] %v10285_v3  ;;  %v10296_v10 = vadd.f32 %v3822_v45, %v3633_v30  ;;  %v13069_v30 = vld [vmem:[#allocation300_spill] sm:$0xff]  ;;  %v3610_v38 = vmul.f32 %v10144_v13, %v13070_v26  ;;  %4655 = vperm.xlu0 %5261, %v5243_v34   ;;  %v4353_v33 = vmul.f32 %v9958_v62, %v13062_v20 }
 0x3b9   : > { %v10308_v7 = vpop.permute.xlu0 %3751  ;;  %v3635_v45 = vadd.f32 %v3608_v18, %v13069_v30  ;;  %v4352_v6 = vmul.f32 %v9958_v62, %v13068_v9  ;;  %v10323_v22 = vadd.f32 %v13071_v2, %v2836_v11  ;;  %v10325_v3 = vadd.f32 %v3825_v28, %v3636_v54  ;;  %v5245_v18 = vld [vmem:[%s5319_s17 + $0x3c0] sm:$0xff]  ;;  %v13075_v34 = vld [vmem:[#allocation160_spill] sm:$0xff]  ;;  %s5251_s17 = smul.u32 216, %s13395_s13 }
 0x3ba   : > { %13063 = vst [vmem:[#allocation193_spill] sm:$0xff] %v10296_v10  ;;  %13067 = vst [vmem:[#allocation178_spill] sm:$0xff] %v10308_v7  ;;  %v3824_v60 = vmul.f32 %v10188_v47, %v10308_v7  ;;  %v10331_v10 = vadd.f32 %v3057_v57, %v9871_v59  ;;  %v10334_v7 = vadd.f32 %v13075_v34, %v4294_v21  ;;  %v10338_v20 = vpop.permute.xlu1 %3766  ;;  %v13078_v2 = vld [vmem:[#allocation192_spill] sm:$0xff]  ;;  %v13079_v21 = vld [vmem:[#allocation209_spill] sm:$0xff] }
 0x3bb   : > { %13072 = vst [vmem:[#allocation191_spill] sm:$0xff] %v10325_v3  ;;  %v3638_v54 = vadd.f32 %v3611_v41, %v13078_v2  ;;  %v3613_v28 = vmul.f32 %v10144_v13, %v9900_v23  ;;  %v3827_v26 = vmul.f32 %v10188_v47, %v10338_v20  ;;  %4670 = vperm.xlu1 %5262, %v5246_v63   ;;  %v13082_v11 = vld [vmem:[#allocation262_spill] sm:$0xff]  ;;  %v13144_v9 = vld [vmem:[#allocation304_spill] sm:$0xff]  ;;  %s11129_s10 = scalar_lea.vmem %s11438_s3, %s5251_s17 }
 0x3bc   : > { %13074 = vst [vmem:[#allocation197_spill] sm:$0xff] %v10331_v10  ;;  %v10336_v17 = vadd.f32 %v3824_v60, %v3635_v45  ;;  %v10350_v57 = vadd.f32 %v3056_v31, %v13079_v21  ;;  %v13081_v45 = vld [vmem:[#allocation306_spill] sm:$0xff]  ;;  %v3612_v34 = vmul.f32 %v10144_v13, %v9855_v5  ;;  %4665 = vperm.xlu0 %5261, %v5245_v18  }
 0x3bd   : > { %v10347_v59 = vpop.permute.xlu0 %3761  ;;  %v3637_v60 = vadd.f32 %v3610_v38, %v13081_v45  ;;  %v10358_v23 = vadd.f32 %v4353_v33, %v9880_v49  ;;  %v10361_v2 = vadd.f32 %v4352_v6, %v9853_v61  ;;  %v3059_v63 = vmul.f32 %v10173_v36, %v13082_v11  ;;  %v13085_v45 = vld [vmem:[#allocation142_spill] sm:$0xff]  ;;  %v13087_v33 = vld [vmem:[#allocation96_spill] sm:$0xff] }
 0x3be   : > { %13076 = vst [vmem:[#allocation73_spill] sm:$0xff] %v10336_v17  ;;  %13080 = vst [vmem:[#allocation194_spill] sm:$0xff] %v10350_v57  ;;  %v3826_v41 = vmul.f32 %v10188_v47, %v10347_v59  ;;  %v10365_v31 = vadd.f32 %v3827_v26, %v3638_v54  ;;  %v4355_v5 = vmul.f32 %v9958_v62, %v13082_v11  ;;  %v10375_v49 = vpop.permute.xlu1 %3776  ;;  %v13092_v17 = vld [vmem:[#allocation268_spill] sm:$0xff]  ;;  %v13133_v11 = vld [vmem:[#allocation53_spill] sm:$0xff] }
 0x3bf   : > { %v3058_v18 = vmul.f32 %v10173_v36, %v13085_v45  ;;  %v4354_v61 = vmul.f32 %v9958_v62, %v13085_v45  ;;  %v3640_v6 = vadd.f32 %v3613_v28, %v13087_v33  ;;  %v3615_v26 = vmul.f32 %v10144_v13, %v9936_v24  ;;  %v13091_v24 = vld [vmem:[#allocation5_spill] sm:$0xff] }
 0x3c0   : > { %13083 = vst [vmem:[#allocation200_spill] sm:$0xff] %v10365_v31  ;;  %v10373_v3 = vadd.f32 %v3826_v41, %v3637_v60  ;;  %v3829_v54 = vmul.f32 %v10188_v47, %v10375_v49  ;;  %v13089_v60 = vld [vmem:[#allocation312_spill] sm:$0xff]  ;;  %v10394_v28 = vadd.f32 %v3059_v63, %v9907_v8  ;;  %v3061_v33 = vmul.f32 %v10173_v36, %v13091_v24 }
 0x3c1   : > { %v10384_v21 = vpop.permute.xlu0 %3771  ;;  %v3639_v41 = vadd.f32 %v3612_v34, %v13089_v60  ;;  %v3060_v10 = vmul.f32 %v10173_v36, %v13092_v17  ;;  %v10403_v31 = vadd.f32 %v4355_v5, %v9919_v40  ;;  %v10406_v34 = vadd.f32 %v3058_v18, %v9864_v19  ;;  %v13097_v18 = vld [vmem:[#allocation317_spill] sm:$0xff] }
 0x3c2   : > { %13086 = vst [vmem:[#allocation161_spill] sm:$0xff] %v10373_v3  ;;  %v3614_v3 = vmul.f32 %v10144_v13, %v9892_v55  ;;  %v3828_v45 = vmul.f32 %v10188_v47, %v10384_v21  ;;  %13090 = vst [vmem:[#allocation159_spill] sm:$0xff] %v10394_v28  ;;  %v10400_v38 = vadd.f32 %v3829_v54, %v3640_v6  ;;  %v10412_v8 = vpop.permute.xlu1 %3786 }
 0x3c3   : > { %13094 = vst [vmem:[#allocation206_spill] sm:$0xff] %v10406_v34  ;;  %v4357_v55 = vmul.f32 %v9958_v62, %v13091_v24  ;;  %v10415_v63 = vadd.f32 %v4354_v61, %v9874_v1  ;;  %v3642_v30 = vadd.f32 %v3615_v26, %v13096_v15  ;;  %v3617_v6 = vmul.f32 %v10144_v13, %v9974_v53 }
 0x3c4   : > { %13093 = vst [vmem:[#allocation80_spill] sm:$0xff] %v10400_v38  ;;  %v10410_v60 = vadd.f32 %v3828_v45, %v3639_v41  ;;  %v3831_v40 = vmul.f32 %v10188_v47, %v10412_v8  ;;  %v4356_v5 = vmul.f32 %v9958_v62, %v13092_v17  ;;  %v3641_v54 = vadd.f32 %v3614_v3, %v13097_v18  ;;  %v13110_v3 = vld [vmem:[#allocation45_spill] sm:$0xff] }
 0x3c5   : > { %v10422_v19 = vpop.permute.xlu0 %3781  ;;  %v3616_v41 = vmul.f32 %v10144_v13, %v9928_v27  ;;  %v10434_v53 = vadd.f32 %v3061_v33, %v9950_v48  ;;  %v10437_v26 = vadd.f32 %v3060_v10, %v9883_v4  ;;  %v10444_v24 = vadd.f32 %v4357_v55, %v9963_v35  ;;  %v13103_v27 = vld [vmem:[#allocation271_spill] sm:$0xff]  ;;  %v13106_v48 = vld [vmem:[#allocation274_spill] sm:$0xff] }
 0x3c6   : > { %13095 = vst [vmem:[#allocation30_spill] sm:$0xff] %v10410_v60  ;;  %v3830_v1 = vmul.f32 %v10188_v47, %v10422_v19  ;;  %v10439_v45 = vadd.f32 %v3831_v40, %v3642_v30  ;;  %v3063_v18 = vmul.f32 %v10173_v36, %v13103_v27  ;;  %v10450_v61 = vpop.permute.xlu1 %3796  ;;  %v3062_v33 = vmul.f32 %v10173_v36, %v13106_v48  ;;  %v13107_v4 = vld [vmem:[#allocation146_spill] sm:$0xff] }
 0x3c7   : > { %13099 = vst [vmem:[#allocation44_spill] sm:$0xff] %v10434_v53  ;;  %13100 = vst [vmem:[#allocation183_spill] sm:$0xff] %v10437_v26  ;;  %v3644_v10 = vadd.f32 %v3617_v6, %v13107_v4  ;;  %v3619_v30 = vmul.f32 %v10144_v13, %v10007_v16  ;;  %v3833_v40 = vmul.f32 %v10188_v47, %v10450_v61  ;;  %v13118_v53 = vld [vmem:[#allocation164_spill] sm:$0xff] }
 0x3c8   : > { %13101 = vst [vmem:[#allocation74_spill] sm:$0xff] %v10439_v45  ;;  %v10448_v38 = vadd.f32 %v3830_v1, %v3641_v54  ;;  %13105 = vst [vmem:[#allocation116_spill] sm:$0xff] %v10450_v61  ;;  %v10462_v55 = vadd.f32 %v4356_v5, %v9910_v43  ;;  %v13109_v54 = vld [vmem:[#allocation323_spill] sm:$0xff]  ;;  %v3618_v45 = vmul.f32 %v10144_v13, %v13110_v3  ;;  %v13120_v6 = vld [vmem:[#allocation56_spill] sm:$0xff] }
 0x3c9   : > { %v10459_v35 = vpop.permute.xlu0 %3791  ;;  %v3643_v1 = vadd.f32 %v3616_v41, %v13109_v54  ;;  %v4359_v28 = vmul.f32 %v9958_v62, %v13103_v27  ;;  %v10475_v15 = vadd.f32 %v3833_v40, %v3644_v10  ;;  %v10478_v43 = vadd.f32 %v3063_v18, %v9991_v51  ;;  %v13115_v41 = vld [vmem:[#allocation276_spill] sm:$0xff]  ;;  %v13121_v10 = vld [vmem:[#allocation15_spill] sm:$0xff] }
 0x3ca   : > { %13104 = vst [vmem:[#allocation90_spill] sm:$0xff] %v10448_v38  ;;  %13108 = vst [vmem:[#allocation75_spill] sm:$0xff] %v10459_v35  ;;  %v3832_v38 = vmul.f32 %v10188_v47, %v10459_v35  ;;  %v4358_v5 = vmul.f32 %v9958_v62, %v13106_v48  ;;  %v3065_v3 = vmul.f32 %v10173_v36, %v13115_v41  ;;  %v10486_v4 = vpop.permute.xlu1 %3806  ;;  %v13164_v35 = vld [vmem:[#allocation186_spill] sm:$0xff]  ;;  %v13166_v61 = vld [vmem:[#allocation315_spill] sm:$0xff] }
 0x3cb   : > { %13113 = vst [vmem:[#allocation34_spill] sm:$0xff] %v10475_v15  ;;  %13114 = vst [vmem:[#allocation82_spill] sm:$0xff] %v10478_v43  ;;  %v10489_v60 = vadd.f32 %v3062_v33, %v13118_v53  ;;  %v3064_v27 = vmul.f32 %v10173_v36, %v13120_v6  ;;  %v3646_v40 = vadd.f32 %v3619_v30, %v13121_v10  ;;  %v13124_v30 = vld [vmem:[#allocation64_spill] sm:$0xff] }
 0x3cc   : > { %v10484_v54 = vadd.f32 %v3832_v38, %v3643_v1  ;;  %13117 = vst [vmem:[#allocation76_spill] sm:$0xff] %v10486_v4  ;;  %v3835_v51 = vmul.f32 %v10188_v47, %v10486_v4  ;;  %v4361_v48 = vmul.f32 %v9958_v62, %v13115_v41  ;;  %v4360_v38 = vmul.f32 %v9958_v62, %v13120_v6  ;;  %v13123_v1 = vld [vmem:[#allocation91_spill] sm:$0xff]  ;;  %v13127_v41 = vld [vmem:[#allocation224_spill] sm:$0xff] }
 0x3cd   : > { %13119 = vst [vmem:[#allocation108_spill] sm:$0xff] %v10489_v60  ;;  %v10496_v18 = vpop.permute.xlu0 %3801  ;;  %v3645_v15 = vadd.f32 %v3618_v45, %v13123_v1  ;;  %v10506_v33 = vadd.f32 %v4359_v28, %v10002_v56  ;;  %v3067_v10 = vmul.f32 %v10173_v36, %v13124_v30  ;;  %v10515_v34 = vadd.f32 %v4358_v5, %v13127_v41  ;;  %v13129_v45 = vld [vmem:[#allocation145_spill] sm:$0xff] }
 0x3ce   : > { %13116 = vst [vmem:[#allocation208_spill] sm:$0xff] %v10484_v54  ;;  %13122 = vst [vmem:[#allocation205_spill] sm:$0xff] %v10496_v18  ;;  %v3834_v53 = vmul.f32 %v10188_v47, %v10496_v18  ;;  %v13125_v54 = vld [vmem:[#allocation287_spill] sm:$0xff]  ;;  %v10512_v16 = vadd.f32 %v3835_v51, %v3646_v40  ;;  %v10518_v6 = vadd.f32 %v3065_v3, %v10012_v52  ;;  %v10524_v56 = vpop.permute.xlu1 %3897  ;;  %v13135_v40 = vld [vmem:[#allocation298_spill] sm:$0xff] }
 0x3cf   : > { %v3066_v26 = vmul.f32 %v10173_v36, %v13125_v54  ;;  %v3069_v1 = vmul.f32 %v10173_v36, %v13129_v45  ;;  %13131 = vst [vmem:[#allocation49_spill] sm:$0xff] %v10524_v56  ;;  %v10529_v44 = vadd.f32 %v3064_v27, %v13133_v11  ;;  %v4363_v5 = vmul.f32 %v9958_v62, %v13124_v30  ;;  %v13140_v27 = vld [vmem:[#allocation181_spill] sm:$0xff]  ;;  %v13142_v30 = vld [vmem:[#allocation54_spill] sm:$0xff] }
 0x3d0   : > { %13126 = vst [vmem:[#allocation195_spill] sm:$0xff] %v10512_v16  ;;  %13128 = vst [vmem:[#allocation228_spill] sm:$0xff] %v10518_v6  ;;  %v10522_v17 = vadd.f32 %v3834_v53, %v3645_v15  ;;  %v3068_v52 = vmul.f32 %v10173_v36, %v13135_v40  ;;  %v13138_v53 = vld [vmem:[#allocation175_spill] sm:$0xff]  ;;  %v4362_v11 = vmul.f32 %v9958_v62, %v13125_v54  ;;  %v13151_v60 = vld [vmem:[#allocation225_spill] sm:$0xff] }
 0x3d1   : > { %13134 = vst [vmem:[#allocation117_spill] sm:$0xff] %v10529_v44  ;;  %v10535_v3 = vpop.permute.xlu0 %3892  ;;  %v10540_v41 = vadd.f32 %v4361_v48, %v13138_v53  ;;  %v10548_v57 = vadd.f32 %v3067_v10, %v13140_v27  ;;  %v10551_v43 = vadd.f32 %v3066_v26, %v13142_v30  ;;  %v4365_v28 = vmul.f32 %v9958_v62, %v13129_v45  ;;  %v13148_v10 = vld [vmem:[#allocation72_spill] sm:$0xff]  ;;  %v13152_v18 = vld [vmem:[#allocation166_spill] sm:$0xff]  ;;  %v13156_v48 = vld [vmem:[#allocation37_spill] sm:$0xff] }
 0x3d2   : > { %13130 = vst [vmem:[#allocation134_spill] sm:$0xff] %v10522_v17  ;;  %13136 = vst [vmem:[#allocation137_spill] sm:$0xff] %v10535_v3  ;;  %v13139_v17 = vld [vmem:[#allocation171_spill] sm:$0xff]  ;;  %v3071_v15 = vmul.f32 %v10173_v36, %v13144_v9  ;;  %v4364_v54 = vmul.f32 %v9958_v62, %v13135_v40  ;;  %v3070_v27 = vmul.f32 %v10173_v36, %v13148_v10  ;;  %v10566_v26 = vpop.permute.xlu1 %3907  ;;  %v13155_v40 = vld [vmem:[#allocation212_spill] sm:$0xff] }
 0x3d3   : > { %v10543_v16 = vadd.f32 %v4360_v38, %v13139_v17  ;;  %13141 = vst [vmem:[#allocation119_spill] sm:$0xff] %v10548_v57  ;;  %13143 = vst [vmem:[#allocation120_spill] sm:$0xff] %v10551_v43  ;;  %v13146_v17 = vld [vmem:[#allocation226_spill] sm:$0xff]  ;;  %v10571_v51 = vadd.f32 %v4363_v5, %v13151_v60  ;;  %v10574_v4 = vadd.f32 %v3068_v52, %v13152_v18  ;;  %v13157_v44 = vld [vmem:[#allocation311_spill] sm:$0xff] }
 0x3d4   : > { %v10560_v38 = vadd.f32 %v3069_v1, %v13146_v17  ;;  %13149 = vst [vmem:[#allocation204_spill] sm:$0xff] %v10566_v26  ;;  %v4367_v1 = vmul.f32 %v9958_v62, %v13144_v9  ;;  %v10581_v53 = vadd.f32 %v4362_v11, %v13155_v40  ;;  %v4366_v6 = vmul.f32 %v9958_v62, %v13148_v10  ;;  %v13160_v30 = vld [vmem:[#allocation107_spill] sm:$0xff]  ;;  %v13169_v40 = vld [vmem:[#allocation321_spill] sm:$0xff]  ;;  %v13173_v9 = vld [vmem:[#allocation182_spill] sm:$0xff] }
 0x3d5   : > { %13153 = vst [vmem:[#allocation101_spill] sm:$0xff] %v10574_v4  ;;  %v10578_v17 = vpop.permute.xlu0 %3902  ;;  %v3073_v45 = vmul.f32 %v10173_v36, %v13156_v48  ;;  %v3072_v60 = vmul.f32 %v10173_v36, %v13157_v44  ;;  %v10597_v11 = vadd.f32 %v3071_v15, %v10127_v32  ;;  %v13163_v26 = vld [vmem:[#allocation19_spill] sm:$0xff]  ;;  %v10605_v56 = vadd.f32 %v3070_v27, %v13164_v35  ;;  %v13171_v35 = vld [vmem:[#allocation153_spill] sm:$0xff]  ;;  %v13178_v4 = vld [vmem:[#allocation202_spill] sm:$0xff] }
 0x3d6   : > { %13147 = vst [vmem:[#allocation229_spill] sm:$0xff] %v10560_v38  ;;  %13154 = vst [vmem:[#allocation123_spill] sm:$0xff] %v10578_v17  ;;  %v10594_v17 = vadd.f32 %v4365_v28, %v13160_v30  ;;  %v10602_v3 = vadd.f32 %v4364_v54, %v13163_v26  ;;  %v3075_v5 = vmul.f32 %v10173_v36, %v13166_v61  ;;  %v10609_v57 = vpop.permute.xlu1 %3917  ;;  %v13175_v10 = vld [vmem:[#allocation215_spill] sm:$0xff]  ;;  %v13183_v43 = vld [vmem:[#allocation92_spill] sm:$0xff] }
 0x3d7   : > { %13161 = vst [vmem:[#allocation112_spill] sm:$0xff] %v10597_v11  ;;  %13165 = vst [vmem:[#allocation223_spill] sm:$0xff] %v10605_v56  ;;  %v10614_v32 = vadd.f32 %v4367_v1, %v10136_v14  ;;  %v4369_v15 = vmul.f32 %v9958_v62, %v13156_v48  ;;  %v3074_v54 = vmul.f32 %v10173_v36, %v13169_v40  ;;  %v13186_v52 = vld [vmem:[#allocation110_spill] sm:$0xff]  ;;  %v13188_v56 = vld [vmem:[#allocation9_spill] sm:$0xff] }
 0x3d8   : > { %13167 = vst [vmem:[#allocation60_spill] sm:$0xff] %v10609_v57  ;;  %v10623_v27 = vadd.f32 %v4366_v6, %v13171_v35  ;;  %v10626_v38 = vadd.f32 %v3073_v45, %v13173_v9  ;;  %v10629_v18 = vadd.f32 %v3072_v60, %v13175_v10  ;;  %v4368_v14 = vmul.f32 %v9958_v62, %v13157_v44  ;;  %v13179_v6 = vld [vmem:[#allocation207_spill] sm:$0xff]  ;;  %v13181_v60 = vld [vmem:[#allocation28_spill] sm:$0xff] }
 0x3d9   : > { %v10620_v26 = vpop.permute.xlu0 %3912  ;;  %v4371_v30 = vmul.f32 %v9958_v62, %v13166_v61  ;;  %v3077_v28 = vmul.f32 %v10173_v36, %v13178_v4  ;;  %v3076_v35 = vmul.f32 %v10173_v36, %v13179_v6  ;;  %v10644_v10 = vadd.f32 %v3075_v5, %v13181_v60  ;;  %v13185_v61 = vld [vmem:[#allocation168_spill] sm:$0xff] }
 0x3da   : > { %13170 = vst [vmem:[#allocation35_spill] sm:$0xff] %v10620_v26  ;;  %13172 = vst [vmem:[#allocation210_spill] sm:$0xff] %v10623_v27  ;;  %v4370_v44 = vmul.f32 %v9958_v62, %v13169_v40  ;;  %v3079_v48 = vmul.f32 %v10173_v36, %v13183_v43  ;;  %v10650_v11 = vpop.permute.xlu1 %3927  ;;  %v10653_v1 = vadd.f32 %v4369_v15, %v13185_v61  ;;  %v13192_v27 = vld [vmem:[#allocation188_spill] sm:$0xff]  ;;  %v13194_v61 = vld [vmem:[#allocation219_spill] sm:$0xff] }
 0x3db   : > { %13174 = vst [vmem:[#allocation32_spill] sm:$0xff] %v10626_v38  ;;  %13176 = vst [vmem:[#allocation94_spill] sm:$0xff] %v10629_v18  ;;  %v10656_v26 = vadd.f32 %v3074_v54, %v13186_v52  ;;  %v4373_v9 = vmul.f32 %v9958_v62, %v13178_v4  ;;  %v3078_v5 = vmul.f32 %v10173_v36, %v13188_v56  ;;  %v13213_v40 = vld [vmem:[#allocation163_spill] sm:$0xff]  ;;  %v13224_v18 = vld [vmem:[#allocation52_spill] sm:$0xff] }
 0x3dc   : > { %13182 = vst [vmem:[#allocation125_spill] sm:$0xff] %v10644_v10  ;;  %13184 = vst [vmem:[#allocation211_spill] sm:$0xff] %v10650_v11  ;;  %v10669_v15 = vadd.f32 %v4368_v14, %v13192_v27  ;;  %v4372_v52 = vmul.f32 %v9958_v62, %v13179_v6  ;;  %v10674_v54 = vadd.f32 %v4371_v30, %v10209_v25  ;;  %v13197_v27 = vld [vmem:[#allocation22_spill] sm:$0xff]  ;;  %v13206_v30 = vld [vmem:[#allocation61_spill] sm:$0xff] }
 0x3dd   : > { %13187 = vst [vmem:[#allocation33_spill] sm:$0xff] %v10656_v26  ;;  %v10662_v60 = vpop.permute.xlu0 %3922  ;;  %v10677_v4 = vadd.f32 %v3077_v28, %v10247_v42  ;;  %v4375_v45 = vmul.f32 %v9958_v62, %v13183_v43  ;;  %v10687_v14 = vadd.f32 %v4370_v44, %v13197_v27  ;;  %v10690_v6 = vadd.f32 %v3079_v48, %v10323_v22  ;;  %v13205_v48 = vld [vmem:[#allocation213_spill] sm:$0xff]  ;;  %v13214_v26 = vld [vmem:[#allocation66_spill] sm:$0xff] }
 0x3de   : > { %13189 = vst [vmem:[#allocation140_spill] sm:$0xff] %v10662_v60  ;;  %v10680_v60 = vadd.f32 %v3076_v35, %v13194_v61  ;;  %v4374_v25 = vmul.f32 %v9958_v62, %v13188_v56  ;;  %v10694_v42 = vpop.permute.xlu1 %3937  ;;  %v10699_v35 = vadd.f32 %v4373_v9, %v10257_v58  ;;  %v10702_v43 = vadd.f32 %v3078_v5, %v10222_v39  ;;  %v13202_v61 = vld [vmem:[#allocation11_spill] sm:$0xff]  ;;  %v13204_v62 = vld [vmem:[#allocation8_spill] sm:$0xff]  ;;  %v13219_v11 = vld [vmem:[#allocation218_spill] sm:$0xff] }
 0x3df   : > { %13193 = vst [vmem:[#allocation132_spill] sm:$0xff] %v10677_v4  ;;  %13198 = vst [vmem:[#allocation263_spill] sm:$0xff] %v10690_v6  ;;  %v3594_v44 = vmul.f32 %v10144_v13, %v13202_v61  ;;  %v10709_v22 = vadd.f32 %v4372_v52, %v10200_v12  ;;  %v3593_v56 = vmul.f32 %v10144_v13, %v13204_v62  ;;  %v13210_v12 = vld [vmem:[#allocation10_spill] sm:$0xff]  ;;  %v13217_v61 = vld [vmem:[#allocation265_spill] sm:$0xff] }
 0x3e0   : > { %13195 = vst [vmem:[#allocation128_spill] sm:$0xff] %v10680_v60  ;;  %13199 = vst [vmem:[#allocation133_spill] sm:$0xff] %v10694_v42  ;;  %v3596_v38 = vmul.f32 %v10144_v13, %v13205_v48  ;;  %v3595_v58 = vmul.f32 %v10144_v13, %v13206_v30  ;;  %v10722_v10 = vadd.f32 %v4375_v45, %v10334_v7  ;;  %v13221_v6 = vld [vmem:[#allocation266_spill] sm:$0xff]  ;;  %v13222_v62 = vld [vmem:[#allocation269_spill] sm:$0xff] }
 0x3e1   : > { %13201 = vst [vmem:[#allocation149_spill] sm:$0xff] %v10702_v43  ;;  %v10706_v27 = vpop.permute.xlu0 %3932  ;;  %v3598_v52 = vmul.f32 %v10144_v13, %v13210_v12  ;;  %v10729_v48 = vadd.f32 %v4374_v25, %v10227_v50  ;;  %v3597_v30 = vmul.f32 %v10144_v13, %v13213_v40  ;;  %v3600_v9 = vmul.f32 %v10144_v13, %v13214_v26  ;;  %v13218_v12 = vld [vmem:[#allocation51_spill] sm:$0xff]  ;;  %v13223_v26 = vld [vmem:[#allocation270_spill] sm:$0xff]  ;;  %v13225_v45 = vld [vmem:[#allocation272_spill] sm:$0xff] }
 0x3e2   : > { %13203 = vst [vmem:[#allocation114_spill] sm:$0xff] %v10706_v27  ;;  %13209 = vst [vmem:[#allocation138_spill] sm:$0xff] %v10722_v10  ;;  %v10735_v4 = vpop.permute.xlu1 %3947  ;;  %v3621_v60 = vadd.f32 %v3594_v44, %v13217_v61  ;;  %v3599_v5 = vmul.f32 %v10144_v13, %v13218_v12  ;;  %v3602_v50 = vmul.f32 %v10144_v13, %v13219_v11  ;;  %v13226_v44 = vld [vmem:[#allocation176_spill] sm:$0xff]  ;;  %v13227_v11 = vld [vmem:[#allocation55_spill] sm:$0xff] }
 0x3e3   : > { %13212 = vst [vmem:[#allocation169_spill] sm:$0xff] %v10729_v48  ;;  %13215 = vst [vmem:[#allocation106_spill] sm:$0xff] %v10735_v4  ;;  %v3620_v40 = vadd.f32 %v3593_v56, %v13221_v6  ;;  %v3623_v39 = vadd.f32 %v3596_v38, %v13222_v62  ;;  %v3622_v28 = vadd.f32 %v3595_v58, %v13223_v26  ;;  %v13229_v56 = vld [vmem:[#allocation275_spill] sm:$0xff]  ;;  %v13230_v62 = vld [vmem:[#allocation214_spill] sm:$0xff] }
 0x3e4   : > { %v3601_v57 = vmul.f32 %v10144_v13, %v13224_v18  ;;  %v3625_v43 = vadd.f32 %v3598_v52, %v13225_v45  ;;  %v3809_v61 = vmul.f32 %v10188_v47, %v13226_v44  ;;  %v4403_v12 = vmul.f32 %v10144_v13, %v13226_v44  ;;  %v13232_v45 = vld [vmem:[#allocation277_spill] sm:$0xff]  ;;  %v13233_v4 = vld [vmem:[#allocation280_spill] sm:$0xff] }
 0x3e5   : > { %v10744_v25 = vpop.permute.xlu0 %3942  ;;  %v3811_v7 = vmul.f32 %v10188_v47, %v13227_v11  ;;  %v3627_v38 = vadd.f32 %v3600_v9, %v13229_v56  ;;  %v4405_v58 = vmul.f32 %v10144_v13, %v13227_v11  ;;  %v3810_v18 = vmul.f32 %v10188_v47, %v13230_v62  ;;  %v13234_v42 = vld [vmem:[#allocation177_spill] sm:$0xff]  ;;  %v13236_v9 = vld [vmem:[#allocation284_spill] sm:$0xff] }
 0x3e6   : > { %13220 = vst [vmem:[#allocation154_spill] sm:$0xff] %v10744_v25  ;;  %v13228_v25 = vld [vmem:[#allocation144_spill] sm:$0xff]  ;;  %v10764_v52 = vpop.permute.xlu1 %3957  ;;  %v3626_v26 = vadd.f32 %v3599_v5, %v13232_v45  ;;  %v3629_v27 = vadd.f32 %v3602_v50, %v13233_v4  ;;  %v4404_v44 = vmul.f32 %v10144_v13, %v13230_v62  ;;  %v3628_v56 = vadd.f32 %v3601_v57, %v13236_v9  ;;  %v13238_v45 = vld [vmem:[#allocation109_spill] sm:$0xff] }
 0x3e7   : > { %v3624_v6 = vadd.f32 %v3597_v30, %v13228_v25  ;;  %13231 = vst [vmem:[#allocation93_spill] sm:$0xff] %v10764_v52  ;;  %v3813_v30 = vmul.f32 %v10188_v47, %v13234_v42  ;;  %v4407_v11 = vmul.f32 %v10144_v13, %v13234_v42  ;;  %v13237_v48 = vld [vmem:[#allocation104_spill] sm:$0xff]  ;;  %v10781_v4 = vadd.f32 %v3809_v61, %v3620_v40 }
 0x3e8   : > { %v3812_v52 = vmul.f32 %v10188_v47, %v13237_v48  ;;  %v4406_v5 = vmul.f32 %v10144_v13, %v13237_v48  ;;  %v10784_v50 = vadd.f32 %v4403_v12, %v10219_v37  ;;  %v10786_v62 = vadd.f32 %v3811_v7, %v3622_v28  ;;  %v13239_v10 = vld [vmem:[#allocation216_spill] sm:$0xff] }
 0x3e9   : > { %v10772_v25 = vpop.permute.xlu0 %3952  ;;  %v10791_v57 = vadd.f32 %v4405_v58, %v10289_v0  ;;  %v10793_v42 = vadd.f32 %v3810_v18, %v3621_v60  ;;  %v4409_v9 = vmul.f32 %v10144_v13, %v13238_v45  ;;  %v3814_v48 = vmul.f32 %v10188_v47, %v13239_v10  ;;  %v13240_v0 = vld [vmem:[#allocation227_spill] sm:$0xff] }
 0x3ea   : > { %13235 = vst [vmem:[#allocation221_spill] sm:$0xff] %v10772_v25  ;;  %v3815_v25 = vmul.f32 %v10188_v47, %v13238_v45  ;;  %v10799_v40 = vpop.permute.xlu1 %3967  ;;  %v10802_v37 = vadd.f32 %v4404_v44, %v10301_v46  ;;  %v10804_v28 = vadd.f32 %v3813_v30, %v3624_v6  ;;  %v4408_v7 = vmul.f32 %v10144_v13, %v13239_v10  ;;  %v13242_v44 = vld [vmem:[#allocation217_spill] sm:$0xff]  ;;  %v13243_v45 = vld [vmem:[#allocation190_spill] sm:$0xff] }
 0x3eb   : > { %v3817_v60 = vmul.f32 %v10188_v47, %v13240_v0  ;;  %v10813_v12 = vadd.f32 %v4407_v11, %v10358_v23  ;;  %v10815_v58 = vadd.f32 %v3812_v52, %v3623_v39  ;;  %v10818_v18 = vadd.f32 %v4406_v5, %v10361_v2  ;;  %v13244_v2 = vld [vmem:[#allocation24_spill] sm:$0xff] }
 0x3ec   : > { %v4411_v46 = vmul.f32 %v10144_v13, %v13240_v0  ;;  %v10822_v6 = vadd.f32 %v3815_v25, %v3626_v26  ;;  %v3816_v10 = vmul.f32 %v10188_v47, %v13242_v44  ;;  %v4410_v30 = vmul.f32 %v10144_v13, %v13242_v44  ;;  %v13245_v44 = vld [vmem:[#allocation155_spill] sm:$0xff] }
 0x3ed   : > { %v10810_v61 = vpop.permute.xlu0 %3962  ;;  %v4413_v23 = vmul.f32 %v10144_v13, %v13243_v45  ;;  %v10831_v39 = vadd.f32 %v4409_v9, %v10403_v31  ;;  %v10833_v52 = vadd.f32 %v3814_v48, %v3625_v43  ;;  %v3818_v11 = vmul.f32 %v10188_v47, %v13244_v2  ;;  %v13246_v31 = vld [vmem:[#allocation83_spill] sm:$0xff] }
 0x3ee   : > { %13241 = vst [vmem:[#allocation172_spill] sm:$0xff] %v10810_v61  ;;  %v4412_v26 = vmul.f32 %v10144_v13, %v13244_v2  ;;  %v10839_v25 = vpop.permute.xlu1 %3977  ;;  %v10842_v5 = vadd.f32 %v4408_v7, %v10415_v63  ;;  %v10844_v0 = vadd.f32 %v3817_v60, %v3628_v56  ;;  %v4415_v45 = vmul.f32 %v10144_v13, %v13245_v44  ;;  %v13248_v61 = vld [vmem:[#allocation3_spill] sm:$0xff] }
 0x3ef   : > { %v4414_v43 = vmul.f32 %v10144_v13, %v13246_v31  ;;  %v10853_v48 = vadd.f32 %v4411_v46, %v10444_v24  ;;  %v4417_v2 = vmul.f32 %v10144_v13, %v13248_v61  ;;  %v4416_v63 = vmul.f32 %v10144_v13, %v10270_v29  ;;  %v13249_v7 = vld [vmem:[#allocation203_spill] sm:$0xff] }
 0x3f0   : > { %v4419_v56 = vmul.f32 %v10144_v13, %v13249_v7  ;;  %v10861_v60 = vadd.f32 %v3816_v10, %v3627_v38  ;;  %v10864_v44 = vadd.f32 %v4410_v30, %v10462_v55  ;;  %v10867_v31 = vadd.f32 %v4413_v23, %v10506_v33  ;;  %v13257_v7 = vld [vmem:[#allocation76_spill] sm:$0xff] }
 0x3f1   : > { %v10850_v9 = vpop.permute.xlu0 %3972  ;;  %v10871_v46 = vadd.f32 %v3818_v11, %v3629_v27  ;;  %v10874_v61 = vadd.f32 %v4412_v26, %v10515_v34  ;;  %v4421_v29 = vmul.f32 %v10144_v13, %v10338_v20  ;;  %v4420_v38 = vmul.f32 %v10144_v13, %v10347_v59 }
 0x3f2   : > { %13247 = vst [vmem:[#allocation131_spill] sm:$0xff] %v10850_v9  ;;  %v13250_v9 = vld [vmem:[#allocation178_spill] sm:$0xff]  ;;  %v10880_v10 = vpop.permute.xlu1 %3987  ;;  %v10883_v55 = vadd.f32 %v4415_v45, %v10540_v41  ;;  %v10886_v33 = vadd.f32 %v4414_v43, %v10543_v16  ;;  %v4423_v27 = vmul.f32 %v10144_v13, %v10375_v49  ;;  %v4422_v34 = vmul.f32 %v10144_v13, %v10384_v21  ;;  %v13251_v49 = vld [vmem:[#allocation116_spill] sm:$0xff]  ;;  %v13254_v43 = vld [vmem:[#allocation75_spill] sm:$0xff] }
 0x3f3   : > { %v4418_v24 = vmul.f32 %v10144_v13, %v13250_v9  ;;  %v10895_v20 = vadd.f32 %v4417_v2, %v10571_v51  ;;  %v10898_v59 = vadd.f32 %v4416_v63, %v10581_v53  ;;  %v10901_v41 = vadd.f32 %v4419_v56, %v10594_v17  ;;  %v13252_v51 = vld [vmem:[#allocation49_spill] sm:$0xff]  ;;  %v13253_v17 = vld [vmem:[#allocation210_spill] sm:$0xff]  ;;  %v13258_v56 = vld [vmem:[#allocation204_spill] sm:$0xff] }
 0x3f4   : > { %v4425_v16 = vmul.f32 %v10144_v13, %v10412_v8  ;;  %v4424_v21 = vmul.f32 %v10144_v13, %v10422_v19  ;;  %v4427_v11 = vmul.f32 %v10144_v13, %v13251_v49  ;;  %v4026_v26 = vmul.f32 %v10173_v36, %v13252_v51  ;;  %v13260_v49 = vld [vmem:[#allocation205_spill] sm:$0xff] }
 0x3f5   : > { %v10892_v30 = vpop.permute.xlu0 %3982  ;;  %v10906_v23 = vadd.f32 %v4418_v24, %v10602_v3  ;;  %v10915_v53 = vadd.f32 %v4421_v29, %v10614_v32  ;;  %v10918_v45 = vadd.f32 %v4420_v38, %v13253_v17  ;;  %v4426_v8 = vmul.f32 %v10144_v13, %v13254_v43  ;;  %v13255_v3 = vld [vmem:[#allocation137_spill] sm:$0xff] }
 0x3f6   : > { %v4025_v9 = vmul.f32 %v10173_v36, %v13255_v3  ;;  %v10924_v2 = vpop.permute.xlu1 %3997  ;;  %v10927_v19 = vadd.f32 %v4423_v27, %v10653_v1  ;;  %v10930_v63 = vadd.f32 %v4422_v34, %v10669_v15  ;;  %v4429_v32 = vmul.f32 %v10144_v13, %v13257_v7  ;;  %v13263_v7 = vld [vmem:[#allocation123_spill] sm:$0xff] }
 0x3f7   : > { %v4028_v24 = vmul.f32 %v10173_v36, %v13258_v56  ;;  %v10939_v38 = vadd.f32 %v4425_v16, %v10674_v54  ;;  %v4428_v17 = vmul.f32 %v10144_v13, %v13260_v49  ;;  %v4458_v1 = vmul.f32 %v10188_v47, %v13252_v51 }
 0x3f8   : > { %13256 = vst [vmem:[#allocation87_spill] sm:$0xff] %v10927_v19  ;;  %v4457_v15 = vmul.f32 %v10188_v47, %v13255_v3  ;;  %v10948_v27 = vadd.f32 %v4424_v21, %v10687_v14  ;;  %v10951_v34 = vadd.f32 %v4427_v11, %v10699_v35  ;;  %v4053_v43 = vadd.f32 %v4026_v26, %v10793_v42  ;;  %v13266_v35 = vld [vmem:[#allocation138_spill] sm:$0xff]  ;;  %v13268_v26 = vld [vmem:[#allocation60_spill] sm:$0xff] }
 0x3f9   : > { %v10936_v29 = vpop.permute.xlu0 %3992  ;;  %13259 = vst [vmem:[#allocation147_spill] sm:$0xff] %v10939_v38  ;;  %v4027_v54 = vmul.f32 %v10173_v36, %v13263_v7  ;;  %v10957_v16 = vadd.f32 %v4426_v8, %v10709_v22  ;;  %v4052_v13 = vadd.f32 %v4025_v9, %v10781_v4  ;;  %v4460_v51 = vmul.f32 %v10188_v47, %v13258_v56  ;;  %v13269_v22 = vld [vmem:[#allocation35_spill] sm:$0xff]  ;;  %v13271_v9 = vld [vmem:[#allocation169_spill] sm:$0xff] }
 0x3fa   : > { %13261 = vst [vmem:[#allocation148_spill] sm:$0xff] %v10948_v27  ;;  %13262 = vst [vmem:[#allocation231_spill] sm:$0xff] %v10951_v34  ;;  %v4459_v14 = vmul.f32 %v10188_v47, %v13263_v7  ;;  %v10964_v21 = vpop.permute.xlu1 %4007  ;;  %v10967_v11 = vadd.f32 %v4429_v32, %v13266_v35  ;;  %v4055_v42 = vadd.f32 %v4028_v24, %v10815_v58  ;;  %v13273_v32 = vld [vmem:[#allocation211_spill] sm:$0xff]  ;;  %v13274_v58 = vld [vmem:[#allocation264_spill] sm:$0xff] }
 0x3fb   : > { %13264 = vst [vmem:[#allocation95_spill] sm:$0xff] %v10957_v16  ;;  %13265 = vst [vmem:[#allocation68_spill] sm:$0xff] %v10964_v21  ;;  %v4030_v3 = vmul.f32 %v10173_v36, %v13268_v26  ;;  %v4029_v8 = vmul.f32 %v10173_v36, %v13269_v22  ;;  %v10977_v56 = vadd.f32 %v4428_v17, %v13271_v9  ;;  %v13275_v24 = vld [vmem:[#allocation189_spill] sm:$0xff]  ;;  %v13277_v17 = vld [vmem:[#allocation140_spill] sm:$0xff] }
 0x3fc   : > { %13267 = vst [vmem:[#allocation233_spill] sm:$0xff] %v10967_v11  ;;  %v10980_v49 = vadd.f32 %v4458_v1, %v10802_v37  ;;  %v4484_v7 = vadd.f32 %v4457_v15, %v10784_v50  ;;  %v4032_v35 = vmul.f32 %v10173_v36, %v13273_v32  ;;  %v13276_v11 = vmax.f32 %v13274_v58, %v13275_v24  ;;  %v13278_v37 = vld [vmem:[#allocation2_spill] sm:$0xff]  ;;  %v13279_v1 = vld [vmem:[#allocation167_spill] sm:$0xff] }
 0x3fd   : > { %v10974_v4 = vpop.permute.xlu0 %4002  ;;  %13272 = vst [vmem:[#allocation135_spill] sm:$0xff] %v10977_v56  ;;  %v4054_v38 = vadd.f32 %v4027_v54, %v10786_v62  ;;  %v4462_v16 = vmul.f32 %v10188_v47, %v13268_v26  ;;  %v4031_v9 = vmul.f32 %v10173_v36, %v13277_v17  ;;  %v13280_v56 = vmax.f32 %v13278_v37, %v13279_v1  ;;  %v13282_v62 = vld [vmem:[#allocation267_spill] sm:$0xff]  ;;  %v13283_v54 = vld [vmem:[#allocation194_spill] sm:$0xff] }
 0x3fe   : > { %13270 = vst [vmem:[#allocation102_spill] sm:$0xff] %v10974_v4  ;;  %v10988_v34 = vmax.f32 %v13276_v11, %v4053_v43  ;;  %v10999_v15 = vadd.f32 %v4460_v51, %v10818_v18  ;;  %v4486_v21 = vadd.f32 %v4459_v14, %v10791_v57  ;;  %v4461_v43 = vmul.f32 %v10188_v47, %v13269_v22  ;;  %v11004_v11 = vpop.permute.xlu1 %4017  ;;  %v13288_v1 = vld [vmem:[#allocation38_spill] sm:$0xff]  ;;  %v13300_v4 = vld [vmem:[#allocation183_spill] sm:$0xff] }
 0x3ff   : > { %v4079_v50 = vmax.f32 %v13280_v56, %v4052_v13  ;;  %13281 = vst [vmem:[#allocation273_spill] sm:$0xff] %v11004_v11  ;;  %v13284_v26 = vmax.f32 %v13282_v62, %v13283_v54  ;;  %v4057_v24 = vadd.f32 %v4030_v3, %v10833_v52  ;;  %v4056_v37 = vadd.f32 %v4029_v8, %v10804_v28  ;;  %v13285_v13 = vld [vmem:[#allocation133_spill] sm:$0xff]  ;;  %v13287_v56 = vld [vmem:[#allocation114_spill] sm:$0xff]  ;;  %v13289_v52 = vld [vmem:[#allocation115_spill] sm:$0xff] }
 0x400   : > { %v4034_v18 = vmul.f32 %v10173_v36, %v13285_v13  ;;  %v4059_v57 = vadd.f32 %v4032_v35, %v10861_v60  ;;  %v4464_v14 = vmul.f32 %v10188_v47, %v13273_v32  ;;  %v4463_v22 = vmul.f32 %v10188_v47, %v13277_v17  ;;  %v13291_v17 = vld [vmem:[#allocation106_spill] sm:$0xff] }
 0x401   : > { %v11009_v58 = vmax.f32 %v13284_v26, %v4055_v42  ;;  %v11015_v51 = vpop.permute.xlu0 %4012  ;;  %v4033_v42 = vmul.f32 %v10173_v36, %v13287_v56  ;;  %v13290_v3 = vmax.f32 %v13288_v1, %v13289_v52  ;;  %v11028_v8 = vadd.f32 %v4462_v16, %v10842_v5  ;;  %v13292_v26 = vld [vmem:[#allocation154_spill] sm:$0xff] }
 0x402   : > { %13286 = vst [vmem:[#allocation85_spill] sm:$0xff] %v11015_v51  ;;  %v4058_v62 = vadd.f32 %v4031_v9, %v10822_v6  ;;  %v4466_v60 = vmul.f32 %v10188_v47, %v13285_v13  ;;  %v4488_v32 = vadd.f32 %v4461_v43, %v10813_v12  ;;  %v4465_v35 = vmul.f32 %v10188_v47, %v13287_v56  ;;  %v13293_v5 = vld [vmem:[#allocation42_spill] sm:$0xff]  ;;  %v13296_v9 = vld [vmem:[#allocation41_spill] sm:$0xff] }
 0x403   : > { %v4081_v28 = vmax.f32 %v13290_v3, %v4054_v38  ;;  %v4036_v54 = vmul.f32 %v10173_v36, %v13291_v17  ;;  %v4035_v1 = vmul.f32 %v10173_v36, %v13292_v26  ;;  %v4541_v38 = vpop.permute.xlu1 %4540  ;;  %v13294_v16 = vld [vmem:[#allocation206_spill] sm:$0xff]  ;;  %v13297_v13 = vld [vmem:[#allocation197_spill] sm:$0xff]  ;;  %v4061_v43 = vadd.f32 %v4034_v18, %v10871_v46 }
 0x404   : > { %v13295_v52 = vmax.f32 %v13293_v5, %v13294_v16  ;;  %v13298_v3 = vmax.f32 %v13296_v9, %v13297_v13  ;;  %v4673_v56 = vmul.f32 %v10173_v36, %v4541_v38  ;;  %v13299_v51 = vld [vmem:[#allocation50_spill] sm:$0xff]  ;;  %v11063_v5 = vadd.f32 %v4463_v22, %v10831_v39  ;;  %v13302_v16 = vld [vmem:[#allocation47_spill] sm:$0xff]  ;;  %v13312_v9 = vld [vmem:[#allocation44_spill] sm:$0xff] }
 0x405   : > { %v11052_v11 = vpop.permute.xlu0 %4022  ;;  %v13301_v19 = vmax.f32 %v13299_v51, %v13300_v4  ;;  %v11072_v38 = vadd.f32 %v4466_v60, %v10874_v61  ;;  %v13305_v51 = vld [vmem:[#allocation27_spill] sm:$0xff]  ;;  %v11087_v61 = vld [vmem:[%s11437_s2] ss:$0 sm:$0xff] }
 0x406   : > { %v11043_v6 = vmax.f32 %v13295_v52, %v4057_v24  ;;  %v11048_v12 = vmax.f32 %v13298_v3, %v4056_v37  ;;  %v11060_v24 = vadd.f32 %v4464_v14, %v10864_v44  ;;  %v4060_v37 = vadd.f32 %v4033_v42, %v10844_v0  ;;  %v13303_v52 = vld [vmem:[#allocation159_spill] sm:$0xff] }
 0x407   : > { %v11057_v27 = vmax.f32 %v13301_v19, %v4059_v57  ;;  %v13304_v46 = vmax.f32 %v13302_v16, %v13303_v52  ;;  %v4468_v19 = vmul.f32 %v10188_v47, %v13291_v17  ;;  %v4700_v4 = vadd.f32 %v4673_v56, %v4484_v7  ;;  %v13306_v57 = vld [vmem:[#allocation220_spill] sm:$0xff]  ;;  %v4551_v22 = vpop.permute.xlu1 %4550  ;;  %v13307_v42 = vld [vmem:[#allocation279_spill] sm:$0xff]  ;;  %v13314_v16 = vld [vmem:[#allocation221_spill] sm:$0xff] }
 0x408   : > { %v11077_v44 = vadd.f32 %v4465_v35, %v10853_v48  ;;  %v4063_v39 = vadd.f32 %v4036_v54, %v13305_v51  ;;  %v4062_v14 = vadd.f32 %v4035_v1, %v13306_v57  ;;  %v4467_v0 = vmul.f32 %v10188_v47, %v13292_v26  ;;  %v13310_v48 = vld [vmem:[#allocation93_spill] sm:$0xff]  ;;  %v13311_v26 = vld [vmem:[#allocation59_spill] sm:$0xff]  ;;  %v13315_v57 = vld [vmem:[#allocation286_spill] sm:$0xff] }
 0x409   : > { %v11069_v18 = vmax.f32 %v13304_v46, %v4058_v62  ;;  %v13308_v62 = vld [vmem:[#allocation108_spill] sm:$0xff]  ;;  %v4038_v35 = vmul.f32 %v10173_v36, %v13310_v48  ;;  %v4727_v17 = vmax.f32 %v4079_v50, %v4700_v4  ;;  %v4675_v54 = vmul.f32 %v10173_v36, %v4551_v22  ;;  %v4546_v1 = vpop.permute.xlu0 %4545 }
 0x40a   : > { %v13309_v7 = vmax.f32 %v13307_v42, %v13308_v62  ;;  %v13313_v13 = vmax.f32 %v13311_v26, %v13312_v9  ;;  %v4470_v56 = vmul.f32 %v10188_v47, %v13310_v48  ;;  %v4037_v52 = vmul.f32 %v10173_v36, %v13314_v16  ;;  %v13318_v62 = vld [vmem:[#allocation65_spill] sm:$0xff] }
 0x40b   : > { %v11108_v46 = vadd.f32 %v4468_v19, %v10886_v33  ;;  %v4469_v50 = vmul.f32 %v10188_v47, %v13314_v16  ;;  %v4761_v4 = vadd.f32 %v11087_v61, %v4727_v17  ;;  %v4702_v51 = vadd.f32 %v4675_v54, %v4486_v21  ;;  %v4561_v21 = vpop.permute.xlu1 %4560  ;;  %v13321_v19 = vld [vmem:[#allocation193_spill] sm:$0xff] }
 0x40c   : > { %v11092_v60 = vmax.f32 %v13309_v7, %v4061_v43  ;;  %v11100_v3 = vmax.f32 %v13313_v13, %v4060_v37  ;;  %v4674_v43 = vmul.f32 %v10173_v36, %v4546_v1  ;;  %v13316_v37 = vld [vmem:[#allocation117_spill] sm:$0xff]  ;;  %v13319_v7 = vld [vmem:[#allocation82_spill] sm:$0xff]  ;;  %v11124_v1 = vadd.f32 %v4467_v0, %v10867_v31 }
 0x40d   : > { %v13317_v22 = vmax.f32 %v13315_v57, %v13316_v37  ;;  %v13320_v48 = vmax.f32 %v13318_v62, %v13319_v7  ;;  %v4788_v17 = vmax.f32 %v4761_v4, 0.0  ;;  %v4729_v54 = vmax.f32 %v4081_v28, %v4702_v51  ;;  %v13322_v31 = vld [vmem:[#allocation113_spill] sm:$0xff]  ;;  %v13325_v62 = vld [vmem:[#allocation120_spill] sm:$0xff] }
 0x40e   : > { %v4701_v33 = vadd.f32 %v4674_v43, %v10980_v49  ;;  %v4677_v9 = vmul.f32 %v10173_v36, %v4561_v21  ;;  %v11135_v13 = vadd.f32 %v4470_v56, %v10898_v59  ;;  %v4064_v0 = vadd.f32 %v4037_v52, %v13322_v31  ;;  %v13323_v56 = vld [vmem:[#allocation172_spill] sm:$0xff] }
 0x40f   : > { %v11116_v42 = vmax.f32 %v13317_v22, %v4063_v39  ;;  %v11121_v26 = vmax.f32 %v13320_v48, %v4062_v14  ;;  %v4065_v39 = vadd.f32 %v4038_v35, %v13321_v19  ;;  %v4556_v14 = vpop.permute.xlu0 %4555  ;;  %v11141_v37 = vadd.f32 %v4469_v50, %v10883_v55  ;;  %4816 = vst.msk [vmem:[%s11129_s10] sm:$0xff] %vm4815_vm0, %v4788_v17  ;;  %v4571_v43 = vpop.permute.xlu1 %4570  ;;  %v13327_v19 = vld [vmem:[#allocation67_spill] sm:$0xff]  ;;  %v13328_v17 = vld [vmem:[#allocation228_spill] sm:$0xff] }
 0x410   : > { %v4728_v16 = vmax.f32 %v10988_v34, %v4701_v33  ;;  %v4676_v57 = vmul.f32 %v10173_v36, %v4556_v14  ;;  %v4040_v49 = vmul.f32 %v10173_v36, %v10799_v40  ;;  %v4763_v28 = vadd.f32 %v11087_v61, %v4729_v54  ;;  %v13330_v14 = vld [vmem:[#allocation73_spill] sm:$0xff] }
 0x411   : > { %v4704_v35 = vadd.f32 %v4677_v9, %v4488_v32  ;;  %v4472_v59 = vmul.f32 %v10188_v47, %v10799_v40  ;;  %v4039_v34 = vmul.f32 %v10173_v36, %v13323_v56  ;;  %v4471_v50 = vmul.f32 %v10188_v47, %v13323_v56  ;;  %v13324_v40 = vld [vmem:[#allocation173_spill] sm:$0xff] }
 0x412   : > { %v4762_v52 = vadd.f32 %v11087_v61, %v4728_v16  ;;  %v4703_v55 = vadd.f32 %v4676_v57, %v10999_v15  ;;  %v4790_v4 = vmax.f32 %v4763_v28, 0.0  ;;  %v4679_v32 = vmul.f32 %v10173_v36, %v4571_v43  ;;  %v13331_v57 = vld [vmem:[#allocation100_spill] sm:$0xff] }
 0x413   : > { %v4731_v51 = vmax.f32 %v11048_v12, %v4704_v35  ;;  %v4566_v22 = vpop.permute.xlu0 %4565  ;;  %v13326_v7 = vmax.f32 %v13324_v40, %v13325_v62  ;;  %v13329_v54 = vmax.f32 %v13327_v19, %v13328_v17  ;;  %v4067_v12 = vadd.f32 %v4040_v49, %v13330_v14  ;;  %v4581_v35 = vpop.permute.xlu1 %4580  ;;  %v13339_v14 = vld [vmem:[#allocation161_spill] sm:$0xff] }
 0x414   : > { %v4789_v33 = vmax.f32 %v4762_v52, 0.0  ;;  %v4730_v21 = vmax.f32 %v11009_v58, %v4703_v55  ;;  %v4678_v15 = vmul.f32 %v10173_v36, %v4566_v22  ;;  %4818 = vst.msk [vmem:[%s11129_s10 + $0x10] sm:$0xff] %vm4815_vm0, %v4790_v4  ;;  %v4706_v16 = vadd.f32 %v4679_v32, %v11063_v5  ;;  %v13334_v32 = vld [vmem:[#allocation101_spill] sm:$0xff] }
 0x415   : > { %v11161_v48 = vmax.f32 %v13326_v7, %v4065_v39  ;;  %v11168_v9 = vmax.f32 %v13329_v54, %v4064_v0  ;;  %v4765_v31 = vadd.f32 %v11087_v61, %v4731_v51  ;;  %v11176_v39 = vadd.f32 %v4472_v59, %v10906_v23  ;;  %v13333_v51 = vld [vmem:[#allocation70_spill] sm:$0xff]  ;;  %v13336_v7 = vld [vmem:[#allocation69_spill] sm:$0xff] }
 0x416   : > { %v4066_v58 = vadd.f32 %v4039_v34, %v13331_v57  ;;  %4817 = vst.msk [vmem:[%s11129_s10 + $0x8] sm:$0xff] %vm4815_vm0, %v4789_v33  ;;  %v4764_v28 = vadd.f32 %v11087_v61, %v4730_v21  ;;  %v4705_v0 = vadd.f32 %v4678_v15, %v11028_v8  ;;  %v11184_v49 = vadd.f32 %v4471_v50, %v10895_v20  ;;  %v13332_v20 = vld [vmem:[#allocation131_spill] sm:$0xff] }
 0x417   : > { %v4792_v56 = vmax.f32 %v4765_v31, 0.0  ;;  %v4733_v5 = vmax.f32 %v11069_v18, %v4706_v16  ;;  %v4681_v23 = vmul.f32 %v10173_v36, %v4581_v35  ;;  %v4576_v59 = vpop.permute.xlu0 %4575  ;;  %v4042_v34 = vmul.f32 %v10173_v36, %v10839_v25  ;;  %v4591_v62 = vpop.permute.xlu1 %4590  ;;  %v13337_v33 = vld [vmem:[#allocation119_spill] sm:$0xff] }
 0x418   : > { %v4791_v52 = vmax.f32 %v4764_v28, 0.0  ;;  %v4732_v55 = vmax.f32 %v11043_v6, %v4705_v0  ;;  %v4680_v43 = vmul.f32 %v10173_v36, %v4576_v59  ;;  %v4474_v8 = vmul.f32 %v10188_v47, %v10839_v25 }
 0x419   : > { %v4041_v50 = vmul.f32 %v10173_v36, %v13332_v20  ;;  %4820 = vst.msk [vmem:[%s11129_s10 + $0x20] sm:$0xff] %vm4815_vm0, %v4792_v56  ;;  %v4767_v18 = vadd.f32 %v11087_v61, %v4733_v5  ;;  %v4708_v4 = vadd.f32 %v4681_v23, %v11077_v44  ;;  %v13335_v22 = vmax.f32 %v13333_v51, %v13334_v32  ;;  %v11244_v23 = vld [vmem:[%s11436_s1 + $0x7] ss:$0 sm:$0xff]  ;;  %v13344_v32 = vld [vmem:[#allocation185_spill] sm:$0xff] }
 0x41a   : > { %v4473_v6 = vmul.f32 %v10188_v47, %v13332_v20  ;;  %4819 = vst.msk [vmem:[%s11129_s10 + $0x18] sm:$0xff] %vm4815_vm0, %v4791_v52  ;;  %v4766_v25 = vadd.f32 %v11087_v61, %v4732_v55  ;;  %v4707_v36 = vadd.f32 %v4680_v43, %v11060_v24  ;;  %v13338_v21 = vmax.f32 %v13336_v7, %v13337_v33  ;;  %v11220_v47 = vld [vmem:[%s11436_s1 + $0x8] ss:$0 sm:$0xff]  ;;  %v13341_v20 = vld [vmem:[#allocation17_spill] sm:$0xff] }
 0x41b   : > { %v11203_v40 = vmax.f32 %v13335_v22, %v4067_v12  ;;  %v4794_v15 = vmax.f32 %v4767_v18, 0.0  ;;  %v4735_v19 = vmax.f32 %v11100_v3, %v4708_v4  ;;  %v4683_v17 = vmul.f32 %v11220_v47, %v4591_v62  ;;  %v4586_v54 = vpop.permute.xlu0 %4585  ;;  %v4601_v5 = vpop.permute.xlu1 %4600  ;;  %v13345_v22 = vld [vmem:[#allocation229_spill] sm:$0xff] }
 0x41c   : > { %v11214_v44 = vmax.f32 %v13338_v21, %v4066_v58  ;;  %v4069_v24 = vadd.f32 %v4042_v34, %v13339_v14  ;;  %v4793_v12 = vmax.f32 %v4766_v25, 0.0  ;;  %v4734_v31 = vmax.f32 %v11057_v27, %v4707_v36  ;;  %v13340_v58 = vld [vmem:[#allocation191_spill] sm:$0xff]  ;;  %v13347_v25 = vld [vmem:[#allocation30_spill] sm:$0xff] }
 0x41d   : > { %v4682_v16 = vmul.f32 %v11220_v47, %v4586_v54  ;;  %v11227_v57 = vadd.f32 %v4474_v8, %v10918_v45  ;;  %v4068_v3 = vadd.f32 %v4041_v50, %v13340_v58  ;;  %4822 = vst.msk [vmem:[%s11129_s10 + $0x30] sm:$0xff] %vm4815_vm0, %v4794_v15  ;;  %v4769_v28 = vadd.f32 %v11087_v61, %v4735_v19  ;;  %v13342_v50 = vld [vmem:[#allocation223_spill] sm:$0xff] }
 0x41e   : > { %v4710_v0 = vadd.f32 %v4683_v17, %v11124_v1  ;;  %v4500_v35 = vadd.f32 %v4473_v6, %v10901_v41  ;;  %v4044_v56 = vmul.f32 %v11220_v47, %v10880_v10  ;;  %4821 = vst.msk [vmem:[%s11129_s10 + $0x28] sm:$0xff] %vm4815_vm0, %v4793_v12  ;;  %v4768_v27 = vadd.f32 %v11087_v61, %v4734_v31  ;;  %v13348_v17 = vld [vmem:[#allocation200_spill] sm:$0xff] }
 0x41f   : > { %v4709_v45 = vadd.f32 %v4682_v16, %v11072_v38  ;;  %v4476_v1 = vmul.f32 %v11244_v23, %v10880_v10  ;;  %v4796_v41 = vmax.f32 %v4769_v28, 0.0  ;;  %v4685_v34 = vmul.f32 %v11220_v47, %v4601_v5  ;;  %v4596_v52 = vpop.permute.xlu0 %4595 }
 0x420   : > { %v4737_v59 = vmax.f32 %v11121_v26, %v4710_v0  ;;  %v4043_v55 = vmul.f32 %v11220_v47, %v10892_v30  ;;  %v4795_v38 = vmax.f32 %v4768_v27, 0.0  ;;  %v4684_v8 = vmul.f32 %v11220_v47, %v4596_v52  ;;  %v13349_v27 = vld [vmem:[#allocation21_spill] sm:$0xff]  ;;  %v13353_v52 = vld [vmem:[#allocation112_spill] sm:$0xff] }
 0x421   : > { %v4736_v43 = vmax.f32 %v11092_v60, %v4709_v45  ;;  %v13343_v18 = vmax.f32 %v13341_v20, %v13342_v50  ;;  %v4475_v10 = vmul.f32 %v11244_v23, %v10892_v30  ;;  %4824 = vst.msk [vmem:[%s11129_s10 + $0x40] sm:$0xff] %vm4815_vm0, %v4796_v41  ;;  %v4712_v51 = vadd.f32 %v4685_v34, %v11141_v37  ;;  %v4611_v30 = vpop.permute.xlu1 %4610  ;;  %v13350_v45 = vld [vmem:[#allocation94_spill] sm:$0xff]  ;;  %v13352_v34 = vld [vmem:[#allocation141_spill] sm:$0xff]  ;;  %v13356_v20 = vld [vmem:[#allocation148_spill] sm:$0xff] }
 0x422   : > { %v4771_v26 = vadd.f32 %v11087_v61, %v4737_v59  ;;  %v13346_v6 = vmax.f32 %v13344_v32, %v13345_v22  ;;  %v4071_v36 = vadd.f32 %v4044_v56, %v13347_v25  ;;  %4823 = vst.msk [vmem:[%s11129_s10 + $0x38] sm:$0xff] %vm4815_vm0, %v4795_v38  ;;  %v4711_v7 = vadd.f32 %v4684_v8, %v11108_v46  ;;  %v13355_v38 = vld [vmem:[#allocation90_spill] sm:$0xff]  ;;  %v13358_v32 = vld [vmem:[#allocation87_spill] sm:$0xff] }
 0x423   : > { %v11257_v4 = vmax.f32 %v13343_v18, %v4069_v24  ;;  %v4770_v62 = vadd.f32 %v11087_v61, %v4736_v43  ;;  %v11274_v33 = vadd.f32 %v4476_v1, %v10930_v63  ;;  %v4739_v37 = vmax.f32 %v11168_v9, %v4712_v51  ;;  %v4606_v19 = vpop.permute.xlu0 %4605  ;;  %v13357_v18 = vld [vmem:[#allocation80_spill] sm:$0xff] }
 0x424   : > { %v4095_v60 = vmax.f32 %v13346_v6, %v4068_v3  ;;  %v4798_v21 = vmax.f32 %v4771_v26, 0.0  ;;  %v4687_v15 = vmul.f32 %v11220_v47, %v4611_v30  ;;  %v4070_v54 = vadd.f32 %v4043_v55, %v13348_v17 }
 0x425   : > { %v4797_v14 = vmax.f32 %v4770_v62, 0.0  ;;  %v4738_v24 = vmax.f32 %v11116_v42, %v4711_v7  ;;  %v4686_v12 = vmul.f32 %v11220_v47, %v4606_v19  ;;  %v4502_v46 = vadd.f32 %v4475_v10, %v10915_v53  ;;  %v4621_v3 = vpop.permute.xlu1 %4620  ;;  %v13359_v62 = vld [vmem:[#allocation102_spill] sm:$0xff]  ;;  %v13361_v19 = vld [vmem:[#allocation33_spill] sm:$0xff] }
 0x426   : > { %v4046_v63 = vmul.f32 %v11220_v47, %v10924_v2  ;;  %4826 = vst.msk [vmem:[%s11129_s10 + $0x50] sm:$0xff] %vm4815_vm0, %v4798_v21  ;;  %v4773_v31 = vadd.f32 %v11087_v61, %v4739_v37  ;;  %v4714_v9 = vadd.f32 %v4687_v15, %v11184_v49  ;;  %v4478_v16 = vmul.f32 %v11244_v23, %v10924_v2  ;;  %v13360_v15 = vld [vmem:[#allocation316_spill] sm:$0xff] }
 0x427   : > { %v4045_v58 = vmul.f32 %v11220_v47, %v10936_v29  ;;  %4825 = vst.msk [vmem:[%s11129_s10 + $0x48] sm:$0xff] %vm4815_vm0, %v4797_v14  ;;  %v4772_v53 = vadd.f32 %v11087_v61, %v4738_v24  ;;  %v4713_v42 = vadd.f32 %v4686_v12, %v11135_v13  ;;  %v4477_v28 = vmul.f32 %v11244_v23, %v10936_v29  ;;  %v4616_v56 = vpop.permute.xlu0 %4615  ;;  %v13364_v12 = vld [vmem:[#allocation26_spill] sm:$0xff] }
 0x428   : > { %v4800_v0 = vmax.f32 %v4773_v31, 0.0  ;;  %v4741_v49 = vmax.f32 %v11214_v44, %v4714_v9  ;;  %v4689_v2 = vmul.f32 %v11220_v47, %v4621_v3  ;;  %v13351_v5 = vmax.f32 %v13349_v27, %v13350_v45 }
 0x429   : > { %v4799_v41 = vmax.f32 %v4772_v53, 0.0  ;;  %v4740_v59 = vmax.f32 %v11161_v48, %v4713_v42  ;;  %v4688_v13 = vmul.f32 %v11220_v47, %v4616_v56  ;;  %v13354_v29 = vmax.f32 %v13352_v34, %v13353_v52  ;;  %v4631_v51 = vpop.permute.xlu1 %4630  ;;  %v13370_v52 = vld [vmem:[#allocation95_spill] sm:$0xff] }
 0x42a   : > { %v11303_v1 = vmax.f32 %v13351_v5, %v4071_v36  ;;  %v4073_v43 = vadd.f32 %v4046_v63, %v13355_v38  ;;  %4828 = vst.msk [vmem:[%s11129_s10 + $0x60] sm:$0xff] %vm4815_vm0, %v4800_v0  ;;  %v4775_v44 = vadd.f32 %v11087_v61, %v4741_v49  ;;  %v4716_v8 = vadd.f32 %v4689_v2, %v4500_v35  ;;  %v13365_v63 = vld [vmem:[#allocation32_spill] sm:$0xff]  ;;  %v13367_v49 = vld [vmem:[#allocation74_spill] sm:$0xff] }
 0x42b   : > { %v4097_v55 = vmax.f32 %v13354_v29, %v4070_v54  ;;  %v11315_v50 = vadd.f32 %v4478_v16, %v13356_v20  ;;  %v4072_v10 = vadd.f32 %v4045_v58, %v13357_v18  ;;  %4827 = vst.msk [vmem:[%s11129_s10 + $0x58] sm:$0xff] %vm4815_vm0, %v4799_v41  ;;  %v4774_v48 = vadd.f32 %v11087_v61, %v4740_v59  ;;  %v4626_v36 = vpop.permute.xlu0 %4625  ;;  %v13363_v54 = vld [vmem:[#allocation68_spill] sm:$0xff] }
 0x42c   : > { %v4715_v26 = vadd.f32 %v4688_v13, %v11176_v39  ;;  %v4504_v22 = vadd.f32 %v4477_v28, %v13358_v32  ;;  %v4802_v6 = vmax.f32 %v4775_v44, 0.0  ;;  %v4743_v25 = vmax.f32 %v4095_v60, %v4716_v8  ;;  %v13368_v5 = vld [vmem:[#allocation208_spill] sm:$0xff]  ;;  %v13371_v44 = vld [vmem:[#allocation147_spill] sm:$0xff] }
 0x42d   : > { %v4691_v35 = vmul.f32 %v11220_v47, %v4631_v51  ;;  %v4047_v7 = vmul.f32 %v11220_v47, %v13359_v62  ;;  %v4801_v30 = vmax.f32 %v4774_v48, 0.0  ;;  %v4690_v37 = vmul.f32 %v11220_v47, %v4626_v36  ;;  %v4641_v53 = vpop.permute.xlu1 %4640  ;;  %v13373_v51 = vld [vmem:[#allocation125_spill] sm:$0xff]  ;;  %v13375_v36 = vld [vmem:[#allocation34_spill] sm:$0xff] }
 0x42e   : > { %v4742_v21 = vmax.f32 %v11203_v40, %v4715_v26  ;;  %v13362_v39 = vmax.f32 %v13360_v15, %v13361_v19  ;;  %v4048_v14 = vmul.f32 %v11220_v47, %v13363_v54  ;;  %4830 = vst.msk [vmem:[%s11129_s10 + $0x70] sm:$0xff] %vm4815_vm0, %v4802_v6  ;;  %v4777_v60 = vadd.f32 %v11087_v61, %v4743_v25  ;;  %v13372_v26 = vld [vmem:[#allocation40_spill] sm:$0xff]  ;;  %v13377_v15 = vld [vmem:[#allocation231_spill] sm:$0xff] }
 0x42f   : > { %v4718_v24 = vadd.f32 %v4691_v35, %v4502_v46  ;;  %v13366_v31 = vmax.f32 %v13364_v12, %v13365_v63  ;;  %v4480_v40 = vmul.f32 %v11244_v23, %v13363_v54  ;;  %4829 = vst.msk [vmem:[%s11129_s10 + $0x68] sm:$0xff] %vm4815_vm0, %v4801_v30  ;;  %v4717_v58 = vadd.f32 %v4690_v37, %v11227_v57  ;;  %v4636_v0 = vpop.permute.xlu0 %4635  ;;  %v13369_v57 = vld [vmem:[#allocation85_spill] sm:$0xff] }
 0x430   : > { %v11331_v17 = vmax.f32 %v13362_v39, %v4073_v43  ;;  %v4776_v16 = vadd.f32 %v11087_v61, %v4742_v21  ;;  %v4479_v42 = vmul.f32 %v11244_v23, %v13359_v62  ;;  %v4804_v46 = vmax.f32 %v4777_v60, 0.0  ;;  %v13376_v21 = vld [vmem:[#allocation273_spill] sm:$0xff] }
 0x431   : > { %v4099_v9 = vmax.f32 %v13366_v31, %v4072_v10  ;;  %v4745_v3 = vmax.f32 %v4097_v55, %v4718_v24  ;;  %v4693_v28 = vmul.f32 %v11220_v47, %v4641_v53  ;;  %v4074_v2 = vadd.f32 %v4047_v7, %v13367_v49  ;;  %v4651_v43 = vpop.permute.xlu1 %4650  ;;  %v13383_v49 = vld [vmem:[#allocation128_spill] sm:$0xff] }
 0x432   : > { %v4803_v56 = vmax.f32 %v4776_v16, 0.0  ;;  %v4744_v27 = vmax.f32 %v11257_v4, %v4717_v58  ;;  %v4692_v45 = vmul.f32 %v11220_v47, %v4636_v0  ;;  %v4075_v41 = vadd.f32 %v4048_v14, %v13368_v5  ;;  %4832 = vst.msk [vmem:[%s11129_s10 + $0x80] sm:$0xff] %vm4815_vm0, %v4804_v46  ;;  %v13378_v58 = vld [vmem:[#allocation48_spill] sm:$0xff]  ;;  %v13381_v46 = vld [vmem:[#allocation195_spill] sm:$0xff]  ;;  %v13382_v0 = vld [vmem:[#allocation81_spill] sm:$0xff] }
 0x433   : > { %v4049_v59 = vmul.f32 %v11220_v47, %v13369_v57  ;;  %v4779_v13 = vadd.f32 %v11087_v61, %v4745_v3  ;;  %v4720_v34 = vadd.f32 %v4693_v28, %v4504_v22  ;;  %v4507_v29 = vadd.f32 %v4480_v40, %v13370_v52  ;;  %v4646_v48 = vpop.permute.xlu0 %4645 }
 0x434   : > { %v4481_v55 = vmul.f32 %v11244_v23, %v13369_v57  ;;  %4831 = vst.msk [vmem:[%s11129_s10 + $0x78] sm:$0xff] %vm4815_vm0, %v4803_v56  ;;  %v4778_v4 = vadd.f32 %v11087_v61, %v4744_v27  ;;  %v4719_v38 = vadd.f32 %v4692_v45, %v11274_v33  ;;  %v4506_v8 = vadd.f32 %v4479_v42, %v13371_v44  ;;  %v13385_v56 = vld [vmem:[#allocation134_spill] sm:$0xff]  ;;  %v13386_v57 = vld [vmem:[#allocation233_spill] sm:$0xff] }
 0x435   : > { %v4806_v20 = vmax.f32 %v4779_v13, 0.0  ;;  %v4747_v18 = vmax.f32 %v4099_v9, %v4720_v34  ;;  %v4695_v10 = vmul.f32 %v11220_v47, %v4651_v43  ;;  %v13374_v32 = vmax.f32 %v13372_v26, %v13373_v51  ;;  %v4661_v54 = vpop.permute.xlu1 %4660  ;;  %v13391_v26 = vld [vmem:[#allocation89_spill] sm:$0xff] }
 0x436   : > { %v4805_v6 = vmax.f32 %v4778_v4, 0.0  ;;  %v4746_v25 = vmax.f32 %v11303_v1, %v4719_v38  ;;  %v4694_v35 = vmul.f32 %v11220_v47, %v4646_v48  ;;  %v4076_v33 = vadd.f32 %v4049_v59, %v13375_v36  ;;  %v13387_v4 = vld [vmem:[#allocation135_spill] sm:$0xff]  ;;  %v13392_v51 = vld [vmem:[#allocation149_spill] sm:$0xff] }
 0x437   : > { %v4101_v22 = vmax.f32 %v13374_v32, %v4074_v2  ;;  %v4051_v62 = vmul.f32 %v11220_v47, %v11052_v11  ;;  %4834 = vst.msk [vmem:[%s11129_s10 + $0x90] sm:$0xff] %vm4815_vm0, %v4806_v20  ;;  %v4781_v7 = vadd.f32 %v11087_v61, %v4747_v18  ;;  %v4722_v30 = vadd.f32 %v4695_v10, %v4506_v8  ;;  %v4656_v63 = vpop.permute.xlu0 %4655  ;;  %v13388_v8 = vld [vmem:[#allocation7_spill] sm:$0xff] }
 0x438   : > { %v4050_v37 = vmul.f32 %v11220_v47, %v13376_v21  ;;  %v4508_v19 = vadd.f32 %v4481_v55, %v13377_v15  ;;  %4833 = vst.msk [vmem:[%s11129_s10 + $0x88] sm:$0xff] %vm4815_vm0, %v4805_v6  ;;  %v4780_v1 = vadd.f32 %v11087_v61, %v4746_v25  ;;  %v4721_v39 = vadd.f32 %v4694_v35, %v11315_v50  ;;  %v13379_v50 = vld [vmem:[#allocation132_spill] sm:$0xff]  ;;  %v13389_v20 = vld [vmem:[#allocation263_spill] sm:$0xff] }
 0x439   : > { %v4483_v14 = vmul.f32 %v11244_v23, %v11052_v11  ;;  %v4808_v60 = vmax.f32 %v4781_v7, 0.0  ;;  %v4749_v24 = vmax.f32 %v4101_v22, %v4722_v30  ;;  %v4697_v12 = vmul.f32 %v11220_v47, %v4661_v54  ;;  %v4671_v5 = vpop.permute.xlu1 %4670 }
 0x43a   : > { %v4482_v31 = vmul.f32 %v11244_v23, %v13376_v21  ;;  %v4807_v9 = vmax.f32 %v4780_v1, 0.0  ;;  %v4748_v40 = vmax.f32 %v11331_v17, %v4721_v39  ;;  %v4696_v16 = vmul.f32 %v11220_v47, %v4656_v63 }
 0x43b   : > { %v13380_v53 = vmax.f32 %v13378_v58, %v13379_v50  ;;  %v4078_v11 = vadd.f32 %v4051_v62, %v13381_v46  ;;  %4836 = vst.msk [vmem:[%s11129_s10 + $0xa0] sm:$0xff] %vm4815_vm0, %v4808_v60  ;;  %v4783_v3 = vadd.f32 %v11087_v61, %v4749_v24  ;;  %v4724_v28 = vadd.f32 %v4697_v12, %v4508_v19  ;;  %v4666_v55 = vpop.permute.xlu0 %4665 }
 0x43c   : > { %v13384_v2 = vmax.f32 %v13382_v0, %v13383_v49  ;;  %v4077_v17 = vadd.f32 %v4050_v37, %v13385_v56  ;;  %4835 = vst.msk [vmem:[%s11129_s10 + $0x98] sm:$0xff] %vm4815_vm0, %v4807_v9  ;;  %v4782_v27 = vadd.f32 %v11087_v61, %v4748_v40  ;;  %v4723_v45 = vadd.f32 %v4696_v16, %v4507_v29 }
 0x43d   : > { %v4103_v42 = vmax.f32 %v13380_v53, %v4076_v33  ;;  %v4510_v59 = vadd.f32 %v4483_v14, %v13386_v57  ;;  %v4810_v13 = vmax.f32 %v4783_v3, 0.0  ;;  %v4699_v52 = vmul.f32 %v11220_v47, %v4671_v5 }
 0x43e   : > { %v4102_v23 = vmax.f32 %v13384_v2, %v4075_v41  ;;  %v4509_v38 = vadd.f32 %v4482_v31, %v13387_v4  ;;  %v4809_v41 = vmax.f32 %v4782_v27, 0.0  ;;  %v4698_v44 = vmul.f32 %v11220_v47, %v4666_v55 }
 0x43f   : > { %v4751_v34 = vmax.f32 %v4103_v42, %v4724_v28  ;;  %v13390_v29 = vmax.f32 %v13388_v8, %v13389_v20  ;;  %4838 = vst.msk [vmem:[%s11129_s10 + $0xb0] sm:$0xff] %vm4815_vm0, %v4810_v13  ;;  %v4726_v48 = vadd.f32 %v4699_v52, %v4510_v59  ;;  %v13393_v32 = vmax.f32 %v13391_v26, %v13392_v51 }
 0x440   : > { %v4750_v43 = vmax.f32 %v4102_v23, %v4723_v45  ;;  %4837 = vst.msk [vmem:[%s11129_s10 + $0xa8] sm:$0xff] %vm4815_vm0, %v4809_v41  ;;  %v4725_v47 = vadd.f32 %v4698_v44, %v4509_v38 }
 0x441   : > { %v4105_v18 = vmax.f32 %v13390_v29, %v4078_v11  ;;  %v4785_v10 = vadd.f32 %v11087_v61, %v4751_v34  ;;  %v4104_v22 = vmax.f32 %v13393_v32, %v4077_v17 }
 0x442   : > { %v4784_v6 = vadd.f32 %v11087_v61, %v4750_v43 }
 0x443   : > { %v4812_v25 = vmax.f32 %v4785_v10, 0.0  ;;  %v4753_v35 = vmax.f32 %v4105_v18, %v4726_v48  ;;  %v4752_v33 = vmax.f32 %v4104_v22, %v4725_v47 }
 0x444   : > { %v4811_v36 = vmax.f32 %v4784_v6, 0.0 }
 0x445   : > { %4840 = vst.msk [vmem:[%s11129_s10 + $0xc0] sm:$0xff] %vm4815_vm0, %v4812_v25  ;;  %v4787_v62 = vadd.f32 %v11087_v61, %v4753_v35  ;;  %v4786_v7 = vadd.f32 %v11087_v61, %v4752_v33 }
 0x446   : > { %4839 = vst.msk [vmem:[%s11129_s10 + $0xb8] sm:$0xff] %vm4815_vm0, %v4811_v36 }
 0x447   : > { %v4814_v30 = vmax.f32 %v4787_v62, 0.0  ;;  %v4813_v21 = vmax.f32 %v4786_v7, 0.0 }
 0x449   : > { %4843 = vst.msk [vmem:[%s11129_s10 + $0xd0] sm:$0x3] %vm4842_vm1, %v4814_v30 }
 0x44a   : > { %4841 = vst.msk [vmem:[%s11129_s10 + $0xc8] sm:$0xff] %vm4815_vm0, %v4813_v21 }
 0x44b PF: > { %s13_s12 = sadd.s32 1, %s5282_s12  }
 0x44c   : > { %p10_p4 = scmp.ge.s32.totalorder %s13_s12, 6  }
 0x44e   :  { %12 = sbr.rel (!%p10_p4) target bundleno = 1 (0x1), region = 73 }

</bundles_post_ra>
